<compile_context>
chip_gen: v5e
topology: v5e:2x2
jax: 0.10.0
libtpu: 0.0.40
codegen_flags: <defaults>
</compile_context>

<pallas_src>
import functools

import jax
import jax.numpy as jnp
from jax.experimental import pallas as pl
from jax.experimental.pallas import tpu as pltpu


def _round_up(x, m):
    return (x + m - 1) // m * m


def _cdiv(a, b):
    return (a + b - 1) // b


def _choose_tile(d, tmax, align=128):
    """Pick (tile, padded_total) with tile | padded_total, tile <= tmax, 128-aligned."""
    dp = _round_up(d, align)
    if dp <= tmax:
        return dp, dp
    n = _cdiv(dp, tmax)
    t = _round_up(_cdiv(dp, n), align)
    return t, t * n


# Tile maxima (shared by prepare_params and the forward pass so weight padding
# matches the kernel grid). FC config is v7x-safe (64 MiB VMEM); on v5e/v6e the
# review allows bn up to 2048 with a larger vmem limit — not applied here.
FC_BK, FC_BN = 4096, 1024
CONV_BK, CONV_BN = 2048, 512
CONV_BM = 1024
FC_BM = 512


# ----------------------------------------------------------------------------
# Pallas kernel: tiled MXU matmul + fused bias / activation epilogue
# ----------------------------------------------------------------------------
def _mm_bias_act_kernel(a_ref, b_ref, bias_ref, o_ref, acc_ref, *, act):
    """bf16 (bm,bk)x(bk,bn) MXU matmul, f32 VMEM accumulator, fused bias+act."""

    @pl.when(pl.program_id(2) == 0)
    def _():
        acc_ref[...] = jnp.zeros_like(acc_ref)

    acc_ref[...] += jnp.dot(a_ref[...], b_ref[...],
                            preferred_element_type=jnp.float32)

    @pl.when(pl.program_id(2) == pl.num_programs(2) - 1)
    def _():
        acc = acc_ref[...] + bias_ref[...]                 # (1, bn) broadcast
        if act == "relu":
            acc = jnp.maximum(acc, 0.0)
        elif act == "sigmoid":
            # sigmoid(x) = 0.5*(tanh(x/2)+1): EUP tanh, no inf intermediate.
            acc = 0.5 * (jnp.tanh(0.5 * acc) + 1.0)
        o_ref[...] = acc.astype(o_ref.dtype)


def matmul_bias_act(a, w_p, bias_p, *, n_out, act="none",
                    out_dtype=jnp.bfloat16, bm=FC_BM,
                    bk_max=CONV_BK, bn_max=CONV_BN):
    """act(a @ w_p + bias_p)[:, :n_out].

    a:      (M, K) activations (bf16 or f32; cast to bf16, no-op if already bf16)
    w_p:    (Kp, Np) bf16 weight, pre-padded in prepare_params with the SAME
            (bk_max, bn_max) so Kp % bk == 0 and Np % bn == 0.
    bias_p: (1, Np) f32, pre-padded.
    """
    M, K = a.shape
    Kp, Np = w_p.shape
    assert K <= Kp and n_out <= Np
    bk, kp_chk = _choose_tile(Kp, bk_max)
    bn, np_chk = _choose_tile(Np, bn_max)
    assert kp_chk == Kp and np_chk == Np, "weight padding / tile maxima mismatch"

    bm = min(bm, _round_up(M, 16))
    Mp = _round_up(M, bm)

    a_p = a.astype(jnp.bfloat16)
    if (Mp, Kp) != (M, K):
        a_p = jnp.pad(a_p, ((0, Mp - M), (0, Kp - K)))

    grid = (Mp // bm, Np // bn, Kp // bk)
    out = pl.pallas_call(
        functools.partial(_mm_bias_act_kernel, act=act),
        out_shape=jax.ShapeDtypeStruct((Mp, Np), out_dtype),
        grid=grid,
        in_specs=[
            pl.BlockSpec((bm, bk), lambda i, j, k: (i, k)),
            pl.BlockSpec((bk, bn), lambda i, j, k: (k, j)),
            pl.BlockSpec((1, bn), lambda i, j, k: (0, j)),
        ],
        out_specs=pl.BlockSpec((bm, bn), lambda i, j, k: (i, j)),
        scratch_shapes=[pltpu.VMEM((bm, bn), jnp.float32)],
        compiler_params=pltpu.CompilerParams(
            dimension_semantics=("parallel", "parallel", "arbitrary"),
            vmem_limit_bytes=40 * 1024 * 1024,
        ),
        cost_estimate=pl.CostEstimate(
            flops=2 * Mp * Np * Kp,
            transcendentals=Mp * Np if act == "sigmoid" else 0,
            bytes_accessed=(2 * Mp * Kp * (Np // bn)          # A re-read per j
                            + 2 * Kp * Np * (Mp // bm)        # B re-read per i
                            + jnp.dtype(out_dtype).itemsize * Mp * Np
                            + 4 * Np),
        ),
    )(a_p, w_p, bias_p)

    if Mp != M:
        out = out[:M]
    if Np != n_out:
        out = out[:, :n_out]
    return out


# ----------------------------------------------------------------------------
# Conv / ConvTranspose built on the Pallas matmul kernel (NHWC)
# ----------------------------------------------------------------------------
def conv2d_nhwc(x, wmat, bias, cout, act, stride=2, pad=1, k=3):
    """x: (B,H,W,Cin) NHWC; wmat: padded (k*k*Cin -> Kp, Cout -> Np), rows (kh,kw,cin)."""
    B, H, W, C = x.shape
    Hout = (H + 2 * pad - k) // stride + 1
    Wout = (W + 2 * pad - k) // stride + 1
    xp = jnp.pad(x, ((0, 0), (pad, pad), (pad, pad), (0, 0)))
    # TODO(synk): im2col patches are still materialized by XLA in HBM; an
    # in-kernel gather of the (bm, k*k*C) window would remove that traffic.
    cols = [xp[:, i:i + stride * Hout:stride, j:j + stride * Wout:stride, :]
            for i in range(k) for j in range(k)]
    patches = jnp.concatenate(cols, axis=-1).reshape(B * Hout * Wout, k * k * C)
    out = matmul_bias_act(patches, wmat, bias, n_out=cout, act=act,
                          out_dtype=jnp.bfloat16, bm=CONV_BM,
                          bk_max=CONV_BK, bn_max=CONV_BN)
    return out.reshape(B, Hout, Wout, cout)


def conv_transpose2d_s2(x, w4mat, b4, cout, act, out_dtype=jnp.bfloat16):
    """PyTorch ConvTranspose2d(k=3, stride=2, padding=1, output_padding=1), NHWC.

    Sub-pixel decomposition: output phase (oh%2, ow%2) only sees a 2x2 input
    window, so all 4 phases are fused into ONE matmul with N = 4*Cout and the
    result is interleaved. No zero-dilated input, ~4x fewer wasted FLOPs/HBM.
    """
    B, H, W, C = x.shape
    xp = jnp.pad(x, ((0, 0), (0, 1), (0, 1), (0, 0)))          # bottom/right zero
    patches = jnp.concatenate(
        [xp[:, :H, :W, :], xp[:, :H, 1:, :],
         xp[:, 1:, :W, :], xp[:, 1:, 1:, :]], axis=-1).reshape(B * H * W, 4 * C)
    out = matmul_bias_act(patches, w4mat, b4, n_out=4 * cout, act=act,
                          out_dtype=out_dtype, bm=CONV_BM,
                          bk_max=CONV_BK, bn_max=CONV_BN)      # (B*H*W, 4*Cout)
    out = out.reshape(B, H, W, 2, 2, cout)                     # (b, m, n, p, q, co)
    return out.transpose(0, 1, 3, 2, 4, 5).reshape(B, 2 * H, 2 * W, cout)


def _build_subpixel_weight(w):
    """PyTorch ConvTranspose2d weight (Cin, Cout, 3, 3) -> (4*Cin, 4*Cout).

    Rows ordered (displacement d = dr*2+dc, cin); columns ordered
    (phase = p*2+q, cout). Tap (kh, kw) = (p+1-2*dr, q+1-2*dc) when in range.
    """
    Cin, Cout = w.shape[0], w.shape[1]
    blocks = []
    for dr in range(2):
        for dc in range(2):
            row = []
            for p in range(2):
                for q in range(2):
                    kh, kw = p + 1 - 2 * dr, q + 1 - 2 * dc
                    if 0 <= kh <= 2 and 0 <= kw <= 2:
                        row.append(w[:, :, kh, kw])            # (Cin, Cout)
                    else:
                        row.append(jnp.zeros((Cin, Cout), w.dtype))
            blocks.append(jnp.concatenate(row, axis=1))        # (Cin, 4*Cout)
    return jnp.concatenate(blocks, axis=0)                     # (4*Cin, 4*Cout)


# ----------------------------------------------------------------------------
# Parameters (PyTorch layouts) + one-time conversion to kernel-friendly layout
# ----------------------------------------------------------------------------
def init_params(key, latent_dim, enc_spatial):
    ks = iter(jax.random.split(key, 24))
    flat = 256 * enc_spatial * enc_spatial

    def w_init(shape, fan_in):
        return (jax.random.normal(next(ks), shape, jnp.float32)
                / jnp.sqrt(fan_in)).astype(jnp.float32)

    def b_init(n):
        return jnp.zeros((n,), jnp.float32)

    p = {}
    # encoder convs: Conv2d weight layout (cout, cin, 3, 3)
    for idx, (cin, cout) in enumerate([(3, 32), (32, 64), (64, 128), (128, 256)], 1):
        p[f"e{idx}_w"] = w_init((cout, cin, 3, 3), cin * 9)
        p[f"e{idx}_b"] = b_init(cout)
    # fc heads (out, in)
    p["mu_w"] = w_init((latent_dim, flat), flat)
    p["mu_b"] = b_init(latent_dim)
    p["lv_w"] = w_init((latent_dim, flat), flat)
    p["lv_b"] = b_init(latent_dim)
    # decoder fc (out, in)
    p["d0_w"] = w_init((flat, latent_dim), latent_dim)
    p["d0_b"] = b_init(flat)
    # decoder transposed convs: ConvTranspose2d weight layout (cin, cout, 3, 3)
    for idx, (cin, cout) in enumerate([(256, 128), (128, 64), (64, 32), (32, 3)], 1):
        p[f"d{idx}_w"] = w_init((cin, cout, 3, 3), cin * 9)
        p[f"d{idx}_b"] = b_init(cout)
    return p


def _pad_layer(w, bias, bk_max, bn_max):
    """One-time: f32 (K, N) weight -> bf16 (Kp, Np), bias -> f32 (1, Np)."""
    K, N = w.shape
    _, Kp = _choose_tile(K, bk_max)
    _, Np = _choose_tile(N, bn_max)
    w_p = jnp.pad(w.astype(jnp.bfloat16), ((0, Kp - K), (0, Np - N)))
    b_p = jnp.pad(bias.astype(jnp.float32), ((0, Np - N),)).reshape(1, Np)
    return w_p, b_p


def prepare_params(p, enc_spatial):
    """Convert PyTorch-layout weights to NHWC / fused-matmul bf16 padded layouts (once)."""
    sp = enc_spatial
    flat = 256 * sp * sp
    q = {}
    # encoder convs: (Cout, Cin, 3, 3) -> (kh*kw*Cin, Cout), rows ordered (kh, kw, cin)
    for i in range(1, 5):
        w = p[f"e{i}_w"]
        wmat = w.transpose(2, 3, 1, 0).reshape(-1, w.shape[0])
        q[f"e{i}_w"], q[f"e{i}_b"] = _pad_layer(wmat, p[f"e{i}_b"], CONV_BK, CONV_BN)

    # Fused mu/logvar heads. PyTorch flattens NCHW -> (C,H,W); our NHWC flatten
    # is (H,W,C), so permute the weight's input dim to keep exact semantics.
    def head(w):
        L = w.shape[0]
        return w.reshape(L, 256, sp, sp).transpose(0, 2, 3, 1).reshape(L, flat).T

    heads_w = jnp.concatenate([head(p["mu_w"]), head(p["lv_w"])], axis=1)
    heads_b = jnp.concatenate([p["mu_b"], p["lv_b"]])
    q["heads_w"], q["heads_b"] = _pad_layer(heads_w, heads_b, FC_BK, FC_BN)

    # Decoder FC: PyTorch Unflatten expects (C,H,W) output order; we produce
    # (H,W,C), so permute the weight's OUTPUT dim and transpose to (latent, flat).
    L = p["d0_w"].shape[1]
    d0_w = p["d0_w"].reshape(256, sp, sp, L).transpose(1, 2, 0, 3).reshape(flat, L).T
    d0_b = p["d0_b"].reshape(256, sp, sp).transpose(1, 2, 0).reshape(flat)
    q["d0_w"], q["d0_b"] = _pad_layer(d0_w, d0_b, FC_BK, FC_BN)

    # Decoder transposed convs -> fused sub-pixel weights (4*Cin, 4*Cout)
    for i in range(1, 5):
        w4 = _build_subpixel_weight(p[f"d{i}_w"])
        b4 = jnp.tile(p[f"d{i}_b"], 4)
        q[f"d{i}_w"], q[f"d{i}_b"] = _pad_layer(w4, b4, CONV_BK, CONV_BN)
    return q


# ----------------------------------------------------------------------------
# Forward pass
# ----------------------------------------------------------------------------
ENC_COUT = [32, 64, 128, 256]
DEC_COUT = [128, 64, 32, 3]


def vae_forward(prep, x, eps, enc_spatial):
    B = x.shape[0]
    L = eps.shape[1]
    # --- encode (NHWC, bf16 internally; single transpose at the boundary) ---
    h = jnp.transpose(x, (0, 2, 3, 1)).astype(jnp.bfloat16)
    for i, cout in enumerate(ENC_COUT, 1):
        h = conv2d_nhwc(h, prep[f"e{i}_w"], prep[f"e{i}_b"], cout, "relu")
    hf = h.reshape(B, -1)                                    # (H,W,C) flat order
    ml = matmul_bias_act(hf, prep["heads_w"], prep["heads_b"], n_out=2 * L,
                         act="none", out_dtype=jnp.float32,
                         bm=FC_BM, bk_max=FC_BK, bn_max=FC_BN)
    mu, logvar = ml[:, :L], ml[:, L:]
    # --- reparameterize: tiny elementwise op, plain jnp (fuses into d0 prep) ---
    z = mu + eps * jnp.exp(0.5 * logvar)
    # --- decode ---
    d = matmul_bias_act(z.astype(jnp.bfloat16), prep["d0_w"], prep["d0_b"],
                        n_out=256 * enc_spatial * enc_spatial, act="none",
                        out_dtype=jnp.bfloat16, bm=FC_BM,
                        bk_max=FC_BK, bn_max=FC_BN)
    d = d.reshape(B, enc_spatial, enc_spatial, 256)
    for i, cout in enumerate(DEC_COUT, 1):
        last = (i == 4)
        d = conv_transpose2d_s2(d, prep[f"d{i}_w"], prep[f"d{i}_b"], cout,
                                "sigmoid" if last else "relu",
                                out_dtype=jnp.float32 if last else jnp.bfloat16)
    return jnp.transpose(d, (0, 3, 1, 2)), mu, logvar        # back to NCHW


if __name__ == "__main__":
    # Small-shape configuration (structure identical to the PyTorch module).
    BATCH = 2
    IMG = 32            # full-size module uses 256
    LATENT = 64         # full-size module uses 6144
    ENC_SP = IMG // 16  # four stride-2 convs

    key = jax.random.PRNGKey(0)
    k_x, k_eps = jax.random.split(key)
    x = jax.random.uniform(k_x, (BATCH, 3, IMG, IMG), jnp.float32)
    # TODO(synk): torch.randn_like uses PyTorch's global RNG; eps is drawn
    # deterministically from a JAX key instead (no bitwise-equivalent stream).
    eps = jax.random.normal(k_eps, (BATCH, LATENT), jnp.float32)

    params = init_params(jax.random.PRNGKey(42), LATENT, ENC_SP)
    prep = prepare_params(params, ENC_SP)   # one-time layout conversion + bf16 pad

    fwd = jax.jit(functools.partial(vae_forward, enc_spatial=ENC_SP))
    recon, mu, logvar = fwd(prep, x, eps)
    jax.block_until_ready((recon, mu, logvar))

    assert recon.shape == (BATCH, 3, IMG, IMG)
    assert mu.shape == (BATCH, LATENT) and logvar.shape == (BATCH, LATENT)
    assert bool(jnp.all(jnp.isfinite(recon)))
    assert bool(jnp.all((recon >= 0.0) & (recon <= 1.0)))
    print("KERNEL_OK")
</pallas_src>

<mosaic_0001>
module attributes {stable_mosaic.version = 11 : i64} {
  func.func @_mm_bias_act_kernel(%arg0: i32, %arg1: i32, %arg2: i32, %arg3: memref<512x128xbf16, #tpu.memory_space<vmem>>, %arg4: memref<128x128xbf16, #tpu.memory_space<vmem>>, %arg5: memref<1x128xf32, #tpu.memory_space<vmem>>, %arg6: memref<512x128xbf16, #tpu.memory_space<vmem>>, %arg7: memref<512x128xf32, #tpu.memory_space<vmem>>) attributes {dimension_semantics = [#tpu.dimension_semantics<parallel>, #tpu.dimension_semantics<parallel>, #tpu.dimension_semantics<arbitrary>], iteration_bounds = array<i64: 1, 1, 1>, scalar_prefetch = 0 : i64, scratch_operands = 1 : i64, tpu.core_type = #tpu.core_type<tc>, window_params = [{transform_indices = @transform_0, window_bounds = array<i64: 512, 128>}, {transform_indices = @transform_1, window_bounds = array<i64: 128, 128>}, {transform_indices = @transform_2, window_bounds = array<i64: 1, 128>}, {transform_indices = @transform_3, window_bounds = array<i64: 512, 128>}]} {
    %c0_i32 = arith.constant 0 : i32
    %0 = arith.cmpi eq, %arg2, %c0_i32 : i32
    %1 = arith.extui %0 : i1 to i32
    %c0_i32_0 = arith.constant 0 : i32
    %2 = arith.cmpi ne, %1, %c0_i32_0 : i32
    scf.if %2 {
      %cst_10 = arith.constant 0.000000e+00 : f32
      %12 = vector.broadcast %cst_10 : f32 to vector<512x128xf32>
      %c0_11 = arith.constant 0 : index
      %c0_12 = arith.constant 0 : index
      %13 = vector.load %arg7[%c0_11, %c0_12] : memref<512x128xf32, #tpu.memory_space<vmem>>, vector<512x128xf32>
      tpu.vector_store %arg7[%c0_11, %c0_12], %12 {strides = array<i32>} : memref<512x128xf32, #tpu.memory_space<vmem>>, vector<512x128xf32>,
    } else {
    }
    %c0 = arith.constant 0 : index
    %c0_1 = arith.constant 0 : index
    %3 = vector.load %arg7[%c0, %c0_1] : memref<512x128xf32, #tpu.memory_space<vmem>>, vector<512x128xf32>
    %c0_2 = arith.constant 0 : index
    %c0_3 = arith.constant 0 : index
    %4 = vector.load %arg3[%c0_2, %c0_3] : memref<512x128xbf16, #tpu.memory_space<vmem>>, vector<512x128xbf16>
    %c0_4 = arith.constant 0 : index
    %c0_5 = arith.constant 0 : index
    %5 = vector.load %arg4[%c0_4, %c0_5] : memref<128x128xbf16, #tpu.memory_space<vmem>>, vector<128x128xbf16>
    %cst = arith.constant dense<0.000000e+00> : vector<512x128xf32>
    %6 = tpu.matmul %4, %5, %cst {dimension_numbers = #tpu.dot_dimension_numbers<[1], [0], [0], [1], [0, 0, 1, 1], [], []>} : vector<512x128xbf16>, vector<128x128xbf16>, vector<512x128xf32> -> vector<512x128xf32>
    %7 = arith.addf %3, %6 : vector<512x128xf32>
    %c0_6 = arith.constant 0 : index
    %c0_7 = arith.constant 0 : index
    %8 = vector.load %arg7[%c0_6, %c0_7] : memref<512x128xf32, #tpu.memory_space<vmem>>, vector<512x128xf32>
    tpu.vector_store %arg7[%c0_6, %c0_7], %7 {strides = array<i32>} : memref<512x128xf32, #tpu.memory_space<vmem>>, vector<512x128xf32>,
    %c0_i32_8 = arith.constant 0 : i32
    %9 = arith.cmpi eq, %arg2, %c0_i32_8 : i32
    %10 = arith.extui %9 : i1 to i32
    %c0_i32_9 = arith.constant 0 : i32
    %11 = arith.cmpi ne, %10, %c0_i32_9 : i32
    scf.if %11 {
      %c0_10 = arith.constant 0 : index
      %c0_11 = arith.constant 0 : index
      %12 = vector.load %arg7[%c0_10, %c0_11] : memref<512x128xf32, #tpu.memory_space<vmem>>, vector<512x128xf32>
      %c0_12 = arith.constant 0 : index
      %c0_13 = arith.constant 0 : index
      %13 = vector.load %arg5[%c0_12, %c0_13] : memref<1x128xf32, #tpu.memory_space<vmem>>, vector<1x128xf32>
      %14 = vector.broadcast %13 : vector<1x128xf32> to vector<512x128xf32>
      %15 = arith.addf %12, %14 : vector<512x128xf32>
      %cst_14 = arith.constant 0.000000e+00 : f32
      %16 = vector.broadcast %cst_14 : f32 to vector<512x128xf32>
      %17 = arith.maximumf %15, %16 : vector<512x128xf32>
      %18 = arith.truncf %17 : vector<512x128xf32> to vector<512x128xbf16>
      %c0_15 = arith.constant 0 : index
      %c0_16 = arith.constant 0 : index
      %19 = vector.load %arg6[%c0_15, %c0_16] : memref<512x128xbf16, #tpu.memory_space<vmem>>, vector<512x128xbf16>
      tpu.vector_store %arg6[%c0_15, %c0_16], %18 {strides = array<i32>} : memref<512x128xbf16, #tpu.memory_space<vmem>>, vector<512x128xbf16>,
    } else {
    }
    return
  }
  func.func @transform_0(%arg0: i32, %arg1: i32, %arg2: i32) -> (i32, i32) {
    %c0_i32 = arith.constant 0 : i32
    return %arg0, %arg2 : i32, i32
  }
  func.func @transform_1(%arg0: i32, %arg1: i32, %arg2: i32) -> (i32, i32) {
    %c0_i32 = arith.constant 0 : i32
    return %arg2, %arg1 : i32, i32
  }
  func.func @transform_2(%arg0: i32, %arg1: i32, %arg2: i32) -> (i32, i32) {
    %c0_i32 = arith.constant 0 : i32
    %c0_i32_0 = arith.constant 0 : i32
    return %c0_i32, %arg1 : i32, i32
  }
  func.func @transform_3(%arg0: i32, %arg1: i32, %arg2: i32) -> (i32, i32) {
    %c0_i32 = arith.constant 0 : i32
    return %arg0, %arg1 : i32, i32
  }
}

module attributes {stable_mosaic.version = 11 : i64} {
  func.func @_mm_bias_act_kernel(%arg0: i32, %arg1: i32, %arg2: i32, %arg3: memref<128x384xbf16, #tpu.memory_space<vmem>>, %arg4: memref<384x128xbf16, #tpu.memory_space<vmem>>, %arg5: memref<1x128xf32, #tpu.memory_space<vmem>>, %arg6: memref<128x128xbf16, #tpu.memory_space<vmem>>, %arg7: memref<128x128xf32, #tpu.memory_space<vmem>>) attributes {dimension_semantics = [#tpu.dimension_semantics<parallel>, #tpu.dimension_semantics<parallel>, #tpu.dimension_semantics<arbitrary>], iteration_bounds = array<i64: 1, 1, 1>, scalar_prefetch = 0 : i64, scratch_operands = 1 : i64, tpu.core_type = #tpu.core_type<tc>, window_params = [{transform_indices = @transform_0, window_bounds = array<i64: 128, 384>}, {transform_indices = @transform_1, window_bounds = array<i64: 384, 128>}, {transform_indices = @transform_2, window_bounds = array<i64: 1, 128>}, {transform_indices = @transform_3, window_bounds = array<i64: 128, 128>}]} {
    %c0_i32 = arith.constant 0 : i32
    %0 = arith.cmpi eq, %arg2, %c0_i32 : i32
    %1 = arith.extui %0 : i1 to i32
    %c0_i32_0 = arith.constant 0 : i32
    %2 = arith.cmpi ne, %1, %c0_i32_0 : i32
    scf.if %2 {
      %cst_10 = arith.constant 0.000000e+00 : f32
      %12 = vector.broadcast %cst_10 : f32 to vector<128x128xf32>
      %c0_11 = arith.constant 0 : index
      %c0_12 = arith.constant 0 : index
      %13 = vector.load %arg7[%c0_11, %c0_12] : memref<128x128xf32, #tpu.memory_space<vmem>>, vector<128x128xf32>
      tpu.vector_store %arg7[%c0_11, %c0_12], %12 {strides = array<i32>} : memref<128x128xf32, #tpu.memory_space<vmem>>, vector<128x128xf32>,
    } else {
    }
    %c0 = arith.constant 0 : index
    %c0_1 = arith.constant 0 : index
    %3 = vector.load %arg7[%c0, %c0_1] : memref<128x128xf32, #tpu.memory_space<vmem>>, vector<128x128xf32>
    %c0_2 = arith.constant 0 : index
    %c0_3 = arith.constant 0 : index
    %4 = vector.load %arg3[%c0_2, %c0_3] : memref<128x384xbf16, #tpu.memory_space<vmem>>, vector<128x384xbf16>
    %c0_4 = arith.constant 0 : index
    %c0_5 = arith.constant 0 : index
    %5 = vector.load %arg4[%c0_4, %c0_5] : memref<384x128xbf16, #tpu.memory_space<vmem>>, vector<384x128xbf16>
    %cst = arith.constant dense<0.000000e+00> : vector<128x128xf32>
    %6 = tpu.matmul %4, %5, %cst {dimension_numbers = #tpu.dot_dimension_numbers<[1], [0], [0], [1], [0, 0, 1, 1], [], []>} : vector<128x384xbf16>, vector<384x128xbf16>, vector<128x128xf32> -> vector<128x128xf32>
    %7 = arith.addf %3, %6 : vector<128x128xf32>
    %c0_6 = arith.constant 0 : index
    %c0_7 = arith.constant 0 : index
    %8 = vector.load %arg7[%c0_6, %c0_7] : memref<128x128xf32, #tpu.memory_space<vmem>>, vector<128x128xf32>
    tpu.vector_store %arg7[%c0_6, %c0_7], %7 {strides = array<i32>} : memref<128x128xf32, #tpu.memory_space<vmem>>, vector<128x128xf32>,
    %c0_i32_8 = arith.constant 0 : i32
    %9 = arith.cmpi eq, %arg2, %c0_i32_8 : i32
    %10 = arith.extui %9 : i1 to i32
    %c0_i32_9 = arith.constant 0 : i32
    %11 = arith.cmpi ne, %10, %c0_i32_9 : i32
    scf.if %11 {
      %c0_10 = arith.constant 0 : index
      %c0_11 = arith.constant 0 : index
      %12 = vector.load %arg7[%c0_10, %c0_11] : memref<128x128xf32, #tpu.memory_space<vmem>>, vector<128x128xf32>
      %c0_12 = arith.constant 0 : index
      %c0_13 = arith.constant 0 : index
      %13 = vector.load %arg5[%c0_12, %c0_13] : memref<1x128xf32, #tpu.memory_space<vmem>>, vector<1x128xf32>
      %14 = vector.broadcast %13 : vector<1x128xf32> to vector<128x128xf32>
      %15 = arith.addf %12, %14 : vector<128x128xf32>
      %cst_14 = arith.constant 0.000000e+00 : f32
      %16 = vector.broadcast %cst_14 : f32 to vector<128x128xf32>
      %17 = arith.maximumf %15, %16 : vector<128x128xf32>
      %18 = arith.truncf %17 : vector<128x128xf32> to vector<128x128xbf16>
      %c0_15 = arith.constant 0 : index
      %c0_16 = arith.constant 0 : index
      %19 = vector.load %arg6[%c0_15, %c0_16] : memref<128x128xbf16, #tpu.memory_space<vmem>>, vector<128x128xbf16>
      tpu.vector_store %arg6[%c0_15, %c0_16], %18 {strides = array<i32>} : memref<128x128xbf16, #tpu.memory_space<vmem>>, vector<128x128xbf16>,
    } else {
    }
    return
  }
  func.func @transform_0(%arg0: i32, %arg1: i32, %arg2: i32) -> (i32, i32) {
    %c0_i32 = arith.constant 0 : i32
    return %arg0, %arg2 : i32, i32
  }
  func.func @transform_1(%arg0: i32, %arg1: i32, %arg2: i32) -> (i32, i32) {
    %c0_i32 = arith.constant 0 : i32
    return %arg2, %arg1 : i32, i32
  }
  func.func @transform_2(%arg0: i32, %arg1: i32, %arg2: i32) -> (i32, i32) {
    %c0_i32 = arith.constant 0 : i32
    %c0_i32_0 = arith.constant 0 : i32
    return %c0_i32, %arg1 : i32, i32
  }
  func.func @transform_3(%arg0: i32, %arg1: i32, %arg2: i32) -> (i32, i32) {
    %c0_i32 = arith.constant 0 : i32
    return %arg0, %arg1 : i32, i32
  }
}

module attributes {stable_mosaic.version = 11 : i64} {
  func.func @_mm_bias_act_kernel(%arg0: i32, %arg1: i32, %arg2: i32, %arg3: memref<32x640xbf16, #tpu.memory_space<vmem>>, %arg4: memref<640x128xbf16, #tpu.memory_space<vmem>>, %arg5: memref<1x128xf32, #tpu.memory_space<vmem>>, %arg6: memref<32x128xbf16, #tpu.memory_space<vmem>>, %arg7: memref<32x128xf32, #tpu.memory_space<vmem>>) attributes {dimension_semantics = [#tpu.dimension_semantics<parallel>, #tpu.dimension_semantics<parallel>, #tpu.dimension_semantics<arbitrary>], iteration_bounds = array<i64: 1, 1, 1>, scalar_prefetch = 0 : i64, scratch_operands = 1 : i64, tpu.core_type = #tpu.core_type<tc>, window_params = [{transform_indices = @transform_0, window_bounds = array<i64: 32, 640>}, {transform_indices = @transform_1, window_bounds = array<i64: 640, 128>}, {transform_indices = @transform_2, window_bounds = array<i64: 1, 128>}, {transform_indices = @transform_3, window_bounds = array<i64: 32, 128>}]} {
    %c0_i32 = arith.constant 0 : i32
    %0 = arith.cmpi eq, %arg2, %c0_i32 : i32
    %1 = arith.extui %0 : i1 to i32
    %c0_i32_0 = arith.constant 0 : i32
    %2 = arith.cmpi ne, %1, %c0_i32_0 : i32
    scf.if %2 {
      %cst_10 = arith.constant 0.000000e+00 : f32
      %12 = vector.broadcast %cst_10 : f32 to vector<32x128xf32>
      %c0_11 = arith.constant 0 : index
      %c0_12 = arith.constant 0 : index
      %13 = vector.load %arg7[%c0_11, %c0_12] : memref<32x128xf32, #tpu.memory_space<vmem>>, vector<32x128xf32>
      tpu.vector_store %arg7[%c0_11, %c0_12], %12 {strides = array<i32>} : memref<32x128xf32, #tpu.memory_space<vmem>>, vector<32x128xf32>,
    } else {
    }
    %c0 = arith.constant 0 : index
    %c0_1 = arith.constant 0 : index
    %3 = vector.load %arg7[%c0, %c0_1] : memref<32x128xf32, #tpu.memory_space<vmem>>, vector<32x128xf32>
    %c0_2 = arith.constant 0 : index
    %c0_3 = arith.constant 0 : index
    %4 = vector.load %arg3[%c0_2, %c0_3] : memref<32x640xbf16, #tpu.memory_space<vmem>>, vector<32x640xbf16>
    %c0_4 = arith.constant 0 : index
    %c0_5 = arith.constant 0 : index
    %5 = vector.load %arg4[%c0_4, %c0_5] : memref<640x128xbf16, #tpu.memory_space<vmem>>, vector<640x128xbf16>
    %cst = arith.constant dense<0.000000e+00> : vector<32x128xf32>
    %6 = tpu.matmul %4, %5, %cst {dimension_numbers = #tpu.dot_dimension_numbers<[1], [0], [0], [1], [0, 0, 1, 1], [], []>} : vector<32x640xbf16>, vector<640x128xbf16>, vector<32x128xf32> -> vector<32x128xf32>
    %7 = arith.addf %3, %6 : vector<32x128xf32>
    %c0_6 = arith.constant 0 : index
    %c0_7 = arith.constant 0 : index
    %8 = vector.load %arg7[%c0_6, %c0_7] : memref<32x128xf32, #tpu.memory_space<vmem>>, vector<32x128xf32>
    tpu.vector_store %arg7[%c0_6, %c0_7], %7 {strides = array<i32>} : memref<32x128xf32, #tpu.memory_space<vmem>>, vector<32x128xf32>,
    %c0_i32_8 = arith.constant 0 : i32
    %9 = arith.cmpi eq, %arg2, %c0_i32_8 : i32
    %10 = arith.extui %9 : i1 to i32
    %c0_i32_9 = arith.constant 0 : i32
    %11 = arith.cmpi ne, %10, %c0_i32_9 : i32
    scf.if %11 {
      %c0_10 = arith.constant 0 : index
      %c0_11 = arith.constant 0 : index
      %12 = vector.load %arg7[%c0_10, %c0_11] : memref<32x128xf32, #tpu.memory_space<vmem>>, vector<32x128xf32>
      %c0_12 = arith.constant 0 : index
      %c0_13 = arith.constant 0 : index
      %13 = vector.load %arg5[%c0_12, %c0_13] : memref<1x128xf32, #tpu.memory_space<vmem>>, vector<1x128xf32>
      %14 = vector.broadcast %13 : vector<1x128xf32> to vector<32x128xf32>
      %15 = arith.addf %12, %14 : vector<32x128xf32>
      %cst_14 = arith.constant 0.000000e+00 : f32
      %16 = vector.broadcast %cst_14 : f32 to vector<32x128xf32>
      %17 = arith.maximumf %15, %16 : vector<32x128xf32>
      %18 = arith.truncf %17 : vector<32x128xf32> to vector<32x128xbf16>
      %c0_15 = arith.constant 0 : index
      %c0_16 = arith.constant 0 : index
      %19 = vector.load %arg6[%c0_15, %c0_16] : memref<32x128xbf16, #tpu.memory_space<vmem>>, vector<32x128xbf16>
      tpu.vector_store %arg6[%c0_15, %c0_16], %18 {strides = array<i32>} : memref<32x128xbf16, #tpu.memory_space<vmem>>, vector<32x128xbf16>,
    } else {
    }
    return
  }
  func.func @transform_0(%arg0: i32, %arg1: i32, %arg2: i32) -> (i32, i32) {
    %c0_i32 = arith.constant 0 : i32
    return %arg0, %arg2 : i32, i32
  }
  func.func @transform_1(%arg0: i32, %arg1: i32, %arg2: i32) -> (i32, i32) {
    %c0_i32 = arith.constant 0 : i32
    return %arg2, %arg1 : i32, i32
  }
  func.func @transform_2(%arg0: i32, %arg1: i32, %arg2: i32) -> (i32, i32) {
    %c0_i32 = arith.constant 0 : i32
    %c0_i32_0 = arith.constant 0 : i32
    return %c0_i32, %arg1 : i32, i32
  }
  func.func @transform_3(%arg0: i32, %arg1: i32, %arg2: i32) -> (i32, i32) {
    %c0_i32 = arith.constant 0 : i32
    return %arg0, %arg1 : i32, i32
  }
}

module attributes {stable_mosaic.version = 11 : i64} {
  func.func @_mm_bias_act_kernel(%arg0: i32, %arg1: i32, %arg2: i32, %arg3: memref<16x1024xbf16, #tpu.memory_space<vmem>>, %arg4: memref<1024x128xbf16, #tpu.memory_space<vmem>>, %arg5: memref<1x128xf32, #tpu.memory_space<vmem>>, %arg6: memref<16x128xf32, #tpu.memory_space<vmem>>, %arg7: memref<16x128xf32, #tpu.memory_space<vmem>>) attributes {dimension_semantics = [#tpu.dimension_semantics<parallel>, #tpu.dimension_semantics<parallel>, #tpu.dimension_semantics<arbitrary>], iteration_bounds = array<i64: 1, 1, 1>, scalar_prefetch = 0 : i64, scratch_operands = 1 : i64, tpu.core_type = #tpu.core_type<tc>, window_params = [{transform_indices = @transform_0, window_bounds = array<i64: 16, 1024>}, {transform_indices = @transform_1, window_bounds = array<i64: 1024, 128>}, {transform_indices = @transform_2, window_bounds = array<i64: 1, 128>}, {transform_indices = @transform_3, window_bounds = array<i64: 16, 128>}]} {
    %c0_i32 = arith.constant 0 : i32
    %0 = arith.cmpi eq, %arg2, %c0_i32 : i32
    %1 = arith.extui %0 : i1 to i32
    %c0_i32_0 = arith.constant 0 : i32
    %2 = arith.cmpi ne, %1, %c0_i32_0 : i32
    scf.if %2 {
      %cst_10 = arith.constant 0.000000e+00 : f32
      %12 = vector.broadcast %cst_10 : f32 to vector<16x128xf32>
      %c0_11 = arith.constant 0 : index
      %c0_12 = arith.constant 0 : index
      %13 = vector.load %arg7[%c0_11, %c0_12] : memref<16x128xf32, #tpu.memory_space<vmem>>, vector<16x128xf32>
      tpu.vector_store %arg7[%c0_11, %c0_12], %12 {strides = array<i32>} : memref<16x128xf32, #tpu.memory_space<vmem>>, vector<16x128xf32>,
    } else {
    }
    %c0 = arith.constant 0 : index
    %c0_1 = arith.constant 0 : index
    %3 = vector.load %arg7[%c0, %c0_1] : memref<16x128xf32, #tpu.memory_space<vmem>>, vector<16x128xf32>
    %c0_2 = arith.constant 0 : index
    %c0_3 = arith.constant 0 : index
    %4 = vector.load %arg3[%c0_2, %c0_3] : memref<16x1024xbf16, #tpu.memory_space<vmem>>, vector<16x1024xbf16>
    %c0_4 = arith.constant 0 : index
    %c0_5 = arith.constant 0 : index
    %5 = vector.load %arg4[%c0_4, %c0_5] : memref<1024x128xbf16, #tpu.memory_space<vmem>>, vector<1024x128xbf16>
    %cst = arith.constant dense<0.000000e+00> : vector<16x128xf32>
    %6 = tpu.matmul %4, %5, %cst {dimension_numbers = #tpu.dot_dimension_numbers<[1], [0], [0], [1], [0, 0, 1, 1], [], []>} : vector<16x1024xbf16>, vector<1024x128xbf16>, vector<16x128xf32> -> vector<16x128xf32>
    %7 = arith.addf %3, %6 : vector<16x128xf32>
    %c0_6 = arith.constant 0 : index
    %c0_7 = arith.constant 0 : index
    %8 = vector.load %arg7[%c0_6, %c0_7] : memref<16x128xf32, #tpu.memory_space<vmem>>, vector<16x128xf32>
    tpu.vector_store %arg7[%c0_6, %c0_7], %7 {strides = array<i32>} : memref<16x128xf32, #tpu.memory_space<vmem>>, vector<16x128xf32>,
    %c0_i32_8 = arith.constant 0 : i32
    %9 = arith.cmpi eq, %arg2, %c0_i32_8 : i32
    %10 = arith.extui %9 : i1 to i32
    %c0_i32_9 = arith.constant 0 : i32
    %11 = arith.cmpi ne, %10, %c0_i32_9 : i32
    scf.if %11 {
      %c0_10 = arith.constant 0 : index
      %c0_11 = arith.constant 0 : index
      %12 = vector.load %arg7[%c0_10, %c0_11] : memref<16x128xf32, #tpu.memory_space<vmem>>, vector<16x128xf32>
      %c0_12 = arith.constant 0 : index
      %c0_13 = arith.constant 0 : index
      %13 = vector.load %arg5[%c0_12, %c0_13] : memref<1x128xf32, #tpu.memory_space<vmem>>, vector<1x128xf32>
      %14 = vector.broadcast %13 : vector<1x128xf32> to vector<16x128xf32>
      %15 = arith.addf %12, %14 : vector<16x128xf32>
      %c0_14 = arith.constant 0 : index
      %c0_15 = arith.constant 0 : index
      %16 = vector.load %arg6[%c0_14, %c0_15] : memref<16x128xf32, #tpu.memory_space<vmem>>, vector<16x128xf32>
      tpu.vector_store %arg6[%c0_14, %c0_15], %15 {strides = array<i32>} : memref<16x128xf32, #tpu.memory_space<vmem>>, vector<16x128xf32>,
    } else {
    }
    return
  }
  func.func @transform_0(%arg0: i32, %arg1: i32, %arg2: i32) -> (i32, i32) {
    %c0_i32 = arith.constant 0 : i32
    return %arg0, %arg2 : i32, i32
  }
  func.func @transform_1(%arg0: i32, %arg1: i32, %arg2: i32) -> (i32, i32) {
    %c0_i32 = arith.constant 0 : i32
    return %arg2, %arg1 : i32, i32
  }
  func.func @transform_2(%arg0: i32, %arg1: i32, %arg2: i32) -> (i32, i32) {
    %c0_i32 = arith.constant 0 : i32
    %c0_i32_0 = arith.constant 0 : i32
    return %c0_i32, %arg1 : i32, i32
  }
  func.func @transform_3(%arg0: i32, %arg1: i32, %arg2: i32) -> (i32, i32) {
    %c0_i32 = arith.constant 0 : i32
    return %arg0, %arg1 : i32, i32
  }
}

module attributes {stable_mosaic.version = 11 : i64} {
  func.func @_mm_bias_act_kernel(%arg0: i32, %arg1: i32, %arg2: i32, %arg3: memref<16x1152xbf16, #tpu.memory_space<vmem>>, %arg4: memref<1152x256xbf16, #tpu.memory_space<vmem>>, %arg5: memref<1x256xf32, #tpu.memory_space<vmem>>, %arg6: memref<16x256xbf16, #tpu.memory_space<vmem>>, %arg7: memref<16x256xf32, #tpu.memory_space<vmem>>) attributes {dimension_semantics = [#tpu.dimension_semantics<parallel>, #tpu.dimension_semantics<parallel>, #tpu.dimension_semantics<arbitrary>], iteration_bounds = array<i64: 1, 1, 1>, scalar_prefetch = 0 : i64, scratch_operands = 1 : i64, tpu.core_type = #tpu.core_type<tc>, window_params = [{transform_indices = @transform_0, window_bounds = array<i64: 16, 1152>}, {transform_indices = @transform_1, window_bounds = array<i64: 1152, 256>}, {transform_indices = @transform_2, window_bounds = array<i64: 1, 256>}, {transform_indices = @transform_3, window_bounds = array<i64: 16, 256>}]} {
    %c0_i32 = arith.constant 0 : i32
    %0 = arith.cmpi eq, %arg2, %c0_i32 : i32
    %1 = arith.extui %0 : i1 to i32
    %c0_i32_0 = arith.constant 0 : i32
    %2 = arith.cmpi ne, %1, %c0_i32_0 : i32
    scf.if %2 {
      %cst_10 = arith.constant 0.000000e+00 : f32
      %12 = vector.broadcast %cst_10 : f32 to vector<16x256xf32>
      %c0_11 = arith.constant 0 : index
      %c0_12 = arith.constant 0 : index
      %13 = vector.load %arg7[%c0_11, %c0_12] : memref<16x256xf32, #tpu.memory_space<vmem>>, vector<16x256xf32>
      tpu.vector_store %arg7[%c0_11, %c0_12], %12 {strides = array<i32>} : memref<16x256xf32, #tpu.memory_space<vmem>>, vector<16x256xf32>,
    } else {
    }
    %c0 = arith.constant 0 : index
    %c0_1 = arith.constant 0 : index
    %3 = vector.load %arg7[%c0, %c0_1] : memref<16x256xf32, #tpu.memory_space<vmem>>, vector<16x256xf32>
    %c0_2 = arith.constant 0 : index
    %c0_3 = arith.constant 0 : index
    %4 = vector.load %arg3[%c0_2, %c0_3] : memref<16x1152xbf16, #tpu.memory_space<vmem>>, vector<16x1152xbf16>
    %c0_4 = arith.constant 0 : index
    %c0_5 = arith.constant 0 : index
    %5 = vector.load %arg4[%c0_4, %c0_5] : memref<1152x256xbf16, #tpu.memory_space<vmem>>, vector<1152x256xbf16>
    %cst = arith.constant dense<0.000000e+00> : vector<16x256xf32>
    %6 = tpu.matmul %4, %5, %cst {dimension_numbers = #tpu.dot_dimension_numbers<[1], [0], [0], [1], [0, 0, 1, 1], [], []>} : vector<16x1152xbf16>, vector<1152x256xbf16>, vector<16x256xf32> -> vector<16x256xf32>
    %7 = arith.addf %3, %6 : vector<16x256xf32>
    %c0_6 = arith.constant 0 : index
    %c0_7 = arith.constant 0 : index
    %8 = vector.load %arg7[%c0_6, %c0_7] : memref<16x256xf32, #tpu.memory_space<vmem>>, vector<16x256xf32>
    tpu.vector_store %arg7[%c0_6, %c0_7], %7 {strides = array<i32>} : memref<16x256xf32, #tpu.memory_space<vmem>>, vector<16x256xf32>,
    %c0_i32_8 = arith.constant 0 : i32
    %9 = arith.cmpi eq, %arg2, %c0_i32_8 : i32
    %10 = arith.extui %9 : i1 to i32
    %c0_i32_9 = arith.constant 0 : i32
    %11 = arith.cmpi ne, %10, %c0_i32_9 : i32
    scf.if %11 {
      %c0_10 = arith.constant 0 : index
      %c0_11 = arith.constant 0 : index
      %12 = vector.load %arg7[%c0_10, %c0_11] : memref<16x256xf32, #tpu.memory_space<vmem>>, vector<16x256xf32>
      %c0_12 = arith.constant 0 : index
      %c0_13 = arith.constant 0 : index
      %13 = vector.load %arg5[%c0_12, %c0_13] : memref<1x256xf32, #tpu.memory_space<vmem>>, vector<1x256xf32>
      %14 = vector.broadcast %13 : vector<1x256xf32> to vector<16x256xf32>
      %15 = arith.addf %12, %14 : vector<16x256xf32>
      %cst_14 = arith.constant 0.000000e+00 : f32
      %16 = vector.broadcast %cst_14 : f32 to vector<16x256xf32>
      %17 = arith.maximumf %15, %16 : vector<16x256xf32>
      %18 = arith.truncf %17 : vector<16x256xf32> to vector<16x256xbf16>
      %c0_15 = arith.constant 0 : index
      %c0_16 = arith.constant 0 : index
      %19 = vector.load %arg6[%c0_15, %c0_16] : memref<16x256xbf16, #tpu.memory_space<vmem>>, vector<16x256xbf16>
      tpu.vector_store %arg6[%c0_15, %c0_16], %18 {strides = array<i32>} : memref<16x256xbf16, #tpu.memory_space<vmem>>, vector<16x256xbf16>,
    } else {
    }
    return
  }
  func.func @transform_0(%arg0: i32, %arg1: i32, %arg2: i32) -> (i32, i32) {
    %c0_i32 = arith.constant 0 : i32
    return %arg0, %arg2 : i32, i32
  }
  func.func @transform_1(%arg0: i32, %arg1: i32, %arg2: i32) -> (i32, i32) {
    %c0_i32 = arith.constant 0 : i32
    return %arg2, %arg1 : i32, i32
  }
  func.func @transform_2(%arg0: i32, %arg1: i32, %arg2: i32) -> (i32, i32) {
    %c0_i32 = arith.constant 0 : i32
    %c0_i32_0 = arith.constant 0 : i32
    return %c0_i32, %arg1 : i32, i32
  }
  func.func @transform_3(%arg0: i32, %arg1: i32, %arg2: i32) -> (i32, i32) {
    %c0_i32 = arith.constant 0 : i32
    return %arg0, %arg1 : i32, i32
  }
}

module attributes {stable_mosaic.version = 11 : i64} {
  func.func @_mm_bias_act_kernel(%arg0: i32, %arg1: i32, %arg2: i32, %arg3: memref<16x128xbf16, #tpu.memory_space<vmem>>, %arg4: memref<128x1024xbf16, #tpu.memory_space<vmem>>, %arg5: memref<1x1024xf32, #tpu.memory_space<vmem>>, %arg6: memref<16x1024xbf16, #tpu.memory_space<vmem>>, %arg7: memref<16x1024xf32, #tpu.memory_space<vmem>>) attributes {dimension_semantics = [#tpu.dimension_semantics<parallel>, #tpu.dimension_semantics<parallel>, #tpu.dimension_semantics<arbitrary>], iteration_bounds = array<i64: 1, 1, 1>, scalar_prefetch = 0 : i64, scratch_operands = 1 : i64, tpu.core_type = #tpu.core_type<tc>, window_params = [{transform_indices = @transform_0, window_bounds = array<i64: 16, 128>}, {transform_indices = @transform_1, window_bounds = array<i64: 128, 1024>}, {transform_indices = @transform_2, window_bounds = array<i64: 1, 1024>}, {transform_indices = @transform_3, window_bounds = array<i64: 16, 1024>}]} {
    %c0_i32 = arith.constant 0 : i32
    %0 = arith.cmpi eq, %arg2, %c0_i32 : i32
    %1 = arith.extui %0 : i1 to i32
    %c0_i32_0 = arith.constant 0 : i32
    %2 = arith.cmpi ne, %1, %c0_i32_0 : i32
    scf.if %2 {
      %cst_10 = arith.constant 0.000000e+00 : f32
      %12 = vector.broadcast %cst_10 : f32 to vector<16x1024xf32>
      %c0_11 = arith.constant 0 : index
      %c0_12 = arith.constant 0 : index
      %13 = vector.load %arg7[%c0_11, %c0_12] : memref<16x1024xf32, #tpu.memory_space<vmem>>, vector<16x1024xf32>
      tpu.vector_store %arg7[%c0_11, %c0_12], %12 {strides = array<i32>} : memref<16x1024xf32, #tpu.memory_space<vmem>>, vector<16x1024xf32>,
    } else {
    }
    %c0 = arith.constant 0 : index
    %c0_1 = arith.constant 0 : index
    %3 = vector.load %arg7[%c0, %c0_1] : memref<16x1024xf32, #tpu.memory_space<vmem>>, vector<16x1024xf32>
    %c0_2 = arith.constant 0 : index
    %c0_3 = arith.constant 0 : index
    %4 = vector.load %arg3[%c0_2, %c0_3] : memref<16x128xbf16, #tpu.memory_space<vmem>>, vector<16x128xbf16>
    %c0_4 = arith.constant 0 : index
    %c0_5 = arith.constant 0 : index
    %5 = vector.load %arg4[%c0_4, %c0_5] : memref<128x1024xbf16, #tpu.memory_space<vmem>>, vector<128x1024xbf16>
    %cst = arith.constant dense<0.000000e+00> : vector<16x1024xf32>
    %6 = tpu.matmul %4, %5, %cst {dimension_numbers = #tpu.dot_dimension_numbers<[1], [0], [0], [1], [0, 0, 1, 1], [], []>} : vector<16x128xbf16>, vector<128x1024xbf16>, vector<16x1024xf32> -> vector<16x1024xf32>
    %7 = arith.addf %3, %6 : vector<16x1024xf32>
    %c0_6 = arith.constant 0 : index
    %c0_7 = arith.constant 0 : index
    %8 = vector.load %arg7[%c0_6, %c0_7] : memref<16x1024xf32, #tpu.memory_space<vmem>>, vector<16x1024xf32>
    tpu.vector_store %arg7[%c0_6, %c0_7], %7 {strides = array<i32>} : memref<16x1024xf32, #tpu.memory_space<vmem>>, vector<16x1024xf32>,
    %c0_i32_8 = arith.constant 0 : i32
    %9 = arith.cmpi eq, %arg2, %c0_i32_8 : i32
    %10 = arith.extui %9 : i1 to i32
    %c0_i32_9 = arith.constant 0 : i32
    %11 = arith.cmpi ne, %10, %c0_i32_9 : i32
    scf.if %11 {
      %c0_10 = arith.constant 0 : index
      %c0_11 = arith.constant 0 : index
      %12 = vector.load %arg7[%c0_10, %c0_11] : memref<16x1024xf32, #tpu.memory_space<vmem>>, vector<16x1024xf32>
      %c0_12 = arith.constant 0 : index
      %c0_13 = arith.constant 0 : index
      %13 = vector.load %arg5[%c0_12, %c0_13] : memref<1x1024xf32, #tpu.memory_space<vmem>>, vector<1x1024xf32>
      %14 = vector.broadcast %13 : vector<1x1024xf32> to vector<16x1024xf32>
      %15 = arith.addf %12, %14 : vector<16x1024xf32>
      %16 = arith.truncf %15 : vector<16x1024xf32> to vector<16x1024xbf16>
      %c0_14 = arith.constant 0 : index
      %c0_15 = arith.constant 0 : index
      %17 = vector.load %arg6[%c0_14, %c0_15] : memref<16x1024xbf16, #tpu.memory_space<vmem>>, vector<16x1024xbf16>
      tpu.vector_store %arg6[%c0_14, %c0_15], %16 {strides = array<i32>} : memref<16x1024xbf16, #tpu.memory_space<vmem>>, vector<16x1024xbf16>,
    } else {
    }
    return
  }
  func.func @transform_0(%arg0: i32, %arg1: i32, %arg2: i32) -> (i32, i32) {
    %c0_i32 = arith.constant 0 : i32
    return %arg0, %arg2 : i32, i32
  }
  func.func @transform_1(%arg0: i32, %arg1: i32, %arg2: i32) -> (i32, i32) {
    %c0_i32 = arith.constant 0 : i32
    return %arg2, %arg1 : i32, i32
  }
  func.func @transform_2(%arg0: i32, %arg1: i32, %arg2: i32) -> (i32, i32) {
    %c0_i32 = arith.constant 0 : i32
    %c0_i32_0 = arith.constant 0 : i32
    return %c0_i32, %arg1 : i32, i32
  }
  func.func @transform_3(%arg0: i32, %arg1: i32, %arg2: i32) -> (i32, i32) {
    %c0_i32 = arith.constant 0 : i32
    return %arg0, %arg1 : i32, i32
  }
}

module attributes {stable_mosaic.version = 11 : i64} {
  func.func @_mm_bias_act_kernel(%arg0: i32, %arg1: i32, %arg2: i32, %arg3: memref<16x1024xbf16, #tpu.memory_space<vmem>>, %arg4: memref<1024x512xbf16, #tpu.memory_space<vmem>>, %arg5: memref<1x512xf32, #tpu.memory_space<vmem>>, %arg6: memref<16x512xbf16, #tpu.memory_space<vmem>>, %arg7: memref<16x512xf32, #tpu.memory_space<vmem>>) attributes {dimension_semantics = [#tpu.dimension_semantics<parallel>, #tpu.dimension_semantics<parallel>, #tpu.dimension_semantics<arbitrary>], iteration_bounds = array<i64: 1, 1, 1>, scalar_prefetch = 0 : i64, scratch_operands = 1 : i64, tpu.core_type = #tpu.core_type<tc>, window_params = [{transform_indices = @transform_0, window_bounds = array<i64: 16, 1024>}, {transform_indices = @transform_1, window_bounds = array<i64: 1024, 512>}, {transform_indices = @transform_2, window_bounds = array<i64: 1, 512>}, {transform_indices = @transform_3, window_bounds = array<i64: 16, 512>}]} {
    %c0_i32 = arith.constant 0 : i32
    %0 = arith.cmpi eq, %arg2, %c0_i32 : i32
    %1 = arith.extui %0 : i1 to i32
    %c0_i32_0 = arith.constant 0 : i32
    %2 = arith.cmpi ne, %1, %c0_i32_0 : i32
    scf.if %2 {
      %cst_10 = arith.constant 0.000000e+00 : f32
      %12 = vector.broadcast %cst_10 : f32 to vector<16x512xf32>
      %c0_11 = arith.constant 0 : index
      %c0_12 = arith.constant 0 : index
      %13 = vector.load %arg7[%c0_11, %c0_12] : memref<16x512xf32, #tpu.memory_space<vmem>>, vector<16x512xf32>
      tpu.vector_store %arg7[%c0_11, %c0_12], %12 {strides = array<i32>} : memref<16x512xf32, #tpu.memory_space<vmem>>, vector<16x512xf32>,
    } else {
    }
    %c0 = arith.constant 0 : index
    %c0_1 = arith.constant 0 : index
    %3 = vector.load %arg7[%c0, %c0_1] : memref<16x512xf32, #tpu.memory_space<vmem>>, vector<16x512xf32>
    %c0_2 = arith.constant 0 : index
    %c0_3 = arith.constant 0 : index
    %4 = vector.load %arg3[%c0_2, %c0_3] : memref<16x1024xbf16, #tpu.memory_space<vmem>>, vector<16x1024xbf16>
    %c0_4 = arith.constant 0 : index
    %c0_5 = arith.constant 0 : index
    %5 = vector.load %arg4[%c0_4, %c0_5] : memref<1024x512xbf16, #tpu.memory_space<vmem>>, vector<1024x512xbf16>
    %cst = arith.constant dense<0.000000e+00> : vector<16x512xf32>
    %6 = tpu.matmul %4, %5, %cst {dimension_numbers = #tpu.dot_dimension_numbers<[1], [0], [0], [1], [0, 0, 1, 1], [], []>} : vector<16x1024xbf16>, vector<1024x512xbf16>, vector<16x512xf32> -> vector<16x512xf32>
    %7 = arith.addf %3, %6 : vector<16x512xf32>
    %c0_6 = arith.constant 0 : index
    %c0_7 = arith.constant 0 : index
    %8 = vector.load %arg7[%c0_6, %c0_7] : memref<16x512xf32, #tpu.memory_space<vmem>>, vector<16x512xf32>
    tpu.vector_store %arg7[%c0_6, %c0_7], %7 {strides = array<i32>} : memref<16x512xf32, #tpu.memory_space<vmem>>, vector<16x512xf32>,
    %c0_i32_8 = arith.constant 0 : i32
    %9 = arith.cmpi eq, %arg2, %c0_i32_8 : i32
    %10 = arith.extui %9 : i1 to i32
    %c0_i32_9 = arith.constant 0 : i32
    %11 = arith.cmpi ne, %10, %c0_i32_9 : i32
    scf.if %11 {
      %c0_10 = arith.constant 0 : index
      %c0_11 = arith.constant 0 : index
      %12 = vector.load %arg7[%c0_10, %c0_11] : memref<16x512xf32, #tpu.memory_space<vmem>>, vector<16x512xf32>
      %c0_12 = arith.constant 0 : index
      %c0_13 = arith.constant 0 : index
      %13 = vector.load %arg5[%c0_12, %c0_13] : memref<1x512xf32, #tpu.memory_space<vmem>>, vector<1x512xf32>
      %14 = vector.broadcast %13 : vector<1x512xf32> to vector<16x512xf32>
      %15 = arith.addf %12, %14 : vector<16x512xf32>
      %cst_14 = arith.constant 0.000000e+00 : f32
      %16 = vector.broadcast %cst_14 : f32 to vector<16x512xf32>
      %17 = arith.maximumf %15, %16 : vector<16x512xf32>
      %18 = arith.truncf %17 : vector<16x512xf32> to vector<16x512xbf16>
      %c0_15 = arith.constant 0 : index
      %c0_16 = arith.constant 0 : index
      %19 = vector.load %arg6[%c0_15, %c0_16] : memref<16x512xbf16, #tpu.memory_space<vmem>>, vector<16x512xbf16>
      tpu.vector_store %arg6[%c0_15, %c0_16], %18 {strides = array<i32>} : memref<16x512xbf16, #tpu.memory_space<vmem>>, vector<16x512xbf16>,
    } else {
    }
    return
  }
  func.func @transform_0(%arg0: i32, %arg1: i32, %arg2: i32) -> (i32, i32) {
    %c0_i32 = arith.constant 0 : i32
    return %arg0, %arg2 : i32, i32
  }
  func.func @transform_1(%arg0: i32, %arg1: i32, %arg2: i32) -> (i32, i32) {
    %c0_i32 = arith.constant 0 : i32
    return %arg2, %arg1 : i32, i32
  }
  func.func @transform_2(%arg0: i32, %arg1: i32, %arg2: i32) -> (i32, i32) {
    %c0_i32 = arith.constant 0 : i32
    %c0_i32_0 = arith.constant 0 : i32
    return %c0_i32, %arg1 : i32, i32
  }
  func.func @transform_3(%arg0: i32, %arg1: i32, %arg2: i32) -> (i32, i32) {
    %c0_i32 = arith.constant 0 : i32
    return %arg0, %arg1 : i32, i32
  }
}

module attributes {stable_mosaic.version = 11 : i64} {
  func.func @_mm_bias_act_kernel(%arg0: i32, %arg1: i32, %arg2: i32, %arg3: memref<32x512xbf16, #tpu.memory_space<vmem>>, %arg4: memref<512x256xbf16, #tpu.memory_space<vmem>>, %arg5: memref<1x256xf32, #tpu.memory_space<vmem>>, %arg6: memref<32x256xbf16, #tpu.memory_space<vmem>>, %arg7: memref<32x256xf32, #tpu.memory_space<vmem>>) attributes {dimension_semantics = [#tpu.dimension_semantics<parallel>, #tpu.dimension_semantics<parallel>, #tpu.dimension_semantics<arbitrary>], iteration_bounds = array<i64: 1, 1, 1>, scalar_prefetch = 0 : i64, scratch_operands = 1 : i64, tpu.core_type = #tpu.core_type<tc>, window_params = [{transform_indices = @transform_0, window_bounds = array<i64: 32, 512>}, {transform_indices = @transform_1, window_bounds = array<i64: 512, 256>}, {transform_indices = @transform_2, window_bounds = array<i64: 1, 256>}, {transform_indices = @transform_3, window_bounds = array<i64: 32, 256>}]} {
    %c0_i32 = arith.constant 0 : i32
    %0 = arith.cmpi eq, %arg2, %c0_i32 : i32
    %1 = arith.extui %0 : i1 to i32
    %c0_i32_0 = arith.constant 0 : i32
    %2 = arith.cmpi ne, %1, %c0_i32_0 : i32
    scf.if %2 {
      %cst_10 = arith.constant 0.000000e+00 : f32
      %12 = vector.broadcast %cst_10 : f32 to vector<32x256xf32>
      %c0_11 = arith.constant 0 : index
      %c0_12 = arith.constant 0 : index
      %13 = vector.load %arg7[%c0_11, %c0_12] : memref<32x256xf32, #tpu.memory_space<vmem>>, vector<32x256xf32>
      tpu.vector_store %arg7[%c0_11, %c0_12], %12 {strides = array<i32>} : memref<32x256xf32, #tpu.memory_space<vmem>>, vector<32x256xf32>,
    } else {
    }
    %c0 = arith.constant 0 : index
    %c0_1 = arith.constant 0 : index
    %3 = vector.load %arg7[%c0, %c0_1] : memref<32x256xf32, #tpu.memory_space<vmem>>, vector<32x256xf32>
    %c0_2 = arith.constant 0 : index
    %c0_3 = arith.constant 0 : index
    %4 = vector.load %arg3[%c0_2, %c0_3] : memref<32x512xbf16, #tpu.memory_space<vmem>>, vector<32x512xbf16>
    %c0_4 = arith.constant 0 : index
    %c0_5 = arith.constant 0 : index
    %5 = vector.load %arg4[%c0_4, %c0_5] : memref<512x256xbf16, #tpu.memory_space<vmem>>, vector<512x256xbf16>
    %cst = arith.constant dense<0.000000e+00> : vector<32x256xf32>
    %6 = tpu.matmul %4, %5, %cst {dimension_numbers = #tpu.dot_dimension_numbers<[1], [0], [0], [1], [0, 0, 1, 1], [], []>} : vector<32x512xbf16>, vector<512x256xbf16>, vector<32x256xf32> -> vector<32x256xf32>
    %7 = arith.addf %3, %6 : vector<32x256xf32>
    %c0_6 = arith.constant 0 : index
    %c0_7 = arith.constant 0 : index
    %8 = vector.load %arg7[%c0_6, %c0_7] : memref<32x256xf32, #tpu.memory_space<vmem>>, vector<32x256xf32>
    tpu.vector_store %arg7[%c0_6, %c0_7], %7 {strides = array<i32>} : memref<32x256xf32, #tpu.memory_space<vmem>>, vector<32x256xf32>,
    %c0_i32_8 = arith.constant 0 : i32
    %9 = arith.cmpi eq, %arg2, %c0_i32_8 : i32
    %10 = arith.extui %9 : i1 to i32
    %c0_i32_9 = arith.constant 0 : i32
    %11 = arith.cmpi ne, %10, %c0_i32_9 : i32
    scf.if %11 {
      %c0_10 = arith.constant 0 : index
      %c0_11 = arith.constant 0 : index
      %12 = vector.load %arg7[%c0_10, %c0_11] : memref<32x256xf32, #tpu.memory_space<vmem>>, vector<32x256xf32>
      %c0_12 = arith.constant 0 : index
      %c0_13 = arith.constant 0 : index
      %13 = vector.load %arg5[%c0_12, %c0_13] : memref<1x256xf32, #tpu.memory_space<vmem>>, vector<1x256xf32>
      %14 = vector.broadcast %13 : vector<1x256xf32> to vector<32x256xf32>
      %15 = arith.addf %12, %14 : vector<32x256xf32>
      %cst_14 = arith.constant 0.000000e+00 : f32
      %16 = vector.broadcast %cst_14 : f32 to vector<32x256xf32>
      %17 = arith.maximumf %15, %16 : vector<32x256xf32>
      %18 = arith.truncf %17 : vector<32x256xf32> to vector<32x256xbf16>
      %c0_15 = arith.constant 0 : index
      %c0_16 = arith.constant 0 : index
      %19 = vector.load %arg6[%c0_15, %c0_16] : memref<32x256xbf16, #tpu.memory_space<vmem>>, vector<32x256xbf16>
      tpu.vector_store %arg6[%c0_15, %c0_16], %18 {strides = array<i32>} : memref<32x256xbf16, #tpu.memory_space<vmem>>, vector<32x256xbf16>,
    } else {
    }
    return
  }
  func.func @transform_0(%arg0: i32, %arg1: i32, %arg2: i32) -> (i32, i32) {
    %c0_i32 = arith.constant 0 : i32
    return %arg0, %arg2 : i32, i32
  }
  func.func @transform_1(%arg0: i32, %arg1: i32, %arg2: i32) -> (i32, i32) {
    %c0_i32 = arith.constant 0 : i32
    return %arg2, %arg1 : i32, i32
  }
  func.func @transform_2(%arg0: i32, %arg1: i32, %arg2: i32) -> (i32, i32) {
    %c0_i32 = arith.constant 0 : i32
    %c0_i32_0 = arith.constant 0 : i32
    return %c0_i32, %arg1 : i32, i32
  }
  func.func @transform_3(%arg0: i32, %arg1: i32, %arg2: i32) -> (i32, i32) {
    %c0_i32 = arith.constant 0 : i32
    return %arg0, %arg1 : i32, i32
  }
}

module attributes {stable_mosaic.version = 11 : i64} {
  func.func @_mm_bias_act_kernel(%arg0: i32, %arg1: i32, %arg2: i32, %arg3: memref<128x256xbf16, #tpu.memory_space<vmem>>, %arg4: memref<256x128xbf16, #tpu.memory_space<vmem>>, %arg5: memref<1x128xf32, #tpu.memory_space<vmem>>, %arg6: memref<128x128xbf16, #tpu.memory_space<vmem>>, %arg7: memref<128x128xf32, #tpu.memory_space<vmem>>) attributes {dimension_semantics = [#tpu.dimension_semantics<parallel>, #tpu.dimension_semantics<parallel>, #tpu.dimension_semantics<arbitrary>], iteration_bounds = array<i64: 1, 1, 1>, scalar_prefetch = 0 : i64, scratch_operands = 1 : i64, tpu.core_type = #tpu.core_type<tc>, window_params = [{transform_indices = @transform_0, window_bounds = array<i64: 128, 256>}, {transform_indices = @transform_1, window_bounds = array<i64: 256, 128>}, {transform_indices = @transform_2, window_bounds = array<i64: 1, 128>}, {transform_indices = @transform_3, window_bounds = array<i64: 128, 128>}]} {
    %c0_i32 = arith.constant 0 : i32
    %0 = arith.cmpi eq, %arg2, %c0_i32 : i32
    %1 = arith.extui %0 : i1 to i32
    %c0_i32_0 = arith.constant 0 : i32
    %2 = arith.cmpi ne, %1, %c0_i32_0 : i32
    scf.if %2 {
      %cst_10 = arith.constant 0.000000e+00 : f32
      %12 = vector.broadcast %cst_10 : f32 to vector<128x128xf32>
      %c0_11 = arith.constant 0 : index
      %c0_12 = arith.constant 0 : index
      %13 = vector.load %arg7[%c0_11, %c0_12] : memref<128x128xf32, #tpu.memory_space<vmem>>, vector<128x128xf32>
      tpu.vector_store %arg7[%c0_11, %c0_12], %12 {strides = array<i32>} : memref<128x128xf32, #tpu.memory_space<vmem>>, vector<128x128xf32>,
    } else {
    }
    %c0 = arith.constant 0 : index
    %c0_1 = arith.constant 0 : index
    %3 = vector.load %arg7[%c0, %c0_1] : memref<128x128xf32, #tpu.memory_space<vmem>>, vector<128x128xf32>
    %c0_2 = arith.constant 0 : index
    %c0_3 = arith.constant 0 : index
    %4 = vector.load %arg3[%c0_2, %c0_3] : memref<128x256xbf16, #tpu.memory_space<vmem>>, vector<128x256xbf16>
    %c0_4 = arith.constant 0 : index
    %c0_5 = arith.constant 0 : index
    %5 = vector.load %arg4[%c0_4, %c0_5] : memref<256x128xbf16, #tpu.memory_space<vmem>>, vector<256x128xbf16>
    %cst = arith.constant dense<0.000000e+00> : vector<128x128xf32>
    %6 = tpu.matmul %4, %5, %cst {dimension_numbers = #tpu.dot_dimension_numbers<[1], [0], [0], [1], [0, 0, 1, 1], [], []>} : vector<128x256xbf16>, vector<256x128xbf16>, vector<128x128xf32> -> vector<128x128xf32>
    %7 = arith.addf %3, %6 : vector<128x128xf32>
    %c0_6 = arith.constant 0 : index
    %c0_7 = arith.constant 0 : index
    %8 = vector.load %arg7[%c0_6, %c0_7] : memref<128x128xf32, #tpu.memory_space<vmem>>, vector<128x128xf32>
    tpu.vector_store %arg7[%c0_6, %c0_7], %7 {strides = array<i32>} : memref<128x128xf32, #tpu.memory_space<vmem>>, vector<128x128xf32>,
    %c0_i32_8 = arith.constant 0 : i32
    %9 = arith.cmpi eq, %arg2, %c0_i32_8 : i32
    %10 = arith.extui %9 : i1 to i32
    %c0_i32_9 = arith.constant 0 : i32
    %11 = arith.cmpi ne, %10, %c0_i32_9 : i32
    scf.if %11 {
      %c0_10 = arith.constant 0 : index
      %c0_11 = arith.constant 0 : index
      %12 = vector.load %arg7[%c0_10, %c0_11] : memref<128x128xf32, #tpu.memory_space<vmem>>, vector<128x128xf32>
      %c0_12 = arith.constant 0 : index
      %c0_13 = arith.constant 0 : index
      %13 = vector.load %arg5[%c0_12, %c0_13] : memref<1x128xf32, #tpu.memory_space<vmem>>, vector<1x128xf32>
      %14 = vector.broadcast %13 : vector<1x128xf32> to vector<128x128xf32>
      %15 = arith.addf %12, %14 : vector<128x128xf32>
      %cst_14 = arith.constant 0.000000e+00 : f32
      %16 = vector.broadcast %cst_14 : f32 to vector<128x128xf32>
      %17 = arith.maximumf %15, %16 : vector<128x128xf32>
      %18 = arith.truncf %17 : vector<128x128xf32> to vector<128x128xbf16>
      %c0_15 = arith.constant 0 : index
      %c0_16 = arith.constant 0 : index
      %19 = vector.load %arg6[%c0_15, %c0_16] : memref<128x128xbf16, #tpu.memory_space<vmem>>, vector<128x128xbf16>
      tpu.vector_store %arg6[%c0_15, %c0_16], %18 {strides = array<i32>} : memref<128x128xbf16, #tpu.memory_space<vmem>>, vector<128x128xbf16>,
    } else {
    }
    return
  }
  func.func @transform_0(%arg0: i32, %arg1: i32, %arg2: i32) -> (i32, i32) {
    %c0_i32 = arith.constant 0 : i32
    return %arg0, %arg2 : i32, i32
  }
  func.func @transform_1(%arg0: i32, %arg1: i32, %arg2: i32) -> (i32, i32) {
    %c0_i32 = arith.constant 0 : i32
    return %arg2, %arg1 : i32, i32
  }
  func.func @transform_2(%arg0: i32, %arg1: i32, %arg2: i32) -> (i32, i32) {
    %c0_i32 = arith.constant 0 : i32
    %c0_i32_0 = arith.constant 0 : i32
    return %c0_i32, %arg1 : i32, i32
  }
  func.func @transform_3(%arg0: i32, %arg1: i32, %arg2: i32) -> (i32, i32) {
    %c0_i32 = arith.constant 0 : i32
    return %arg0, %arg1 : i32, i32
  }
}

module attributes {stable_mosaic.version = 11 : i64} {
  func.func @_mm_bias_act_kernel(%arg0: i32, %arg1: i32, %arg2: i32, %arg3: memref<512x128xbf16, #tpu.memory_space<vmem>>, %arg4: memref<128x128xbf16, #tpu.memory_space<vmem>>, %arg5: memref<1x128xf32, #tpu.memory_space<vmem>>, %arg6: memref<512x128xf32, #tpu.memory_space<vmem>>, %arg7: memref<512x128xf32, #tpu.memory_space<vmem>>) attributes {dimension_semantics = [#tpu.dimension_semantics<parallel>, #tpu.dimension_semantics<parallel>, #tpu.dimension_semantics<arbitrary>], iteration_bounds = array<i64: 1, 1, 1>, scalar_prefetch = 0 : i64, scratch_operands = 1 : i64, tpu.core_type = #tpu.core_type<tc>, window_params = [{transform_indices = @transform_0, window_bounds = array<i64: 512, 128>}, {transform_indices = @transform_1, window_bounds = array<i64: 128, 128>}, {transform_indices = @transform_2, window_bounds = array<i64: 1, 128>}, {transform_indices = @transform_3, window_bounds = array<i64: 512, 128>}]} {
    %c0_i32 = arith.constant 0 : i32
    %0 = arith.cmpi eq, %arg2, %c0_i32 : i32
    %1 = arith.extui %0 : i1 to i32
    %c0_i32_0 = arith.constant 0 : i32
    %2 = arith.cmpi ne, %1, %c0_i32_0 : i32
    scf.if %2 {
      %cst_10 = arith.constant 0.000000e+00 : f32
      %12 = vector.broadcast %cst_10 : f32 to vector<512x128xf32>
      %c0_11 = arith.constant 0 : index
      %c0_12 = arith.constant 0 : index
      %13 = vector.load %arg7[%c0_11, %c0_12] : memref<512x128xf32, #tpu.memory_space<vmem>>, vector<512x128xf32>
      tpu.vector_store %arg7[%c0_11, %c0_12], %12 {strides = array<i32>} : memref<512x128xf32, #tpu.memory_space<vmem>>, vector<512x128xf32>,
    } else {
    }
    %c0 = arith.constant 0 : index
    %c0_1 = arith.constant 0 : index
    %3 = vector.load %arg7[%c0, %c0_1] : memref<512x128xf32, #tpu.memory_space<vmem>>, vector<512x128xf32>
    %c0_2 = arith.constant 0 : index
    %c0_3 = arith.constant 0 : index
    %4 = vector.load %arg3[%c0_2, %c0_3] : memref<512x128xbf16, #tpu.memory_space<vmem>>, vector<512x128xbf16>
    %c0_4 = arith.constant 0 : index
    %c0_5 = arith.constant 0 : index
    %5 = vector.load %arg4[%c0_4, %c0_5] : memref<128x128xbf16, #tpu.memory_space<vmem>>, vector<128x128xbf16>
    %cst = arith.constant dense<0.000000e+00> : vector<512x128xf32>
    %6 = tpu.matmul %4, %5, %cst {dimension_numbers = #tpu.dot_dimension_numbers<[1], [0], [0], [1], [0, 0, 1, 1], [], []>} : vector<512x128xbf16>, vector<128x128xbf16>, vector<512x128xf32> -> vector<512x128xf32>
    %7 = arith.addf %3, %6 : vector<512x128xf32>
    %c0_6 = arith.constant 0 : index
    %c0_7 = arith.constant 0 : index
    %8 = vector.load %arg7[%c0_6, %c0_7] : memref<512x128xf32, #tpu.memory_space<vmem>>, vector<512x128xf32>
    tpu.vector_store %arg7[%c0_6, %c0_7], %7 {strides = array<i32>} : memref<512x128xf32, #tpu.memory_space<vmem>>, vector<512x128xf32>,
    %c0_i32_8 = arith.constant 0 : i32
    %9 = arith.cmpi eq, %arg2, %c0_i32_8 : i32
    %10 = arith.extui %9 : i1 to i32
    %c0_i32_9 = arith.constant 0 : i32
    %11 = arith.cmpi ne, %10, %c0_i32_9 : i32
    scf.if %11 {
      %c0_10 = arith.constant 0 : index
      %c0_11 = arith.constant 0 : index
      %12 = vector.load %arg7[%c0_10, %c0_11] : memref<512x128xf32, #tpu.memory_space<vmem>>, vector<512x128xf32>
      %c0_12 = arith.constant 0 : index
      %c0_13 = arith.constant 0 : index
      %13 = vector.load %arg5[%c0_12, %c0_13] : memref<1x128xf32, #tpu.memory_space<vmem>>, vector<1x128xf32>
      %14 = vector.broadcast %13 : vector<1x128xf32> to vector<512x128xf32>
      %15 = arith.addf %12, %14 : vector<512x128xf32>
      %cst_14 = arith.constant 5.000000e-01 : f32
      %16 = vector.broadcast %cst_14 : f32 to vector<512x128xf32>
      %17 = arith.mulf %16, %15 : vector<512x128xf32>
      %18 = math.tanh %17 : vector<512x128xf32>
      %cst_15 = arith.constant 1.000000e+00 : f32
      %19 = vector.broadcast %cst_15 : f32 to vector<512x128xf32>
      %20 = arith.addf %18, %19 : vector<512x128xf32>
      %cst_16 = arith.constant 5.000000e-01 : f32
      %21 = vector.broadcast %cst_16 : f32 to vector<512x128xf32>
      %22 = arith.mulf %21, %20 : vector<512x128xf32>
      %c0_17 = arith.constant 0 : index
      %c0_18 = arith.constant 0 : index
      %23 = vector.load %arg6[%c0_17, %c0_18] : memref<512x128xf32, #tpu.memory_space<vmem>>, vector<512x128xf32>
      tpu.vector_store %arg6[%c0_17, %c0_18], %22 {strides = array<i32>} : memref<512x128xf32, #tpu.memory_space<vmem>>, vector<512x128xf32>,
    } else {
    }
    return
  }
  func.func @transform_0(%arg0: i32, %arg1: i32, %arg2: i32) -> (i32, i32) {
    %c0_i32 = arith.constant 0 : i32
    return %arg0, %arg2 : i32, i32
  }
  func.func @transform_1(%arg0: i32, %arg1: i32, %arg2: i32) -> (i32, i32) {
    %c0_i32 = arith.constant 0 : i32
    return %arg2, %arg1 : i32, i32
  }
  func.func @transform_2(%arg0: i32, %arg1: i32, %arg2: i32) -> (i32, i32) {
    %c0_i32 = arith.constant 0 : i32
    %c0_i32_0 = arith.constant 0 : i32
    return %c0_i32, %arg1 : i32, i32
  }
  func.func @transform_3(%arg0: i32, %arg1: i32, %arg2: i32) -> (i32, i32) {
    %c0_i32 = arith.constant 0 : i32
    return %arg0, %arg1 : i32, i32
  }
}

</mosaic_0001>

<bundles_post_ra>
// kernel: vae_forward.10
= control target key start
LH: loop header
LB: loop body
LE: loop exit
PB: predicated region body
PF: predicated region fallthrough
CT: control target
= control target key end

     0   :  { %s1815_s1 = inlined_call_operand.vmem [shape: bf16[128,128], index: 1, kind: input, shape index: {}]   ;;  %s1816_s2 = inlined_call_operand.vmem [shape: f32[1,128], index: 2, kind: input, shape index: {}]   ;;  %s1817_s0 = inlined_call_operand.vmem [shape: bf16[512,128], index: 0, kind: input, shape index: {}]   ;;  %s1818_s3 = inlined_call_operand.vmem [shape: bf16[512,128], index: 3, kind: output, shape index: {}]  }
   0x1   :  { %v1293_v0 = vld [vmem:[%s1815_s1 + $0x38] sm:$0xff]  ;;  %v1292_v1 = vld [vmem:[%s1815_s1 + $0x30] sm:$0xff]  ;;  %v1291_v2 = vld [vmem:[%s1815_s1 + $0x28] sm:$0xff] }
   0x2   :  { %466 = vmatpush.bf16.msra.mxu0 %v1293_v0  ;;  %1485 = vmatpush.bf16.msra.mxu1 %v1293_v0  ;;  %v1290_v3 = vld [vmem:[%s1815_s1 + $0x20] sm:$0xff]  ;;  %v1289_v4 = vld [vmem:[%s1815_s1 + $0x18] sm:$0xff]  ;;  %v1288_v5 = vld [vmem:[%s1815_s1 + $0x10] sm:$0xff] }
   0x3   :  { %1486 = vmatpush.bf16.msra.mxu2 %v1293_v0  ;;  %1487 = vmatpush.bf16.msra.mxu3 %v1293_v0  ;;  %v1287_v6 = vld [vmem:[%s1815_s1 + $0x8] sm:$0xff]  ;;  %v1286_v7 = vld [vmem:[%s1815_s1] sm:$0xff]  ;;  %v1256_v16 = vld [vmem:[%s1817_s0 + $0x10] sm:$0xff] }
   0x4   :  { %v1254_v8 = vld [vmem:[%s1817_s0] sm:$0xff]  ;;  %v1255_v12 = vld [vmem:[%s1817_s0 + $0x8] sm:$0xff]  ;;  %v1264_v17 = vld [vmem:[%s1817_s0 + $0x50] sm:$0xff] }
   0x5   :  { %v1262_v9 = vld [vmem:[%s1817_s0 + $0x40] sm:$0xff]  ;;  %v1263_v13 = vld [vmem:[%s1817_s0 + $0x48] sm:$0xff]  ;;  %v1272_v18 = vld [vmem:[%s1817_s0 + $0x90] sm:$0xff] }
   0x6   :  { %467 = vmatpush.bf16.msra.mxu0 %v1292_v1  ;;  %1488 = vmatpush.bf16.msra.mxu1 %v1292_v1  ;;  %v1270_v10 = vld [vmem:[%s1817_s0 + $0x80] sm:$0xff]  ;;  %v1271_v14 = vld [vmem:[%s1817_s0 + $0x88] sm:$0xff]  ;;  %v1280_v19 = vld [vmem:[%s1817_s0 + $0xd0] sm:$0xff] }
   0x7   :  { %1489 = vmatpush.bf16.msra.mxu2 %v1292_v1  ;;  %1490 = vmatpush.bf16.msra.mxu3 %v1292_v1  ;;  %v1278_v11 = vld [vmem:[%s1817_s0 + $0xc0] sm:$0xff]  ;;  %v1279_v15 = vld [vmem:[%s1817_s0 + $0xc8] sm:$0xff]  ;;  %v1257_v20 = vld [vmem:[%s1817_s0 + $0x18] sm:$0xff] }
   0x8   :  { %v1265_v21 = vld [vmem:[%s1817_s0 + $0x58] sm:$0xff]  ;;  %v1258_v24 = vld [vmem:[%s1817_s0 + $0x20] sm:$0xff]  ;;  %v1259_v28 = vld [vmem:[%s1817_s0 + $0x28] sm:$0xff] }
   0x9   :  { %v1273_v22 = vld [vmem:[%s1817_s0 + $0x98] sm:$0xff]  ;;  %v1266_v25 = vld [vmem:[%s1817_s0 + $0x60] sm:$0xff]  ;;  %v1267_v29 = vld [vmem:[%s1817_s0 + $0x68] sm:$0xff] }
   0xa   :  { %468 = vmatpush.bf16.msra.mxu0 %v1291_v2  ;;  %1491 = vmatpush.bf16.msra.mxu1 %v1291_v2  ;;  %v1281_v23 = vld [vmem:[%s1817_s0 + $0xd8] sm:$0xff]  ;;  %v1274_v26 = vld [vmem:[%s1817_s0 + $0xa0] sm:$0xff]  ;;  %v1275_v30 = vld [vmem:[%s1817_s0 + $0xa8] sm:$0xff] }
   0xb   :  { %1492 = vmatpush.bf16.msra.mxu2 %v1291_v2  ;;  %1493 = vmatpush.bf16.msra.mxu3 %v1291_v2  ;;  %v1282_v27 = vld [vmem:[%s1817_s0 + $0xe0] sm:$0xff]  ;;  %v1283_v31 = vld [vmem:[%s1817_s0 + $0xe8] sm:$0xff]  ;;  %v1260_v32 = vld [vmem:[%s1817_s0 + $0x30] sm:$0xff] }
   0xc   :  { %v1268_v33 = vld [vmem:[%s1817_s0 + $0x70] sm:$0xff]  ;;  %v1261_v36 = vld [vmem:[%s1817_s0 + $0x38] sm:$0xff]  ;;  %v1653_v42 = vld [vmem:[%s1816_s2] ss:$0 sm:$0xff] }
   0xd   :  { %v1276_v34 = vld [vmem:[%s1817_s0 + $0xb0] sm:$0xff]  ;;  %v1269_v37 = vld [vmem:[%s1817_s0 + $0x78] sm:$0xff] }
   0xe   :  { %469 = vmatpush.bf16.msra.mxu0 %v1290_v3  ;;  %1494 = vmatpush.bf16.msra.mxu1 %v1290_v3  ;;  %v1284_v35 = vld [vmem:[%s1817_s0 + $0xf0] sm:$0xff]  ;;  %v1277_v38 = vld [vmem:[%s1817_s0 + $0xb8] sm:$0xff] }
   0xf   :  { %1495 = vmatpush.bf16.msra.mxu2 %v1290_v3  ;;  %1496 = vmatpush.bf16.msra.mxu3 %v1290_v3  ;;  %v1285_v39 = vld [vmem:[%s1817_s0 + $0xf8] sm:$0xff] }
  0x12   :  { %470 = vmatpush.bf16.msra.mxu0 %v1289_v4  ;;  %1497 = vmatpush.bf16.msra.mxu1 %v1289_v4 }
  0x13   :  { %1498 = vmatpush.bf16.msra.mxu2 %v1289_v4  ;;  %1499 = vmatpush.bf16.msra.mxu3 %v1289_v4 }
  0x16   :  { %471 = vmatpush.bf16.msra.mxu0 %v1288_v5  ;;  %1500 = vmatpush.bf16.msra.mxu1 %v1288_v5 }
  0x17   :  { %1501 = vmatpush.bf16.msra.mxu2 %v1288_v5  ;;  %1502 = vmatpush.bf16.msra.mxu3 %v1288_v5 }
  0x1a   :  { %472 = vmatpush.bf16.msra.mxu0 %v1287_v6  ;;  %1503 = vmatpush.bf16.msra.mxu1 %v1287_v6 }
  0x1b   :  { %1504 = vmatpush.bf16.msra.mxu2 %v1287_v6  ;;  %1505 = vmatpush.bf16.msra.mxu3 %v1287_v6 }
  0x1e   :  { %473 = vmatpush.bf16.msra.mxu0 %v1286_v7  ;;  %1506 = vmatpush.bf16.msra.mxu1 %v1286_v7 }
  0x1f   :  { %1507 = vmatpush.bf16.msra.mxu2 %v1286_v7  ;;  %1508 = vmatpush.bf16.msra.mxu3 %v1286_v7 }
  0x21   :  { %474 = vmatmul.bf16.vlgmr.msra.gmra.mxu0 %v1254_v8  ;;  %514 = vmatmul.bf16.vlgmr.msra.gmra.mxu1 %v1262_v9 }
  0x22   :  { %554 = vmatmul.bf16.vlgmr.msra.gmra.mxu2 %v1270_v10  ;;  %594 = vmatmul.bf16.vlgmr.msra.gmra.mxu3 %v1278_v11 }
  0x31   :  { %479 = vmatmul.bf16.gmra.mxu0 %v1255_v12  ;;  %519 = vmatmul.bf16.gmra.mxu1 %v1263_v13 }
  0x32   :  { %559 = vmatmul.bf16.gmra.mxu2 %v1271_v14  ;;  %599 = vmatmul.bf16.gmra.mxu3 %v1279_v15 }
  0x41   :  { %484 = vmatmul.bf16.gmra.mxu0 %v1256_v16  ;;  %524 = vmatmul.bf16.gmra.mxu1 %v1264_v17 }
  0x42   :  { %564 = vmatmul.bf16.gmra.mxu2 %v1272_v18  ;;  %604 = vmatmul.bf16.gmra.mxu3 %v1280_v19 }
  0x51   :  { %489 = vmatmul.bf16.gmra.mxu0 %v1257_v20  ;;  %529 = vmatmul.bf16.gmra.mxu1 %v1265_v21 }
  0x52   :  { %569 = vmatmul.bf16.gmra.mxu2 %v1273_v22  ;;  %609 = vmatmul.bf16.gmra.mxu3 %v1281_v23 }
  0x61   :  { %494 = vmatmul.bf16.gmra.mxu0 %v1258_v24  ;;  %534 = vmatmul.bf16.gmra.mxu1 %v1266_v25 }
  0x62   :  { %574 = vmatmul.bf16.gmra.mxu2 %v1274_v26  ;;  %614 = vmatmul.bf16.gmra.mxu3 %v1282_v27 }
  0x71   :  { %499 = vmatmul.bf16.gmra.mxu0 %v1259_v28  ;;  %539 = vmatmul.bf16.gmra.mxu1 %v1267_v29 }
  0x72   :  { %579 = vmatmul.bf16.gmra.mxu2 %v1275_v30  ;;  %619 = vmatmul.bf16.gmra.mxu3 %v1283_v31 }
  0x81   :  { %504 = vmatmul.bf16.gmra.mxu0 %v1260_v32  ;;  %544 = vmatmul.bf16.gmra.mxu1 %v1268_v33 }
  0x82   :  { %584 = vmatmul.bf16.gmra.mxu2 %v1276_v34  ;;  %624 = vmatmul.bf16.gmra.mxu3 %v1284_v35 }
  0x91   :  { %509 = vmatmul.bf16.gmra.mxu0 %v1261_v36  ;;  %549 = vmatmul.bf16.gmra.mxu1 %v1269_v37 }
  0x92   :  { %589 = vmatmul.bf16.gmra.mxu2 %v1277_v38  ;;  %629 = vmatmul.bf16.gmra.mxu3 %v1285_v39 }
  0x9e   :  { %v475_v40 = vpop.f32.mrf.mxu0  ;;  %v515_v41 = vpop.f32.mrf.mxu1 }
  0x9f   :  { %v834_v43 = vadd.f32 %v1653_v42, %v475_v40  ;;  %v850_v44 = vadd.f32 %v1653_v42, %v515_v41 }
  0xa1   :  { %v898_v51 = vmax.f32 %v834_v43, 0.0  ;;  %v914_v52 = vmax.f32 %v850_v44, 0.0 }
  0xa5   :  { %v555_v45 = vpop.f32.mrf.mxu2  ;;  %v595_v46 = vpop.f32.mrf.mxu3 }
  0xa6   :  { %v477_v47 = vpop.f32.mrf.mxu0  ;;  %v517_v48 = vpop.f32.mrf.mxu1  ;;  %v866_v57 = vadd.f32 %v1653_v42, %v555_v45  ;;  %v882_v58 = vadd.f32 %v1653_v42, %v595_v46 }
  0xa7   :  { %v835_v49 = vadd.f32 %v1653_v42, %v477_v47  ;;  %v851_v50 = vadd.f32 %v1653_v42, %v517_v48 }
  0xa8   :  { %v930_v1 = vmax.f32 %v866_v57, 0.0  ;;  %v946_v2 = vmax.f32 %v882_v58, 0.0 }
  0xa9   :  { %v899_v53 = vmax.f32 %v835_v49, 0.0  ;;  %v915_v54 = vmax.f32 %v851_v50, 0.0 }
  0xab   :  { %v1297_v55 = vpack.c.bf16 %v899_v53, %v898_v51  ;;  %v1337_v56 = vpack.c.bf16 %v915_v54, %v914_v52 }
  0xad   :  { %1298 = vst [vmem:[%s1818_s3] sm:$0xff] %v1297_v55   ;;  %v557_v59 = vpop.f32.mrf.mxu2  ;;  %v597_v60 = vpop.f32.mrf.mxu3 }
  0xae   :  { %1461 = vst [vmem:[%s1818_s3 + $0x40] sm:$0xff] %v1337_v56   ;;  %v867_v61 = vadd.f32 %v1653_v42, %v557_v59  ;;  %v883_v62 = vadd.f32 %v1653_v42, %v597_v60  ;;  %v480_v63 = vpop.f32.mrf.mxu0  ;;  %v520_v0 = vpop.f32.mrf.mxu1 }
  0xaf   :  { %v836_v7 = vadd.f32 %v1653_v42, %v480_v63  ;;  %v852_v8 = vadd.f32 %v1653_v42, %v520_v0 }
  0xb0   :  { %v931_v3 = vmax.f32 %v867_v61, 0.0  ;;  %v947_v4 = vmax.f32 %v883_v62, 0.0 }
  0xb1   :  { %v900_v15 = vmax.f32 %v836_v7, 0.0  ;;  %v916_v16 = vmax.f32 %v852_v8, 0.0 }
  0xb2   :  { %v1377_v5 = vpack.c.bf16 %v931_v3, %v930_v1  ;;  %v1417_v6 = vpack.c.bf16 %v947_v4, %v946_v2 }
  0xb4   :  { %1469 = vst [vmem:[%s1818_s3 + $0x80] sm:$0xff] %v1377_v5  }
  0xb5   :  { %1477 = vst [vmem:[%s1818_s3 + $0xc0] sm:$0xff] %v1417_v6   ;;  %v560_v9 = vpop.f32.mrf.mxu2  ;;  %v600_v10 = vpop.f32.mrf.mxu3 }
  0xb6   :  { %v482_v11 = vpop.f32.mrf.mxu0  ;;  %v522_v12 = vpop.f32.mrf.mxu1  ;;  %v868_v21 = vadd.f32 %v1653_v42, %v560_v9  ;;  %v884_v22 = vadd.f32 %v1653_v42, %v600_v10 }
  0xb7   :  { %v837_v13 = vadd.f32 %v1653_v42, %v482_v11  ;;  %v853_v14 = vadd.f32 %v1653_v42, %v522_v12 }
  0xb8   :  { %v932_v29 = vmax.f32 %v868_v21, 0.0  ;;  %v948_v30 = vmax.f32 %v884_v22, 0.0 }
  0xb9   :  { %v901_v17 = vmax.f32 %v837_v13, 0.0  ;;  %v917_v18 = vmax.f32 %v853_v14, 0.0 }
  0xbb   :  { %v1302_v19 = vpack.c.bf16 %v901_v17, %v900_v15  ;;  %v1342_v20 = vpack.c.bf16 %v917_v18, %v916_v16 }
  0xbd   :  { %1454 = vst [vmem:[%s1818_s3 + $0x8] sm:$0xff] %v1302_v19   ;;  %v562_v23 = vpop.f32.mrf.mxu2  ;;  %v602_v24 = vpop.f32.mrf.mxu3 }
  0xbe   :  { %1462 = vst [vmem:[%s1818_s3 + $0x48] sm:$0xff] %v1342_v20   ;;  %v869_v25 = vadd.f32 %v1653_v42, %v562_v23  ;;  %v885_v26 = vadd.f32 %v1653_v42, %v602_v24  ;;  %v485_v27 = vpop.f32.mrf.mxu0  ;;  %v525_v28 = vpop.f32.mrf.mxu1 }
  0xbf   :  { %v838_v35 = vadd.f32 %v1653_v42, %v485_v27  ;;  %v854_v36 = vadd.f32 %v1653_v42, %v525_v28 }
  0xc0   :  { %v933_v31 = vmax.f32 %v869_v25, 0.0  ;;  %v949_v32 = vmax.f32 %v885_v26, 0.0 }
  0xc1   :  { %v902_v44 = vmax.f32 %v838_v35, 0.0  ;;  %v918_v45 = vmax.f32 %v854_v36, 0.0 }
  0xc2   :  { %v1382_v33 = vpack.c.bf16 %v933_v31, %v932_v29  ;;  %v1422_v34 = vpack.c.bf16 %v949_v32, %v948_v30 }
  0xc4   :  { %1470 = vst [vmem:[%s1818_s3 + $0x88] sm:$0xff] %v1382_v33  }
  0xc5   :  { %1478 = vst [vmem:[%s1818_s3 + $0xc8] sm:$0xff] %v1422_v34   ;;  %v565_v37 = vpop.f32.mrf.mxu2  ;;  %v605_v38 = vpop.f32.mrf.mxu3 }
  0xc6   :  { %v487_v39 = vpop.f32.mrf.mxu0  ;;  %v527_v40 = vpop.f32.mrf.mxu1  ;;  %v870_v50 = vadd.f32 %v1653_v42, %v565_v37  ;;  %v886_v51 = vadd.f32 %v1653_v42, %v605_v38 }
  0xc7   :  { %v839_v41 = vadd.f32 %v1653_v42, %v487_v39  ;;  %v855_v43 = vadd.f32 %v1653_v42, %v527_v40 }
  0xc8   :  { %v934_v58 = vmax.f32 %v870_v50, 0.0  ;;  %v950_v59 = vmax.f32 %v886_v51, 0.0 }
  0xc9   :  { %v903_v46 = vmax.f32 %v839_v41, 0.0  ;;  %v919_v47 = vmax.f32 %v855_v43, 0.0 }
  0xcb   :  { %v1307_v48 = vpack.c.bf16 %v903_v46, %v902_v44  ;;  %v1347_v49 = vpack.c.bf16 %v919_v47, %v918_v45 }
  0xcd   :  { %1455 = vst [vmem:[%s1818_s3 + $0x10] sm:$0xff] %v1307_v48   ;;  %v567_v52 = vpop.f32.mrf.mxu2  ;;  %v607_v53 = vpop.f32.mrf.mxu3 }
  0xce   :  { %1463 = vst [vmem:[%s1818_s3 + $0x50] sm:$0xff] %v1347_v49   ;;  %v871_v54 = vadd.f32 %v1653_v42, %v567_v52  ;;  %v887_v55 = vadd.f32 %v1653_v42, %v607_v53  ;;  %v490_v56 = vpop.f32.mrf.mxu0  ;;  %v530_v57 = vpop.f32.mrf.mxu1 }
  0xcf   :  { %v840_v0 = vadd.f32 %v1653_v42, %v490_v56  ;;  %v856_v1 = vadd.f32 %v1653_v42, %v530_v57 }
  0xd0   :  { %v935_v60 = vmax.f32 %v871_v54, 0.0  ;;  %v951_v61 = vmax.f32 %v887_v55, 0.0 }
  0xd1   :  { %v904_v8 = vmax.f32 %v840_v0, 0.0  ;;  %v920_v9 = vmax.f32 %v856_v1, 0.0 }
  0xd2   :  { %v1387_v62 = vpack.c.bf16 %v935_v60, %v934_v58  ;;  %v1427_v63 = vpack.c.bf16 %v951_v61, %v950_v59 }
  0xd4   :  { %1471 = vst [vmem:[%s1818_s3 + $0x90] sm:$0xff] %v1387_v62  }
  0xd5   :  { %1479 = vst [vmem:[%s1818_s3 + $0xd0] sm:$0xff] %v1427_v63   ;;  %v570_v2 = vpop.f32.mrf.mxu2  ;;  %v610_v3 = vpop.f32.mrf.mxu3 }
  0xd6   :  { %v492_v4 = vpop.f32.mrf.mxu0  ;;  %v532_v5 = vpop.f32.mrf.mxu1  ;;  %v872_v14 = vadd.f32 %v1653_v42, %v570_v2  ;;  %v888_v15 = vadd.f32 %v1653_v42, %v610_v3 }
  0xd7   :  { %v841_v6 = vadd.f32 %v1653_v42, %v492_v4  ;;  %v857_v7 = vadd.f32 %v1653_v42, %v532_v5 }
  0xd8   :  { %v936_v22 = vmax.f32 %v872_v14, 0.0  ;;  %v952_v23 = vmax.f32 %v888_v15, 0.0 }
  0xd9   :  { %v905_v10 = vmax.f32 %v841_v6, 0.0  ;;  %v921_v11 = vmax.f32 %v857_v7, 0.0 }
  0xdb   :  { %v1312_v12 = vpack.c.bf16 %v905_v10, %v904_v8  ;;  %v1352_v13 = vpack.c.bf16 %v921_v11, %v920_v9 }
  0xdd   :  { %1456 = vst [vmem:[%s1818_s3 + $0x18] sm:$0xff] %v1312_v12   ;;  %v572_v16 = vpop.f32.mrf.mxu2  ;;  %v612_v17 = vpop.f32.mrf.mxu3 }
  0xde   :  { %1464 = vst [vmem:[%s1818_s3 + $0x58] sm:$0xff] %v1352_v13   ;;  %v873_v18 = vadd.f32 %v1653_v42, %v572_v16  ;;  %v889_v19 = vadd.f32 %v1653_v42, %v612_v17  ;;  %v495_v20 = vpop.f32.mrf.mxu0  ;;  %v535_v21 = vpop.f32.mrf.mxu1 }
  0xdf   :  { %v842_v28 = vadd.f32 %v1653_v42, %v495_v20  ;;  %v858_v29 = vadd.f32 %v1653_v42, %v535_v21 }
  0xe0   :  { %v937_v24 = vmax.f32 %v873_v18, 0.0  ;;  %v953_v25 = vmax.f32 %v889_v19, 0.0 }
  0xe1   :  { %v906_v36 = vmax.f32 %v842_v28, 0.0  ;;  %v922_v37 = vmax.f32 %v858_v29, 0.0 }
  0xe2   :  { %v1392_v26 = vpack.c.bf16 %v937_v24, %v936_v22  ;;  %v1432_v27 = vpack.c.bf16 %v953_v25, %v952_v23 }
  0xe4   :  { %1472 = vst [vmem:[%s1818_s3 + $0x98] sm:$0xff] %v1392_v26  }
  0xe5   :  { %1480 = vst [vmem:[%s1818_s3 + $0xd8] sm:$0xff] %v1432_v27   ;;  %v575_v30 = vpop.f32.mrf.mxu2  ;;  %v615_v31 = vpop.f32.mrf.mxu3 }
  0xe6   :  { %v497_v32 = vpop.f32.mrf.mxu0  ;;  %v537_v33 = vpop.f32.mrf.mxu1  ;;  %v874_v43 = vadd.f32 %v1653_v42, %v575_v30  ;;  %v890_v44 = vadd.f32 %v1653_v42, %v615_v31 }
  0xe7   :  { %v843_v34 = vadd.f32 %v1653_v42, %v497_v32  ;;  %v859_v35 = vadd.f32 %v1653_v42, %v537_v33 }
  0xe8   :  { %v938_v51 = vmax.f32 %v874_v43, 0.0  ;;  %v954_v52 = vmax.f32 %v890_v44, 0.0 }
  0xe9   :  { %v907_v38 = vmax.f32 %v843_v34, 0.0  ;;  %v923_v39 = vmax.f32 %v859_v35, 0.0 }
  0xeb   :  { %v1317_v40 = vpack.c.bf16 %v907_v38, %v906_v36  ;;  %v1357_v41 = vpack.c.bf16 %v923_v39, %v922_v37 }
  0xed   :  { %1457 = vst [vmem:[%s1818_s3 + $0x20] sm:$0xff] %v1317_v40   ;;  %v577_v45 = vpop.f32.mrf.mxu2  ;;  %v617_v46 = vpop.f32.mrf.mxu3 }
  0xee   :  { %1465 = vst [vmem:[%s1818_s3 + $0x60] sm:$0xff] %v1357_v41   ;;  %v875_v47 = vadd.f32 %v1653_v42, %v577_v45  ;;  %v891_v48 = vadd.f32 %v1653_v42, %v617_v46  ;;  %v500_v49 = vpop.f32.mrf.mxu0  ;;  %v540_v50 = vpop.f32.mrf.mxu1 }
  0xef   :  { %v844_v57 = vadd.f32 %v1653_v42, %v500_v49  ;;  %v860_v58 = vadd.f32 %v1653_v42, %v540_v50 }
  0xf0   :  { %v939_v53 = vmax.f32 %v875_v47, 0.0  ;;  %v955_v54 = vmax.f32 %v891_v48, 0.0 }
  0xf1   :  { %v908_v1 = vmax.f32 %v844_v57, 0.0  ;;  %v924_v2 = vmax.f32 %v860_v58, 0.0 }
  0xf2   :  { %v1397_v55 = vpack.c.bf16 %v939_v53, %v938_v51  ;;  %v1437_v56 = vpack.c.bf16 %v955_v54, %v954_v52 }
  0xf4   :  { %1473 = vst [vmem:[%s1818_s3 + $0xa0] sm:$0xff] %v1397_v55  }
  0xf5   :  { %1481 = vst [vmem:[%s1818_s3 + $0xe0] sm:$0xff] %v1437_v56   ;;  %v580_v59 = vpop.f32.mrf.mxu2  ;;  %v620_v60 = vpop.f32.mrf.mxu3 }
  0xf6   :  { %v502_v61 = vpop.f32.mrf.mxu0  ;;  %v542_v62 = vpop.f32.mrf.mxu1  ;;  %v876_v7 = vadd.f32 %v1653_v42, %v580_v59  ;;  %v892_v8 = vadd.f32 %v1653_v42, %v620_v60 }
  0xf7   :  { %v845_v63 = vadd.f32 %v1653_v42, %v502_v61  ;;  %v861_v0 = vadd.f32 %v1653_v42, %v542_v62 }
  0xf8   :  { %v940_v15 = vmax.f32 %v876_v7, 0.0  ;;  %v956_v16 = vmax.f32 %v892_v8, 0.0 }
  0xf9   :  { %v909_v3 = vmax.f32 %v845_v63, 0.0  ;;  %v925_v4 = vmax.f32 %v861_v0, 0.0 }
  0xfb   :  { %v1322_v5 = vpack.c.bf16 %v909_v3, %v908_v1  ;;  %v1362_v6 = vpack.c.bf16 %v925_v4, %v924_v2 }
  0xfd   :  { %1458 = vst [vmem:[%s1818_s3 + $0x28] sm:$0xff] %v1322_v5   ;;  %v582_v9 = vpop.f32.mrf.mxu2  ;;  %v622_v10 = vpop.f32.mrf.mxu3 }
  0xfe   :  { %1466 = vst [vmem:[%s1818_s3 + $0x68] sm:$0xff] %v1362_v6   ;;  %v877_v11 = vadd.f32 %v1653_v42, %v582_v9  ;;  %v893_v12 = vadd.f32 %v1653_v42, %v622_v10  ;;  %v505_v13 = vpop.f32.mrf.mxu0  ;;  %v545_v14 = vpop.f32.mrf.mxu1 }
  0xff   :  { %v846_v21 = vadd.f32 %v1653_v42, %v505_v13  ;;  %v862_v22 = vadd.f32 %v1653_v42, %v545_v14 }
 0x100   :  { %v941_v17 = vmax.f32 %v877_v11, 0.0  ;;  %v957_v18 = vmax.f32 %v893_v12, 0.0 }
 0x101   :  { %v910_v29 = vmax.f32 %v846_v21, 0.0  ;;  %v926_v30 = vmax.f32 %v862_v22, 0.0 }
 0x102   :  { %v1402_v19 = vpack.c.bf16 %v941_v17, %v940_v15  ;;  %v1442_v20 = vpack.c.bf16 %v957_v18, %v956_v16 }
 0x104   :  { %1474 = vst [vmem:[%s1818_s3 + $0xa8] sm:$0xff] %v1402_v19  }
 0x105   :  { %1482 = vst [vmem:[%s1818_s3 + $0xe8] sm:$0xff] %v1442_v20   ;;  %v585_v23 = vpop.f32.mrf.mxu2  ;;  %v625_v24 = vpop.f32.mrf.mxu3 }
 0x106   :  { %v507_v25 = vpop.f32.mrf.mxu0  ;;  %v547_v26 = vpop.f32.mrf.mxu1  ;;  %v878_v35 = vadd.f32 %v1653_v42, %v585_v23  ;;  %v894_v36 = vadd.f32 %v1653_v42, %v625_v24 }
 0x107   :  { %v847_v27 = vadd.f32 %v1653_v42, %v507_v25  ;;  %v863_v28 = vadd.f32 %v1653_v42, %v547_v26 }
 0x108   :  { %v942_v44 = vmax.f32 %v878_v35, 0.0  ;;  %v958_v45 = vmax.f32 %v894_v36, 0.0 }
 0x109   :  { %v911_v31 = vmax.f32 %v847_v27, 0.0  ;;  %v927_v32 = vmax.f32 %v863_v28, 0.0 }
 0x10b   :  { %v1327_v33 = vpack.c.bf16 %v911_v31, %v910_v29  ;;  %v1367_v34 = vpack.c.bf16 %v927_v32, %v926_v30 }
 0x10d   :  { %1459 = vst [vmem:[%s1818_s3 + $0x30] sm:$0xff] %v1327_v33   ;;  %v587_v37 = vpop.f32.mrf.mxu2  ;;  %v627_v38 = vpop.f32.mrf.mxu3 }
 0x10e   :  { %1467 = vst [vmem:[%s1818_s3 + $0x70] sm:$0xff] %v1367_v34   ;;  %v879_v39 = vadd.f32 %v1653_v42, %v587_v37  ;;  %v895_v40 = vadd.f32 %v1653_v42, %v627_v38  ;;  %v510_v41 = vpop.f32.mrf.mxu0  ;;  %v550_v43 = vpop.f32.mrf.mxu1 }
 0x10f   :  { %v848_v50 = vadd.f32 %v1653_v42, %v510_v41  ;;  %v864_v51 = vadd.f32 %v1653_v42, %v550_v43 }
 0x110   :  { %v943_v46 = vmax.f32 %v879_v39, 0.0  ;;  %v959_v47 = vmax.f32 %v895_v40, 0.0 }
 0x111   :  { %v912_v58 = vmax.f32 %v848_v50, 0.0  ;;  %v928_v59 = vmax.f32 %v864_v51, 0.0 }
 0x112   :  { %v1407_v48 = vpack.c.bf16 %v943_v46, %v942_v44  ;;  %v1447_v49 = vpack.c.bf16 %v959_v47, %v958_v45 }
 0x114   :  { %1475 = vst [vmem:[%s1818_s3 + $0xb0] sm:$0xff] %v1407_v48  }
 0x115   :  { %1483 = vst [vmem:[%s1818_s3 + $0xf0] sm:$0xff] %v1447_v49   ;;  %v590_v52 = vpop.f32.mrf.mxu2  ;;  %v630_v53 = vpop.f32.mrf.mxu3 }
 0x116   :  { %v512_v54 = vpop.f32.mrf.mxu0  ;;  %v552_v55 = vpop.f32.mrf.mxu1  ;;  %v880_v0 = vadd.f32 %v1653_v42, %v590_v52  ;;  %v896_v1 = vadd.f32 %v1653_v42, %v630_v53 }
 0x117   :  { %v849_v56 = vadd.f32 %v1653_v42, %v512_v54  ;;  %v865_v57 = vadd.f32 %v1653_v42, %v552_v55 }
 0x118   :  { %v944_v6 = vmax.f32 %v880_v0, 0.0  ;;  %v960_v7 = vmax.f32 %v896_v1, 0.0 }
 0x119   :  { %v913_v60 = vmax.f32 %v849_v56, 0.0  ;;  %v929_v61 = vmax.f32 %v865_v57, 0.0 }
 0x11b   :  { %v1332_v62 = vpack.c.bf16 %v913_v60, %v912_v58  ;;  %v1372_v63 = vpack.c.bf16 %v929_v61, %v928_v59 }
 0x11d   :  { %1460 = vst [vmem:[%s1818_s3 + $0x38] sm:$0xff] %v1332_v62   ;;  %v592_v2 = vpop.f32.mrf.mxu2  ;;  %v632_v3 = vpop.f32.mrf.mxu3 }
 0x11e   :  { %1468 = vst [vmem:[%s1818_s3 + $0x78] sm:$0xff] %v1372_v63   ;;  %v881_v4 = vadd.f32 %v1653_v42, %v592_v2  ;;  %v897_v5 = vadd.f32 %v1653_v42, %v632_v3 }
 0x120   :  { %v945_v8 = vmax.f32 %v881_v4, 0.0  ;;  %v961_v9 = vmax.f32 %v897_v5, 0.0 }
 0x122   :  { %v1412_v10 = vpack.c.bf16 %v945_v8, %v944_v6  ;;  %v1452_v11 = vpack.c.bf16 %v961_v9, %v960_v7 }
 0x124   :  { %1476 = vst [vmem:[%s1818_s3 + $0xb8] sm:$0xff] %v1412_v10  }
 0x125   :  { %1484 = vst [vmem:[%s1818_s3 + $0xf8] sm:$0xff] %v1452_v11  }

// kernel: vae_forward.11
= control target key start
LH: loop header
LB: loop body
LE: loop exit
PB: predicated region body
PF: predicated region fallthrough
CT: control target
= control target key end

     0   :  { %s1317_s1 = inlined_call_operand.vmem [shape: bf16[384,128], index: 1, kind: input, shape index: {}]   ;;  %s1318_s0 = inlined_call_operand.vmem [shape: bf16[128,384], index: 0, kind: input, shape index: {}]   ;;  %s1319_s2 = inlined_call_operand.vmem [shape: f32[1,128], index: 2, kind: input, shape index: {}]   ;;  %s1320_s3 = inlined_call_operand.vmem [shape: bf16[128,128], index: 3, kind: output, shape index: {}]  }
   0x1   :  { %v895_v0 = vld [vmem:[%s1317_s1 + $0x38] sm:$0xff]  ;;  %v894_v3 = vld [vmem:[%s1317_s1 + $0x30] sm:$0xff]  ;;  %v893_v6 = vld [vmem:[%s1317_s1 + $0x28] sm:$0xff] }
   0x2   :  { %v1010_v1 = vld [vmem:[%s1317_s1 + $0x78] sm:$0xff]  ;;  %402 = vmatpush.bf16.msra.mxu0 %v895_v0  ;;  %959 = vmatpush.bf16.msra.mxu3 %v895_v0  ;;  %v1025_v4 = vld [vmem:[%s1317_s1 + $0x70] sm:$0xff]  ;;  %v901_v7 = vld [vmem:[%s1317_s1 + $0x68] sm:$0xff] }
   0x3   :  { %v1015_v2 = vld [vmem:[%s1317_s1 + $0xb8] sm:$0xff]  ;;  %451 = vmatpush.bf16.msra.mxu1 %v1010_v1  ;;  %v1030_v5 = vld [vmem:[%s1317_s1 + $0xb0] sm:$0xff]  ;;  %v1043_v8 = vld [vmem:[%s1317_s1 + $0xa8] sm:$0xff] }
   0x4   :  { %500 = vmatpush.bf16.msra.mxu2 %v1015_v2  ;;  %v892_v9 = vld [vmem:[%s1317_s1 + $0x20] sm:$0xff]  ;;  %v891_v12 = vld [vmem:[%s1317_s1 + $0x18] sm:$0xff]  ;;  %v890_v15 = vld [vmem:[%s1317_s1 + $0x10] sm:$0xff] }
   0x5   :  { %v900_v10 = vld [vmem:[%s1317_s1 + $0x60] sm:$0xff]  ;;  %v899_v13 = vld [vmem:[%s1317_s1 + $0x58] sm:$0xff]  ;;  %v898_v16 = vld [vmem:[%s1317_s1 + $0x50] sm:$0xff] }
   0x6   :  { %403 = vmatpush.bf16.msra.mxu0 %v894_v3  ;;  %960 = vmatpush.bf16.msra.mxu3 %v894_v3  ;;  %v1055_v11 = vld [vmem:[%s1317_s1 + $0xa0] sm:$0xff]  ;;  %v1067_v14 = vld [vmem:[%s1317_s1 + $0x98] sm:$0xff]  ;;  %v1079_v17 = vld [vmem:[%s1317_s1 + $0x90] sm:$0xff] }
   0x7   :  { %452 = vmatpush.bf16.msra.mxu1 %v1025_v4  ;;  %v889_v18 = vld [vmem:[%s1317_s1 + $0x8] sm:$0xff]  ;;  %v888_v21 = vld [vmem:[%s1317_s1] sm:$0xff]  ;;  %v746_v26 = vld [vmem:[%s1318_s0 + $0x90] sm:$0xf] }
   0x8   :  { %501 = vmatpush.bf16.msra.mxu2 %v1030_v5  ;;  %v897_v19 = vld [vmem:[%s1317_s1 + $0x48] sm:$0xff]  ;;  %v896_v22 = vld [vmem:[%s1317_s1 + $0x40] sm:$0xff]  ;;  %v883_v27 = vld [vmem:[%s1318_s0 + $0x98] sm:$0xf0] }
   0x9   :  { %v1091_v20 = vld [vmem:[%s1317_s1 + $0x88] sm:$0xff]  ;;  %v1102_v23 = vld [vmem:[%s1317_s1 + $0x80] sm:$0xff]  ;;  %v676_v29 = vld [vmem:[%s1318_s0 + $0xc] sm:$0xf0]  ;;  %v747_v33 = vor.u32 %v883_v27, %v746_v26 }
   0xa   :  { %404 = vmatpush.bf16.msra.mxu0 %v893_v6  ;;  %961 = vmatpush.bf16.msra.mxu3 %v893_v6  ;;  %v674_v24 = vld [vmem:[%s1318_s0] sm:$0xf]  ;;  %v865_v25 = vld [vmem:[%s1318_s0 + $0x8] sm:$0xf0]  ;;  %v864_v28 = vld [vmem:[%s1318_s0 + $0x4] sm:$0xf] }
   0xb   :  { %453 = vmatpush.bf16.msra.mxu1 %v901_v7  ;;  %v682_v30 = vld [vmem:[%s1318_s0 + $0x8] sm:$0xf]  ;;  %v866_v31 = vld [vmem:[%s1318_s0 + $0x10] sm:$0xf0]  ;;  %v675_v32 = vor.u32 %v865_v25, %v674_v24  ;;  %v679_v34 = vor.u32 %v864_v28, %v676_v29  ;;  %v686_v36 = vld [vmem:[%s1318_s0 + $0x18] sm:$0xf] }
   0xc   :  { %502 = vmatpush.bf16.msra.mxu2 %v1043_v8  ;;  %v683_v35 = vor.u32 %v866_v31, %v682_v30  ;;  %v868_v37 = vld [vmem:[%s1318_s0 + $0x20] sm:$0xf0]  ;;  %v758_v38 = vld [vmem:[%s1318_s0 + $0xa8] sm:$0xf]  ;;  %v886_v39 = vld [vmem:[%s1318_s0 + $0xb0] sm:$0xf0] }
   0xd   :  { %v867_v40 = vld [vmem:[%s1318_s0 + $0x1c] sm:$0xf]  ;;  %v688_v41 = vld [vmem:[%s1318_s0 + $0x24] sm:$0xf0]  ;;  %v694_v42 = vld [vmem:[%s1318_s0 + $0x20] sm:$0xf]  ;;  %v687_v44 = vor.u32 %v868_v37, %v686_v36  ;;  %v759_v45 = vor.u32 %v886_v39, %v758_v38 }
   0xe   :  { %405 = vmatpush.bf16.msra.mxu0 %v892_v9  ;;  %962 = vmatpush.bf16.msra.mxu3 %v892_v9  ;;  %v869_v43 = vld [vmem:[%s1318_s0 + $0x28] sm:$0xf0]  ;;  %v691_v46 = vor.u32 %v867_v40, %v688_v41  ;;  %v698_v48 = vld [vmem:[%s1318_s0 + $0x30] sm:$0xf]  ;;  %v871_v49 = vld [vmem:[%s1318_s0 + $0x38] sm:$0xf0] }
   0xf   :  { %454 = vmatpush.bf16.msra.mxu1 %v900_v10  ;;  %v695_v47 = vor.u32 %v869_v43, %v694_v42  ;;  %v870_v50 = vld [vmem:[%s1318_s0 + $0x34] sm:$0xf]  ;;  %v748_v52 = vld [vmem:[%s1318_s0 + $0x9c] sm:$0xf0]  ;;  %v706_v54 = vld [vmem:[%s1318_s0 + $0x38] sm:$0xf]  ;;  %v699_v56 = vor.u32 %v871_v49, %v698_v48 }
  0x10   :  { %503 = vmatpush.bf16.msra.mxu2 %v1055_v11  ;;  %v882_v51 = vld [vmem:[%s1318_s0 + $0x94] sm:$0xf]  ;;  %v700_v53 = vld [vmem:[%s1318_s0 + $0x3c] sm:$0xf0]  ;;  %v872_v55 = vld [vmem:[%s1318_s0 + $0x40] sm:$0xf0] }
  0x11   :  { %v751_v57 = vor.u32 %v882_v51, %v748_v52  ;;  %v703_v58 = vor.u32 %v870_v50, %v700_v53  ;;  %v707_v59 = vor.u32 %v872_v55, %v706_v54  ;;  %v710_v60 = vld [vmem:[%s1318_s0 + $0x48] sm:$0xf]  ;;  %v874_v61 = vld [vmem:[%s1318_s0 + $0x50] sm:$0xf0]  ;;  %v873_v62 = vld [vmem:[%s1318_s0 + $0x4c] sm:$0xf] }
  0x12   :  { %406 = vmatpush.bf16.msra.mxu0 %v891_v12  ;;  %963 = vmatpush.bf16.msra.mxu3 %v891_v12  ;;  %v885_v63 = vld [vmem:[%s1318_s0 + $0xac] sm:$0xf]  ;;  %v760_v0 = vld [vmem:[%s1318_s0 + $0xb4] sm:$0xf0]  ;;  %v875_v3 = vld [vmem:[%s1318_s0 + $0x58] sm:$0xf0] }
  0x13   :  { %455 = vmatpush.bf16.msra.mxu1 %v899_v13  ;;  %v877_v9 = vld [vmem:[%s1318_s0 + $0x68] sm:$0xf0]  ;;  %v884_v12 = vld [vmem:[%s1318_s0 + $0xa0] sm:$0xf0]  ;;  %v887_v24 = vld [vmem:[%s1318_s0 + $0xb8] sm:$0xf0] }
  0x14   :  { %504 = vmatpush.bf16.msra.mxu2 %v1067_v14  ;;  %v736_v25 = vld [vmem:[%s1318_s0 + $0x84] sm:$0xf0]  ;;  %v742_v26 = vld [vmem:[%s1318_s0 + $0x80] sm:$0xf]  ;;  %v881_v27 = vld [vmem:[%s1318_s0 + $0x88] sm:$0xf0] }
  0x15   :  { %v743_v31 = vor.u32 %v881_v27, %v742_v26  ;;  %v1265_v40 = vld [vmem:[%s1319_s2] ss:$0 sm:$0xff] }
  0x16   :  { %407 = vmatpush.bf16.msra.mxu0 %v890_v15  ;;  %964 = vmatpush.bf16.msra.mxu3 %v890_v15  ;;  %v878_v15 = vld [vmem:[%s1318_s0 + $0x70] sm:$0xf0] }
  0x17   :  { %456 = vmatpush.bf16.msra.mxu1 %v898_v16 }
  0x18   :  { %505 = vmatpush.bf16.msra.mxu2 %v1079_v17 }
  0x1a   :  { %408 = vmatpush.bf16.msra.mxu0 %v889_v18  ;;  %965 = vmatpush.bf16.msra.mxu3 %v889_v18 }
  0x1b   :  { %457 = vmatpush.bf16.msra.mxu1 %v897_v19 }
  0x1c   :  { %506 = vmatpush.bf16.msra.mxu2 %v1091_v20 }
  0x1e   :  { %409 = vmatpush.bf16.msra.mxu0 %v888_v21  ;;  %966 = vmatpush.bf16.msra.mxu3 %v888_v21  ;;  %v880_v21 = vld [vmem:[%s1318_s0 + $0x80] sm:$0xf0] }
  0x1f   :  { %458 = vmatpush.bf16.msra.mxu1 %v896_v22 }
  0x20   :  { %507 = vmatpush.bf16.msra.mxu2 %v1102_v23 }
  0x21   :  { %410 = vmatmul.bf16.vlgmr.msra.gmra.mxu0 %v675_v32  ;;  %440 = vmatmul.bf16.vlgmr.msra.gmra.mxu3 %v747_v33 }
  0x22   :  { %967 = vmatpush.bf16.msrb.mxu3 %v1010_v1  ;;  %459 = vmatmul.bf16.vlgmr.msra.gmra.mxu1 %v679_v34  ;;  %v712_v1 = vld [vmem:[%s1318_s0 + $0x54] sm:$0xf0] }
  0x23   :  { %508 = vmatmul.bf16.vlgmr.msra.gmra.mxu2 %v683_v35  ;;  %v715_v6 = vor.u32 %v873_v62, %v712_v1 }
  0x26   :  { %968 = vmatpush.bf16.msrb.mxu3 %v1025_v4  ;;  %v711_v4 = vor.u32 %v874_v61, %v710_v60 }
  0x2a   :  { %969 = vmatpush.bf16.msrb.mxu3 %v901_v7 }
  0x2e   :  { %970 = vmatpush.bf16.msrb.mxu3 %v900_v10  ;;  %v876_v10 = vld [vmem:[%s1318_s0 + $0x64] sm:$0xf] }
  0x31   :  { %415 = vmatmul.bf16.gmra.mxu0 %v687_v44  ;;  %445 = vmatmul.bf16.gmra.mxu3 %v759_v45 }
  0x32   :  { %971 = vmatpush.bf16.msrb.mxu3 %v899_v13  ;;  %464 = vmatmul.bf16.gmra.mxu1 %v691_v46  ;;  %v724_v13 = vld [vmem:[%s1318_s0 + $0x6c] sm:$0xf0] }
  0x33   :  { %513 = vmatmul.bf16.gmra.mxu2 %v695_v47  ;;  %v727_v18 = vor.u32 %v876_v10, %v724_v13 }
  0x36   :  { %972 = vmatpush.bf16.msrb.mxu3 %v898_v16 }
  0x3a   :  { %973 = vmatpush.bf16.msrb.mxu3 %v897_v19 }
  0x3e   :  { %974 = vmatpush.bf16.msrb.mxu3 %v896_v22  ;;  %v879_v22 = vld [vmem:[%s1318_s0 + $0x7c] sm:$0xf] }
  0x3f   :  { %v739_v30 = vor.u32 %v879_v22, %v736_v25 }
  0x41   :  { %420 = vmatmul.bf16.gmra.mxu0 %v699_v56  ;;  %489 = vmatmul.bf16.vlgmr.msrb.gmra.mxu3 %v751_v57 }
  0x42   :  { %975 = vmatpush.bf16.msra.mxu3 %v1015_v2  ;;  %469 = vmatmul.bf16.gmra.mxu1 %v703_v58  ;;  %v718_v2 = vld [vmem:[%s1318_s0 + $0x50] sm:$0xf] }
  0x43   :  { %518 = vmatmul.bf16.gmra.mxu2 %v707_v59  ;;  %v719_v7 = vor.u32 %v875_v3, %v718_v2 }
  0x46   :  { %976 = vmatpush.bf16.msra.mxu3 %v1030_v5  ;;  %v763_v5 = vor.u32 %v885_v63, %v760_v0 }
  0x4a   :  { %977 = vmatpush.bf16.msra.mxu3 %v1043_v8  ;;  %v722_v8 = vld [vmem:[%s1318_s0 + $0x60] sm:$0xf] }
  0x4b   :  { %v723_v16 = vor.u32 %v877_v9, %v722_v8 }
  0x4e   :  { %978 = vmatpush.bf16.msra.mxu3 %v1055_v11  ;;  %v754_v11 = vld [vmem:[%s1318_s0 + $0x98] sm:$0xf] }
  0x51   :  { %425 = vmatmul.bf16.gmra.mxu0 %v711_v4  ;;  %494 = vmatmul.bf16.gmra.mxu3 %v763_v5 }
  0x52   :  { %979 = vmatpush.bf16.msra.mxu3 %v1067_v14  ;;  %474 = vmatmul.bf16.gmra.mxu1 %v715_v6  ;;  %v730_v14 = vld [vmem:[%s1318_s0 + $0x68] sm:$0xf] }
  0x53   :  { %523 = vmatmul.bf16.gmra.mxu2 %v719_v7  ;;  %v731_v19 = vor.u32 %v878_v15, %v730_v14 }
  0x56   :  { %980 = vmatpush.bf16.msra.mxu3 %v1079_v17  ;;  %v755_v17 = vor.u32 %v884_v12, %v754_v11 }
  0x5a   :  { %981 = vmatpush.bf16.msra.mxu3 %v1091_v20  ;;  %v734_v20 = vld [vmem:[%s1318_s0 + $0x78] sm:$0xf] }
  0x5b   :  { %v735_v28 = vor.u32 %v880_v21, %v734_v20 }
  0x5e   :  { %982 = vmatpush.bf16.msra.mxu3 %v1102_v23  ;;  %v766_v23 = vld [vmem:[%s1318_s0 + $0xb0] sm:$0xf] }
  0x5f   :  { %v767_v29 = vor.u32 %v887_v24, %v766_v23 }
  0x61   :  { %430 = vmatmul.bf16.gmra.mxu0 %v723_v16  ;;  %538 = vmatmul.bf16.vlgmr.msra.gmra.mxu3 %v755_v17 }
  0x62   :  { %479 = vmatmul.bf16.gmra.mxu1 %v727_v18 }
  0x63   :  { %528 = vmatmul.bf16.gmra.mxu2 %v731_v19 }
  0x71   :  { %435 = vmatmul.bf16.gmra.mxu0 %v735_v28  ;;  %543 = vmatmul.bf16.gmra.mxu3 %v767_v29 }
  0x72   :  { %484 = vmatmul.bf16.gmra.mxu1 %v739_v30 }
  0x73   :  { %533 = vmatmul.bf16.gmra.mxu2 %v743_v31 }
  0x9e   :  { %v411_v32 = vpop.f32.mrf.mxu0 }
  0x9f   :  { %v460_v33 = vpop.f32.mrf.mxu1 }
  0xa0   :  { %v461_v36 = vadd.f32 %v460_v33, %v411_v32 }
  0xa4   :  { %v1260_v34 = vpop.f32.mrf.mxu3 }
  0xa6   :  { %v509_v35 = vpop.f32.mrf.mxu2  ;;  %v413_v37 = vpop.f32.mrf.mxu0 }
  0xa7   :  { %v462_v38 = vpop.f32.mrf.mxu1  ;;  %v510_v39 = vadd.f32 %v509_v35, %v461_v36 }
  0xa8   :  { %v463_v41 = vadd.f32 %v462_v38, %v413_v37 }
  0xa9   :  { %v604_v44 = vadd.f32 %v1265_v40, %v510_v39 }
  0xab   :  { %v620_v49 = vmax.f32 %v604_v44, 0.0 }
  0xac   :  { %v1267_v42 = vpop.f32.mrf.mxu3 }
  0xae   :  { %v511_v43 = vpop.f32.mrf.mxu2  ;;  %v416_v46 = vpop.f32.mrf.mxu0 }
  0xaf   :  { %v512_v45 = vadd.f32 %v511_v43, %v463_v41  ;;  %v465_v47 = vpop.f32.mrf.mxu1 }
  0xb0   :  { %v466_v54 = vadd.f32 %v465_v47, %v416_v46 }
  0xb1   :  { %v605_v48 = vadd.f32 %v1265_v40, %v512_v45 }
  0xb3   :  { %v621_v50 = vmax.f32 %v605_v48, 0.0 }
  0xb4   :  { %v1271_v52 = vpop.f32.mrf.mxu3 }
  0xb5   :  { %v915_v51 = vpack.c.bf16 %v621_v50, %v620_v49 }
  0xb6   :  { %v514_v53 = vpop.f32.mrf.mxu2  ;;  %v418_v55 = vpop.f32.mrf.mxu0 }
  0xb7   :  { %916 = vst [vmem:[%s1320_s3] sm:$0xff] %v915_v51   ;;  %v467_v56 = vpop.f32.mrf.mxu1  ;;  %v515_v57 = vadd.f32 %v514_v53, %v466_v54 }
  0xb8   :  { %v468_v58 = vadd.f32 %v467_v56, %v418_v55 }
  0xb9   :  { %v606_v61 = vadd.f32 %v1265_v40, %v515_v57 }
  0xbb   :  { %v622_v2 = vmax.f32 %v606_v61, 0.0 }
  0xbc   :  { %v1276_v59 = vpop.f32.mrf.mxu3 }
  0xbe   :  { %v516_v60 = vpop.f32.mrf.mxu2  ;;  %v421_v63 = vpop.f32.mrf.mxu0 }
  0xbf   :  { %v517_v62 = vadd.f32 %v516_v60, %v468_v58  ;;  %v470_v0 = vpop.f32.mrf.mxu1 }
  0xc0   :  { %v471_v7 = vadd.f32 %v470_v0, %v421_v63 }
  0xc1   :  { %v607_v1 = vadd.f32 %v1265_v40, %v517_v62 }
  0xc3   :  { %v623_v3 = vmax.f32 %v607_v1, 0.0 }
  0xc4   :  { %v490_v5 = vpop.f32.mrf.mxu3 }
  0xc5   :  { %v920_v4 = vpack.c.bf16 %v623_v3, %v622_v2  ;;  %v491_v46 = vadd.f32 %v490_v5, %v1260_v34 }
  0xc6   :  { %v519_v6 = vpop.f32.mrf.mxu2  ;;  %v423_v8 = vpop.f32.mrf.mxu0 }
  0xc7   :  { %952 = vst [vmem:[%s1320_s3 + $0x8] sm:$0xff] %v920_v4   ;;  %v472_v9 = vpop.f32.mrf.mxu1  ;;  %v520_v10 = vadd.f32 %v519_v6, %v471_v7 }
  0xc8   :  { %v473_v11 = vadd.f32 %v472_v9, %v423_v8 }
  0xc9   :  { %v608_v14 = vadd.f32 %v1265_v40, %v520_v10 }
  0xcb   :  { %v624_v19 = vmax.f32 %v608_v14, 0.0 }
  0xcc   :  { %v492_v12 = vpop.f32.mrf.mxu3 }
  0xcd   :  { %v493_v50 = vadd.f32 %v492_v12, %v1267_v42 }
  0xce   :  { %v521_v13 = vpop.f32.mrf.mxu2  ;;  %v426_v16 = vpop.f32.mrf.mxu0 }
  0xcf   :  { %v522_v15 = vadd.f32 %v521_v13, %v473_v11  ;;  %v475_v17 = vpop.f32.mrf.mxu1 }
  0xd0   :  { %v476_v24 = vadd.f32 %v475_v17, %v426_v16 }
  0xd1   :  { %v609_v18 = vadd.f32 %v1265_v40, %v522_v15 }
  0xd3   :  { %v625_v20 = vmax.f32 %v609_v18, 0.0 }
  0xd4   :  { %v495_v22 = vpop.f32.mrf.mxu3 }
  0xd5   :  { %v925_v21 = vpack.c.bf16 %v625_v20, %v624_v19  ;;  %v496_v7 = vadd.f32 %v495_v22, %v1271_v52 }
  0xd6   :  { %v524_v23 = vpop.f32.mrf.mxu2  ;;  %v428_v25 = vpop.f32.mrf.mxu0 }
  0xd7   :  { %953 = vst [vmem:[%s1320_s3 + $0x10] sm:$0xff] %v925_v21   ;;  %v477_v26 = vpop.f32.mrf.mxu1  ;;  %v525_v27 = vadd.f32 %v524_v23, %v476_v24 }
  0xd8   :  { %v478_v28 = vadd.f32 %v477_v26, %v428_v25 }
  0xd9   :  { %v610_v31 = vadd.f32 %v1265_v40, %v525_v27 }
  0xdb   :  { %v626_v37 = vmax.f32 %v610_v31, 0.0 }
  0xdc   :  { %v497_v29 = vpop.f32.mrf.mxu3 }
  0xdd   :  { %v498_v12 = vadd.f32 %v497_v29, %v1276_v59 }
  0xde   :  { %v526_v30 = vpop.f32.mrf.mxu2  ;;  %v431_v33 = vpop.f32.mrf.mxu0 }
  0xdf   :  { %v527_v32 = vadd.f32 %v526_v30, %v478_v28  ;;  %v480_v35 = vpop.f32.mrf.mxu1 }
  0xe0   :  { %v481_v44 = vadd.f32 %v480_v35, %v431_v33 }
  0xe1   :  { %v611_v36 = vadd.f32 %v1265_v40, %v527_v32 }
  0xe3   :  { %v627_v38 = vmax.f32 %v611_v36, 0.0 }
  0xe4   :  { %v539_v41 = vpop.f32.mrf.mxu3 }
  0xe5   :  { %v930_v39 = vpack.c.bf16 %v627_v38, %v626_v37  ;;  %v540_v48 = vadd.f32 %v539_v41, %v491_v46 }
  0xe6   :  { %v529_v43 = vpop.f32.mrf.mxu2  ;;  %v433_v45 = vpop.f32.mrf.mxu0 }
  0xe7   :  { %954 = vst [vmem:[%s1320_s3 + $0x18] sm:$0xff] %v930_v39   ;;  %v482_v47 = vpop.f32.mrf.mxu1  ;;  %v530_v49 = vadd.f32 %v529_v43, %v481_v44  ;;  %v616_v54 = vadd.f32 %v1265_v40, %v540_v48 }
  0xe8   :  { %v483_v51 = vadd.f32 %v482_v47, %v433_v45 }
  0xe9   :  { %v612_v57 = vadd.f32 %v1265_v40, %v530_v49  ;;  %v632_v63 = vmax.f32 %v616_v54, 0.0 }
  0xeb   :  { %v628_v1 = vmax.f32 %v612_v57, 0.0 }
  0xec   :  { %v541_v53 = vpop.f32.mrf.mxu3 }
  0xed   :  { %v542_v56 = vadd.f32 %v541_v53, %v493_v50 }
  0xee   :  { %v531_v55 = vpop.f32.mrf.mxu2  ;;  %v436_v61 = vpop.f32.mrf.mxu0 }
  0xef   :  { %v532_v58 = vadd.f32 %v531_v55, %v483_v51  ;;  %v617_v60 = vadd.f32 %v1265_v40, %v542_v56  ;;  %v485_v62 = vpop.f32.mrf.mxu1 }
  0xf0   :  { %v486_v6 = vadd.f32 %v485_v62, %v436_v61 }
  0xf1   :  { %v613_v34 = vadd.f32 %v1265_v40, %v532_v58  ;;  %v633_v0 = vmax.f32 %v617_v60, 0.0 }
  0xf3   :  { %v629_v2 = vmax.f32 %v613_v34, 0.0  ;;  %v945_v42 = vpack.c.bf16 %v633_v0, %v632_v63 }
  0xf4   :  { %v544_v4 = vpop.f32.mrf.mxu3 }
  0xf5   :  { %v935_v3 = vpack.c.bf16 %v629_v2, %v628_v1  ;;  %957 = vst [vmem:[%s1320_s3 + $0x30] sm:$0xff] %v945_v42   ;;  %v545_v8 = vadd.f32 %v544_v4, %v496_v7 }
  0xf6   :  { %v534_v5 = vpop.f32.mrf.mxu2  ;;  %v438_v9 = vpop.f32.mrf.mxu0 }
  0xf7   :  { %955 = vst [vmem:[%s1320_s3 + $0x20] sm:$0xff] %v935_v3   ;;  %v487_v10 = vpop.f32.mrf.mxu1  ;;  %v535_v11 = vadd.f32 %v534_v5, %v486_v6  ;;  %v618_v15 = vadd.f32 %v1265_v40, %v545_v8 }
  0xf8   :  { %v488_v13 = vadd.f32 %v487_v10, %v438_v9 }
  0xf9   :  { %v614_v18 = vadd.f32 %v1265_v40, %v535_v11  ;;  %v634_v52 = vmax.f32 %v618_v15, 0.0 }
  0xfb   :  { %v630_v23 = vmax.f32 %v614_v18, 0.0 }
  0xfc   :  { %v546_v14 = vpop.f32.mrf.mxu3 }
  0xfd   :  { %v547_v17 = vadd.f32 %v546_v14, %v498_v12 }
  0xfe   :  { %v536_v16 = vpop.f32.mrf.mxu2 }
  0xff   :  { %v537_v19 = vadd.f32 %v536_v16, %v488_v13  ;;  %v619_v20 = vadd.f32 %v1265_v40, %v547_v17 }
 0x101   :  { %v615_v21 = vadd.f32 %v1265_v40, %v537_v19  ;;  %v635_v22 = vmax.f32 %v619_v20, 0.0 }
 0x103   :  { %v631_v24 = vmax.f32 %v615_v21, 0.0  ;;  %v950_v25 = vpack.c.bf16 %v635_v22, %v634_v52 }
 0x105   :  { %v940_v26 = vpack.c.bf16 %v631_v24, %v630_v23  ;;  %958 = vst [vmem:[%s1320_s3 + $0x38] sm:$0xff] %v950_v25  }
 0x107   :  { %956 = vst [vmem:[%s1320_s3 + $0x28] sm:$0xff] %v940_v26  }

// kernel: vae_forward.12
= control target key start
LH: loop header
LB: loop body
LE: loop exit
PB: predicated region body
PF: predicated region fallthrough
CT: control target
= control target key end

     0   :  { %s1023_s1 = inlined_call_operand.vmem [shape: bf16[640,128], index: 1, kind: input, shape index: {}]   ;;  %s1024_s0 = inlined_call_operand.vmem [shape: bf16[32,640], index: 0, kind: input, shape index: {}]   ;;  %s1025_s2 = inlined_call_operand.vmem [shape: f32[1,128], index: 2, kind: input, shape index: {}]   ;;  %s1026_s3 = inlined_call_operand.vmem [shape: bf16[32,128], index: 3, kind: output, shape index: {}]  }
   0x1   :  { %v761_v0 = vld [vmem:[%s1023_s1 + $0x38] sm:$0xff]  ;;  %v760_v4 = vld [vmem:[%s1023_s1 + $0x30] sm:$0xff]  ;;  %v759_v8 = vld [vmem:[%s1023_s1 + $0x28] sm:$0xff] }
   0x2   :  { %v769_v1 = vld [vmem:[%s1023_s1 + $0x78] sm:$0xff]  ;;  %410 = vmatpush.bf16.msra.mxu0 %v761_v0  ;;  %v768_v5 = vld [vmem:[%s1023_s1 + $0x70] sm:$0xff]  ;;  %v767_v9 = vld [vmem:[%s1023_s1 + $0x68] sm:$0xff] }
   0x3   :  { %v777_v2 = vld [vmem:[%s1023_s1 + $0xb8] sm:$0xff]  ;;  %429 = vmatpush.bf16.msra.mxu1 %v769_v1  ;;  %v776_v6 = vld [vmem:[%s1023_s1 + $0xb0] sm:$0xff]  ;;  %v775_v10 = vld [vmem:[%s1023_s1 + $0xa8] sm:$0xff] }
   0x4   :  { %v785_v3 = vld [vmem:[%s1023_s1 + $0xf8] sm:$0xff]  ;;  %448 = vmatpush.bf16.msra.mxu2 %v777_v2  ;;  %v784_v7 = vld [vmem:[%s1023_s1 + $0xf0] sm:$0xff]  ;;  %v783_v11 = vld [vmem:[%s1023_s1 + $0xe8] sm:$0xff] }
   0x5   :  { %467 = vmatpush.bf16.msra.mxu3 %v785_v3  ;;  %v758_v12 = vld [vmem:[%s1023_s1 + $0x20] sm:$0xff]  ;;  %v757_v16 = vld [vmem:[%s1023_s1 + $0x18] sm:$0xff]  ;;  %v756_v20 = vld [vmem:[%s1023_s1 + $0x10] sm:$0xff] }
   0x6   :  { %411 = vmatpush.bf16.msra.mxu0 %v760_v4  ;;  %v766_v13 = vld [vmem:[%s1023_s1 + $0x60] sm:$0xff]  ;;  %v765_v17 = vld [vmem:[%s1023_s1 + $0x58] sm:$0xff]  ;;  %v764_v21 = vld [vmem:[%s1023_s1 + $0x50] sm:$0xff] }
   0x7   :  { %430 = vmatpush.bf16.msra.mxu1 %v768_v5  ;;  %v774_v14 = vld [vmem:[%s1023_s1 + $0xa0] sm:$0xff]  ;;  %v773_v18 = vld [vmem:[%s1023_s1 + $0x98] sm:$0xff]  ;;  %v772_v22 = vld [vmem:[%s1023_s1 + $0x90] sm:$0xff] }
   0x8   :  { %449 = vmatpush.bf16.msra.mxu2 %v776_v6  ;;  %v782_v15 = vld [vmem:[%s1023_s1 + $0xe0] sm:$0xff]  ;;  %v781_v19 = vld [vmem:[%s1023_s1 + $0xd8] sm:$0xff]  ;;  %v780_v23 = vld [vmem:[%s1023_s1 + $0xd0] sm:$0xff] }
   0x9   :  { %468 = vmatpush.bf16.msra.mxu3 %v784_v7  ;;  %v755_v24 = vld [vmem:[%s1023_s1 + $0x8] sm:$0xff]  ;;  %v754_v28 = vld [vmem:[%s1023_s1] sm:$0xff]  ;;  %v746_v33 = vld [vmem:[%s1024_s0 + $0x10] sm:$0xf0] }
   0xa   :  { %412 = vmatpush.bf16.msra.mxu0 %v759_v8  ;;  %v763_v25 = vld [vmem:[%s1023_s1 + $0x48] sm:$0xff]  ;;  %v762_v29 = vld [vmem:[%s1023_s1 + $0x40] sm:$0xff]  ;;  %v548_v35 = vld [vmem:[%s1024_s0 + $0x14] sm:$0xf0] }
   0xb   :  { %431 = vmatpush.bf16.msra.mxu1 %v767_v9  ;;  %v771_v26 = vld [vmem:[%s1023_s1 + $0x88] sm:$0xff]  ;;  %v770_v30 = vld [vmem:[%s1023_s1 + $0x80] sm:$0xff]  ;;  %v747_v37 = vld [vmem:[%s1024_s0 + $0x18] sm:$0xf0] }
   0xc   :  { %450 = vmatpush.bf16.msra.mxu2 %v775_v10  ;;  %v779_v27 = vld [vmem:[%s1023_s1 + $0xc8] sm:$0xff]  ;;  %v778_v31 = vld [vmem:[%s1023_s1 + $0xc0] sm:$0xff]  ;;  %v793_v40 = vld [vmem:[%s1023_s1 + $0x138] sm:$0xff] }
   0xd   :  { %469 = vmatpush.bf16.msra.mxu3 %v783_v11  ;;  %v546_v32 = vld [vmem:[%s1024_s0] sm:$0xf]  ;;  %v744_v34 = vld [vmem:[%s1024_s0 + $0x4] sm:$0xf]  ;;  %v554_v36 = vld [vmem:[%s1024_s0 + $0x8] sm:$0xf] }
   0xe   :  { %413 = vmatpush.bf16.msra.mxu0 %v758_v12  ;;  %v745_v38 = vld [vmem:[%s1024_s0 + $0xc] sm:$0xf]  ;;  %v556_v39 = vld [vmem:[%s1024_s0 + $0x1c] sm:$0xf0]  ;;  %v547_v41 = vor.u32 %v746_v33, %v546_v32  ;;  %v551_v42 = vor.u32 %v744_v34, %v548_v35  ;;  %v555_v43 = vor.u32 %v747_v37, %v554_v36  ;;  %v792_v45 = vld [vmem:[%s1023_s1 + $0x130] sm:$0xff] }
   0xf   :  { %432 = vmatpush.bf16.msra.mxu1 %v766_v13  ;;  %v559_v44 = vor.u32 %v745_v38, %v556_v39  ;;  %v791_v46 = vld [vmem:[%s1023_s1 + $0x128] sm:$0xff]  ;;  %v790_v47 = vld [vmem:[%s1023_s1 + $0x120] sm:$0xff]  ;;  %v751_v49 = vld [vmem:[%s1024_s0 + $0x38] sm:$0xf0] }
  0x10   :  { %451 = vmatpush.bf16.msra.mxu2 %v774_v14  ;;  %v566_v48 = vld [vmem:[%s1024_s0 + $0x28] sm:$0xf]  ;;  %v749_v50 = vld [vmem:[%s1024_s0 + $0x2c] sm:$0xf]  ;;  %v568_v51 = vld [vmem:[%s1024_s0 + $0x3c] sm:$0xf0] }
  0x11   :  { %470 = vmatpush.bf16.msra.mxu3 %v782_v15  ;;  %v574_v52 = vld [vmem:[%s1024_s0 + $0x30] sm:$0xf]  ;;  %v752_v53 = vld [vmem:[%s1024_s0 + $0x40] sm:$0xf0]  ;;  %v750_v54 = vld [vmem:[%s1024_s0 + $0x34] sm:$0xf]  ;;  %v567_v57 = vor.u32 %v751_v49, %v566_v48  ;;  %v571_v58 = vor.u32 %v749_v50, %v568_v51 }
  0x12   :  { %414 = vmatpush.bf16.msra.mxu0 %v757_v16  ;;  %v576_v55 = vld [vmem:[%s1024_s0 + $0x44] sm:$0xf0]  ;;  %v789_v56 = vld [vmem:[%s1023_s1 + $0x118] sm:$0xff]  ;;  %v575_v59 = vor.u32 %v752_v53, %v574_v52  ;;  %v788_v61 = vld [vmem:[%s1023_s1 + $0x110] sm:$0xff] }
  0x13   :  { %433 = vmatpush.bf16.msra.mxu1 %v765_v17  ;;  %v579_v60 = vor.u32 %v750_v54, %v576_v55  ;;  %v787_v62 = vld [vmem:[%s1023_s1 + $0x108] sm:$0xff]  ;;  %v786_v63 = vld [vmem:[%s1023_s1 + $0x100] sm:$0xff]  ;;  %v562_v0 = vld [vmem:[%s1024_s0 + $0x10] sm:$0xf] }
  0x14   :  { %452 = vmatpush.bf16.msra.mxu2 %v773_v18  ;;  %v748_v1 = vld [vmem:[%s1024_s0 + $0x20] sm:$0xf0]  ;;  %v582_v2 = vld [vmem:[%s1024_s0 + $0x38] sm:$0xf]  ;;  %v753_v3 = vld [vmem:[%s1024_s0 + $0x48] sm:$0xf0] }
  0x15   :  { %471 = vmatpush.bf16.msra.mxu3 %v781_v19  ;;  %v563_v4 = vor.u32 %v748_v1, %v562_v0  ;;  %v583_v5 = vor.u32 %v753_v3, %v582_v2  ;;  %v813_v34 = vld [vmem:[%s1025_s2] ss:$0 sm:$0xff] }
  0x16   :  { %415 = vmatpush.bf16.msra.mxu0 %v756_v20 }
  0x17   :  { %434 = vmatpush.bf16.msra.mxu1 %v764_v21 }
  0x18   :  { %453 = vmatpush.bf16.msra.mxu2 %v772_v22 }
  0x19   :  { %472 = vmatpush.bf16.msra.mxu3 %v780_v23 }
  0x1a   :  { %416 = vmatpush.bf16.msra.mxu0 %v755_v24 }
  0x1b   :  { %435 = vmatpush.bf16.msra.mxu1 %v763_v25 }
  0x1c   :  { %454 = vmatpush.bf16.msra.mxu2 %v771_v26 }
  0x1d   :  { %473 = vmatpush.bf16.msra.mxu3 %v779_v27 }
  0x1e   :  { %417 = vmatpush.bf16.msra.mxu0 %v754_v28 }
  0x1f   :  { %436 = vmatpush.bf16.msra.mxu1 %v762_v29 }
  0x20   :  { %455 = vmatpush.bf16.msra.mxu2 %v770_v30 }
  0x21   :  { %474 = vmatpush.bf16.msra.mxu3 %v778_v31  ;;  %418 = vmatmul.bf16.vlgmr.msra.gmra.mxu0 %v547_v41 }
  0x22   :  { %486 = vmatpush.bf16.msrb.mxu0 %v793_v40  ;;  %437 = vmatmul.bf16.vlgmr.msra.gmra.mxu1 %v551_v42 }
  0x23   :  { %805 = vmatpush.bf16.msrb.mxu1 %v793_v40  ;;  %456 = vmatmul.bf16.vlgmr.msra.gmra.mxu2 %v555_v43 }
  0x24   :  { %475 = vmatmul.bf16.vlgmr.msra.gmra.mxu3 %v559_v44 }
  0x26   :  { %487 = vmatpush.bf16.msrb.mxu0 %v792_v45 }
  0x27   :  { %806 = vmatpush.bf16.msrb.mxu1 %v792_v45 }
  0x2a   :  { %488 = vmatpush.bf16.msrb.mxu0 %v791_v46 }
  0x2b   :  { %807 = vmatpush.bf16.msrb.mxu1 %v791_v46 }
  0x2e   :  { %489 = vmatpush.bf16.msrb.mxu0 %v790_v47 }
  0x2f   :  { %808 = vmatpush.bf16.msrb.mxu1 %v790_v47 }
  0x31   :  { %423 = vmatmul.bf16.gmra.mxu0 %v567_v57 }
  0x32   :  { %490 = vmatpush.bf16.msrb.mxu0 %v789_v56  ;;  %442 = vmatmul.bf16.gmra.mxu1 %v571_v58 }
  0x33   :  { %809 = vmatpush.bf16.msrb.mxu1 %v789_v56  ;;  %461 = vmatmul.bf16.gmra.mxu2 %v575_v59 }
  0x34   :  { %480 = vmatmul.bf16.gmra.mxu3 %v579_v60 }
  0x36   :  { %491 = vmatpush.bf16.msrb.mxu0 %v788_v61 }
  0x37   :  { %810 = vmatpush.bf16.msrb.mxu1 %v788_v61 }
  0x3a   :  { %492 = vmatpush.bf16.msrb.mxu0 %v787_v62 }
  0x3b   :  { %811 = vmatpush.bf16.msrb.mxu1 %v787_v62 }
  0x3e   :  { %493 = vmatpush.bf16.msrb.mxu0 %v786_v63 }
  0x3f   :  { %812 = vmatpush.bf16.msrb.mxu1 %v786_v63 }
  0x41   :  { %494 = vmatmul.bf16.vlgmr.msrb.gmra.mxu0 %v563_v4 }
  0x42   :  { %499 = vmatmul.bf16.vlgmr.msrb.gmra.mxu1 %v583_v5 }
  0x9e   :  { %v419_v6 = vpop.f32.mrf.mxu0 }
  0x9f   :  { %v438_v7 = vpop.f32.mrf.mxu1 }
  0xa0   :  { %v439_v20 = vadd.f32 %v438_v7, %v419_v6 }
  0xa6   :  { %v457_v8 = vpop.f32.mrf.mxu2  ;;  %v421_v10 = vpop.f32.mrf.mxu0 }
  0xa7   :  { %v476_v9 = vpop.f32.mrf.mxu3  ;;  %v440_v11 = vpop.f32.mrf.mxu1  ;;  %v458_v22 = vadd.f32 %v457_v8, %v439_v20 }
  0xa8   :  { %v441_v27 = vadd.f32 %v440_v11, %v421_v10 }
  0xa9   :  { %v477_v29 = vadd.f32 %v476_v9, %v458_v22 }
  0xae   :  { %v459_v12 = vpop.f32.mrf.mxu2  ;;  %v424_v13 = vpop.f32.mrf.mxu0 }
  0xaf   :  { %v443_v14 = vpop.f32.mrf.mxu1  ;;  %v478_v15 = vpop.f32.mrf.mxu3  ;;  %v460_v30 = vadd.f32 %v459_v12, %v441_v27 }
  0xb0   :  { %v444_v21 = vadd.f32 %v443_v14, %v424_v13 }
  0xb1   :  { %v479_v37 = vadd.f32 %v478_v15, %v460_v30 }
  0xb6   :  { %v462_v16 = vpop.f32.mrf.mxu2  ;;  %v426_v17 = vpop.f32.mrf.mxu0 }
  0xb7   :  { %v445_v18 = vpop.f32.mrf.mxu1  ;;  %v481_v19 = vpop.f32.mrf.mxu3  ;;  %v463_v23 = vadd.f32 %v462_v16, %v444_v21 }
  0xb8   :  { %v446_v28 = vadd.f32 %v445_v18, %v426_v17 }
  0xb9   :  { %v482_v31 = vadd.f32 %v481_v19, %v463_v23 }
  0xbe   :  { %v464_v24 = vpop.f32.mrf.mxu2  ;;  %v495_v25 = vpop.f32.mrf.mxu0 }
  0xbf   :  { %v500_v26 = vpop.f32.mrf.mxu1  ;;  %v465_v32 = vadd.f32 %v464_v24, %v446_v28  ;;  %v496_v33 = vadd.f32 %v495_v25, %v477_v29  ;;  %v483_v36 = vpop.f32.mrf.mxu3 }
  0xc0   :  { %v501_v35 = vadd.f32 %v500_v26, %v482_v31 }
  0xc1   :  { %v484_v38 = vadd.f32 %v483_v36, %v465_v32  ;;  %v524_v41 = vadd.f32 %v813_v34, %v496_v33 }
  0xc2   :  { %v526_v42 = vadd.f32 %v813_v34, %v501_v35 }
  0xc3   :  { %v528_v47 = vmax.f32 %v524_v41, 0.0 }
  0xc4   :  { %v530_v48 = vmax.f32 %v526_v42, 0.0 }
  0xc6   :  { %v497_v39 = vpop.f32.mrf.mxu0 }
  0xc7   :  { %v502_v40 = vpop.f32.mrf.mxu1  ;;  %v498_v43 = vadd.f32 %v497_v39, %v479_v37 }
  0xc8   :  { %v503_v44 = vadd.f32 %v502_v40, %v484_v38 }
  0xc9   :  { %v525_v45 = vadd.f32 %v813_v34, %v498_v43 }
  0xca   :  { %v527_v46 = vadd.f32 %v813_v34, %v503_v44 }
  0xcb   :  { %v529_v49 = vmax.f32 %v525_v45, 0.0 }
  0xcc   :  { %v531_v50 = vmax.f32 %v527_v46, 0.0 }
  0xcd   :  { %v797_v51 = vpack.c.bf16 %v529_v49, %v528_v47 }
  0xce   :  { %v802_v52 = vpack.c.bf16 %v531_v50, %v530_v48 }
  0xcf   :  { %798 = vst [vmem:[%s1026_s3] sm:$0xff] %v797_v51  }
  0xd0   :  { %804 = vst [vmem:[%s1026_s3 + $0x8] sm:$0xff] %v802_v52  }

// kernel: vae_forward.14
= control target key start
LH: loop header
LB: loop body
LE: loop exit
PB: predicated region body
PF: predicated region fallthrough
CT: control target
= control target key end

     0   :  { %s1345_s1 = inlined_call_operand.vmem [shape: bf16[1024,128], index: 1, kind: input, shape index: {}]   ;;  %s1346_s0 = inlined_call_operand.vmem [shape: bf16[16,1024], index: 0, kind: input, shape index: {}]   ;;  %s1347_s2 = inlined_call_operand.vmem [shape: f32[1,128], index: 2, kind: input, shape index: {}]   ;;  %s1348_s3 = inlined_call_operand.vmem [shape: f32[16,128], index: 3, kind: output, shape index: {}]  }
   0x1   :  { %v1018_v0 = vld [vmem:[%s1345_s1 + $0x38] sm:$0xff]  ;;  %v1017_v4 = vld [vmem:[%s1345_s1 + $0x30] sm:$0xff]  ;;  %v1016_v8 = vld [vmem:[%s1345_s1 + $0x28] sm:$0xff] }
   0x2   :  { %v1026_v1 = vld [vmem:[%s1345_s1 + $0x78] sm:$0xff]  ;;  %582 = vmatpush.bf16.msra.mxu0 %v1018_v0  ;;  %v1025_v5 = vld [vmem:[%s1345_s1 + $0x70] sm:$0xff]  ;;  %v1024_v9 = vld [vmem:[%s1345_s1 + $0x68] sm:$0xff] }
   0x3   :  { %v1034_v2 = vld [vmem:[%s1345_s1 + $0xb8] sm:$0xff]  ;;  %596 = vmatpush.bf16.msra.mxu1 %v1026_v1  ;;  %v1033_v6 = vld [vmem:[%s1345_s1 + $0xb0] sm:$0xff]  ;;  %v1032_v10 = vld [vmem:[%s1345_s1 + $0xa8] sm:$0xff] }
   0x4   :  { %v1042_v3 = vld [vmem:[%s1345_s1 + $0xf8] sm:$0xff]  ;;  %610 = vmatpush.bf16.msra.mxu2 %v1034_v2  ;;  %v1041_v7 = vld [vmem:[%s1345_s1 + $0xf0] sm:$0xff]  ;;  %v1040_v11 = vld [vmem:[%s1345_s1 + $0xe8] sm:$0xff] }
   0x5   :  { %624 = vmatpush.bf16.msra.mxu3 %v1042_v3  ;;  %v1015_v12 = vld [vmem:[%s1345_s1 + $0x20] sm:$0xff]  ;;  %v1014_v16 = vld [vmem:[%s1345_s1 + $0x18] sm:$0xff]  ;;  %v1013_v20 = vld [vmem:[%s1345_s1 + $0x10] sm:$0xff] }
   0x6   :  { %583 = vmatpush.bf16.msra.mxu0 %v1017_v4  ;;  %v1023_v13 = vld [vmem:[%s1345_s1 + $0x60] sm:$0xff]  ;;  %v1022_v17 = vld [vmem:[%s1345_s1 + $0x58] sm:$0xff]  ;;  %v1021_v21 = vld [vmem:[%s1345_s1 + $0x50] sm:$0xff] }
   0x7   :  { %597 = vmatpush.bf16.msra.mxu1 %v1025_v5  ;;  %v1031_v14 = vld [vmem:[%s1345_s1 + $0xa0] sm:$0xff]  ;;  %v1030_v18 = vld [vmem:[%s1345_s1 + $0x98] sm:$0xff]  ;;  %v1029_v22 = vld [vmem:[%s1345_s1 + $0x90] sm:$0xff] }
   0x8   :  { %611 = vmatpush.bf16.msra.mxu2 %v1033_v6  ;;  %v1039_v15 = vld [vmem:[%s1345_s1 + $0xe0] sm:$0xff]  ;;  %v1038_v19 = vld [vmem:[%s1345_s1 + $0xd8] sm:$0xff]  ;;  %v1037_v23 = vld [vmem:[%s1345_s1 + $0xd0] sm:$0xff] }
   0x9   :  { %625 = vmatpush.bf16.msra.mxu3 %v1041_v7  ;;  %v1012_v24 = vld [vmem:[%s1345_s1 + $0x8] sm:$0xff]  ;;  %v1011_v28 = vld [vmem:[%s1345_s1] sm:$0xff]  ;;  %v1050_v32 = vld [vmem:[%s1345_s1 + $0x138] sm:$0xff] }
   0xa   :  { %584 = vmatpush.bf16.msra.mxu0 %v1016_v8  ;;  %v1020_v25 = vld [vmem:[%s1345_s1 + $0x48] sm:$0xff]  ;;  %v1019_v29 = vld [vmem:[%s1345_s1 + $0x40] sm:$0xff]  ;;  %v1058_v33 = vld [vmem:[%s1345_s1 + $0x178] sm:$0xff] }
   0xb   :  { %598 = vmatpush.bf16.msra.mxu1 %v1024_v9  ;;  %v1028_v26 = vld [vmem:[%s1345_s1 + $0x88] sm:$0xff]  ;;  %v1027_v30 = vld [vmem:[%s1345_s1 + $0x80] sm:$0xff]  ;;  %v1066_v42 = vld [vmem:[%s1345_s1 + $0x1b8] sm:$0xff] }
   0xc   :  { %612 = vmatpush.bf16.msra.mxu2 %v1032_v10  ;;  %v1036_v27 = vld [vmem:[%s1345_s1 + $0xc8] sm:$0xff]  ;;  %v1035_v31 = vld [vmem:[%s1345_s1 + $0xc0] sm:$0xff]  ;;  %v1074_v43 = vld [vmem:[%s1345_s1 + $0x1f8] sm:$0xff] }
   0xd   :  { %626 = vmatpush.bf16.msra.mxu3 %v1040_v11  ;;  %v725_v34 = vld [vmem:[%s1346_s0 + $0x8] sm:$0xf]  ;;  %v1004_v36 = vld [vmem:[%s1346_s0 + $0xc] sm:$0xf]  ;;  %v717_v38 = vld [vmem:[%s1346_s0] sm:$0xf] }
   0xe   :  { %585 = vmatpush.bf16.msra.mxu0 %v1015_v12  ;;  %v1008_v35 = vld [vmem:[%s1346_s0 + $0x24] sm:$0xf0]  ;;  %v727_v37 = vld [vmem:[%s1346_s0 + $0x28] sm:$0xf0]  ;;  %v1007_v39 = vld [vmem:[%s1346_s0 + $0x1c] sm:$0xf0] }
   0xf   :  { %599 = vmatpush.bf16.msra.mxu1 %v1023_v13  ;;  %v1003_v40 = vld [vmem:[%s1346_s0 + $0x4] sm:$0xf]  ;;  %v726_v44 = vor.u32 %v1008_v35, %v725_v34  ;;  %v730_v45 = vor.u32 %v1004_v36, %v727_v37  ;;  %v718_v46 = vor.u32 %v1007_v39, %v717_v38  ;;  %v1049_v48 = vld [vmem:[%s1345_s1 + $0x130] sm:$0xff]  ;;  %v1048_v52 = vld [vmem:[%s1345_s1 + $0x128] sm:$0xff] }
  0x10   :  { %613 = vmatpush.bf16.msra.mxu2 %v1031_v14  ;;  %v719_v41 = vld [vmem:[%s1346_s0 + $0x20] sm:$0xf0]  ;;  %v1057_v49 = vld [vmem:[%s1345_s1 + $0x170] sm:$0xff]  ;;  %v1056_v53 = vld [vmem:[%s1345_s1 + $0x168] sm:$0xff] }
  0x11   :  { %627 = vmatpush.bf16.msra.mxu3 %v1039_v15  ;;  %v722_v47 = vor.u32 %v1003_v40, %v719_v41  ;;  %v1065_v50 = vld [vmem:[%s1345_s1 + $0x1b0] sm:$0xff]  ;;  %v1064_v54 = vld [vmem:[%s1345_s1 + $0x1a8] sm:$0xff]  ;;  %v1047_v56 = vld [vmem:[%s1345_s1 + $0x120] sm:$0xff] }
  0x12   :  { %586 = vmatpush.bf16.msra.mxu0 %v1014_v16  ;;  %v1073_v51 = vld [vmem:[%s1345_s1 + $0x1f0] sm:$0xff]  ;;  %v1072_v55 = vld [vmem:[%s1345_s1 + $0x1e8] sm:$0xff]  ;;  %v1055_v57 = vld [vmem:[%s1345_s1 + $0x160] sm:$0xff] }
  0x13   :  { %600 = vmatpush.bf16.msra.mxu1 %v1022_v17  ;;  %v1063_v58 = vld [vmem:[%s1345_s1 + $0x1a0] sm:$0xff]  ;;  %v1046_v60 = vld [vmem:[%s1345_s1 + $0x118] sm:$0xff]  ;;  %v1045_v0 = vld [vmem:[%s1345_s1 + $0x110] sm:$0xff] }
  0x14   :  { %614 = vmatpush.bf16.msra.mxu2 %v1030_v18  ;;  %v1071_v59 = vld [vmem:[%s1345_s1 + $0x1e0] sm:$0xff]  ;;  %v1054_v61 = vld [vmem:[%s1345_s1 + $0x158] sm:$0xff]  ;;  %v1053_v1 = vld [vmem:[%s1345_s1 + $0x150] sm:$0xff] }
  0x15   :  { %628 = vmatpush.bf16.msra.mxu3 %v1038_v19  ;;  %v1062_v62 = vld [vmem:[%s1345_s1 + $0x198] sm:$0xff]  ;;  %v1061_v2 = vld [vmem:[%s1345_s1 + $0x190] sm:$0xff]  ;;  %v1044_v4 = vld [vmem:[%s1345_s1 + $0x108] sm:$0xff] }
  0x16   :  { %587 = vmatpush.bf16.msra.mxu0 %v1013_v20  ;;  %v1070_v63 = vld [vmem:[%s1345_s1 + $0x1d8] sm:$0xff]  ;;  %v1069_v3 = vld [vmem:[%s1345_s1 + $0x1d0] sm:$0xff]  ;;  %v1052_v5 = vld [vmem:[%s1345_s1 + $0x148] sm:$0xff] }
  0x17   :  { %601 = vmatpush.bf16.msra.mxu1 %v1021_v21  ;;  %v1060_v6 = vld [vmem:[%s1345_s1 + $0x188] sm:$0xff]  ;;  %v1043_v8 = vld [vmem:[%s1345_s1 + $0x100] sm:$0xff]  ;;  %v733_v12 = vld [vmem:[%s1346_s0 + $0x10] sm:$0xf] }
  0x18   :  { %615 = vmatpush.bf16.msra.mxu2 %v1029_v22  ;;  %v1068_v7 = vld [vmem:[%s1345_s1 + $0x1c8] sm:$0xff]  ;;  %v1051_v9 = vld [vmem:[%s1345_s1 + $0x140] sm:$0xff]  ;;  %v1009_v13 = vld [vmem:[%s1346_s0 + $0x2c] sm:$0xf0] }
  0x19   :  { %629 = vmatpush.bf16.msra.mxu3 %v1037_v23  ;;  %v1059_v10 = vld [vmem:[%s1345_s1 + $0x180] sm:$0xff]  ;;  %v1005_v14 = vld [vmem:[%s1346_s0 + $0x14] sm:$0xf]  ;;  %v741_v16 = vld [vmem:[%s1346_s0 + $0x18] sm:$0xf]  ;;  %v734_v20 = vor.u32 %v1009_v13, %v733_v12 }
  0x1a   :  { %588 = vmatpush.bf16.msra.mxu0 %v1012_v24  ;;  %v1067_v11 = vld [vmem:[%s1345_s1 + $0x1c0] sm:$0xff]  ;;  %v735_v15 = vld [vmem:[%s1346_s0 + $0x30] sm:$0xf0]  ;;  %v1010_v17 = vld [vmem:[%s1346_s0 + $0x34] sm:$0xf0] }
  0x1b   :  { %602 = vmatpush.bf16.msra.mxu1 %v1020_v25  ;;  %v1006_v18 = vld [vmem:[%s1346_s0 + $0x1c] sm:$0xf]  ;;  %v738_v21 = vor.u32 %v1005_v14, %v735_v15  ;;  %v742_v22 = vor.u32 %v1010_v17, %v741_v16 }
  0x1c   :  { %616 = vmatpush.bf16.msra.mxu2 %v1028_v26  ;;  %v743_v19 = vld [vmem:[%s1346_s0 + $0x38] sm:$0xf0] }
  0x1d   :  { %630 = vmatpush.bf16.msra.mxu3 %v1036_v27  ;;  %v746_v23 = vor.u32 %v1006_v18, %v743_v19 }
  0x1e   :  { %589 = vmatpush.bf16.msra.mxu0 %v1011_v28 }
  0x1f   :  { %603 = vmatpush.bf16.msra.mxu1 %v1019_v29 }
  0x20   :  { %617 = vmatpush.bf16.msra.mxu2 %v1027_v30 }
  0x21   :  { %631 = vmatpush.bf16.msra.mxu3 %v1035_v31  ;;  %590 = vmatmul.bf16.vlgmr.msra.gmra.mxu0 %v718_v46 }
  0x22   :  { %638 = vmatpush.bf16.msrb.mxu0 %v1050_v32  ;;  %604 = vmatmul.bf16.vlgmr.msra.gmra.mxu1 %v722_v47 }
  0x23   :  { %652 = vmatpush.bf16.msrb.mxu1 %v1058_v33  ;;  %618 = vmatmul.bf16.vlgmr.msra.gmra.mxu2 %v726_v44 }
  0x24   :  { %666 = vmatpush.bf16.msrb.mxu2 %v1066_v42  ;;  %632 = vmatmul.bf16.vlgmr.msra.gmra.mxu3 %v730_v45  ;;  %v1075_v45 = vld [vmem:[%s1347_s2] ss:$0 sm:$0xff] }
  0x25   :  { %680 = vmatpush.bf16.msrb.mxu3 %v1074_v43 }
  0x26   :  { %639 = vmatpush.bf16.msrb.mxu0 %v1049_v48 }
  0x27   :  { %653 = vmatpush.bf16.msrb.mxu1 %v1057_v49 }
  0x28   :  { %667 = vmatpush.bf16.msrb.mxu2 %v1065_v50 }
  0x29   :  { %681 = vmatpush.bf16.msrb.mxu3 %v1073_v51 }
  0x2a   :  { %640 = vmatpush.bf16.msrb.mxu0 %v1048_v52 }
  0x2b   :  { %654 = vmatpush.bf16.msrb.mxu1 %v1056_v53 }
  0x2c   :  { %668 = vmatpush.bf16.msrb.mxu2 %v1064_v54 }
  0x2d   :  { %682 = vmatpush.bf16.msrb.mxu3 %v1072_v55 }
  0x2e   :  { %641 = vmatpush.bf16.msrb.mxu0 %v1047_v56 }
  0x2f   :  { %655 = vmatpush.bf16.msrb.mxu1 %v1055_v57 }
  0x30   :  { %669 = vmatpush.bf16.msrb.mxu2 %v1063_v58 }
  0x31   :  { %683 = vmatpush.bf16.msrb.mxu3 %v1071_v59 }
  0x32   :  { %642 = vmatpush.bf16.msrb.mxu0 %v1046_v60 }
  0x33   :  { %656 = vmatpush.bf16.msrb.mxu1 %v1054_v61 }
  0x34   :  { %670 = vmatpush.bf16.msrb.mxu2 %v1062_v62 }
  0x35   :  { %684 = vmatpush.bf16.msrb.mxu3 %v1070_v63 }
  0x36   :  { %643 = vmatpush.bf16.msrb.mxu0 %v1045_v0 }
  0x37   :  { %657 = vmatpush.bf16.msrb.mxu1 %v1053_v1 }
  0x38   :  { %671 = vmatpush.bf16.msrb.mxu2 %v1061_v2 }
  0x39   :  { %685 = vmatpush.bf16.msrb.mxu3 %v1069_v3 }
  0x3a   :  { %644 = vmatpush.bf16.msrb.mxu0 %v1044_v4 }
  0x3b   :  { %658 = vmatpush.bf16.msrb.mxu1 %v1052_v5 }
  0x3c   :  { %672 = vmatpush.bf16.msrb.mxu2 %v1060_v6 }
  0x3d   :  { %686 = vmatpush.bf16.msrb.mxu3 %v1068_v7 }
  0x3e   :  { %645 = vmatpush.bf16.msrb.mxu0 %v1043_v8 }
  0x3f   :  { %659 = vmatpush.bf16.msrb.mxu1 %v1051_v9 }
  0x40   :  { %673 = vmatpush.bf16.msrb.mxu2 %v1059_v10 }
  0x41   :  { %687 = vmatpush.bf16.msrb.mxu3 %v1067_v11  ;;  %646 = vmatmul.bf16.vlgmr.msrb.gmra.mxu0 %v734_v20 }
  0x42   :  { %660 = vmatmul.bf16.vlgmr.msrb.gmra.mxu1 %v738_v21 }
  0x43   :  { %674 = vmatmul.bf16.vlgmr.msrb.gmra.mxu2 %v742_v22 }
  0x44   :  { %688 = vmatmul.bf16.vlgmr.msrb.gmra.mxu3 %v746_v23 }
  0x9e   :  { %v591_v24 = vpop.f32.mrf.mxu0 }
  0x9f   :  { %v605_v25 = vpop.f32.mrf.mxu1 }
  0xa0   :  { %v606_v28 = vadd.f32 %v605_v25, %v591_v24 }
  0xa6   :  { %v619_v26 = vpop.f32.mrf.mxu2  ;;  %v593_v29 = vpop.f32.mrf.mxu0 }
  0xa7   :  { %v633_v27 = vpop.f32.mrf.mxu3  ;;  %v607_v30 = vpop.f32.mrf.mxu1  ;;  %v620_v31 = vadd.f32 %v619_v26, %v606_v28 }
  0xa8   :  { %v608_v35 = vadd.f32 %v607_v30, %v593_v29 }
  0xa9   :  { %v634_v34 = vadd.f32 %v633_v27, %v620_v31 }
  0xae   :  { %v621_v32 = vpop.f32.mrf.mxu2 }
  0xaf   :  { %v635_v33 = vpop.f32.mrf.mxu3  ;;  %v622_v39 = vadd.f32 %v621_v32, %v608_v35 }
  0xb1   :  { %v636_v43 = vadd.f32 %v635_v33, %v622_v39 }
  0xbe   :  { %v647_v36 = vpop.f32.mrf.mxu0 }
  0xbf   :  { %v648_v37 = vadd.f32 %v647_v36, %v634_v34  ;;  %v661_v38 = vpop.f32.mrf.mxu1 }
  0xc1   :  { %v662_v40 = vadd.f32 %v661_v38, %v648_v37 }
  0xc6   :  { %v675_v41 = vpop.f32.mrf.mxu2  ;;  %v649_v46 = vpop.f32.mrf.mxu0 }
  0xc7   :  { %v689_v42 = vpop.f32.mrf.mxu3  ;;  %v676_v44 = vadd.f32 %v675_v41, %v662_v40  ;;  %v650_v48 = vadd.f32 %v649_v46, %v636_v43  ;;  %v663_v50 = vpop.f32.mrf.mxu1 }
  0xc9   :  { %v690_v47 = vadd.f32 %v689_v42, %v676_v44  ;;  %v664_v51 = vadd.f32 %v663_v50, %v650_v48 }
  0xcb   :  { %v707_v49 = vadd.f32 %v1075_v45, %v690_v47 }
  0xcd   :  { %709 = vst [vmem:[%s1348_s3] sm:$0xff] %v707_v49 }
  0xce   :  { %v677_v52 = vpop.f32.mrf.mxu2 }
  0xcf   :  { %v678_v53 = vadd.f32 %v677_v52, %v664_v51  ;;  %v691_v54 = vpop.f32.mrf.mxu3 }
  0xd1   :  { %v692_v55 = vadd.f32 %v691_v54, %v678_v53 }
  0xd3   :  { %v708_v56 = vadd.f32 %v1075_v45, %v692_v55 }
  0xd5   :  { %710 = vst [vmem:[%s1348_s3 + $0x8] sm:$0xff] %v708_v56 }

// kernel: vae_forward.15
= control target key start
LH: loop header
LB: loop body
LE: loop exit
PB: predicated region body
PF: predicated region fallthrough
CT: control target
= control target key end

     0   :  { %s1428_s1 = inlined_call_operand.vmem [shape: bf16[128,1024], index: 1, kind: input, shape index: {}]   ;;  %s1429_s0 = inlined_call_operand.vmem [shape: bf16[16,128], index: 0, kind: input, shape index: {}]   ;;  %s1430_s2 = inlined_call_operand.vmem [shape: f32[1,1024], index: 2, kind: input, shape index: {}]   ;;  %s1431_s3 = inlined_call_operand.vmem [shape: bf16[16,1024], index: 3, kind: output, shape index: {}]  }
   0x1   :  { %v889_v0 = vld [vmem:[%s1428_s1 + $0x1c0] sm:$0xf]  ;;  %v976_v2 = vld [vmem:[%s1428_s1 + $0x1c4] sm:$0xf]  ;;  %v897_v5 = vld [vmem:[%s1428_s1 + $0x1c8] sm:$0xf] }
   0x2   :  { %v980_v1 = vld [vmem:[%s1428_s1 + $0x1dc] sm:$0xf0]  ;;  %v891_v4 = vld [vmem:[%s1428_s1 + $0x1e0] sm:$0xf0]  ;;  %v981_v6 = vld [vmem:[%s1428_s1 + $0x1e4] sm:$0xf0] }
   0x3   :  { %v890_v3 = vor.u32 %v980_v1, %v889_v0  ;;  %v894_v7 = vor.u32 %v976_v2, %v891_v4  ;;  %v898_v8 = vor.u32 %v981_v6, %v897_v5  ;;  %v977_v9 = vld [vmem:[%s1428_s1 + $0x1cc] sm:$0xf]  ;;  %v857_v11 = vld [vmem:[%s1428_s1 + $0x180] sm:$0xf]  ;;  %v968_v14 = vld [vmem:[%s1428_s1 + $0x184] sm:$0xf] }
   0x4   :  { %v899_v10 = vld [vmem:[%s1428_s1 + $0x1e8] sm:$0xf0]  ;;  %v972_v13 = vld [vmem:[%s1428_s1 + $0x19c] sm:$0xf0]  ;;  %v859_v15 = vld [vmem:[%s1428_s1 + $0x1a0] sm:$0xf0] }
   0x5   :  { %442 = vmatpush.bf16.msra.mxu0 %v890_v3  ;;  %v902_v12 = vor.u32 %v977_v9, %v899_v10  ;;  %456 = vmatpush.bf16.msra.mxu1 %v894_v7  ;;  %v858_v16 = vor.u32 %v972_v13, %v857_v11  ;;  %v862_v17 = vor.u32 %v968_v14, %v859_v15  ;;  %v865_v18 = vld [vmem:[%s1428_s1 + $0x188] sm:$0xf]  ;;  %v969_v20 = vld [vmem:[%s1428_s1 + $0x18c] sm:$0xf]  ;;  %v825_v23 = vld [vmem:[%s1428_s1 + $0x140] sm:$0xf] }
   0x6   :  { %470 = vmatpush.bf16.msra.mxu2 %v898_v8  ;;  %v973_v19 = vld [vmem:[%s1428_s1 + $0x1a4] sm:$0xf0]  ;;  %v867_v22 = vld [vmem:[%s1428_s1 + $0x1a8] sm:$0xf0]  ;;  %v964_v24 = vld [vmem:[%s1428_s1 + $0x15c] sm:$0xf0] }
   0x7   :  { %484 = vmatpush.bf16.msra.mxu3 %v902_v12  ;;  %v866_v21 = vor.u32 %v973_v19, %v865_v18  ;;  %v870_v25 = vor.u32 %v969_v20, %v867_v22  ;;  %v960_v26 = vld [vmem:[%s1428_s1 + $0x144] sm:$0xf]  ;;  %v833_v28 = vld [vmem:[%s1428_s1 + $0x148] sm:$0xf]  ;;  %v826_v29 = vor.u32 %v964_v24, %v825_v23  ;;  %v961_v31 = vld [vmem:[%s1428_s1 + $0x14c] sm:$0xf] }
   0x8   :  { %v827_v27 = vld [vmem:[%s1428_s1 + $0x160] sm:$0xf0]  ;;  %v965_v30 = vld [vmem:[%s1428_s1 + $0x164] sm:$0xf0]  ;;  %v835_v32 = vld [vmem:[%s1428_s1 + $0x168] sm:$0xf0] }
   0x9   :  { %443 = vmatpush.bf16.msra.mxu0 %v858_v16  ;;  %457 = vmatpush.bf16.msra.mxu1 %v862_v17  ;;  %v830_v33 = vor.u32 %v960_v26, %v827_v27  ;;  %v834_v34 = vor.u32 %v965_v30, %v833_v28  ;;  %v793_v35 = vld [vmem:[%s1428_s1 + $0x100] sm:$0xf]  ;;  %v952_v37 = vld [vmem:[%s1428_s1 + $0x104] sm:$0xf]  ;;  %v838_v38 = vor.u32 %v961_v31, %v835_v32  ;;  %v801_v40 = vld [vmem:[%s1428_s1 + $0x108] sm:$0xf] }
   0xa   :  { %471 = vmatpush.bf16.msra.mxu2 %v866_v21  ;;  %v956_v36 = vld [vmem:[%s1428_s1 + $0x11c] sm:$0xf0]  ;;  %v795_v39 = vld [vmem:[%s1428_s1 + $0x120] sm:$0xf0]  ;;  %v957_v41 = vld [vmem:[%s1428_s1 + $0x124] sm:$0xf0] }
   0xb   :  { %485 = vmatpush.bf16.msra.mxu3 %v870_v25  ;;  %v953_v42 = vld [vmem:[%s1428_s1 + $0x10c] sm:$0xf]  ;;  %v794_v44 = vor.u32 %v956_v36, %v793_v35  ;;  %v798_v45 = vor.u32 %v952_v37, %v795_v39  ;;  %v802_v46 = vor.u32 %v957_v41, %v801_v40  ;;  %v761_v47 = vld [vmem:[%s1428_s1 + $0xc0] sm:$0xf]  ;;  %v944_v49 = vld [vmem:[%s1428_s1 + $0xc4] sm:$0xf] }
   0xc   :  { %v803_v43 = vld [vmem:[%s1428_s1 + $0x128] sm:$0xf0]  ;;  %v948_v48 = vld [vmem:[%s1428_s1 + $0xdc] sm:$0xf0]  ;;  %v763_v51 = vld [vmem:[%s1428_s1 + $0xe0] sm:$0xf0] }
   0xd   :  { %444 = vmatpush.bf16.msra.mxu0 %v826_v29  ;;  %458 = vmatpush.bf16.msra.mxu1 %v830_v33  ;;  %v806_v50 = vor.u32 %v953_v42, %v803_v43  ;;  %v769_v52 = vld [vmem:[%s1428_s1 + $0xc8] sm:$0xf]  ;;  %v945_v54 = vld [vmem:[%s1428_s1 + $0xcc] sm:$0xf]  ;;  %v762_v56 = vor.u32 %v948_v48, %v761_v47  ;;  %v766_v57 = vor.u32 %v944_v49, %v763_v51  ;;  %v729_v59 = vld [vmem:[%s1428_s1 + $0x80] sm:$0xf] }
   0xe   :  { %472 = vmatpush.bf16.msra.mxu2 %v834_v34  ;;  %v949_v53 = vld [vmem:[%s1428_s1 + $0xe4] sm:$0xf0]  ;;  %v771_v55 = vld [vmem:[%s1428_s1 + $0xe8] sm:$0xf0]  ;;  %v940_v60 = vld [vmem:[%s1428_s1 + $0x9c] sm:$0xf0] }
   0xf   :  { %486 = vmatpush.bf16.msra.mxu3 %v838_v38  ;;  %v770_v58 = vor.u32 %v949_v53, %v769_v52  ;;  %v936_v61 = vld [vmem:[%s1428_s1 + $0x84] sm:$0xf]  ;;  %v774_v62 = vor.u32 %v945_v54, %v771_v55  ;;  %v737_v0 = vld [vmem:[%s1428_s1 + $0x88] sm:$0xf]  ;;  %v937_v2 = vld [vmem:[%s1428_s1 + $0x8c] sm:$0xf]  ;;  %v730_v4 = vor.u32 %v940_v60, %v729_v59 }
  0x10   :  { %v731_v63 = vld [vmem:[%s1428_s1 + $0xa0] sm:$0xf0]  ;;  %v941_v1 = vld [vmem:[%s1428_s1 + $0xa4] sm:$0xf0]  ;;  %v739_v3 = vld [vmem:[%s1428_s1 + $0xa8] sm:$0xf0] }
  0x11   :  { %445 = vmatpush.bf16.msra.mxu0 %v794_v44  ;;  %459 = vmatpush.bf16.msra.mxu1 %v798_v45  ;;  %v734_v5 = vor.u32 %v936_v61, %v731_v63  ;;  %v738_v6 = vor.u32 %v941_v1, %v737_v0  ;;  %v697_v7 = vld [vmem:[%s1428_s1 + $0x40] sm:$0xf]  ;;  %v928_v9 = vld [vmem:[%s1428_s1 + $0x44] sm:$0xf]  ;;  %v742_v10 = vor.u32 %v937_v2, %v739_v3  ;;  %v705_v12 = vld [vmem:[%s1428_s1 + $0x48] sm:$0xf] }
  0x12   :  { %473 = vmatpush.bf16.msra.mxu2 %v802_v46  ;;  %v932_v8 = vld [vmem:[%s1428_s1 + $0x5c] sm:$0xf0]  ;;  %v699_v11 = vld [vmem:[%s1428_s1 + $0x60] sm:$0xf0]  ;;  %v933_v13 = vld [vmem:[%s1428_s1 + $0x64] sm:$0xf0] }
  0x13   :  { %487 = vmatpush.bf16.msra.mxu3 %v806_v50  ;;  %v929_v14 = vld [vmem:[%s1428_s1 + $0x4c] sm:$0xf]  ;;  %v698_v16 = vor.u32 %v932_v8, %v697_v7  ;;  %v665_v17 = vld [vmem:[%s1428_s1] sm:$0xf]  ;;  %v702_v19 = vor.u32 %v928_v9, %v699_v11  ;;  %v706_v20 = vor.u32 %v933_v13, %v705_v12  ;;  %v920_v21 = vld [vmem:[%s1428_s1 + $0x4] sm:$0xf] }
  0x14   :  { %v707_v15 = vld [vmem:[%s1428_s1 + $0x68] sm:$0xf0]  ;;  %v924_v18 = vld [vmem:[%s1428_s1 + $0x1c] sm:$0xf0]  ;;  %v667_v22 = vld [vmem:[%s1428_s1 + $0x20] sm:$0xf0] }
  0x15   :  { %446 = vmatpush.bf16.msra.mxu0 %v762_v56  ;;  %460 = vmatpush.bf16.msra.mxu1 %v766_v57  ;;  %v673_v23 = vld [vmem:[%s1428_s1 + $0x8] sm:$0xf]  ;;  %v710_v24 = vor.u32 %v929_v14, %v707_v15  ;;  %v921_v26 = vld [vmem:[%s1428_s1 + $0xc] sm:$0xf]  ;;  %v905_v28 = vld [vmem:[%s1428_s1 + $0x1d0] sm:$0xf]  ;;  %v666_v31 = vor.u32 %v924_v18, %v665_v17  ;;  %v670_v35 = vor.u32 %v920_v21, %v667_v22 }
  0x16   :  { %474 = vmatpush.bf16.msra.mxu2 %v770_v58  ;;  %v925_v25 = vld [vmem:[%s1428_s1 + $0x24] sm:$0xf0]  ;;  %v675_v27 = vld [vmem:[%s1428_s1 + $0x28] sm:$0xf0]  ;;  %v982_v29 = vld [vmem:[%s1428_s1 + $0x1ec] sm:$0xf0] }
  0x17   :  { %488 = vmatpush.bf16.msra.mxu3 %v774_v62  ;;  %v978_v30 = vld [vmem:[%s1428_s1 + $0x1d4] sm:$0xf]  ;;  %v913_v33 = vld [vmem:[%s1428_s1 + $0x1d8] sm:$0xf]  ;;  %v674_v36 = vor.u32 %v925_v25, %v673_v23  ;;  %v979_v37 = vld [vmem:[%s1428_s1 + $0x1dc] sm:$0xf]  ;;  %v678_v39 = vor.u32 %v921_v26, %v675_v27  ;;  %v906_v40 = vor.u32 %v982_v29, %v905_v28 }
  0x18   :  { %v907_v32 = vld [vmem:[%s1428_s1 + $0x1f0] sm:$0xf0]  ;;  %v983_v34 = vld [vmem:[%s1428_s1 + $0x1f4] sm:$0xf0]  ;;  %v915_v38 = vld [vmem:[%s1428_s1 + $0x1f8] sm:$0xf0] }
  0x19   :  { %447 = vmatpush.bf16.msra.mxu0 %v730_v4  ;;  %461 = vmatpush.bf16.msra.mxu1 %v734_v5  ;;  %v873_v41 = vld [vmem:[%s1428_s1 + $0x190] sm:$0xf]  ;;  %v910_v42 = vor.u32 %v978_v30, %v907_v32  ;;  %v914_v43 = vor.u32 %v983_v34, %v913_v33  ;;  %v970_v45 = vld [vmem:[%s1428_s1 + $0x194] sm:$0xf]  ;;  %v918_v47 = vor.u32 %v979_v37, %v915_v38  ;;  %v881_v48 = vld [vmem:[%s1428_s1 + $0x198] sm:$0xf] }
  0x1a   :  { %475 = vmatpush.bf16.msra.mxu2 %v738_v6  ;;  %v974_v44 = vld [vmem:[%s1428_s1 + $0x1ac] sm:$0xf0]  ;;  %v875_v46 = vld [vmem:[%s1428_s1 + $0x1b0] sm:$0xf0]  ;;  %v975_v49 = vld [vmem:[%s1428_s1 + $0x1b4] sm:$0xf0] }
  0x1b   :  { %489 = vmatpush.bf16.msra.mxu3 %v742_v10  ;;  %v1241_v50 = vld [vmem:[%s1429_s0] sm:$0xff]  ;;  %v971_v51 = vld [vmem:[%s1428_s1 + $0x19c] sm:$0xf]  ;;  %v874_v53 = vor.u32 %v974_v44, %v873_v41  ;;  %v878_v54 = vor.u32 %v970_v45, %v875_v46  ;;  %v882_v55 = vor.u32 %v975_v49, %v881_v48  ;;  %v841_v56 = vld [vmem:[%s1428_s1 + $0x150] sm:$0xf] }
  0x1c   :  { %v883_v52 = vld [vmem:[%s1428_s1 + $0x1b8] sm:$0xf0]  ;;  %v966_v57 = vld [vmem:[%s1428_s1 + $0x16c] sm:$0xf0]  ;;  %v962_v58 = vld [vmem:[%s1428_s1 + $0x154] sm:$0xf] }
  0x1d   :  { %448 = vmatpush.bf16.msra.mxu0 %v698_v16  ;;  %462 = vmatpush.bf16.msra.mxu1 %v702_v19  ;;  %v886_v59 = vor.u32 %v971_v51, %v883_v52  ;;  %v843_v60 = vld [vmem:[%s1428_s1 + $0x170] sm:$0xf0]  ;;  %v849_v61 = vld [vmem:[%s1428_s1 + $0x158] sm:$0xf]  ;;  %v963_v63 = vld [vmem:[%s1428_s1 + $0x15c] sm:$0xf]  ;;  %v842_v1 = vor.u32 %v966_v57, %v841_v56 }
  0x1e   :  { %476 = vmatpush.bf16.msra.mxu2 %v706_v20  ;;  %v967_v62 = vld [vmem:[%s1428_s1 + $0x174] sm:$0xf0]  ;;  %v851_v0 = vld [vmem:[%s1428_s1 + $0x178] sm:$0xf0]  ;;  %v846_v2 = vor.u32 %v962_v58, %v843_v60  ;;  %v809_v4 = vld [vmem:[%s1428_s1 + $0x110] sm:$0xf] }
  0x1f   :  { %490 = vmatpush.bf16.msra.mxu3 %v710_v24  ;;  %v850_v3 = vor.u32 %v967_v62, %v849_v61  ;;  %v958_v5 = vld [vmem:[%s1428_s1 + $0x12c] sm:$0xf0]  ;;  %v954_v6 = vld [vmem:[%s1428_s1 + $0x114] sm:$0xf]  ;;  %v854_v7 = vor.u32 %v963_v63, %v851_v0  ;;  %v817_v9 = vld [vmem:[%s1428_s1 + $0x118] sm:$0xf] }
  0x20   :  { %v811_v8 = vld [vmem:[%s1428_s1 + $0x130] sm:$0xf0]  ;;  %v959_v10 = vld [vmem:[%s1428_s1 + $0x134] sm:$0xf0]  ;;  %v955_v11 = vld [vmem:[%s1428_s1 + $0x11c] sm:$0xf]  ;;  %v810_v13 = vor.u32 %v958_v5, %v809_v4 }
  0x21   :  { %449 = vmatpush.bf16.msra.mxu0 %v666_v31  ;;  %463 = vmatpush.bf16.msra.mxu1 %v670_v35  ;;  %v819_v12 = vld [vmem:[%s1428_s1 + $0x138] sm:$0xf0]  ;;  %v814_v14 = vor.u32 %v954_v6, %v811_v8  ;;  %v818_v15 = vor.u32 %v959_v10, %v817_v9  ;;  %v777_v16 = vld [vmem:[%s1428_s1 + $0xd0] sm:$0xf]  ;;  %v946_v18 = vld [vmem:[%s1428_s1 + $0xd4] sm:$0xf] }
  0x22   :  { %477 = vmatpush.bf16.msra.mxu2 %v674_v36  ;;  %v950_v17 = vld [vmem:[%s1428_s1 + $0xec] sm:$0xf0]  ;;  %v822_v19 = vor.u32 %v955_v11, %v819_v12  ;;  %v779_v20 = vld [vmem:[%s1428_s1 + $0xf0] sm:$0xf0]  ;;  %v785_v21 = vld [vmem:[%s1428_s1 + $0xd8] sm:$0xf] }
  0x23   :  { %491 = vmatpush.bf16.msra.mxu3 %v678_v39  ;;  %v951_v22 = vld [vmem:[%s1428_s1 + $0xf4] sm:$0xf0]  ;;  %v947_v23 = vld [vmem:[%s1428_s1 + $0xdc] sm:$0xf]  ;;  %v778_v25 = vor.u32 %v950_v17, %v777_v16  ;;  %v782_v26 = vor.u32 %v946_v18, %v779_v20  ;;  %v745_v28 = vld [vmem:[%s1428_s1 + $0x90] sm:$0xf] }
  0x24   :  { %450 = vmatmul.bf16.vlgmr.msra.gmra.mxu0 %v1241_v50  ;;  %464 = vmatmul.bf16.vlgmr.msra.gmra.mxu1 %v1241_v50  ;;  %v787_v24 = vld [vmem:[%s1428_s1 + $0xf8] sm:$0xf0]  ;;  %v786_v27 = vor.u32 %v951_v22, %v785_v21  ;;  %v942_v29 = vld [vmem:[%s1428_s1 + $0xac] sm:$0xf0]  ;;  %v938_v30 = vld [vmem:[%s1428_s1 + $0x94] sm:$0xf] }
  0x25   :  { %498 = vmatpush.bf16.msrb.mxu0 %v906_v40  ;;  %512 = vmatpush.bf16.msrb.mxu1 %v910_v42  ;;  %v790_v31 = vor.u32 %v947_v23, %v787_v24  ;;  %v747_v32 = vld [vmem:[%s1428_s1 + $0xb0] sm:$0xf0]  ;;  %v753_v33 = vld [vmem:[%s1428_s1 + $0x98] sm:$0xf]  ;;  %v939_v35 = vld [vmem:[%s1428_s1 + $0x9c] sm:$0xf]  ;;  %v746_v37 = vor.u32 %v942_v29, %v745_v28 }
  0x26   :  { %526 = vmatpush.bf16.msrb.mxu2 %v914_v43  ;;  %492 = vmatmul.bf16.vlgmr.msra.gmra.mxu3 %v1241_v50  ;;  %v943_v34 = vld [vmem:[%s1428_s1 + $0xb4] sm:$0xf0]  ;;  %v755_v36 = vld [vmem:[%s1428_s1 + $0xb8] sm:$0xf0]  ;;  %v750_v38 = vor.u32 %v938_v30, %v747_v32  ;;  %v713_v40 = vld [vmem:[%s1428_s1 + $0x50] sm:$0xf] }
  0x27   :  { %540 = vmatpush.bf16.msrb.mxu3 %v918_v47  ;;  %478 = vmatmul.bf16.vlgmr.msra.gmra.mxu2 %v1241_v50  ;;  %v754_v39 = vor.u32 %v943_v34, %v753_v33  ;;  %v934_v41 = vld [vmem:[%s1428_s1 + $0x6c] sm:$0xf0]  ;;  %v930_v42 = vld [vmem:[%s1428_s1 + $0x54] sm:$0xf]  ;;  %v758_v43 = vor.u32 %v939_v35, %v755_v36  ;;  %v721_v45 = vld [vmem:[%s1428_s1 + $0x58] sm:$0xf] }
  0x28   :  { %v715_v44 = vld [vmem:[%s1428_s1 + $0x70] sm:$0xf0]  ;;  %v935_v46 = vld [vmem:[%s1428_s1 + $0x74] sm:$0xf0]  ;;  %v931_v47 = vld [vmem:[%s1428_s1 + $0x5c] sm:$0xf]  ;;  %v714_v49 = vor.u32 %v934_v41, %v713_v40 }
  0x29   :  { %499 = vmatpush.bf16.msrb.mxu0 %v874_v53  ;;  %513 = vmatpush.bf16.msrb.mxu1 %v878_v54  ;;  %v723_v48 = vld [vmem:[%s1428_s1 + $0x78] sm:$0xf0]  ;;  %v718_v51 = vor.u32 %v930_v42, %v715_v44  ;;  %v722_v52 = vor.u32 %v935_v46, %v721_v45  ;;  %v681_v53 = vld [vmem:[%s1428_s1 + $0x10] sm:$0xf]  ;;  %v683_v57 = vld [vmem:[%s1428_s1 + $0x30] sm:$0xf0] }
  0x2a   :  { %527 = vmatpush.bf16.msrb.mxu2 %v882_v55  ;;  %v926_v54 = vld [vmem:[%s1428_s1 + $0x2c] sm:$0xf0]  ;;  %v922_v55 = vld [vmem:[%s1428_s1 + $0x14] sm:$0xf]  ;;  %v726_v56 = vor.u32 %v931_v47, %v723_v48  ;;  %v689_v58 = vld [vmem:[%s1428_s1 + $0x18] sm:$0xf] }
  0x2b   :  { %541 = vmatpush.bf16.msrb.mxu3 %v886_v59  ;;  %v927_v59 = vld [vmem:[%s1428_s1 + $0x34] sm:$0xf0]  ;;  %v923_v60 = vld [vmem:[%s1428_s1 + $0x1c] sm:$0xf]  ;;  %v682_v62 = vor.u32 %v926_v54, %v681_v53  ;;  %v686_v63 = vor.u32 %v922_v55, %v683_v57 }
  0x2c   :  { %v691_v61 = vld [vmem:[%s1428_s1 + $0x38] sm:$0xf0]  ;;  %v690_v0 = vor.u32 %v927_v59, %v689_v58 }
  0x2d   :  { %500 = vmatpush.bf16.msrb.mxu0 %v842_v1  ;;  %514 = vmatpush.bf16.msrb.mxu1 %v846_v2  ;;  %v694_v1 = vor.u32 %v923_v60, %v691_v61  ;;  %v605_v2 = vld [vmem:[%s1430_s2] sm:$0xff] }
  0x2e   :  { %528 = vmatpush.bf16.msrb.mxu2 %v850_v3  ;;  %v607_v3 = vperm.slane %v605_v2, 0  ;;  %v608_v4 = vperm.slane %v605_v2, 1  ;;  %v609_v9 = vperm.slane %v605_v2, 2  ;;  %v610_v10 = vperm.slane %v605_v2, 3 }
  0x2f   :  { %542 = vmatpush.bf16.msrb.mxu3 %v854_v7  ;;  %v613_v33 = vperm.slane %v605_v2, 6  ;;  %v614_v34 = vperm.slane %v605_v2, 7 }
  0x31   :  { %501 = vmatpush.bf16.msrb.mxu0 %v810_v13  ;;  %515 = vmatpush.bf16.msrb.mxu1 %v814_v14 }
  0x32   :  { %529 = vmatpush.bf16.msrb.mxu2 %v818_v15 }
  0x33   :  { %543 = vmatpush.bf16.msrb.mxu3 %v822_v19 }
  0x35   :  { %502 = vmatpush.bf16.msrb.mxu0 %v778_v25  ;;  %516 = vmatpush.bf16.msrb.mxu1 %v782_v26  ;;  %v611_v26 = vperm.slane %v605_v2, 4 }
  0x36   :  { %530 = vmatpush.bf16.msrb.mxu2 %v786_v27  ;;  %v612_v27 = vperm.slane %v605_v2, 5 }
  0x37   :  { %544 = vmatpush.bf16.msrb.mxu3 %v790_v31 }
  0x39   :  { %503 = vmatpush.bf16.msrb.mxu0 %v746_v37  ;;  %517 = vmatpush.bf16.msrb.mxu1 %v750_v38 }
  0x3a   :  { %531 = vmatpush.bf16.msrb.mxu2 %v754_v39 }
  0x3b   :  { %545 = vmatpush.bf16.msrb.mxu3 %v758_v43 }
  0x3d   :  { %504 = vmatpush.bf16.msrb.mxu0 %v714_v49  ;;  %518 = vmatpush.bf16.msrb.mxu1 %v718_v51 }
  0x3e   :  { %532 = vmatpush.bf16.msrb.mxu2 %v722_v52 }
  0x3f   :  { %546 = vmatpush.bf16.msrb.mxu3 %v726_v56 }
  0x41   :  { %505 = vmatpush.bf16.msrb.mxu0 %v682_v62  ;;  %519 = vmatpush.bf16.msrb.mxu1 %v686_v63 }
  0x42   :  { %533 = vmatpush.bf16.msrb.mxu2 %v690_v0 }
  0x43   :  { %547 = vmatpush.bf16.msrb.mxu3 %v694_v1 }
  0x44   :  { %506 = vmatmul.bf16.vlgmr.msrb.gmra.mxu0 %v1241_v50  ;;  %520 = vmatmul.bf16.vlgmr.msrb.gmra.mxu1 %v1241_v50 }
  0x45   :  { %534 = vmatmul.bf16.vlgmr.msrb.gmra.mxu2 %v1241_v50 }
  0x46   :  { %548 = vmatmul.bf16.vlgmr.msrb.gmra.mxu3 %v1241_v50 }
  0xa1   :  { %v451_v5 = vpop.f32.mrf.mxu0  ;;  %v465_v7 = vpop.f32.mrf.mxu1 }
  0xa2   :  { %v623_v6 = vadd.f32 %v607_v3, %v451_v5  ;;  %v624_v8 = vadd.f32 %v608_v4, %v465_v7 }
  0xa4   :  { %v639_v11 = vpack.c.bf16 %v624_v8, %v623_v6 }
  0xa6   :  { %647 = vst [vmem:[%s1431_s3] sm:$0xff] %v639_v11 }
  0xa9   :  { %v493_v50 = vpop.f32.mrf.mxu3  ;;  %v453_v15 = vpop.f32.mrf.mxu0 }
  0xaa   :  { %v479_v12 = vpop.f32.mrf.mxu2  ;;  %v626_v14 = vadd.f32 %v610_v10, %v493_v50  ;;  %v631_v17 = vadd.f32 %v607_v3, %v453_v15  ;;  %v467_v18 = vpop.f32.mrf.mxu1 }
  0xab   :  { %v625_v13 = vadd.f32 %v609_v9, %v479_v12  ;;  %v632_v19 = vadd.f32 %v608_v4, %v467_v18 }
  0xad   :  { %v640_v16 = vpack.c.bf16 %v626_v14, %v625_v13  ;;  %v643_v20 = vpack.c.bf16 %v632_v19, %v631_v17 }
  0xaf   :  { %648 = vst [vmem:[%s1431_s3 + $0x8] sm:$0xff] %v640_v16 }
  0xb0   :  { %651 = vst [vmem:[%s1431_s3 + $0x20] sm:$0xff] %v643_v20 }
  0xb1   :  { %v495_v23 = vpop.f32.mrf.mxu3 }
  0xb2   :  { %v481_v21 = vpop.f32.mrf.mxu2  ;;  %v634_v24 = vadd.f32 %v610_v10, %v495_v23 }
  0xb3   :  { %v633_v22 = vadd.f32 %v609_v9, %v481_v21 }
  0xb5   :  { %v644_v25 = vpack.c.bf16 %v634_v24, %v633_v22 }
  0xb7   :  { %652 = vst [vmem:[%s1431_s3 + $0x28] sm:$0xff] %v644_v25 }
  0xc1   :  { %v507_v28 = vpop.f32.mrf.mxu0  ;;  %v521_v30 = vpop.f32.mrf.mxu1 }
  0xc2   :  { %v627_v29 = vadd.f32 %v611_v26, %v507_v28  ;;  %v628_v31 = vadd.f32 %v612_v27, %v521_v30 }
  0xc4   :  { %v641_v32 = vpack.c.bf16 %v628_v31, %v627_v29 }
  0xc6   :  { %649 = vst [vmem:[%s1431_s3 + $0x10] sm:$0xff] %v641_v32 }
  0xc8   :  { %v535_v35 = vpop.f32.mrf.mxu2 }
  0xc9   :  { %v629_v36 = vadd.f32 %v613_v33, %v535_v35  ;;  %v549_v37 = vpop.f32.mrf.mxu3  ;;  %v509_v38 = vpop.f32.mrf.mxu0 }
  0xca   :  { %v630_v39 = vadd.f32 %v614_v34, %v549_v37  ;;  %v635_v40 = vadd.f32 %v611_v26, %v509_v38  ;;  %v523_v41 = vpop.f32.mrf.mxu1 }
  0xcb   :  { %v636_v42 = vadd.f32 %v612_v27, %v523_v41 }
  0xcc   :  { %v642_v43 = vpack.c.bf16 %v630_v39, %v629_v36 }
  0xcd   :  { %v645_v44 = vpack.c.bf16 %v636_v42, %v635_v40 }
  0xce   :  { %650 = vst [vmem:[%s1431_s3 + $0x18] sm:$0xff] %v642_v43 }
  0xcf   :  { %653 = vst [vmem:[%s1431_s3 + $0x30] sm:$0xff] %v645_v44 }
  0xd0   :  { %v537_v45 = vpop.f32.mrf.mxu2 }
  0xd1   :  { %v637_v46 = vadd.f32 %v613_v33, %v537_v45  ;;  %v551_v47 = vpop.f32.mrf.mxu3 }
  0xd2   :  { %v638_v48 = vadd.f32 %v614_v34, %v551_v47 }
  0xd4   :  { %v646_v49 = vpack.c.bf16 %v638_v48, %v637_v46 }
  0xd6   :  { %654 = vst [vmem:[%s1431_s3 + $0x38] sm:$0xff] %v646_v49 }

// kernel: vae_forward.13
= control target key start
LH: loop header
LB: loop body
LE: loop exit
PB: predicated region body
PF: predicated region fallthrough
CT: control target
= control target key end

     0   :  { %s2983_s1 = inlined_call_operand.vmem [shape: bf16[1152,256], index: 1, kind: input, shape index: {}]   ;;  %s2984_s0 = inlined_call_operand.vmem [shape: bf16[16,1152], index: 0, kind: input, shape index: {}]   ;;  %s2985_s2 = inlined_call_operand.vmem [shape: f32[1,256], index: 2, kind: input, shape index: {}]   ;;  %s2986_s3 = inlined_call_operand.vmem [shape: bf16[16,256], index: 3, kind: output, shape index: {}]  }
   0x1   :  { %v1329_v0 = vld [vmem:[%s2983_s1 + $0x70] sm:$0xf]  ;;  %v1871_v1 = vld [vmem:[%s2983_s1 + $0x74] sm:$0xf0]  ;;  %v1321_v11 = vld [vmem:[%s2983_s1 + $0x60] sm:$0xf] }
   0x2   :  { %v1393_v2 = vld [vmem:[%s2983_s1 + $0xf0] sm:$0xf]  ;;  %v1330_v3 = vor.u32 %v1871_v1, %v1329_v0  ;;  %v1887_v4 = vld [vmem:[%s2983_s1 + $0xf4] sm:$0xf0]  ;;  %v1869_v13 = vld [vmem:[%s2983_s1 + $0x64] sm:$0xf0] }
   0x3   :  { %v1457_v5 = vld [vmem:[%s2983_s1 + $0x170] sm:$0xf]  ;;  %v1903_v6 = vld [vmem:[%s2983_s1 + $0x174] sm:$0xf0]  ;;  %v1394_v7 = vor.u32 %v1887_v4, %v1393_v2  ;;  %v1385_v14 = vld [vmem:[%s2983_s1 + $0xe0] sm:$0xf]  ;;  %v1322_v16 = vor.u32 %v1869_v13, %v1321_v11 }
   0x4   :  { %v1458_v8 = vor.u32 %v1903_v6, %v1457_v5  ;;  %v1521_v9 = vld [vmem:[%s2983_s1 + $0x1f0] sm:$0xf]  ;;  %v1919_v10 = vld [vmem:[%s2983_s1 + $0x1f4] sm:$0xf0]  ;;  %946 = vmatpush.bf16.msra.mxu0 %v1330_v3  ;;  %v1885_v15 = vld [vmem:[%s2983_s1 + $0xe4] sm:$0xf0] }
   0x5   :  { %v1522_v12 = vor.u32 %v1919_v10, %v1521_v9  ;;  %960 = vmatpush.bf16.msra.mxu1 %v1394_v7  ;;  %v1386_v17 = vor.u32 %v1885_v15, %v1385_v14  ;;  %v1449_v18 = vld [vmem:[%s2983_s1 + $0x160] sm:$0xf]  ;;  %v1901_v19 = vld [vmem:[%s2983_s1 + $0x164] sm:$0xf0]  ;;  %v1313_v23 = vld [vmem:[%s2983_s1 + $0x50] sm:$0xf] }
   0x6   :  { %974 = vmatpush.bf16.msra.mxu2 %v1458_v8  ;;  %v1513_v20 = vld [vmem:[%s2983_s1 + $0x1e0] sm:$0xf]  ;;  %v1450_v21 = vor.u32 %v1901_v19, %v1449_v18  ;;  %v1917_v22 = vld [vmem:[%s2983_s1 + $0x1e4] sm:$0xf0]  ;;  %v1867_v24 = vld [vmem:[%s2983_s1 + $0x54] sm:$0xf0] }
   0x7   :  { %988 = vmatpush.bf16.msra.mxu3 %v1522_v12  ;;  %v1514_v25 = vor.u32 %v1917_v22, %v1513_v20  ;;  %v1377_v26 = vld [vmem:[%s2983_s1 + $0xd0] sm:$0xf]  ;;  %v1883_v27 = vld [vmem:[%s2983_s1 + $0xd4] sm:$0xf0]  ;;  %v1314_v29 = vor.u32 %v1867_v24, %v1313_v23  ;;  %v1305_v35 = vld [vmem:[%s2983_s1 + $0x40] sm:$0xf] }
   0x8   :  { %v1441_v28 = vld [vmem:[%s2983_s1 + $0x150] sm:$0xf]  ;;  %947 = vmatpush.bf16.msra.mxu0 %v1322_v16  ;;  %v1899_v30 = vld [vmem:[%s2983_s1 + $0x154] sm:$0xf0]  ;;  %v1378_v33 = vor.u32 %v1883_v27, %v1377_v26  ;;  %v1865_v36 = vld [vmem:[%s2983_s1 + $0x44] sm:$0xf0] }
   0x9   :  { %v1505_v31 = vld [vmem:[%s2983_s1 + $0x1d0] sm:$0xf]  ;;  %v1915_v32 = vld [vmem:[%s2983_s1 + $0x1d4] sm:$0xf0]  ;;  %961 = vmatpush.bf16.msra.mxu1 %v1386_v17  ;;  %v1442_v34 = vor.u32 %v1899_v30, %v1441_v28  ;;  %v1369_v37 = vld [vmem:[%s2983_s1 + $0xc0] sm:$0xf]  ;;  %v1306_v44 = vor.u32 %v1865_v36, %v1305_v35 }
   0xa   :  { %975 = vmatpush.bf16.msra.mxu2 %v1450_v21  ;;  %v1506_v38 = vor.u32 %v1915_v32, %v1505_v31  ;;  %v1881_v39 = vld [vmem:[%s2983_s1 + $0xc4] sm:$0xf0]  ;;  %v1433_v40 = vld [vmem:[%s2983_s1 + $0x140] sm:$0xf]  ;;  %v1297_v47 = vld [vmem:[%s2983_s1 + $0x30] sm:$0xf] }
   0xb   :  { %989 = vmatpush.bf16.msra.mxu3 %v1514_v25  ;;  %v1897_v41 = vld [vmem:[%s2983_s1 + $0x144] sm:$0xf0]  ;;  %v1497_v42 = vld [vmem:[%s2983_s1 + $0x1c0] sm:$0xf]  ;;  %v1370_v45 = vor.u32 %v1881_v39, %v1369_v37  ;;  %v1863_v48 = vld [vmem:[%s2983_s1 + $0x34] sm:$0xf0] }
   0xc   :  { %v1913_v43 = vld [vmem:[%s2983_s1 + $0x1c4] sm:$0xf0]  ;;  %948 = vmatpush.bf16.msra.mxu0 %v1314_v29  ;;  %v1434_v46 = vor.u32 %v1897_v41, %v1433_v40  ;;  %v1361_v49 = vld [vmem:[%s2983_s1 + $0xb0] sm:$0xf]  ;;  %v1879_v51 = vld [vmem:[%s2983_s1 + $0xb4] sm:$0xf0]  ;;  %v1298_v56 = vor.u32 %v1863_v48, %v1297_v47 }
   0xd   :  { %962 = vmatpush.bf16.msra.mxu1 %v1378_v33  ;;  %v1498_v50 = vor.u32 %v1913_v43, %v1497_v42  ;;  %v1425_v52 = vld [vmem:[%s2983_s1 + $0x130] sm:$0xf]  ;;  %v1895_v53 = vld [vmem:[%s2983_s1 + $0x134] sm:$0xf0]  ;;  %v1362_v57 = vor.u32 %v1879_v51, %v1361_v49  ;;  %v1289_v59 = vld [vmem:[%s2983_s1 + $0x20] sm:$0xf] }
   0xe   :  { %976 = vmatpush.bf16.msra.mxu2 %v1442_v34  ;;  %v1489_v54 = vld [vmem:[%s2983_s1 + $0x1b0] sm:$0xf]  ;;  %v1911_v55 = vld [vmem:[%s2983_s1 + $0x1b4] sm:$0xf0]  ;;  %v1426_v58 = vor.u32 %v1895_v53, %v1425_v52  ;;  %v1861_v60 = vld [vmem:[%s2983_s1 + $0x24] sm:$0xf0] }
   0xf   :  { %990 = vmatpush.bf16.msra.mxu3 %v1506_v38  ;;  %v1353_v61 = vld [vmem:[%s2983_s1 + $0xa0] sm:$0xf]  ;;  %v1490_v62 = vor.u32 %v1911_v55, %v1489_v54  ;;  %v1877_v63 = vld [vmem:[%s2983_s1 + $0xa4] sm:$0xf0]  ;;  %v1290_v4 = vor.u32 %v1861_v60, %v1289_v59  ;;  %v1281_v7 = vld [vmem:[%s2983_s1 + $0x10] sm:$0xf] }
  0x10   :  { %949 = vmatpush.bf16.msra.mxu0 %v1306_v44  ;;  %v1417_v0 = vld [vmem:[%s2983_s1 + $0x120] sm:$0xf]  ;;  %v1893_v1 = vld [vmem:[%s2983_s1 + $0x124] sm:$0xf0]  ;;  %v1354_v5 = vor.u32 %v1877_v63, %v1353_v61  ;;  %v1859_v8 = vld [vmem:[%s2983_s1 + $0x14] sm:$0xf0] }
  0x11   :  { %963 = vmatpush.bf16.msra.mxu1 %v1370_v45  ;;  %v1481_v2 = vld [vmem:[%s2983_s1 + $0x1a0] sm:$0xf]  ;;  %v1909_v3 = vld [vmem:[%s2983_s1 + $0x1a4] sm:$0xf0]  ;;  %v1418_v6 = vor.u32 %v1893_v1, %v1417_v0  ;;  %v1345_v9 = vld [vmem:[%s2983_s1 + $0x90] sm:$0xf]  ;;  %v1282_v16 = vor.u32 %v1859_v8, %v1281_v7 }
  0x12   :  { %977 = vmatpush.bf16.msra.mxu2 %v1434_v46  ;;  %v1482_v10 = vor.u32 %v1909_v3, %v1481_v2  ;;  %v1875_v11 = vld [vmem:[%s2983_s1 + $0x94] sm:$0xf0]  ;;  %v1409_v12 = vld [vmem:[%s2983_s1 + $0x110] sm:$0xf]  ;;  %v1273_v17 = vld [vmem:[%s2983_s1] sm:$0xf] }
  0x13   :  { %991 = vmatpush.bf16.msra.mxu3 %v1498_v50  ;;  %v1891_v13 = vld [vmem:[%s2983_s1 + $0x114] sm:$0xf0]  ;;  %v1473_v14 = vld [vmem:[%s2983_s1 + $0x190] sm:$0xf]  ;;  %v1857_v18 = vld [vmem:[%s2983_s1 + $0x4] sm:$0xf0]  ;;  %v1346_v19 = vor.u32 %v1875_v11, %v1345_v9 }
  0x14   :  { %950 = vmatpush.bf16.msra.mxu0 %v1298_v56  ;;  %v1907_v15 = vld [vmem:[%s2983_s1 + $0x194] sm:$0xf0]  ;;  %v1410_v20 = vor.u32 %v1891_v13, %v1409_v12  ;;  %v1337_v21 = vld [vmem:[%s2983_s1 + $0x80] sm:$0xf]  ;;  %v1873_v22 = vld [vmem:[%s2983_s1 + $0x84] sm:$0xf0]  ;;  %v1274_v31 = vor.u32 %v1857_v18, %v1273_v17 }
  0x15   :  { %964 = vmatpush.bf16.msra.mxu1 %v1362_v57  ;;  %v1401_v23 = vld [vmem:[%s2983_s1 + $0x100] sm:$0xf]  ;;  %v1474_v24 = vor.u32 %v1907_v15, %v1473_v14  ;;  %v1889_v25 = vld [vmem:[%s2983_s1 + $0x104] sm:$0xf0]  ;;  %v1585_v26 = vld [vmem:[%s2983_s1 + $0x270] sm:$0xf]  ;;  %v1338_v35 = vor.u32 %v1873_v22, %v1337_v21 }
  0x16   :  { %978 = vmatpush.bf16.msra.mxu2 %v1426_v58  ;;  %v1935_v27 = vld [vmem:[%s2983_s1 + $0x274] sm:$0xf0]  ;;  %v1649_v28 = vld [vmem:[%s2983_s1 + $0x2f0] sm:$0xf]  ;;  %v1465_v33 = vld [vmem:[%s2983_s1 + $0x180] sm:$0xf]  ;;  %v1402_v36 = vor.u32 %v1889_v25, %v1401_v23 }
  0x17   :  { %992 = vmatpush.bf16.msra.mxu3 %v1490_v62  ;;  %v1951_v29 = vld [vmem:[%s2983_s1 + $0x2f4] sm:$0xf0]  ;;  %v1713_v30 = vld [vmem:[%s2983_s1 + $0x370] sm:$0xf]  ;;  %v1905_v34 = vld [vmem:[%s2983_s1 + $0x184] sm:$0xf0]  ;;  %v1586_v39 = vor.u32 %v1935_v27, %v1585_v26 }
  0x18   :  { %951 = vmatpush.bf16.msra.mxu0 %v1290_v4  ;;  %v1967_v32 = vld [vmem:[%s2983_s1 + $0x374] sm:$0xf0]  ;;  %v1777_v37 = vld [vmem:[%s2983_s1 + $0x3f0] sm:$0xf]  ;;  %v1650_v40 = vor.u32 %v1951_v29, %v1649_v28  ;;  %v1577_v41 = vld [vmem:[%s2983_s1 + $0x260] sm:$0xf]  ;;  %v1466_v44 = vor.u32 %v1905_v34, %v1465_v33 }
  0x19   :  { %965 = vmatpush.bf16.msra.mxu1 %v1354_v5  ;;  %v1983_v38 = vld [vmem:[%s2983_s1 + $0x3f4] sm:$0xf0]  ;;  %v1933_v42 = vld [vmem:[%s2983_s1 + $0x264] sm:$0xf0]  ;;  %v1714_v43 = vor.u32 %v1967_v32, %v1713_v30  ;;  %v1641_v45 = vld [vmem:[%s2983_s1 + $0x2e0] sm:$0xf] }
  0x1a   :  { %979 = vmatpush.bf16.msra.mxu2 %v1418_v6  ;;  %v1949_v46 = vld [vmem:[%s2983_s1 + $0x2e4] sm:$0xf0]  ;;  %v1705_v47 = vld [vmem:[%s2983_s1 + $0x360] sm:$0xf]  ;;  %v1778_v48 = vor.u32 %v1983_v38, %v1777_v37  ;;  %v1569_v52 = vld [vmem:[%s2983_s1 + $0x250] sm:$0xf]  ;;  %v1578_v56 = vor.u32 %v1933_v42, %v1577_v41 }
  0x1b   :  { %993 = vmatpush.bf16.msra.mxu3 %v1482_v10  ;;  %v1965_v49 = vld [vmem:[%s2983_s1 + $0x364] sm:$0xf0]  ;;  %v1769_v50 = vld [vmem:[%s2983_s1 + $0x3e0] sm:$0xf]  ;;  %v1851_v54 = vld [vmem:[%s2984_s0 + $0x20] sm:$0xf0]  ;;  %v1642_v57 = vor.u32 %v1949_v46, %v1641_v45 }
  0x1c   :  { %952 = vmatpush.bf16.msra.mxu0 %v1282_v16  ;;  %v1981_v51 = vld [vmem:[%s2983_s1 + $0x3e4] sm:$0xf0]  ;;  %v1237_v53 = vld [vmem:[%s2984_s0] sm:$0xf]  ;;  %v1931_v58 = vld [vmem:[%s2983_s1 + $0x254] sm:$0xf0]  ;;  %v1706_v62 = vor.u32 %v1965_v49, %v1705_v47 }
  0x1d   :  { %966 = vmatpush.bf16.msra.mxu1 %v1346_v19  ;;  %v1245_v55 = vld [vmem:[%s2984_s0 + $0x8] sm:$0xf]  ;;  %v1633_v59 = vld [vmem:[%s2983_s1 + $0x2d0] sm:$0xf]  ;;  %v2278_v60 = vor.u32 %v1851_v54, %v1237_v53  ;;  %v1852_v61 = vld [vmem:[%s2984_s0 + $0x28] sm:$0xf0]  ;;  %v1770_v3 = vor.u32 %v1981_v51, %v1769_v50  ;;  %v1570_v11 = vor.u32 %v1931_v58, %v1569_v52 }
  0x1e   :  { %980 = vmatpush.bf16.msra.mxu2 %v1410_v20  ;;  %v1947_v63 = vld [vmem:[%s2983_s1 + $0x2d4] sm:$0xf0]  ;;  %v1697_v0 = vld [vmem:[%s2983_s1 + $0x350] sm:$0xf]  ;;  %v2292_v2 = vor.u32 %v1852_v61, %v1245_v55  ;;  %v1847_v5 = vld [vmem:[%s2984_s0 + $0x4] sm:$0xf] }
  0x1f   :  { %994 = vmatpush.bf16.msra.mxu3 %v1474_v24  ;;  %v1963_v1 = vld [vmem:[%s2983_s1 + $0x354] sm:$0xf0]  ;;  %v1761_v4 = vld [vmem:[%s2983_s1 + $0x3d0] sm:$0xf]  ;;  %v1239_v6 = vld [vmem:[%s2984_s0 + $0x24] sm:$0xf0]  ;;  %v1634_v12 = vor.u32 %v1947_v63, %v1633_v59 }
  0x20   :  { %953 = vmatpush.bf16.msra.mxu0 %v1274_v31  ;;  %v1979_v7 = vld [vmem:[%s2983_s1 + $0x3d4] sm:$0xf0]  ;;  %v2308_v8 = vor.u32 %v1847_v5, %v1239_v6  ;;  %v1848_v9 = vld [vmem:[%s2984_s0 + $0xc] sm:$0xf]  ;;  %v1247_v10 = vld [vmem:[%s2984_s0 + $0x2c] sm:$0xf0]  ;;  %v1698_v15 = vor.u32 %v1963_v1, %v1697_v0 }
  0x21   :  { %967 = vmatpush.bf16.msra.mxu1 %v1338_v35  ;;  %v1561_v13 = vld [vmem:[%s2983_s1 + $0x240] sm:$0xf]  ;;  %v2319_v14 = vor.u32 %v1848_v9, %v1247_v10  ;;  %v1929_v16 = vld [vmem:[%s2983_s1 + $0x244] sm:$0xf0]  ;;  %v1762_v19 = vor.u32 %v1979_v7, %v1761_v4  ;;  %v1553_v26 = vld [vmem:[%s2983_s1 + $0x230] sm:$0xf] }
  0x22   :  { %981 = vmatpush.bf16.msra.mxu2 %v1402_v36  ;;  %v1625_v17 = vld [vmem:[%s2983_s1 + $0x2c0] sm:$0xf]  ;;  %v1945_v18 = vld [vmem:[%s2983_s1 + $0x2c4] sm:$0xf0]  ;;  %v1562_v24 = vor.u32 %v1929_v16, %v1561_v13  ;;  %v1927_v28 = vld [vmem:[%s2983_s1 + $0x234] sm:$0xf0] }
  0x23   :  { %995 = vmatpush.bf16.msra.mxu3 %v1466_v44  ;;  %954 = vmatmul.bf16.vlgmr.msra.gmra.mxu0 %v2278_v60  ;;  %v1689_v20 = vld [vmem:[%s2983_s1 + $0x340] sm:$0xf]  ;;  %v1961_v21 = vld [vmem:[%s2983_s1 + $0x344] sm:$0xf0]  ;;  %v1626_v25 = vor.u32 %v1945_v18, %v1625_v17  ;;  %v1617_v29 = vld [vmem:[%s2983_s1 + $0x2b0] sm:$0xf]  ;;  %v1554_v36 = vor.u32 %v1927_v28, %v1553_v26 }
  0x24   :  { %1002 = vmatpush.bf16.msrb.mxu0 %v1586_v39  ;;  %968 = vmatmul.bf16.vlgmr.msra.gmra.mxu1 %v2308_v8  ;;  %v1753_v22 = vld [vmem:[%s2983_s1 + $0x3c0] sm:$0xf]  ;;  %v1977_v23 = vld [vmem:[%s2983_s1 + $0x3c4] sm:$0xf0]  ;;  %v1690_v27 = vor.u32 %v1961_v21, %v1689_v20  ;;  %v1943_v30 = vld [vmem:[%s2983_s1 + $0x2b4] sm:$0xf0] }
  0x25   :  { %1016 = vmatpush.bf16.msrb.mxu1 %v1650_v40  ;;  %982 = vmatmul.bf16.vlgmr.msra.gmra.mxu2 %v2292_v2  ;;  %v1754_v31 = vor.u32 %v1977_v23, %v1753_v22  ;;  %v1681_v32 = vld [vmem:[%s2983_s1 + $0x330] sm:$0xf]  ;;  %v1959_v33 = vld [vmem:[%s2983_s1 + $0x334] sm:$0xf0]  ;;  %v1618_v37 = vor.u32 %v1943_v30, %v1617_v29  ;;  %v1545_v38 = vld [vmem:[%s2983_s1 + $0x220] sm:$0xf] }
  0x26   :  { %1030 = vmatpush.bf16.msrb.mxu2 %v1714_v43  ;;  %996 = vmatmul.bf16.vlgmr.msra.gmra.mxu3 %v2319_v14  ;;  %v1745_v34 = vld [vmem:[%s2983_s1 + $0x3b0] sm:$0xf]  ;;  %v1975_v35 = vld [vmem:[%s2983_s1 + $0x3b4] sm:$0xf0]  ;;  %v1682_v39 = vor.u32 %v1959_v33, %v1681_v32  ;;  %v1925_v40 = vld [vmem:[%s2983_s1 + $0x224] sm:$0xf0] }
  0x27   :  { %1044 = vmatpush.bf16.msrb.mxu3 %v1778_v48  ;;  %v1609_v41 = vld [vmem:[%s2983_s1 + $0x2a0] sm:$0xf]  ;;  %v1941_v42 = vld [vmem:[%s2983_s1 + $0x2a4] sm:$0xf0]  ;;  %v1746_v43 = vor.u32 %v1975_v35, %v1745_v34  ;;  %v1546_v48 = vor.u32 %v1925_v40, %v1545_v38  ;;  %v1537_v50 = vld [vmem:[%s2983_s1 + $0x210] sm:$0xf] }
  0x28   :  { %1003 = vmatpush.bf16.msrb.mxu0 %v1578_v56  ;;  %v1673_v44 = vld [vmem:[%s2983_s1 + $0x320] sm:$0xf]  ;;  %v1957_v45 = vld [vmem:[%s2983_s1 + $0x324] sm:$0xf0]  ;;  %v1610_v49 = vor.u32 %v1941_v42, %v1609_v41  ;;  %v1923_v51 = vld [vmem:[%s2983_s1 + $0x214] sm:$0xf0] }
  0x29   :  { %1017 = vmatpush.bf16.msrb.mxu1 %v1642_v57  ;;  %v1737_v46 = vld [vmem:[%s2983_s1 + $0x3a0] sm:$0xf]  ;;  %v1973_v47 = vld [vmem:[%s2983_s1 + $0x3a4] sm:$0xf0]  ;;  %v1674_v52 = vor.u32 %v1957_v45, %v1673_v44  ;;  %v1601_v53 = vld [vmem:[%s2983_s1 + $0x290] sm:$0xf]  ;;  %v1538_v1 = vor.u32 %v1923_v51, %v1537_v50 }
  0x2a   :  { %1031 = vmatpush.bf16.msrb.mxu2 %v1706_v62  ;;  %v1939_v54 = vld [vmem:[%s2983_s1 + $0x294] sm:$0xf0]  ;;  %v1665_v55 = vld [vmem:[%s2983_s1 + $0x310] sm:$0xf]  ;;  %v1738_v56 = vor.u32 %v1973_v47, %v1737_v46  ;;  %v1529_v61 = vld [vmem:[%s2983_s1 + $0x200] sm:$0xf] }
  0x2b   :  { %1045 = vmatpush.bf16.msrb.mxu3 %v1770_v3  ;;  %v1955_v57 = vld [vmem:[%s2983_s1 + $0x314] sm:$0xf0]  ;;  %v1729_v58 = vld [vmem:[%s2983_s1 + $0x390] sm:$0xf]  ;;  %v1921_v62 = vld [vmem:[%s2983_s1 + $0x204] sm:$0xf0]  ;;  %v1602_v3 = vor.u32 %v1939_v54, %v1601_v53 }
  0x2c   :  { %1004 = vmatpush.bf16.msrb.mxu0 %v1570_v11  ;;  %v1971_v59 = vld [vmem:[%s2983_s1 + $0x394] sm:$0xf0]  ;;  %v1593_v63 = vld [vmem:[%s2983_s1 + $0x280] sm:$0xf]  ;;  %v1937_v0 = vld [vmem:[%s2983_s1 + $0x284] sm:$0xf0]  ;;  %v1666_v7 = vor.u32 %v1955_v57, %v1665_v55  ;;  %v1530_v20 = vor.u32 %v1921_v62, %v1529_v61 }
  0x2d   :  { %1018 = vmatpush.bf16.msrb.mxu1 %v1634_v12  ;;  %v1657_v4 = vld [vmem:[%s2983_s1 + $0x300] sm:$0xf]  ;;  %v1953_v5 = vld [vmem:[%s2983_s1 + $0x304] sm:$0xf0]  ;;  %v1841_v6 = vld [vmem:[%s2983_s1 + $0x470] sm:$0xf]  ;;  %v1730_v12 = vor.u32 %v1971_v59, %v1729_v58  ;;  %v1594_v21 = vor.u32 %v1937_v0, %v1593_v63 }
  0x2e   :  { %1032 = vmatpush.bf16.msrb.mxu2 %v1698_v15  ;;  %v1999_v9 = vld [vmem:[%s2983_s1 + $0x474] sm:$0xf0]  ;;  %v1870_v10 = vld [vmem:[%s2983_s1 + $0x74] sm:$0xf]  ;;  %v1331_v11 = vld [vmem:[%s2983_s1 + $0x78] sm:$0xf0] }
  0x2f   :  { %1046 = vmatpush.bf16.msrb.mxu3 %v1762_v19  ;;  %v1886_v13 = vld [vmem:[%s2983_s1 + $0xf4] sm:$0xf]  ;;  %v1395_v15 = vld [vmem:[%s2983_s1 + $0xf8] sm:$0xf0]  ;;  %v1721_v16 = vld [vmem:[%s2983_s1 + $0x380] sm:$0xf]  ;;  %v1842_v26 = vor.u32 %v1999_v9, %v1841_v6  ;;  %v1334_v30 = vor.u32 %v1870_v10, %v1331_v11 }
  0x30   :  { %1005 = vmatpush.bf16.msrb.mxu0 %v1562_v24  ;;  %v1969_v17 = vld [vmem:[%s2983_s1 + $0x384] sm:$0xf0]  ;;  %v1253_v18 = vld [vmem:[%s2984_s0 + $0x10] sm:$0xf]  ;;  %v1853_v19 = vld [vmem:[%s2984_s0 + $0x30] sm:$0xf0] }
  0x31   :  { %1019 = vmatpush.bf16.msrb.mxu1 %v1626_v25  ;;  %v1261_v22 = vld [vmem:[%s2984_s0 + $0x18] sm:$0xf]  ;;  %v1854_v23 = vld [vmem:[%s2984_s0 + $0x38] sm:$0xf0]  ;;  %v1902_v24 = vld [vmem:[%s2983_s1 + $0x174] sm:$0xf]  ;;  %v1658_v25 = vor.u32 %v1953_v5, %v1657_v4  ;;  %v1722_v35 = vor.u32 %v1969_v17, %v1721_v16 }
  0x32   :  { %1033 = vmatpush.bf16.msrb.mxu2 %v1690_v27  ;;  %v1459_v27 = vld [vmem:[%s2983_s1 + $0x178] sm:$0xf0]  ;;  %v1849_v28 = vld [vmem:[%s2984_s0 + $0x14] sm:$0xf]  ;;  %v1255_v29 = vld [vmem:[%s2984_s0 + $0x34] sm:$0xf0]  ;;  %v2502_v40 = vor.u32 %v1854_v23, %v1261_v22 }
  0x33   :  { %1047 = vmatpush.bf16.msrb.mxu3 %v1754_v31  ;;  %v1398_v31 = vor.u32 %v1886_v13, %v1395_v15  ;;  %v1850_v32 = vld [vmem:[%s2984_s0 + $0x1c] sm:$0xf]  ;;  %v1833_v33 = vld [vmem:[%s2983_s1 + $0x460] sm:$0xf]  ;;  %v1997_v34 = vld [vmem:[%s2983_s1 + $0x464] sm:$0xf0]  ;;  %v1462_v41 = vor.u32 %v1902_v24, %v1459_v27  ;;  %v2510_v44 = vor.u32 %v1849_v28, %v1255_v29 }
  0x34   :  { %1006 = vmatpush.bf16.msrb.mxu0 %v1554_v36  ;;  %v2491_v36 = vor.u32 %v1853_v19, %v1253_v18  ;;  %v1868_v38 = vld [vmem:[%s2983_s1 + $0x64] sm:$0xf]  ;;  %v1834_v45 = vor.u32 %v1997_v34, %v1833_v33  ;;  %v1451_v47 = vld [vmem:[%s2983_s1 + $0x168] sm:$0xf0]  ;;  %v1825_v50 = vld [vmem:[%s2983_s1 + $0x450] sm:$0xf] }
  0x35   :  { %1020 = vmatpush.bf16.msrb.mxu1 %v1618_v37  ;;  %v1263_v37 = vld [vmem:[%s2984_s0 + $0x3c] sm:$0xf0]  ;;  %v1884_v42 = vld [vmem:[%s2983_s1 + $0xe4] sm:$0xf]  ;;  %v1995_v51 = vld [vmem:[%s2983_s1 + $0x454] sm:$0xf0] }
  0x36   :  { %1034 = vmatpush.bf16.msrb.mxu2 %v1682_v39  ;;  %v1323_v39 = vld [vmem:[%s2983_s1 + $0x68] sm:$0xf0]  ;;  %v1900_v46 = vld [vmem:[%s2983_s1 + $0x164] sm:$0xf]  ;;  %v1866_v53 = vld [vmem:[%s2983_s1 + $0x54] sm:$0xf]  ;;  %v1826_v58 = vor.u32 %v1995_v51, %v1825_v50 }
  0x37   :  { %1048 = vmatpush.bf16.msrb.mxu3 %v1746_v43  ;;  %v1387_v43 = vld [vmem:[%s2983_s1 + $0xe8] sm:$0xf0]  ;;  %v1315_v54 = vld [vmem:[%s2983_s1 + $0x58] sm:$0xf0]  ;;  %v1454_v55 = vor.u32 %v1900_v46, %v1451_v47  ;;  %v1898_v59 = vld [vmem:[%s2983_s1 + $0x154] sm:$0xf] }
  0x38   :  { %1007 = vmatpush.bf16.msrb.mxu0 %v1546_v48  ;;  %v2518_v48 = vor.u32 %v1850_v32, %v1263_v37  ;;  %v1379_v57 = vld [vmem:[%s2983_s1 + $0xd8] sm:$0xf0]  ;;  %v1318_v62 = vor.u32 %v1866_v53, %v1315_v54  ;;  %v1817_v63 = vld [vmem:[%s2983_s1 + $0x440] sm:$0xf]  ;;  %v1993_v0 = vld [vmem:[%s2983_s1 + $0x444] sm:$0xf0] }
  0x39   :  { %1021 = vmatpush.bf16.msrb.mxu1 %v1610_v49  ;;  %v1326_v49 = vor.u32 %v1868_v38, %v1323_v39  ;;  %v1443_v61 = vld [vmem:[%s2983_s1 + $0x158] sm:$0xf0]  ;;  %v1307_v4 = vld [vmem:[%s2983_s1 + $0x48] sm:$0xf0]  ;;  %v1880_v6 = vld [vmem:[%s2983_s1 + $0xc4] sm:$0xf]  ;;  %v1818_v9 = vor.u32 %v1993_v0, %v1817_v63 }
  0x3a   :  { %1035 = vmatpush.bf16.msrb.mxu2 %v1674_v52  ;;  %v1390_v52 = vor.u32 %v1884_v42, %v1387_v43  ;;  %v1446_v5 = vor.u32 %v1898_v59, %v1443_v61  ;;  %v1896_v10 = vld [vmem:[%s2983_s1 + $0x144] sm:$0xf]  ;;  %v1435_v11 = vld [vmem:[%s2983_s1 + $0x148] sm:$0xf0]  ;;  %v1809_v13 = vld [vmem:[%s2983_s1 + $0x430] sm:$0xf] }
  0x3b   :  { %1049 = vmatpush.bf16.msrb.mxu3 %v1738_v56  ;;  %v1882_v56 = vld [vmem:[%s2983_s1 + $0xd4] sm:$0xf]  ;;  %v1991_v15 = vld [vmem:[%s2983_s1 + $0x434] sm:$0xf0]  ;;  %v1299_v18 = vld [vmem:[%s2983_s1 + $0x38] sm:$0xf0]  ;;  %v1438_v19 = vor.u32 %v1896_v10, %v1435_v11 }
  0x3c   :  { %1008 = vmatpush.bf16.msrb.mxu0 %v1538_v1  ;;  %v1382_v1 = vor.u32 %v1882_v56, %v1379_v57  ;;  %v1862_v17 = vld [vmem:[%s2983_s1 + $0x34] sm:$0xf]  ;;  %v1810_v22 = vor.u32 %v1991_v15, %v1809_v13  ;;  %v1427_v24 = vld [vmem:[%s2983_s1 + $0x138] sm:$0xf0]  ;;  %v1989_v27 = vld [vmem:[%s2983_s1 + $0x424] sm:$0xf0] }
  0x3d   :  { %1022 = vmatpush.bf16.msrb.mxu1 %v1602_v3  ;;  %v1864_v3 = vld [vmem:[%s2983_s1 + $0x44] sm:$0xf]  ;;  %v1894_v23 = vld [vmem:[%s2983_s1 + $0x134] sm:$0xf]  ;;  %v1355_v33 = vld [vmem:[%s2983_s1 + $0xa8] sm:$0xf0] }
  0x3e   :  { %1036 = vmatpush.bf16.msrb.mxu2 %v1666_v7  ;;  %v1371_v7 = vld [vmem:[%s2983_s1 + $0xc8] sm:$0xf0]  ;;  %v1860_v29 = vld [vmem:[%s2983_s1 + $0x24] sm:$0xf]  ;;  %v1793_v39 = vld [vmem:[%s2983_s1 + $0x410] sm:$0xf] }
  0x3f   :  { %1050 = vmatpush.bf16.msrb.mxu3 %v1730_v12  ;;  %v1310_v12 = vor.u32 %v1864_v3, %v1307_v4  ;;  %v1374_v16 = vor.u32 %v1880_v6, %v1371_v7  ;;  %v1876_v32 = vld [vmem:[%s2983_s1 + $0xa4] sm:$0xf]  ;;  %v1419_v37 = vld [vmem:[%s2983_s1 + $0x128] sm:$0xf0]  ;;  %v1858_v43 = vld [vmem:[%s2983_s1 + $0x14] sm:$0xf] }
  0x40   :  { %1009 = vmatpush.bf16.msrb.mxu0 %v1530_v20  ;;  %v1878_v20 = vld [vmem:[%s2983_s1 + $0xb4] sm:$0xf]  ;;  %v1358_v42 = vor.u32 %v1876_v32, %v1355_v33  ;;  %v1411_v51 = vld [vmem:[%s2983_s1 + $0x118] sm:$0xf0]  ;;  %v1785_v53 = vld [vmem:[%s2983_s1 + $0x400] sm:$0xf] }
  0x41   :  { %1023 = vmatpush.bf16.msrb.mxu1 %v1594_v21  ;;  %v1363_v21 = vld [vmem:[%s2983_s1 + $0xb8] sm:$0xf0]  ;;  %v1874_v46 = vld [vmem:[%s2983_s1 + $0x94] sm:$0xf]  ;;  %v1985_v54 = vld [vmem:[%s2983_s1 + $0x404] sm:$0xf0] }
  0x42   :  { %1037 = vmatpush.bf16.msrb.mxu2 %v1658_v25  ;;  %v1302_v25 = vor.u32 %v1862_v17, %v1299_v18  ;;  %v1366_v28 = vor.u32 %v1878_v20, %v1363_v21  ;;  %v1890_v50 = vld [vmem:[%s2983_s1 + $0x114] sm:$0xf]  ;;  %v1275_v57 = vld [vmem:[%s2983_s1 + $0x8] sm:$0xf0]  ;;  %v1523_v63 = vld [vmem:[%s2983_s1 + $0x1f8] sm:$0xf0]  ;;  %v1786_v6 = vor.u32 %v1985_v54, %v1785_v53 }
  0x43   :  { %1051 = vmatpush.bf16.msrb.mxu3 %v1722_v35  ;;  %1010 = vmatmul.bf16.vlgmr.msrb.gmra.mxu0 %v2491_v36  ;;  %v1892_v35 = vld [vmem:[%s2983_s1 + $0x124] sm:$0xf]  ;;  %v1339_v59 = vld [vmem:[%s2983_s1 + $0x88] sm:$0xf0]  ;;  %v1934_v0 = vld [vmem:[%s2983_s1 + $0x274] sm:$0xf] }
  0x44   :  { %1058 = vmatpush.bf16.msra.mxu0 %v1842_v26  ;;  %1024 = vmatmul.bf16.vlgmr.msrb.gmra.mxu1 %v2510_v44  ;;  %v1801_v26 = vld [vmem:[%s2983_s1 + $0x420] sm:$0xf]  ;;  %v1422_v47 = vor.u32 %v1892_v35, %v1419_v37  ;;  %v1587_v3 = vld [vmem:[%s2983_s1 + $0x278] sm:$0xf0]  ;;  %v1950_v4 = vld [vmem:[%s2983_s1 + $0x2f4] sm:$0xf] }
  0x45   :  { %1072 = vmatpush.bf16.msra.mxu1 %v1334_v30  ;;  %1038 = vmatmul.bf16.vlgmr.msrb.gmra.mxu2 %v2502_v40  ;;  %v1291_v30 = vld [vmem:[%s2983_s1 + $0x28] sm:$0xf0]  ;;  %v1802_v34 = vor.u32 %v1989_v27, %v1801_v26  ;;  %v1888_v7 = vld [vmem:[%s2983_s1 + $0x104] sm:$0xf]  ;;  %v1269_v10 = vld [vmem:[%s2984_s0 + $0x20] sm:$0xf]  ;;  %v1590_v18 = vor.u32 %v1934_v0, %v1587_v3 }
  0x46   :  { %1086 = vmatpush.bf16.msra.mxu2 %v1398_v31  ;;  %1052 = vmatmul.bf16.vlgmr.msrb.gmra.mxu3 %v2518_v48  ;;  %v1430_v31 = vor.u32 %v1894_v23, %v1427_v24  ;;  %v1294_v38 = vor.u32 %v1860_v29, %v1291_v30  ;;  %v1855_v13 = vld [vmem:[%s2984_s0 + $0x40] sm:$0xf0]  ;;  %v1966_v15 = vld [vmem:[%s2983_s1 + $0x374] sm:$0xf]  ;;  %v1515_v20 = vld [vmem:[%s2983_s1 + $0x1e8] sm:$0xf0] }
  0x47   :  { %1100 = vmatpush.bf16.msra.mxu3 %v1462_v41  ;;  %v1987_v41 = vld [vmem:[%s2983_s1 + $0x414] sm:$0xf0]  ;;  %v1932_v23 = vld [vmem:[%s2983_s1 + $0x264] sm:$0xf]  ;;  %v1579_v24 = vld [vmem:[%s2983_s1 + $0x268] sm:$0xf0] }
  0x48   :  { %1059 = vmatpush.bf16.msra.mxu0 %v1834_v45  ;;  %v1283_v45 = vld [vmem:[%s2983_s1 + $0x18] sm:$0xf0]  ;;  %v1948_v27 = vld [vmem:[%s2983_s1 + $0x2e4] sm:$0xf]  ;;  %v1582_v32 = vor.u32 %v1932_v23, %v1579_v24  ;;  %v1914_v33 = vld [vmem:[%s2983_s1 + $0x1d4] sm:$0xf] }
  0x49   :  { %1073 = vmatpush.bf16.msra.mxu1 %v1326_v49  ;;  %v1347_v49 = vld [vmem:[%s2983_s1 + $0x98] sm:$0xf0]  ;;  %v1286_v56 = vor.u32 %v1858_v43, %v1283_v45  ;;  %v1964_v30 = vld [vmem:[%s2983_s1 + $0x364] sm:$0xf]  ;;  %v1930_v37 = vld [vmem:[%s2983_s1 + $0x254] sm:$0xf] }
  0x4a   :  { %1087 = vmatpush.bf16.msra.mxu2 %v1390_v52  ;;  %v1794_v52 = vor.u32 %v1987_v41, %v1793_v39  ;;  %v1350_v61 = vor.u32 %v1874_v46, %v1347_v49  ;;  %v1946_v41 = vld [vmem:[%s2983_s1 + $0x2d4] sm:$0xf]  ;;  %v1699_v46 = vld [vmem:[%s2983_s1 + $0x358] sm:$0xf0]  ;;  %v1912_v49 = vld [vmem:[%s2983_s1 + $0x1c4] sm:$0xf] }
  0x4b   :  { %1101 = vmatpush.bf16.msra.mxu3 %v1454_v55  ;;  %v1856_v55 = vld [vmem:[%s2983_s1 + $0x4] sm:$0xf]  ;;  %v1962_v45 = vld [vmem:[%s2983_s1 + $0x354] sm:$0xf]  ;;  %v1619_v3 = vld [vmem:[%s2983_s1 + $0x2b8] sm:$0xf0] }
  0x4c   :  { %1060 = vmatpush.bf16.msra.mxu0 %v1826_v58  ;;  %v1872_v58 = vld [vmem:[%s2983_s1 + $0x84] sm:$0xf]  ;;  %v1278_v11 = vor.u32 %v1856_v55, %v1275_v57  ;;  %v1702_v53 = vor.u32 %v1962_v45, %v1699_v46  ;;  %v1475_v23 = vld [vmem:[%s2983_s1 + $0x198] sm:$0xf0] }
  0x4d   :  { %1074 = vmatpush.bf16.msra.mxu1 %v1318_v62  ;;  %v1918_v62 = vld [vmem:[%s2983_s1 + $0x1f4] sm:$0xf]  ;;  %v1342_v17 = vor.u32 %v1872_v58, %v1339_v59  ;;  %v1944_v54 = vld [vmem:[%s2983_s1 + $0x2c4] sm:$0xf]  ;;  %v1491_v59 = vld [vmem:[%s2983_s1 + $0x1b8] sm:$0xf0] }
  0x4e   :  { %1088 = vmatpush.bf16.msra.mxu2 %v1382_v1  ;;  %v1414_v1 = vor.u32 %v1890_v50, %v1411_v51  ;;  %v1499_v50 = vld [vmem:[%s2983_s1 + $0x1c8] sm:$0xf0]  ;;  %v1910_v58 = vld [vmem:[%s2983_s1 + $0x1b4] sm:$0xf]  ;;  %v1779_v45 = vld [vmem:[%s2983_s1 + $0x3f8] sm:$0xf0] }
  0x4f   :  { %1102 = vmatpush.bf16.msra.mxu3 %v1446_v5  ;;  %v1651_v5 = vld [vmem:[%s2983_s1 + $0x2f8] sm:$0xf0]  ;;  %v1502_v55 = vor.u32 %v1912_v49, %v1499_v50  ;;  %v1998_v49 = vld [vmem:[%s2983_s1 + $0x474] sm:$0xf] }
  0x50   :  { %1061 = vmatpush.bf16.msra.mxu0 %v1818_v9  ;;  %v1403_v9 = vld [vmem:[%s2983_s1 + $0x108] sm:$0xf0]  ;;  %v1654_v21 = vor.u32 %v1950_v4, %v1651_v5  ;;  %v1494_v4 = vor.u32 %v1910_v58, %v1491_v59  ;;  %v1958_v5 = vld [vmem:[%s2983_s1 + $0x334] sm:$0xf]  ;;  %v1843_v50 = vld [vmem:[%s2983_s1 + $0x478] sm:$0xf0] }
  0x51   :  { %1075 = vmatpush.bf16.msra.mxu1 %v1310_v12  ;;  %v1526_v12 = vor.u32 %v1918_v62, %v1523_v63  ;;  %v1926_v62 = vld [vmem:[%s2983_s1 + $0x234] sm:$0xf]  ;;  %v1555_v63 = vld [vmem:[%s2983_s1 + $0x238] sm:$0xf0]  ;;  %v1996_v58 = vld [vmem:[%s2983_s1 + $0x464] sm:$0xf] }
  0x52   :  { %1089 = vmatpush.bf16.msra.mxu2 %v1374_v16  ;;  %v1715_v16 = vld [vmem:[%s2983_s1 + $0x378] sm:$0xf0]  ;;  %v1835_v59 = vld [vmem:[%s2983_s1 + $0x468] sm:$0xf0] }
  0x53   :  { %1103 = vmatpush.bf16.msra.mxu3 %v1438_v19  ;;  %v1916_v19 = vld [vmem:[%s2983_s1 + $0x1e4] sm:$0xf]  ;;  %v1718_v26 = vor.u32 %v1966_v15, %v1715_v16 }
  0x54   :  { %1062 = vmatpush.bf16.msra.mxu0 %v1810_v22  ;;  %v1406_v22 = vor.u32 %v1888_v7, %v1403_v9  ;;  %v1518_v29 = vor.u32 %v1916_v19, %v1515_v20  ;;  %v1558_v7 = vor.u32 %v1926_v62, %v1555_v63  ;;  %v1908_v9 = vld [vmem:[%s2983_s1 + $0x1a4] sm:$0xf]  ;;  %v1675_v20 = vld [vmem:[%s2983_s1 + $0x328] sm:$0xf0]  ;;  %v1838_v62 = vor.u32 %v1996_v58, %v1835_v59  ;;  %v1978_v63 = vld [vmem:[%s2983_s1 + $0x3d4] sm:$0xf] }
  0x55   :  { %1076 = vmatpush.bf16.msra.mxu1 %v1302_v25  ;;  %v2710_v25 = vor.u32 %v1855_v13, %v1269_v10  ;;  %v1483_v10 = vld [vmem:[%s2983_s1 + $0x1a8] sm:$0xf0]  ;;  %v1940_v16 = vld [vmem:[%s2983_s1 + $0x2a4] sm:$0xf] }
  0x56   :  { %1090 = vmatpush.bf16.msra.mxu2 %v1366_v28  ;;  %v1643_v28 = vld [vmem:[%s2983_s1 + $0x2e8] sm:$0xf0]  ;;  %v1956_v19 = vld [vmem:[%s2983_s1 + $0x324] sm:$0xf] }
  0x57   :  { %1104 = vmatpush.bf16.msra.mxu3 %v1430_v31  ;;  %v1707_v31 = vld [vmem:[%s2983_s1 + $0x368] sm:$0xf0]  ;;  %v1646_v35 = vor.u32 %v1948_v27, %v1643_v28  ;;  %v1539_v27 = vld [vmem:[%s2983_s1 + $0x218] sm:$0xf0]  ;;  %v1678_v28 = vor.u32 %v1956_v19, %v1675_v20 }
  0x58   :  { %1063 = vmatpush.bf16.msra.mxu0 %v1802_v34  ;;  %v1507_v34 = vld [vmem:[%s2983_s1 + $0x1d8] sm:$0xf0]  ;;  %v1710_v39 = vor.u32 %v1964_v30, %v1707_v31  ;;  %v1547_v13 = vld [vmem:[%s2983_s1 + $0x228] sm:$0xf0] }
  0x59   :  { %1077 = vmatpush.bf16.msra.mxu1 %v1294_v38  ;;  %v1571_v38 = vld [vmem:[%s2983_s1 + $0x258] sm:$0xf0]  ;;  %v1510_v43 = vor.u32 %v1914_v33, %v1507_v34  ;;  %v1904_v34 = vld [vmem:[%s2983_s1 + $0x184] sm:$0xf]  ;;  %v1803_v19 = vld [vmem:[%s2983_s1 + $0x428] sm:$0xf0] }
  0x5a   :  { %1091 = vmatpush.bf16.msra.mxu2 %v1358_v42  ;;  %v1635_v42 = vld [vmem:[%s2983_s1 + $0x2d8] sm:$0xf0] }
  0x5b   :  { %1105 = vmatpush.bf16.msra.mxu3 %v1422_v47  ;;  %v1574_v47 = vor.u32 %v1930_v37, %v1571_v38  ;;  %v1638_v51 = vor.u32 %v1946_v41, %v1635_v42  ;;  %v1603_v30 = vld [vmem:[%s2983_s1 + $0x298] sm:$0xf0]  ;;  %v1467_v37 = vld [vmem:[%s2983_s1 + $0x188] sm:$0xf0]  ;;  %v1920_v38 = vld [vmem:[%s2983_s1 + $0x204] sm:$0xf] }
  0x5c   :  { %1064 = vmatpush.bf16.msra.mxu0 %v1794_v52  ;;  %v1928_v52 = vld [vmem:[%s2983_s1 + $0x244] sm:$0xf]  ;;  %v1667_v33 = vld [vmem:[%s2983_s1 + $0x318] sm:$0xf0] }
  0x5d   :  { %1078 = vmatpush.bf16.msra.mxu1 %v1286_v56  ;;  %v1960_v56 = vld [vmem:[%s2983_s1 + $0x344] sm:$0xf] }
  0x5e   :  { %1092 = vmatpush.bf16.msra.mxu2 %v1350_v61  ;;  %v1936_v42 = vld [vmem:[%s2983_s1 + $0x284] sm:$0xf] }
  0x5f   :  { %1106 = vmatpush.bf16.msra.mxu3 %v1414_v1  ;;  %v1942_v1 = vld [vmem:[%s2983_s1 + $0x2b4] sm:$0xf] }
  0x60   :  { %1065 = vmatpush.bf16.msra.mxu0 %v1786_v6  ;;  %v1683_v6 = vld [vmem:[%s2983_s1 + $0x338] sm:$0xf0] }
  0x61   :  { %1079 = vmatpush.bf16.msra.mxu1 %v1278_v11  ;;  %v1622_v11 = vor.u32 %v1942_v1, %v1619_v3  ;;  %v1686_v15 = vor.u32 %v1958_v5, %v1683_v6  ;;  %v1994_v1 = vld [vmem:[%s2983_s1 + $0x454] sm:$0xf]  ;;  %v1827_v3 = vld [vmem:[%s2983_s1 + $0x458] sm:$0xf0]  ;;  %v1755_v6 = vld [vmem:[%s2983_s1 + $0x3c8] sm:$0xf0] }
  0x62   :  { %1093 = vmatpush.bf16.msra.mxu2 %v1342_v17  ;;  %v1611_v17 = vld [vmem:[%s2983_s1 + $0x2a8] sm:$0xf0]  ;;  %v1830_v5 = vor.u32 %v1994_v1, %v1827_v3 }
  0x63   :  { %1107 = vmatpush.bf16.msra.mxu3 %v1406_v22  ;;  %1066 = vmatmul.bf16.vlgmr.msra.gmra.mxu0 %v2710_v25  ;;  %v1906_v22 = vld [vmem:[%s2983_s1 + $0x194] sm:$0xf]  ;;  %v1614_v24 = vor.u32 %v1940_v16, %v1611_v17  ;;  %v1972_v16 = vld [vmem:[%s2983_s1 + $0x3a4] sm:$0xf]  ;;  %v1739_v17 = vld [vmem:[%s2983_s1 + $0x3a8] sm:$0xf0] }
  0x64   :  { %1114 = vmatpush.bf16.msrb.mxu0 %v1526_v12  ;;  %1080 = vmatmul.bf16.vlgmr.msra.gmra.mxu1 %v2278_v60  ;;  %v1691_v60 = vld [vmem:[%s2983_s1 + $0x348] sm:$0xf0]  ;;  %v1924_v12 = vld [vmem:[%s2983_s1 + $0x224] sm:$0xf]  ;;  %v1478_v31 = vor.u32 %v1906_v22, %v1475_v23  ;;  %v1742_v20 = vor.u32 %v1972_v16, %v1739_v17  ;;  %v1970_v22 = vld [vmem:[%s2983_s1 + $0x394] sm:$0xf] }
  0x65   :  { %1128 = vmatpush.bf16.msrb.mxu1 %v1590_v18  ;;  %1094 = vmatmul.bf16.vlgmr.msra.gmra.mxu2 %v2308_v8  ;;  %v1563_v8 = vld [vmem:[%s2983_s1 + $0x248] sm:$0xf0]  ;;  %v1694_v0 = vor.u32 %v1960_v56, %v1691_v60  ;;  %v1486_v18 = vor.u32 %v1908_v9, %v1483_v10  ;;  %v1980_v56 = vld [vmem:[%s2983_s1 + $0x3e4] sm:$0xf]  ;;  %v1974_v9 = vld [vmem:[%s2983_s1 + $0x3b4] sm:$0xf] }
  0x66   :  { %1142 = vmatpush.bf16.msrb.mxu2 %v1654_v21  ;;  %1108 = vmatmul.bf16.vlgmr.msra.gmra.mxu3 %v2292_v2  ;;  %v1627_v2 = vld [vmem:[%s2983_s1 + $0x2c8] sm:$0xf0]  ;;  %v1566_v57 = vor.u32 %v1928_v52, %v1563_v8  ;;  %v1550_v21 = vor.u32 %v1924_v12, %v1547_v13  ;;  %v1952_v52 = vld [vmem:[%s2983_s1 + $0x304] sm:$0xf]  ;;  %v1747_v10 = vld [vmem:[%s2983_s1 + $0x3b8] sm:$0xf0] }
  0x67   :  { %1156 = vmatpush.bf16.msrb.mxu3 %v1718_v26  ;;  %v1630_v61 = vor.u32 %v1944_v54, %v1627_v2  ;;  %v1922_v26 = vld [vmem:[%s2983_s1 + $0x214] sm:$0xf]  ;;  %v1659_v8 = vld [vmem:[%s2983_s1 + $0x308] sm:$0xf0]  ;;  %v1811_v12 = vld [vmem:[%s2983_s1 + $0x438] sm:$0xf0]  ;;  %v1750_v13 = vor.u32 %v1974_v9, %v1747_v10 }
  0x68   :  { %1115 = vmatpush.bf16.msrb.mxu0 %v1518_v29  ;;  %v1938_v29 = vld [vmem:[%s2983_s1 + $0x294] sm:$0xf]  ;;  %v1771_v60 = vld [vmem:[%s2983_s1 + $0x3e8] sm:$0xf0]  ;;  %v1731_v23 = vld [vmem:[%s2983_s1 + $0x398] sm:$0xf0] }
  0x69   :  { %1129 = vmatpush.bf16.msrb.mxu1 %v1582_v32  ;;  %v1954_v32 = vld [vmem:[%s2983_s1 + $0x314] sm:$0xf]  ;;  %v1606_v41 = vor.u32 %v1938_v29, %v1603_v30  ;;  %v1968_v29 = vld [vmem:[%s2983_s1 + $0x384] sm:$0xf]  ;;  %v1723_v30 = vld [vmem:[%s2983_s1 + $0x388] sm:$0xf0] }
  0x6a   :  { %1143 = vmatpush.bf16.msrb.mxu2 %v1646_v35  ;;  %v1542_v35 = vor.u32 %v1922_v26, %v1539_v27  ;;  %v1670_v46 = vor.u32 %v1954_v32, %v1667_v33  ;;  %v1795_v26 = vld [vmem:[%s2983_s1 + $0x418] sm:$0xf0]  ;;  %v1734_v27 = vor.u32 %v1970_v22, %v1731_v23  ;;  %v1787_v32 = vld [vmem:[%s2983_s1 + $0x408] sm:$0xf0]  ;;  %v1726_v33 = vor.u32 %v1968_v29, %v1723_v30  ;;  %v1213_v17 = vld [vmem:[%s2985_s2] sm:$0x3] }
  0x6b   :  { %1157 = vmatpush.bf16.msrb.mxu3 %v1710_v39  ;;  %v1531_v39 = vld [vmem:[%s2983_s1 + $0x208] sm:$0xf0]  ;;  %v1215_v22 = vperm.slane %v1213_v17, 0 }
  0x6c   :  { %1116 = vmatpush.bf16.msrb.mxu0 %v1510_v43  ;;  %v1982_v43 = vld [vmem:[%s2983_s1 + $0x3f4] sm:$0xf] }
  0x6d   :  { %1130 = vmatpush.bf16.msrb.mxu1 %v1574_v47  ;;  %v1595_v47 = vld [vmem:[%s2983_s1 + $0x288] sm:$0xf0]  ;;  %v1782_v54 = vor.u32 %v1982_v43, %v1779_v45 }
  0x6e   :  { %1144 = vmatpush.bf16.msrb.mxu2 %v1638_v51  ;;  %v1470_v51 = vor.u32 %v1904_v34, %v1467_v37  ;;  %v1598_v2 = vor.u32 %v1936_v42, %v1595_v47 }
  0x6f   :  { %1158 = vmatpush.bf16.msrb.mxu3 %v1702_v53  ;;  %v1534_v53 = vor.u32 %v1920_v38, %v1531_v39 }
  0x70   :  { %1117 = vmatpush.bf16.msrb.mxu0 %v1502_v55  ;;  %v1846_v55 = vor.u32 %v1998_v49, %v1843_v50 }
  0x71   :  { %1131 = vmatpush.bf16.msrb.mxu1 %v1566_v57  ;;  %v1662_v57 = vor.u32 %v1952_v52, %v1659_v8 }
  0x72   :  { %1145 = vmatpush.bf16.msrb.mxu2 %v1630_v61  ;;  %v1774_v61 = vor.u32 %v1980_v56, %v1771_v60 }
  0x73   :  { %1159 = vmatpush.bf16.msrb.mxu3 %v1694_v0  ;;  %v1763_v0 = vld [vmem:[%s2983_s1 + $0x3d8] sm:$0xf0] }
  0x74   :  { %1118 = vmatpush.bf16.msrb.mxu0 %v1494_v4  ;;  %v1766_v4 = vor.u32 %v1978_v63, %v1763_v0 }
  0x75   :  { %1132 = vmatpush.bf16.msrb.mxu1 %v1558_v7 }
  0x76   :  { %1146 = vmatpush.bf16.msrb.mxu2 %v1622_v11  ;;  %v1990_v11 = vld [vmem:[%s2983_s1 + $0x434] sm:$0xf] }
  0x77   :  { %1160 = vmatpush.bf16.msrb.mxu3 %v1686_v15  ;;  %v1814_v15 = vor.u32 %v1990_v11, %v1811_v12 }
  0x78   :  { %1119 = vmatpush.bf16.msrb.mxu0 %v1486_v18  ;;  %v1988_v18 = vld [vmem:[%s2983_s1 + $0x424] sm:$0xf] }
  0x79   :  { %1133 = vmatpush.bf16.msrb.mxu1 %v1550_v21  ;;  %v1806_v21 = vor.u32 %v1988_v18, %v1803_v19 }
  0x7a   :  { %1147 = vmatpush.bf16.msrb.mxu2 %v1614_v24  ;;  %v1986_v24 = vld [vmem:[%s2983_s1 + $0x414] sm:$0xf] }
  0x7b   :  { %1161 = vmatpush.bf16.msrb.mxu3 %v1678_v28  ;;  %v1798_v28 = vor.u32 %v1986_v24, %v1795_v26 }
  0x7c   :  { %1120 = vmatpush.bf16.msrb.mxu0 %v1478_v31  ;;  %v1984_v31 = vld [vmem:[%s2983_s1 + $0x404] sm:$0xf] }
  0x7d   :  { %1134 = vmatpush.bf16.msrb.mxu1 %v1542_v35  ;;  %v1790_v34 = vor.u32 %v1984_v31, %v1787_v32  ;;  %v1216_v31 = vperm.slane %v1213_v17, 1 }
  0x7e   :  { %1148 = vmatpush.bf16.msrb.mxu2 %v1606_v41 }
  0x7f   :  { %1162 = vmatpush.bf16.msrb.mxu3 %v1670_v46 }
  0x80   :  { %1121 = vmatpush.bf16.msrb.mxu0 %v1470_v51 }
  0x81   :  { %1135 = vmatpush.bf16.msrb.mxu1 %v1534_v53 }
  0x82   :  { %1149 = vmatpush.bf16.msrb.mxu2 %v1598_v2 }
  0x83   :  { %1163 = vmatpush.bf16.msrb.mxu3 %v1662_v57  ;;  %1122 = vmatmul.bf16.vlgmr.msrb.gmra.mxu0 %v2319_v14  ;;  %v1976_v14 = vld [vmem:[%s2983_s1 + $0x3c4] sm:$0xf] }
  0x84   :  { %1170 = vmatpush.bf16.msra.mxu0 %v1782_v54  ;;  %1136 = vmatmul.bf16.vlgmr.msrb.gmra.mxu1 %v2491_v36  ;;  %v1992_v36 = vld [vmem:[%s2983_s1 + $0x444] sm:$0xf] }
  0x85   :  { %1184 = vmatpush.bf16.msra.mxu1 %v1846_v55  ;;  %1150 = vmatmul.bf16.vlgmr.msrb.gmra.mxu2 %v2510_v44  ;;  %v1819_v44 = vld [vmem:[%s2983_s1 + $0x448] sm:$0xf0] }
  0x86   :  { %1164 = vmatmul.bf16.vlgmr.msrb.gmra.mxu3 %v2502_v40  ;;  %v1758_v40 = vor.u32 %v1976_v14, %v1755_v6  ;;  %v1822_v7 = vor.u32 %v1992_v36, %v1819_v44 }
  0x88   :  { %1171 = vmatpush.bf16.msra.mxu0 %v1774_v61 }
  0x89   :  { %1185 = vmatpush.bf16.msra.mxu1 %v1838_v62 }
  0x8c   :  { %1172 = vmatpush.bf16.msra.mxu0 %v1766_v4 }
  0x8d   :  { %1186 = vmatpush.bf16.msra.mxu1 %v1830_v5 }
  0x90   :  { %1173 = vmatpush.bf16.msra.mxu0 %v1758_v40 }
  0x91   :  { %1187 = vmatpush.bf16.msra.mxu1 %v1822_v7 }
  0x94   :  { %1174 = vmatpush.bf16.msra.mxu0 %v1750_v13 }
  0x95   :  { %1188 = vmatpush.bf16.msra.mxu1 %v1814_v15 }
  0x98   :  { %1175 = vmatpush.bf16.msra.mxu0 %v1742_v20 }
  0x99   :  { %1189 = vmatpush.bf16.msra.mxu1 %v1806_v21 }
  0x9c   :  { %1176 = vmatpush.bf16.msra.mxu0 %v1734_v27 }
  0x9d   :  { %1190 = vmatpush.bf16.msra.mxu1 %v1798_v28 }
  0xa0   :  { %1177 = vmatpush.bf16.msra.mxu0 %v1726_v33  ;;  %v955_v37 = vpop.f32.mrf.mxu0 }
  0xa1   :  { %1191 = vmatpush.bf16.msra.mxu1 %v1790_v34  ;;  %v969_v35 = vpop.f32.mrf.mxu1 }
  0xa3   :  { %1178 = vmatmul.bf16.vlgmr.msra.gmra.mxu0 %v2518_v48 }
  0xa4   :  { %1192 = vmatmul.bf16.vlgmr.msra.gmra.mxu1 %v2710_v25  ;;  %v970_v25 = vadd.f32 %v969_v35, %v955_v37 }
  0xa8   :  { %v983_v38 = vpop.f32.mrf.mxu2  ;;  %v957_v41 = vpop.f32.mrf.mxu0 }
  0xa9   :  { %v971_v39 = vpop.f32.mrf.mxu1  ;;  %v997_v42 = vpop.f32.mrf.mxu3  ;;  %v984_v57 = vadd.f32 %v983_v38, %v970_v25 }
  0xaa   :  { %v972_v3 = vadd.f32 %v971_v39, %v957_v41 }
  0xab   :  { %v998_v61 = vadd.f32 %v997_v42, %v984_v57 }
  0xb0   :  { %v985_v43 = vpop.f32.mrf.mxu2 }
  0xb1   :  { %v999_v46 = vpop.f32.mrf.mxu3  ;;  %v986_v14 = vadd.f32 %v985_v43, %v972_v3 }
  0xb3   :  { %v1000_v9 = vadd.f32 %v999_v46, %v986_v14 }
  0xc0   :  { %v1011_v47 = vpop.f32.mrf.mxu0 }
  0xc1   :  { %v1025_v45 = vpop.f32.mrf.mxu1  ;;  %v1012_v4 = vadd.f32 %v1011_v47, %v998_v61 }
  0xc3   :  { %v1026_v6 = vadd.f32 %v1025_v45, %v1012_v4 }
  0xc8   :  { %v1039_v49 = vpop.f32.mrf.mxu2  ;;  %v1013_v51 = vpop.f32.mrf.mxu0 }
  0xc9   :  { %v1027_v50 = vpop.f32.mrf.mxu1  ;;  %v1053_v52 = vpop.f32.mrf.mxu3  ;;  %v1040_v10 = vadd.f32 %v1039_v49, %v1026_v6  ;;  %v1014_v13 = vadd.f32 %v1013_v51, %v1000_v9 }
  0xcb   :  { %v1054_v18 = vadd.f32 %v1053_v52, %v1040_v10  ;;  %v1028_v20 = vadd.f32 %v1027_v50, %v1014_v13 }
  0xd0   :  { %v1041_v8 = vpop.f32.mrf.mxu2 }
  0xd1   :  { %v1055_v48 = vpop.f32.mrf.mxu3  ;;  %v1042_v27 = vadd.f32 %v1041_v8, %v1028_v20 }
  0xd3   :  { %v1056_v37 = vadd.f32 %v1055_v48, %v1042_v27 }
  0xe0   :  { %v1067_v54 = vpop.f32.mrf.mxu0 }
  0xe1   :  { %v1081_v53 = vpop.f32.mrf.mxu1  ;;  %v1068_v21 = vadd.f32 %v1067_v54, %v1054_v18 }
  0xe3   :  { %v1219_v32 = vadd.f32 %v1215_v22, %v1068_v21 }
  0xe5   :  { %v1223_v39 = vmax.f32 %v1219_v32, 0.0 }
  0xe8   :  { %v1095_v2 = vpop.f32.mrf.mxu2  ;;  %v1069_v56 = vpop.f32.mrf.mxu0 }
  0xe9   :  { %v1083_v55 = vpop.f32.mrf.mxu1  ;;  %v1109_v60 = vpop.f32.mrf.mxu3  ;;  %v1096_v58 = vadd.f32 %v1095_v2, %v1081_v53  ;;  %v1070_v41 = vadd.f32 %v1069_v56, %v1056_v37 }
  0xeb   :  { %v1110_v63 = vadd.f32 %v1109_v60, %v1096_v58  ;;  %v1221_v50 = vadd.f32 %v1215_v22, %v1070_v41 }
  0xed   :  { %v1225_v8 = vmax.f32 %v1221_v50, 0.0 }
  0xf0   :  { %v1097_v59 = vpop.f32.mrf.mxu2 }
  0xf1   :  { %v1111_v1 = vpop.f32.mrf.mxu3  ;;  %v1098_v44 = vadd.f32 %v1097_v59, %v1083_v55 }
  0xf3   :  { %v1112_v15 = vadd.f32 %v1111_v1, %v1098_v44 }
 0x100   :  { %v1123_v62 = vpop.f32.mrf.mxu0 }
 0x101   :  { %v1137_v0 = vpop.f32.mrf.mxu1  ;;  %v1124_v5 = vadd.f32 %v1123_v62, %v1110_v63 }
 0x103   :  { %v1138_v40 = vadd.f32 %v1137_v0, %v1124_v5 }
 0x108   :  { %v1151_v36 = vpop.f32.mrf.mxu2  ;;  %v1125_v7 = vpop.f32.mrf.mxu0 }
 0x109   :  { %v1139_v11 = vpop.f32.mrf.mxu1  ;;  %v1165_v12 = vpop.f32.mrf.mxu3  ;;  %v1152_v16 = vadd.f32 %v1151_v36, %v1138_v40  ;;  %v1126_v19 = vadd.f32 %v1125_v7, %v1112_v15 }
 0x10b   :  { %v1166_v23 = vadd.f32 %v1165_v12, %v1152_v16  ;;  %v1140_v28 = vadd.f32 %v1139_v11, %v1126_v19 }
 0x110   :  { %v1153_v24 = vpop.f32.mrf.mxu2 }
 0x111   :  { %v1154_v33 = vadd.f32 %v1153_v24, %v1140_v28  ;;  %v1167_v35 = vpop.f32.mrf.mxu3 }
 0x113   :  { %v1168_v42 = vadd.f32 %v1167_v35, %v1154_v33 }
 0x120   :  { %v1179_v26 = vpop.f32.mrf.mxu0 }
 0x121   :  { %v1180_v29 = vadd.f32 %v1179_v26, %v1166_v23  ;;  %v1193_v30 = vpop.f32.mrf.mxu1 }
 0x123   :  { %v1194_v34 = vadd.f32 %v1193_v30, %v1180_v29 }
 0x125   :  { %v1220_v38 = vadd.f32 %v1216_v31, %v1194_v34 }
 0x127   :  { %v1224_v43 = vmax.f32 %v1220_v38, 0.0 }
 0x128   :  { %v1181_v45 = vpop.f32.mrf.mxu0 }
 0x129   :  { %v1227_v46 = vpack.c.bf16 %v1224_v43, %v1223_v39  ;;  %v1182_v47 = vadd.f32 %v1181_v45, %v1168_v42  ;;  %v1195_v49 = vpop.f32.mrf.mxu1 }
 0x12b   :  { %1229 = vst [vmem:[%s2986_s3] sm:$0xff] %v1227_v46  ;;  %v1196_v51 = vadd.f32 %v1195_v49, %v1182_v47 }
 0x12d   :  { %v1222_v52 = vadd.f32 %v1216_v31, %v1196_v51 }
 0x12f   :  { %v1226_v53 = vmax.f32 %v1222_v52, 0.0 }
 0x131   :  { %v1228_v54 = vpack.c.bf16 %v1226_v53, %v1225_v8 }
 0x133   :  { %1230 = vst [vmem:[%s2986_s3 + $0x8] sm:$0xff] %v1228_v54 }

// kernel: vae_forward.17
= control target key start
LH: loop header
LB: loop body
LE: loop exit
PB: predicated region body
PF: predicated region fallthrough
CT: control target
= control target key end

     0   :  { %s1534_s1 = inlined_call_operand.vmem [shape: bf16[512,256], index: 1, kind: input, shape index: {}]   ;;  %s1535_s0 = inlined_call_operand.vmem [shape: bf16[32,512], index: 0, kind: input, shape index: {}]   ;;  %s1536_s2 = inlined_call_operand.vmem [shape: f32[1,256], index: 2, kind: input, shape index: {}]   ;;  %s1537_s3 = inlined_call_operand.vmem [shape: bf16[32,256], index: 3, kind: output, shape index: {}]  }
   0x1   :  { %v769_v0 = vld [vmem:[%s1534_s1 + $0x70] sm:$0xf]  ;;  %v990_v1 = vld [vmem:[%s1534_s1 + $0x74] sm:$0xf0]  ;;  %v761_v11 = vld [vmem:[%s1534_s1 + $0x60] sm:$0xf] }
   0x2   :  { %v833_v2 = vld [vmem:[%s1534_s1 + $0xf0] sm:$0xf]  ;;  %v770_v3 = vor.u32 %v990_v1, %v769_v0  ;;  %v1006_v4 = vld [vmem:[%s1534_s1 + $0xf4] sm:$0xf0]  ;;  %v988_v13 = vld [vmem:[%s1534_s1 + $0x64] sm:$0xf0] }
   0x3   :  { %v897_v5 = vld [vmem:[%s1534_s1 + $0x170] sm:$0xf]  ;;  %v1022_v6 = vld [vmem:[%s1534_s1 + $0x174] sm:$0xf0]  ;;  %v834_v7 = vor.u32 %v1006_v4, %v833_v2  ;;  %v825_v14 = vld [vmem:[%s1534_s1 + $0xe0] sm:$0xf]  ;;  %v762_v16 = vor.u32 %v988_v13, %v761_v11 }
   0x4   :  { %v898_v8 = vor.u32 %v1022_v6, %v897_v5  ;;  %v961_v9 = vld [vmem:[%s1534_s1 + $0x1f0] sm:$0xf]  ;;  %v1038_v10 = vld [vmem:[%s1534_s1 + $0x1f4] sm:$0xf0]  ;;  %466 = vmatpush.bf16.msra.mxu0 %v770_v3  ;;  %v1004_v15 = vld [vmem:[%s1534_s1 + $0xe4] sm:$0xf0] }
   0x5   :  { %v962_v12 = vor.u32 %v1038_v10, %v961_v9  ;;  %485 = vmatpush.bf16.msra.mxu1 %v834_v7  ;;  %v826_v17 = vor.u32 %v1004_v15, %v825_v14  ;;  %v889_v18 = vld [vmem:[%s1534_s1 + $0x160] sm:$0xf]  ;;  %v1020_v19 = vld [vmem:[%s1534_s1 + $0x164] sm:$0xf0]  ;;  %v753_v23 = vld [vmem:[%s1534_s1 + $0x50] sm:$0xf] }
   0x6   :  { %504 = vmatpush.bf16.msra.mxu2 %v898_v8  ;;  %v953_v20 = vld [vmem:[%s1534_s1 + $0x1e0] sm:$0xf]  ;;  %v890_v21 = vor.u32 %v1020_v19, %v889_v18  ;;  %v1036_v22 = vld [vmem:[%s1534_s1 + $0x1e4] sm:$0xf0]  ;;  %v986_v24 = vld [vmem:[%s1534_s1 + $0x54] sm:$0xf0] }
   0x7   :  { %523 = vmatpush.bf16.msra.mxu3 %v962_v12  ;;  %v954_v25 = vor.u32 %v1036_v22, %v953_v20  ;;  %v817_v26 = vld [vmem:[%s1534_s1 + $0xd0] sm:$0xf]  ;;  %v1002_v27 = vld [vmem:[%s1534_s1 + $0xd4] sm:$0xf0]  ;;  %v754_v29 = vor.u32 %v986_v24, %v753_v23  ;;  %v745_v35 = vld [vmem:[%s1534_s1 + $0x40] sm:$0xf] }
   0x8   :  { %v881_v28 = vld [vmem:[%s1534_s1 + $0x150] sm:$0xf]  ;;  %467 = vmatpush.bf16.msra.mxu0 %v762_v16  ;;  %v1018_v30 = vld [vmem:[%s1534_s1 + $0x154] sm:$0xf0]  ;;  %v818_v33 = vor.u32 %v1002_v27, %v817_v26  ;;  %v984_v36 = vld [vmem:[%s1534_s1 + $0x44] sm:$0xf0] }
   0x9   :  { %v945_v31 = vld [vmem:[%s1534_s1 + $0x1d0] sm:$0xf]  ;;  %v1034_v32 = vld [vmem:[%s1534_s1 + $0x1d4] sm:$0xf0]  ;;  %486 = vmatpush.bf16.msra.mxu1 %v826_v17  ;;  %v882_v34 = vor.u32 %v1018_v30, %v881_v28  ;;  %v809_v37 = vld [vmem:[%s1534_s1 + $0xc0] sm:$0xf]  ;;  %v746_v44 = vor.u32 %v984_v36, %v745_v35 }
   0xa   :  { %505 = vmatpush.bf16.msra.mxu2 %v890_v21  ;;  %v946_v38 = vor.u32 %v1034_v32, %v945_v31  ;;  %v1000_v39 = vld [vmem:[%s1534_s1 + $0xc4] sm:$0xf0]  ;;  %v873_v40 = vld [vmem:[%s1534_s1 + $0x140] sm:$0xf]  ;;  %v737_v47 = vld [vmem:[%s1534_s1 + $0x30] sm:$0xf] }
   0xb   :  { %524 = vmatpush.bf16.msra.mxu3 %v954_v25  ;;  %v1016_v41 = vld [vmem:[%s1534_s1 + $0x144] sm:$0xf0]  ;;  %v937_v42 = vld [vmem:[%s1534_s1 + $0x1c0] sm:$0xf]  ;;  %v810_v45 = vor.u32 %v1000_v39, %v809_v37  ;;  %v982_v48 = vld [vmem:[%s1534_s1 + $0x34] sm:$0xf0] }
   0xc   :  { %v1032_v43 = vld [vmem:[%s1534_s1 + $0x1c4] sm:$0xf0]  ;;  %468 = vmatpush.bf16.msra.mxu0 %v754_v29  ;;  %v874_v46 = vor.u32 %v1016_v41, %v873_v40  ;;  %v801_v49 = vld [vmem:[%s1534_s1 + $0xb0] sm:$0xf]  ;;  %v998_v51 = vld [vmem:[%s1534_s1 + $0xb4] sm:$0xf0]  ;;  %v738_v56 = vor.u32 %v982_v48, %v737_v47 }
   0xd   :  { %487 = vmatpush.bf16.msra.mxu1 %v818_v33  ;;  %v938_v50 = vor.u32 %v1032_v43, %v937_v42  ;;  %v865_v52 = vld [vmem:[%s1534_s1 + $0x130] sm:$0xf]  ;;  %v1014_v53 = vld [vmem:[%s1534_s1 + $0x134] sm:$0xf0]  ;;  %v802_v57 = vor.u32 %v998_v51, %v801_v49  ;;  %v729_v59 = vld [vmem:[%s1534_s1 + $0x20] sm:$0xf] }
   0xe   :  { %506 = vmatpush.bf16.msra.mxu2 %v882_v34  ;;  %v929_v54 = vld [vmem:[%s1534_s1 + $0x1b0] sm:$0xf]  ;;  %v1030_v55 = vld [vmem:[%s1534_s1 + $0x1b4] sm:$0xf0]  ;;  %v866_v58 = vor.u32 %v1014_v53, %v865_v52  ;;  %v980_v60 = vld [vmem:[%s1534_s1 + $0x24] sm:$0xf0] }
   0xf   :  { %525 = vmatpush.bf16.msra.mxu3 %v946_v38  ;;  %v793_v61 = vld [vmem:[%s1534_s1 + $0xa0] sm:$0xf]  ;;  %v930_v62 = vor.u32 %v1030_v55, %v929_v54  ;;  %v996_v63 = vld [vmem:[%s1534_s1 + $0xa4] sm:$0xf0]  ;;  %v730_v4 = vor.u32 %v980_v60, %v729_v59  ;;  %v721_v7 = vld [vmem:[%s1534_s1 + $0x10] sm:$0xf] }
  0x10   :  { %469 = vmatpush.bf16.msra.mxu0 %v746_v44  ;;  %v857_v0 = vld [vmem:[%s1534_s1 + $0x120] sm:$0xf]  ;;  %v1012_v1 = vld [vmem:[%s1534_s1 + $0x124] sm:$0xf0]  ;;  %v794_v5 = vor.u32 %v996_v63, %v793_v61  ;;  %v978_v8 = vld [vmem:[%s1534_s1 + $0x14] sm:$0xf0] }
  0x11   :  { %488 = vmatpush.bf16.msra.mxu1 %v810_v45  ;;  %v921_v2 = vld [vmem:[%s1534_s1 + $0x1a0] sm:$0xf]  ;;  %v1028_v3 = vld [vmem:[%s1534_s1 + $0x1a4] sm:$0xf0]  ;;  %v858_v6 = vor.u32 %v1012_v1, %v857_v0  ;;  %v785_v9 = vld [vmem:[%s1534_s1 + $0x90] sm:$0xf]  ;;  %v722_v17 = vor.u32 %v978_v8, %v721_v7 }
  0x12   :  { %507 = vmatpush.bf16.msra.mxu2 %v874_v46  ;;  %v922_v10 = vor.u32 %v1028_v3, %v921_v2  ;;  %v994_v11 = vld [vmem:[%s1534_s1 + $0x94] sm:$0xf0]  ;;  %v849_v12 = vld [vmem:[%s1534_s1 + $0x110] sm:$0xf]  ;;  %v713_v16 = vld [vmem:[%s1534_s1] sm:$0xf] }
  0x13   :  { %526 = vmatpush.bf16.msra.mxu3 %v938_v50  ;;  %v1010_v13 = vld [vmem:[%s1534_s1 + $0x114] sm:$0xf0]  ;;  %v913_v14 = vld [vmem:[%s1534_s1 + $0x190] sm:$0xf]  ;;  %v976_v18 = vld [vmem:[%s1534_s1 + $0x4] sm:$0xf0]  ;;  %v786_v21 = vor.u32 %v994_v11, %v785_v9 }
  0x14   :  { %470 = vmatpush.bf16.msra.mxu0 %v738_v56  ;;  %v1026_v15 = vld [vmem:[%s1534_s1 + $0x194] sm:$0xf0]  ;;  %v777_v19 = vld [vmem:[%s1534_s1 + $0x80] sm:$0xf]  ;;  %v992_v20 = vld [vmem:[%s1534_s1 + $0x84] sm:$0xf0]  ;;  %v850_v22 = vor.u32 %v1010_v13, %v849_v12  ;;  %v714_v34 = vor.u32 %v976_v18, %v713_v16 }
  0x15   :  { %489 = vmatpush.bf16.msra.mxu1 %v802_v57  ;;  %v841_v23 = vld [vmem:[%s1534_s1 + $0x100] sm:$0xf]  ;;  %v1008_v24 = vld [vmem:[%s1534_s1 + $0x104] sm:$0xf0]  ;;  %v914_v26 = vor.u32 %v1026_v15, %v913_v14  ;;  %v969_v29 = vld [vmem:[%s1535_s0 + $0xc] sm:$0xf0]  ;;  %v778_v38 = vor.u32 %v992_v20, %v777_v19 }
  0x16   :  { %508 = vmatpush.bf16.msra.mxu2 %v866_v58  ;;  %v905_v25 = vld [vmem:[%s1534_s1 + $0x180] sm:$0xf]  ;;  %v1024_v27 = vld [vmem:[%s1534_s1 + $0x184] sm:$0xf0]  ;;  %v967_v30 = vld [vmem:[%s1535_s0 + $0x4] sm:$0xf]  ;;  %v842_v39 = vor.u32 %v1008_v24, %v841_v23 }
  0x17   :  { %527 = vmatpush.bf16.msra.mxu3 %v930_v62  ;;  %v681_v28 = vld [vmem:[%s1535_s0] sm:$0xf]  ;;  %v683_v31 = vld [vmem:[%s1535_s0 + $0x10] sm:$0xf0]  ;;  %v899_v33 = vld [vmem:[%s1534_s1 + $0x178] sm:$0xf0]  ;;  %v906_v43 = vor.u32 %v1024_v27, %v905_v25 }
  0x18   :  { %471 = vmatpush.bf16.msra.mxu0 %v730_v4  ;;  %v1021_v32 = vld [vmem:[%s1534_s1 + $0x174] sm:$0xf]  ;;  %v689_v35 = vld [vmem:[%s1535_s0 + $0x8] sm:$0xf]  ;;  %v835_v37 = vld [vmem:[%s1534_s1 + $0xf8] sm:$0xf0]  ;;  %v1296_v48 = vor.u32 %v969_v29, %v681_v28  ;;  %v1307_v53 = vor.u32 %v967_v30, %v683_v31 }
  0x19   :  { %490 = vmatpush.bf16.msra.mxu1 %v794_v5  ;;  %v1005_v36 = vld [vmem:[%s1534_s1 + $0xf4] sm:$0xf]  ;;  %v970_v40 = vld [vmem:[%s1535_s0 + $0x14] sm:$0xf0]  ;;  %v968_v41 = vld [vmem:[%s1535_s0 + $0xc] sm:$0xf]  ;;  %v902_v44 = vor.u32 %v1021_v32, %v899_v33 }
  0x1a   :  { %509 = vmatpush.bf16.msra.mxu2 %v858_v6  ;;  %v691_v42 = vld [vmem:[%s1535_s0 + $0x18] sm:$0xf0]  ;;  %v989_v45 = vld [vmem:[%s1534_s1 + $0x74] sm:$0xf]  ;;  %v838_v49 = vor.u32 %v1005_v36, %v835_v37  ;;  %v1019_v51 = vld [vmem:[%s1534_s1 + $0x164] sm:$0xf]  ;;  %v1309_v54 = vor.u32 %v970_v40, %v689_v35 }
  0x1b   :  { %528 = vmatpush.bf16.msra.mxu3 %v922_v10  ;;  %v771_v46 = vld [vmem:[%s1534_s1 + $0x78] sm:$0xf0]  ;;  %v1037_v47 = vld [vmem:[%s1534_s1 + $0x1f4] sm:$0xf]  ;;  %v891_v52 = vld [vmem:[%s1534_s1 + $0x168] sm:$0xf0]  ;;  %v1317_v57 = vor.u32 %v968_v41, %v691_v42 }
  0x1c   :  { %472 = vmatpush.bf16.msra.mxu0 %v722_v17  ;;  %v963_v50 = vld [vmem:[%s1534_s1 + $0x1f8] sm:$0xf0]  ;;  %v1003_v55 = vld [vmem:[%s1534_s1 + $0xe4] sm:$0xf]  ;;  %v827_v56 = vld [vmem:[%s1534_s1 + $0xe8] sm:$0xf0]  ;;  %v774_v58 = vor.u32 %v989_v45, %v771_v46  ;;  %v894_v60 = vor.u32 %v1019_v51, %v891_v52 }
  0x1d   :  { %491 = vmatpush.bf16.msra.mxu1 %v786_v21  ;;  %v966_v59 = vor.u32 %v1037_v47, %v963_v50  ;;  %v987_v61 = vld [vmem:[%s1534_s1 + $0x64] sm:$0xf]  ;;  %v763_v62 = vld [vmem:[%s1534_s1 + $0x68] sm:$0xf0]  ;;  %v830_v0 = vor.u32 %v1003_v55, %v827_v56  ;;  %v1017_v2 = vld [vmem:[%s1534_s1 + $0x154] sm:$0xf] }
  0x1e   :  { %510 = vmatpush.bf16.msra.mxu2 %v850_v22  ;;  %v1035_v63 = vld [vmem:[%s1534_s1 + $0x1e4] sm:$0xf]  ;;  %v955_v1 = vld [vmem:[%s1534_s1 + $0x1e8] sm:$0xf0]  ;;  %v883_v3 = vld [vmem:[%s1534_s1 + $0x158] sm:$0xf0]  ;;  %v766_v6 = vor.u32 %v987_v61, %v763_v62 }
  0x1f   :  { %529 = vmatpush.bf16.msra.mxu3 %v914_v26  ;;  %v1001_v4 = vld [vmem:[%s1534_s1 + $0xd4] sm:$0xf]  ;;  %v819_v5 = vld [vmem:[%s1534_s1 + $0xd8] sm:$0xf0]  ;;  %v958_v7 = vor.u32 %v1035_v63, %v955_v1  ;;  %v886_v8 = vor.u32 %v1017_v2, %v883_v3  ;;  %v1015_v14 = vld [vmem:[%s1534_s1 + $0x144] sm:$0xf] }
  0x20   :  { %473 = vmatpush.bf16.msra.mxu0 %v714_v34  ;;  %v985_v9 = vld [vmem:[%s1534_s1 + $0x54] sm:$0xf]  ;;  %v755_v10 = vld [vmem:[%s1534_s1 + $0x58] sm:$0xf0]  ;;  %v822_v12 = vor.u32 %v1001_v4, %v819_v5  ;;  %v875_v15 = vld [vmem:[%s1534_s1 + $0x148] sm:$0xf0] }
  0x21   :  { %492 = vmatpush.bf16.msra.mxu1 %v778_v38  ;;  %v1033_v11 = vld [vmem:[%s1534_s1 + $0x1d4] sm:$0xf]  ;;  %v947_v13 = vld [vmem:[%s1534_s1 + $0x1d8] sm:$0xf0]  ;;  %v999_v16 = vld [vmem:[%s1534_s1 + $0xc4] sm:$0xf]  ;;  %v758_v18 = vor.u32 %v985_v9, %v755_v10  ;;  %v878_v23 = vor.u32 %v1015_v14, %v875_v15 }
  0x22   :  { %511 = vmatpush.bf16.msra.mxu2 %v842_v39  ;;  %v811_v17 = vld [vmem:[%s1534_s1 + $0xc8] sm:$0xf0]  ;;  %v983_v19 = vld [vmem:[%s1534_s1 + $0x44] sm:$0xf]  ;;  %v950_v22 = vor.u32 %v1033_v11, %v947_v13  ;;  %v697_v25 = vld [vmem:[%s1535_s0 + $0x20] sm:$0xf] }
  0x23   :  { %530 = vmatpush.bf16.msra.mxu3 %v906_v43  ;;  %474 = vmatmul.bf16.vlgmr.msra.gmra.mxu0 %v1296_v48  ;;  %v747_v20 = vld [vmem:[%s1534_s1 + $0x48] sm:$0xf0]  ;;  %v1031_v21 = vld [vmem:[%s1534_s1 + $0x1c4] sm:$0xf]  ;;  %v973_v26 = vld [vmem:[%s1535_s0 + $0x2c] sm:$0xf0]  ;;  %v814_v27 = vor.u32 %v999_v16, %v811_v17 }
  0x24   :  { %493 = vmatmul.bf16.vlgmr.msra.gmra.mxu1 %v1307_v53  ;;  %542 = vmatpush.bf16.msrb.mxu0 %v774_v58  ;;  %v939_v24 = vld [vmem:[%s1534_s1 + $0x1c8] sm:$0xf0]  ;;  %v971_v28 = vld [vmem:[%s1535_s0 + $0x24] sm:$0xf]  ;;  %v699_v29 = vld [vmem:[%s1535_s0 + $0x30] sm:$0xf0]  ;;  %v750_v35 = vor.u32 %v983_v19, %v747_v20 }
  0x25   :  { %561 = vmatpush.bf16.msrb.mxu1 %v838_v49  ;;  %512 = vmatmul.bf16.vlgmr.msra.gmra.mxu2 %v1309_v54  ;;  %v1013_v30 = vld [vmem:[%s1534_s1 + $0x134] sm:$0xf]  ;;  %v867_v31 = vld [vmem:[%s1534_s1 + $0x138] sm:$0xf0]  ;;  %v705_v32 = vld [vmem:[%s1535_s0 + $0x28] sm:$0xf]  ;;  %v942_v39 = vor.u32 %v1031_v21, %v939_v24  ;;  %v1439_v50 = vor.u32 %v971_v28, %v699_v29 }
  0x26   :  { %580 = vmatpush.bf16.msrb.mxu2 %v902_v44  ;;  %531 = vmatmul.bf16.vlgmr.msra.gmra.mxu3 %v1317_v57  ;;  %v997_v33 = vld [vmem:[%s1534_s1 + $0xb4] sm:$0xf]  ;;  %v803_v34 = vld [vmem:[%s1534_s1 + $0xb8] sm:$0xf0]  ;;  %v974_v36 = vld [vmem:[%s1535_s0 + $0x34] sm:$0xf0]  ;;  %v870_v40 = vor.u32 %v1013_v30, %v867_v31  ;;  %v1428_v44 = vor.u32 %v973_v26, %v697_v25 }
  0x27   :  { %599 = vmatpush.bf16.msrb.mxu3 %v966_v59  ;;  %v972_v37 = vld [vmem:[%s1535_s0 + $0x2c] sm:$0xf]  ;;  %v707_v38 = vld [vmem:[%s1535_s0 + $0x38] sm:$0xf0]  ;;  %v981_v41 = vld [vmem:[%s1534_s1 + $0x34] sm:$0xf]  ;;  %v806_v45 = vor.u32 %v997_v33, %v803_v34  ;;  %v1441_v51 = vor.u32 %v974_v36, %v705_v32 }
  0x28   :  { %543 = vmatpush.bf16.msrb.mxu0 %v766_v6  ;;  %v739_v42 = vld [vmem:[%s1534_s1 + $0x38] sm:$0xf0]  ;;  %v1029_v43 = vld [vmem:[%s1534_s1 + $0x1b4] sm:$0xf]  ;;  %v1011_v47 = vld [vmem:[%s1534_s1 + $0x124] sm:$0xf]  ;;  %v710_v56 = vor.u32 %v972_v37, %v707_v38 }
  0x29   :  { %562 = vmatpush.bf16.msrb.mxu1 %v830_v0  ;;  %v931_v46 = vld [vmem:[%s1534_s1 + $0x1b8] sm:$0xf0]  ;;  %v859_v49 = vld [vmem:[%s1534_s1 + $0x128] sm:$0xf0]  ;;  %v995_v52 = vld [vmem:[%s1534_s1 + $0xa4] sm:$0xf]  ;;  %v742_v58 = vor.u32 %v981_v41, %v739_v42 }
  0x2a   :  { %581 = vmatpush.bf16.msrb.mxu2 %v894_v60  ;;  %v795_v55 = vld [vmem:[%s1534_s1 + $0xa8] sm:$0xf0]  ;;  %v934_v59 = vor.u32 %v1029_v43, %v931_v46  ;;  %v862_v60 = vor.u32 %v1011_v47, %v859_v49  ;;  %v979_v61 = vld [vmem:[%s1534_s1 + $0x24] sm:$0xf]  ;;  %v1009_v2 = vld [vmem:[%s1534_s1 + $0x114] sm:$0xf] }
  0x2b   :  { %600 = vmatpush.bf16.msrb.mxu3 %v958_v7  ;;  %v731_v62 = vld [vmem:[%s1534_s1 + $0x28] sm:$0xf0]  ;;  %v1027_v63 = vld [vmem:[%s1534_s1 + $0x1a4] sm:$0xf]  ;;  %v798_v0 = vor.u32 %v995_v52, %v795_v55  ;;  %v851_v3 = vld [vmem:[%s1534_s1 + $0x118] sm:$0xf0] }
  0x2c   :  { %544 = vmatpush.bf16.msrb.mxu0 %v758_v18  ;;  %v923_v1 = vld [vmem:[%s1534_s1 + $0x1a8] sm:$0xf0]  ;;  %v993_v4 = vld [vmem:[%s1534_s1 + $0x94] sm:$0xf]  ;;  %v787_v5 = vld [vmem:[%s1534_s1 + $0x98] sm:$0xf0]  ;;  %v734_v6 = vor.u32 %v979_v61, %v731_v62 }
  0x2d   :  { %563 = vmatpush.bf16.msrb.mxu1 %v822_v12  ;;  %v926_v7 = vor.u32 %v1027_v63, %v923_v1  ;;  %v977_v9 = vld [vmem:[%s1534_s1 + $0x14] sm:$0xf]  ;;  %v723_v10 = vld [vmem:[%s1534_s1 + $0x18] sm:$0xf0]  ;;  %v790_v12 = vor.u32 %v993_v4, %v787_v5  ;;  %v1007_v14 = vld [vmem:[%s1534_s1 + $0x104] sm:$0xf] }
  0x2e   :  { %582 = vmatpush.bf16.msrb.mxu2 %v886_v8  ;;  %v854_v8 = vor.u32 %v1009_v2, %v851_v3  ;;  %v1025_v11 = vld [vmem:[%s1534_s1 + $0x194] sm:$0xf]  ;;  %v915_v13 = vld [vmem:[%s1534_s1 + $0x198] sm:$0xf0]  ;;  %v843_v15 = vld [vmem:[%s1534_s1 + $0x108] sm:$0xf0]  ;;  %v726_v18 = vor.u32 %v977_v9, %v723_v10 }
  0x2f   :  { %601 = vmatpush.bf16.msrb.mxu3 %v950_v22  ;;  %v991_v16 = vld [vmem:[%s1534_s1 + $0x84] sm:$0xf]  ;;  %v779_v17 = vld [vmem:[%s1534_s1 + $0x88] sm:$0xf0]  ;;  %v918_v19 = vor.u32 %v1025_v11, %v915_v13  ;;  %v846_v20 = vor.u32 %v1007_v14, %v843_v15 }
  0x30   :  { %545 = vmatpush.bf16.msrb.mxu0 %v750_v35  ;;  %v975_v21 = vld [vmem:[%s1534_s1 + $0x4] sm:$0xf]  ;;  %v715_v22 = vld [vmem:[%s1534_s1 + $0x8] sm:$0xf0] }
  0x31   :  { %564 = vmatpush.bf16.msrb.mxu1 %v814_v27  ;;  %v1023_v24 = vld [vmem:[%s1534_s1 + $0x184] sm:$0xf]  ;;  %v907_v25 = vld [vmem:[%s1534_s1 + $0x188] sm:$0xf0]  ;;  %v718_v26 = vor.u32 %v975_v21, %v715_v22 }
  0x32   :  { %583 = vmatpush.bf16.msrb.mxu2 %v878_v23  ;;  %v782_v23 = vor.u32 %v991_v16, %v779_v17  ;;  %v910_v27 = vor.u32 %v1023_v24, %v907_v25 }
  0x33   :  { %602 = vmatpush.bf16.msrb.mxu3 %v942_v39  ;;  %479 = vmatmul.bf16.gmra.mxu0 %v1428_v44 }
  0x34   :  { %498 = vmatmul.bf16.gmra.mxu1 %v1439_v50  ;;  %546 = vmatpush.bf16.msrb.mxu0 %v742_v58 }
  0x35   :  { %565 = vmatpush.bf16.msrb.mxu1 %v806_v45  ;;  %517 = vmatmul.bf16.gmra.mxu2 %v1441_v51 }
  0x36   :  { %584 = vmatpush.bf16.msrb.mxu2 %v870_v40  ;;  %536 = vmatmul.bf16.gmra.mxu3 %v710_v56 }
  0x37   :  { %603 = vmatpush.bf16.msrb.mxu3 %v934_v59 }
  0x38   :  { %547 = vmatpush.bf16.msrb.mxu0 %v734_v6 }
  0x39   :  { %566 = vmatpush.bf16.msrb.mxu1 %v798_v0 }
  0x3a   :  { %585 = vmatpush.bf16.msrb.mxu2 %v862_v60 }
  0x3b   :  { %604 = vmatpush.bf16.msrb.mxu3 %v926_v7 }
  0x3c   :  { %548 = vmatpush.bf16.msrb.mxu0 %v726_v18 }
  0x3d   :  { %567 = vmatpush.bf16.msrb.mxu1 %v790_v12 }
  0x3e   :  { %586 = vmatpush.bf16.msrb.mxu2 %v854_v8 }
  0x3f   :  { %605 = vmatpush.bf16.msrb.mxu3 %v918_v19 }
  0x40   :  { %549 = vmatpush.bf16.msrb.mxu0 %v718_v26 }
  0x41   :  { %568 = vmatpush.bf16.msrb.mxu1 %v782_v23 }
  0x42   :  { %587 = vmatpush.bf16.msrb.mxu2 %v846_v20 }
  0x43   :  { %606 = vmatpush.bf16.msrb.mxu3 %v910_v27  ;;  %550 = vmatmul.bf16.vlgmr.msrb.gmra.mxu0 %v1296_v48 }
  0x44   :  { %569 = vmatmul.bf16.vlgmr.msrb.gmra.mxu1 %v1307_v53 }
  0x45   :  { %588 = vmatmul.bf16.vlgmr.msrb.gmra.mxu2 %v1309_v54 }
  0x46   :  { %607 = vmatmul.bf16.vlgmr.msrb.gmra.mxu3 %v1317_v57 }
  0x53   :  { %555 = vmatmul.bf16.gmra.mxu0 %v1428_v44  ;;  %v645_v44 = vld [vmem:[%s1536_s2] sm:$0x3] }
  0x54   :  { %574 = vmatmul.bf16.gmra.mxu1 %v1439_v50  ;;  %v647_v47 = vperm.slane %v645_v44, 0  ;;  %v648_v55 = vperm.slane %v645_v44, 1 }
  0x55   :  { %593 = vmatmul.bf16.gmra.mxu2 %v1441_v51 }
  0x56   :  { %612 = vmatmul.bf16.gmra.mxu3 %v710_v56 }
  0xa0   :  { %v475_v28 = vpop.f32.mrf.mxu0 }
  0xa1   :  { %v494_v29 = vpop.f32.mrf.mxu1 }
  0xa2   :  { %v495_v38 = vadd.f32 %v494_v29, %v475_v28 }
  0xa8   :  { %v513_v30 = vpop.f32.mrf.mxu2  ;;  %v477_v32 = vpop.f32.mrf.mxu0 }
  0xa9   :  { %v532_v31 = vpop.f32.mrf.mxu3  ;;  %v496_v33 = vpop.f32.mrf.mxu1  ;;  %v514_v43 = vadd.f32 %v513_v30, %v495_v38 }
  0xaa   :  { %v497_v51 = vadd.f32 %v496_v33, %v477_v32 }
  0xab   :  { %v533_v46 = vadd.f32 %v532_v31, %v514_v43 }
  0xad   :  { %v651_v59 = vadd.f32 %v647_v47, %v533_v46 }
  0xaf   :  { %v659_v63 = vmax.f32 %v651_v59, 0.0 }
  0xb0   :  { %v515_v48 = vpop.f32.mrf.mxu2  ;;  %v480_v53 = vpop.f32.mrf.mxu0 }
  0xb1   :  { %v534_v34 = vpop.f32.mrf.mxu3  ;;  %v499_v35 = vpop.f32.mrf.mxu1  ;;  %v516_v60 = vadd.f32 %v515_v48, %v497_v51 }
  0xb2   :  { %v500_v1 = vadd.f32 %v499_v35, %v480_v53 }
  0xb3   :  { %v535_v0 = vadd.f32 %v534_v34, %v516_v60 }
  0xb5   :  { %v653_v10 = vadd.f32 %v647_v47, %v535_v0 }
  0xb7   :  { %v661_v15 = vmax.f32 %v653_v10, 0.0 }
  0xb8   :  { %v518_v54 = vpop.f32.mrf.mxu2  ;;  %v482_v57 = vpop.f32.mrf.mxu0 }
  0xb9   :  { %v537_v36 = vpop.f32.mrf.mxu3  ;;  %v501_v37 = vpop.f32.mrf.mxu1  ;;  %v519_v11 = vadd.f32 %v518_v54, %v500_v1 }
  0xba   :  { %v502_v20 = vadd.f32 %v501_v37, %v482_v57 }
  0xbb   :  { %v538_v16 = vadd.f32 %v537_v36, %v519_v11 }
  0xbd   :  { %v655_v23 = vadd.f32 %v647_v47, %v538_v16 }
  0xbf   :  { %v663_v29 = vmax.f32 %v655_v23, 0.0 }
  0xc0   :  { %v520_v39 = vpop.f32.mrf.mxu2  ;;  %v551_v41 = vpop.f32.mrf.mxu0 }
  0xc1   :  { %v539_v40 = vpop.f32.mrf.mxu3  ;;  %v570_v42 = vpop.f32.mrf.mxu1  ;;  %v521_v24 = vadd.f32 %v520_v39, %v502_v20 }
  0xc2   :  { %v571_v45 = vadd.f32 %v570_v42, %v551_v41 }
  0xc3   :  { %v540_v30 = vadd.f32 %v539_v40, %v521_v24 }
  0xc5   :  { %v657_v35 = vadd.f32 %v647_v47, %v540_v30 }
  0xc7   :  { %v665_v57 = vmax.f32 %v657_v35, 0.0 }
  0xc8   :  { %v589_v49 = vpop.f32.mrf.mxu2  ;;  %v553_v56 = vpop.f32.mrf.mxu0 }
  0xc9   :  { %v608_v50 = vpop.f32.mrf.mxu3  ;;  %v590_v52 = vadd.f32 %v589_v49, %v571_v45  ;;  %v572_v58 = vpop.f32.mrf.mxu1 }
  0xca   :  { %v573_v3 = vadd.f32 %v572_v58, %v553_v56 }
  0xcb   :  { %v609_v61 = vadd.f32 %v608_v50, %v590_v52 }
  0xcd   :  { %v652_v62 = vadd.f32 %v648_v55, %v609_v61 }
  0xcf   :  { %v660_v2 = vmax.f32 %v652_v62, 0.0 }
  0xd0   :  { %v591_v4 = vpop.f32.mrf.mxu2  ;;  %v556_v8 = vpop.f32.mrf.mxu0 }
  0xd1   :  { %v610_v5 = vpop.f32.mrf.mxu3  ;;  %v667_v6 = vpack.c.bf16 %v660_v2, %v659_v63  ;;  %v592_v7 = vadd.f32 %v591_v4, %v573_v3  ;;  %v575_v9 = vpop.f32.mrf.mxu1 }
  0xd2   :  { %v576_v14 = vadd.f32 %v575_v9, %v556_v8 }
  0xd3   :  { %671 = vst [vmem:[%s1537_s3] sm:$0xff] %v667_v6  ;;  %v611_v12 = vadd.f32 %v610_v5, %v592_v7 }
  0xd5   :  { %v654_v13 = vadd.f32 %v648_v55, %v611_v12 }
  0xd7   :  { %v662_v17 = vmax.f32 %v654_v13, 0.0 }
  0xd8   :  { %v594_v18 = vpop.f32.mrf.mxu2  ;;  %v558_v26 = vpop.f32.mrf.mxu0 }
  0xd9   :  { %v613_v19 = vpop.f32.mrf.mxu3  ;;  %v668_v21 = vpack.c.bf16 %v662_v17, %v661_v15  ;;  %v595_v22 = vadd.f32 %v594_v18, %v576_v14  ;;  %v577_v27 = vpop.f32.mrf.mxu1 }
  0xda   :  { %v578_v32 = vadd.f32 %v577_v27, %v558_v26 }
  0xdb   :  { %672 = vst [vmem:[%s1537_s3 + $0x8] sm:$0xff] %v668_v21  ;;  %v614_v25 = vadd.f32 %v613_v19, %v595_v22 }
  0xdd   :  { %v656_v28 = vadd.f32 %v648_v55, %v614_v25 }
  0xdf   :  { %v664_v31 = vmax.f32 %v656_v28, 0.0 }
  0xe0   :  { %v596_v33 = vpop.f32.mrf.mxu2 }
  0xe1   :  { %v669_v48 = vpack.c.bf16 %v664_v31, %v663_v29  ;;  %v597_v34 = vadd.f32 %v596_v33, %v578_v32  ;;  %v615_v53 = vpop.f32.mrf.mxu3 }
  0xe3   :  { %673 = vst [vmem:[%s1537_s3 + $0x10] sm:$0xff] %v669_v48  ;;  %v616_v54 = vadd.f32 %v615_v53, %v597_v34 }
  0xe5   :  { %v658_v36 = vadd.f32 %v648_v55, %v616_v54 }
  0xe7   :  { %v666_v37 = vmax.f32 %v658_v36, 0.0 }
  0xe9   :  { %v670_v38 = vpack.c.bf16 %v666_v37, %v665_v57 }
  0xeb   :  { %674 = vst [vmem:[%s1537_s3 + $0x18] sm:$0xff] %v670_v38 }

// kernel: vae_forward.16
= control target key start
LH: loop header
LB: loop body
LE: loop exit
PB: predicated region body
PF: predicated region fallthrough
CT: control target
= control target key end

     0   :  { %s5172_s1 = inlined_call_operand.vmem [shape: bf16[1024,512], index: 1, kind: input, shape index: {}]   ;;  %s5173_s0 = inlined_call_operand.vmem [shape: bf16[16,1024], index: 0, kind: input, shape index: {}]   ;;  %s5174_s2 = inlined_call_operand.vmem [shape: f32[1,512], index: 2, kind: input, shape index: {}]   ;;  %s5175_s3 = inlined_call_operand.vmem [shape: bf16[16,512], index: 3, kind: output, shape index: {}]  }
   0x1   :  { %v2277_v0 = vld [vmem:[%s5172_s1 + $0xe0] sm:$0xf]  ;;  %v3225_v1 = vld [vmem:[%s5172_s1 + $0xec] sm:$0xf0] }
   0x2   :  { %v2405_v2 = vld [vmem:[%s5172_s1 + $0x1e0] sm:$0xf]  ;;  %v2278_v3 = vor.u32 %v3225_v1, %v2277_v0  ;;  %v3257_v4 = vld [vmem:[%s5172_s1 + $0x1ec] sm:$0xf0] }
   0x3   :  { %v2533_v5 = vld [vmem:[%s5172_s1 + $0x2e0] sm:$0xf]  ;;  %v3289_v6 = vld [vmem:[%s5172_s1 + $0x2ec] sm:$0xf0]  ;;  %v2406_v7 = vor.u32 %v3257_v4, %v2405_v2 }
   0x4   :  { %v2534_v8 = vor.u32 %v3289_v6, %v2533_v5  ;;  %v2661_v9 = vld [vmem:[%s5172_s1 + $0x3e0] sm:$0xf]  ;;  %v3321_v10 = vld [vmem:[%s5172_s1 + $0x3ec] sm:$0xf0]  ;;  %1618 = vmatpush.bf16.msra.mxu0 %v2278_v3 }
   0x5   :  { %v2261_v11 = vld [vmem:[%s5172_s1 + $0xc0] sm:$0xf]  ;;  %v2662_v12 = vor.u32 %v3321_v10, %v2661_v9  ;;  %v3221_v13 = vld [vmem:[%s5172_s1 + $0xcc] sm:$0xf0]  ;;  %1632 = vmatpush.bf16.msra.mxu1 %v2406_v7 }
   0x6   :  { %v2389_v14 = vld [vmem:[%s5172_s1 + $0x1c0] sm:$0xf]  ;;  %v3253_v15 = vld [vmem:[%s5172_s1 + $0x1cc] sm:$0xf0]  ;;  %1646 = vmatpush.bf16.msra.mxu2 %v2534_v8  ;;  %v2262_v16 = vor.u32 %v3221_v13, %v2261_v11 }
   0x7   :  { %v2390_v17 = vor.u32 %v3253_v15, %v2389_v14  ;;  %v2517_v18 = vld [vmem:[%s5172_s1 + $0x2c0] sm:$0xf]  ;;  %v3285_v19 = vld [vmem:[%s5172_s1 + $0x2cc] sm:$0xf0]  ;;  %1660 = vmatpush.bf16.msra.mxu3 %v2662_v12 }
   0x8   :  { %v2645_v20 = vld [vmem:[%s5172_s1 + $0x3c0] sm:$0xf]  ;;  %v2518_v21 = vor.u32 %v3285_v19, %v2517_v18  ;;  %v3317_v22 = vld [vmem:[%s5172_s1 + $0x3cc] sm:$0xf0]  ;;  %1619 = vmatpush.bf16.msra.mxu0 %v2262_v16 }
   0x9   :  { %v2245_v23 = vld [vmem:[%s5172_s1 + $0xa0] sm:$0xf]  ;;  %v3217_v24 = vld [vmem:[%s5172_s1 + $0xac] sm:$0xf0]  ;;  %v2646_v25 = vor.u32 %v3317_v22, %v2645_v20  ;;  %1633 = vmatpush.bf16.msra.mxu1 %v2390_v17 }
   0xa   :  { %v2373_v26 = vld [vmem:[%s5172_s1 + $0x1a0] sm:$0xf]  ;;  %v3249_v27 = vld [vmem:[%s5172_s1 + $0x1ac] sm:$0xf0]  ;;  %v2246_v29 = vor.u32 %v3217_v24, %v2245_v23  ;;  %1647 = vmatpush.bf16.msra.mxu2 %v2518_v21 }
   0xb   :  { %v2501_v28 = vld [vmem:[%s5172_s1 + $0x2a0] sm:$0xf]  ;;  %v3281_v30 = vld [vmem:[%s5172_s1 + $0x2ac] sm:$0xf0]  ;;  %v2374_v33 = vor.u32 %v3249_v27, %v2373_v26  ;;  %1661 = vmatpush.bf16.msra.mxu3 %v2646_v25 }
   0xc   :  { %v2629_v31 = vld [vmem:[%s5172_s1 + $0x3a0] sm:$0xf]  ;;  %v3313_v32 = vld [vmem:[%s5172_s1 + $0x3ac] sm:$0xf0]  ;;  %v2502_v34 = vor.u32 %v3281_v30, %v2501_v28  ;;  %1620 = vmatpush.bf16.msra.mxu0 %v2246_v29 }
   0xd   :  { %v2229_v35 = vld [vmem:[%s5172_s1 + $0x80] sm:$0xf]  ;;  %v3213_v36 = vld [vmem:[%s5172_s1 + $0x8c] sm:$0xf0]  ;;  %v2630_v38 = vor.u32 %v3313_v32, %v2629_v31  ;;  %1634 = vmatpush.bf16.msra.mxu1 %v2374_v33 }
   0xe   :  { %v2357_v37 = vld [vmem:[%s5172_s1 + $0x180] sm:$0xf]  ;;  %v3245_v39 = vld [vmem:[%s5172_s1 + $0x18c] sm:$0xf0]  ;;  %v2230_v44 = vor.u32 %v3213_v36, %v2229_v35  ;;  %1648 = vmatpush.bf16.msra.mxu2 %v2502_v34 }
   0xf   :  { %v2485_v40 = vld [vmem:[%s5172_s1 + $0x280] sm:$0xf]  ;;  %v3277_v41 = vld [vmem:[%s5172_s1 + $0x28c] sm:$0xf0]  ;;  %v2358_v45 = vor.u32 %v3245_v39, %v2357_v37  ;;  %1662 = vmatpush.bf16.msra.mxu3 %v2630_v38 }
  0x10   :  { %v2613_v42 = vld [vmem:[%s5172_s1 + $0x380] sm:$0xf]  ;;  %v3309_v43 = vld [vmem:[%s5172_s1 + $0x38c] sm:$0xf0]  ;;  %v2486_v46 = vor.u32 %v3277_v41, %v2485_v40  ;;  %1621 = vmatpush.bf16.msra.mxu0 %v2230_v44 }
  0x11   :  { %v2213_v47 = vld [vmem:[%s5172_s1 + $0x60] sm:$0xf]  ;;  %v3209_v48 = vld [vmem:[%s5172_s1 + $0x6c] sm:$0xf0]  ;;  %v2614_v50 = vor.u32 %v3309_v43, %v2613_v42  ;;  %1635 = vmatpush.bf16.msra.mxu1 %v2358_v45 }
  0x12   :  { %v2341_v49 = vld [vmem:[%s5172_s1 + $0x160] sm:$0xf]  ;;  %v3241_v51 = vld [vmem:[%s5172_s1 + $0x16c] sm:$0xf0]  ;;  %v2214_v56 = vor.u32 %v3209_v48, %v2213_v47  ;;  %1649 = vmatpush.bf16.msra.mxu2 %v2486_v46 }
  0x13   :  { %v2469_v52 = vld [vmem:[%s5172_s1 + $0x260] sm:$0xf]  ;;  %v3273_v53 = vld [vmem:[%s5172_s1 + $0x26c] sm:$0xf0]  ;;  %v2342_v57 = vor.u32 %v3241_v51, %v2341_v49  ;;  %1663 = vmatpush.bf16.msra.mxu3 %v2614_v50 }
  0x14   :  { %v2597_v54 = vld [vmem:[%s5172_s1 + $0x360] sm:$0xf]  ;;  %v3305_v55 = vld [vmem:[%s5172_s1 + $0x36c] sm:$0xf0]  ;;  %v2470_v58 = vor.u32 %v3273_v53, %v2469_v52  ;;  %1622 = vmatpush.bf16.msra.mxu0 %v2214_v56 }
  0x15   :  { %v2197_v59 = vld [vmem:[%s5172_s1 + $0x40] sm:$0xf]  ;;  %v3205_v60 = vld [vmem:[%s5172_s1 + $0x4c] sm:$0xf0]  ;;  %v2598_v62 = vor.u32 %v3305_v55, %v2597_v54  ;;  %1636 = vmatpush.bf16.msra.mxu1 %v2342_v57  ;;  %v2141_v54 = vld [vmem:[%s5173_s0 + $0x8] sm:$0xf] }
  0x16   :  { %v2325_v61 = vld [vmem:[%s5172_s1 + $0x140] sm:$0xf]  ;;  %v3237_v63 = vld [vmem:[%s5172_s1 + $0x14c] sm:$0xf0]  ;;  %v2198_v4 = vor.u32 %v3205_v60, %v2197_v59  ;;  %1650 = vmatpush.bf16.msra.mxu2 %v2470_v58  ;;  %v3192_v59 = vld [vmem:[%s5173_s0 + $0x24] sm:$0xf0] }
  0x17   :  { %v2453_v0 = vld [vmem:[%s5172_s1 + $0x240] sm:$0xf]  ;;  %v3269_v1 = vld [vmem:[%s5172_s1 + $0x24c] sm:$0xf0]  ;;  %v2326_v5 = vor.u32 %v3237_v63, %v2325_v61  ;;  %1664 = vmatpush.bf16.msra.mxu3 %v2598_v62 }
  0x18   :  { %v2581_v2 = vld [vmem:[%s5172_s1 + $0x340] sm:$0xf]  ;;  %v3301_v3 = vld [vmem:[%s5172_s1 + $0x34c] sm:$0xf0]  ;;  %v2454_v6 = vor.u32 %v3269_v1, %v2453_v0  ;;  %1623 = vmatpush.bf16.msra.mxu0 %v2198_v4  ;;  %v3740_v1 = vor.u32 %v3192_v59, %v2141_v54 }
  0x19   :  { %v2181_v7 = vld [vmem:[%s5172_s1 + $0x20] sm:$0xf]  ;;  %v3201_v8 = vld [vmem:[%s5172_s1 + $0x2c] sm:$0xf0]  ;;  %v2582_v10 = vor.u32 %v3301_v3, %v2581_v2  ;;  %1637 = vmatpush.bf16.msra.mxu1 %v2326_v5 }
  0x1a   :  { %v2309_v9 = vld [vmem:[%s5172_s1 + $0x120] sm:$0xf]  ;;  %v3233_v11 = vld [vmem:[%s5172_s1 + $0x12c] sm:$0xf0]  ;;  %v2182_v16 = vor.u32 %v3201_v8, %v2181_v7  ;;  %1651 = vmatpush.bf16.msra.mxu2 %v2454_v6  ;;  %v3187_v6 = vld [vmem:[%s5173_s0 + $0x4] sm:$0xf] }
  0x1b   :  { %v2437_v12 = vld [vmem:[%s5172_s1 + $0x220] sm:$0xf]  ;;  %v3265_v13 = vld [vmem:[%s5172_s1 + $0x22c] sm:$0xf0]  ;;  %v2310_v19 = vor.u32 %v3233_v11, %v2309_v9  ;;  %1665 = vmatpush.bf16.msra.mxu3 %v2582_v10  ;;  %v2135_v7 = vld [vmem:[%s5173_s0 + $0x20] sm:$0xf0] }
  0x1c   :  { %v2565_v14 = vld [vmem:[%s5172_s1 + $0x320] sm:$0xf]  ;;  %v3297_v15 = vld [vmem:[%s5172_s1 + $0x32c] sm:$0xf0]  ;;  %v2438_v20 = vor.u32 %v3265_v13, %v2437_v12  ;;  %1624 = vmatpush.bf16.msra.mxu0 %v2182_v16  ;;  %v3188_v8 = vld [vmem:[%s5173_s0 + $0xc] sm:$0xf]  ;;  %v3762_v10 = vor.u32 %v3187_v6, %v2135_v7 }
  0x1d   :  { %v2165_v17 = vld [vmem:[%s5172_s1] sm:$0xf]  ;;  %v3197_v18 = vld [vmem:[%s5172_s1 + $0xc] sm:$0xf0]  ;;  %v2566_v24 = vor.u32 %v3297_v15, %v2565_v14  ;;  %1638 = vmatpush.bf16.msra.mxu1 %v2310_v19  ;;  %v2143_v11 = vld [vmem:[%s5173_s0 + $0x28] sm:$0xf0] }
  0x1e   :  { %v2293_v21 = vld [vmem:[%s5172_s1 + $0x100] sm:$0xf]  ;;  %v3229_v22 = vld [vmem:[%s5172_s1 + $0x10c] sm:$0xf0]  ;;  %v2166_v31 = vor.u32 %v3197_v18, %v2165_v17  ;;  %1652 = vmatpush.bf16.msra.mxu2 %v2438_v20  ;;  %v3776_v17 = vor.u32 %v3188_v8, %v2143_v11 }
  0x1f   :  { %v2421_v23 = vld [vmem:[%s5172_s1 + $0x200] sm:$0xf]  ;;  %v3261_v25 = vld [vmem:[%s5172_s1 + $0x20c] sm:$0xf0]  ;;  %v2294_v35 = vor.u32 %v3229_v22, %v2293_v21  ;;  %1666 = vmatpush.bf16.msra.mxu3 %v2566_v24 }
  0x20   :  { %v2549_v26 = vld [vmem:[%s5172_s1 + $0x300] sm:$0xf]  ;;  %v3293_v27 = vld [vmem:[%s5172_s1 + $0x30c] sm:$0xf0]  ;;  %v2422_v36 = vor.u32 %v3261_v25, %v2421_v23  ;;  %1625 = vmatpush.bf16.msra.mxu0 %v2166_v31 }
  0x21   :  { %v2789_v28 = vld [vmem:[%s5172_s1 + $0x4e0] sm:$0xf]  ;;  %v3353_v29 = vld [vmem:[%s5172_s1 + $0x4ec] sm:$0xf0]  ;;  %v2550_v39 = vor.u32 %v3293_v27, %v2549_v26  ;;  %1639 = vmatpush.bf16.msra.mxu1 %v2294_v35 }
  0x22   :  { %v2917_v30 = vld [vmem:[%s5172_s1 + $0x5e0] sm:$0xf]  ;;  %v3385_v32 = vld [vmem:[%s5172_s1 + $0x5ec] sm:$0xf0]  ;;  %v2790_v40 = vor.u32 %v3353_v29, %v2789_v28  ;;  %1653 = vmatpush.bf16.msra.mxu2 %v2422_v36 }
  0x23   :  { %v3045_v33 = vld [vmem:[%s5172_s1 + $0x6e0] sm:$0xf]  ;;  %v3417_v34 = vld [vmem:[%s5172_s1 + $0x6ec] sm:$0xf0]  ;;  %v2918_v43 = vor.u32 %v3385_v32, %v2917_v30  ;;  %1667 = vmatpush.bf16.msra.mxu3 %v2550_v39 }
  0x24   :  { %v3173_v37 = vld [vmem:[%s5172_s1 + $0x7e0] sm:$0xf]  ;;  %v3449_v38 = vld [vmem:[%s5172_s1 + $0x7ec] sm:$0xf0]  ;;  %v3046_v44 = vor.u32 %v3417_v34, %v3045_v33  ;;  %1674 = vmatpush.bf16.msrb.mxu0 %v2790_v40  ;;  %1640 = vmatmul.bf16.vlgmr.msra.gmra.mxu1 %v3762_v10 }
  0x25   :  { %v2773_v41 = vld [vmem:[%s5172_s1 + $0x4c0] sm:$0xf]  ;;  %v3349_v42 = vld [vmem:[%s5172_s1 + $0x4cc] sm:$0xf0]  ;;  %v3174_v48 = vor.u32 %v3449_v38, %v3173_v37  ;;  %1688 = vmatpush.bf16.msrb.mxu1 %v2918_v43  ;;  %1654 = vmatmul.bf16.vlgmr.msra.gmra.mxu2 %v3740_v1 }
  0x26   :  { %v2901_v45 = vld [vmem:[%s5172_s1 + $0x5c0] sm:$0xf]  ;;  %v3381_v46 = vld [vmem:[%s5172_s1 + $0x5cc] sm:$0xf0]  ;;  %v2774_v55 = vor.u32 %v3349_v42, %v2773_v41  ;;  %1702 = vmatpush.bf16.msrb.mxu2 %v3046_v44  ;;  %1668 = vmatmul.bf16.vlgmr.msra.gmra.mxu3 %v3776_v17 }
  0x27   :  { %v3029_v47 = vld [vmem:[%s5172_s1 + $0x6c0] sm:$0xf]  ;;  %v3413_v49 = vld [vmem:[%s5172_s1 + $0x6cc] sm:$0xf0]  ;;  %v2902_v60 = vor.u32 %v3381_v46, %v2901_v45  ;;  %1716 = vmatpush.bf16.msrb.mxu3 %v3174_v48 }
  0x28   :  { %v3157_v50 = vld [vmem:[%s5172_s1 + $0x7c0] sm:$0xf]  ;;  %v3445_v51 = vld [vmem:[%s5172_s1 + $0x7cc] sm:$0xf0]  ;;  %v3030_v61 = vor.u32 %v3413_v49, %v3029_v47  ;;  %1675 = vmatpush.bf16.msrb.mxu0 %v2774_v55 }
  0x29   :  { %v2133_v52 = vld [vmem:[%s5173_s0] sm:$0xf]  ;;  %v3345_v57 = vld [vmem:[%s5172_s1 + $0x4ac] sm:$0xf0]  ;;  %v3158_v2 = vor.u32 %v3445_v51, %v3157_v50  ;;  %1689 = vmatpush.bf16.msrb.mxu1 %v2902_v60 }
  0x2a   :  { %v3191_v53 = vld [vmem:[%s5173_s0 + $0x1c] sm:$0xf0]  ;;  %v3377_v63 = vld [vmem:[%s5172_s1 + $0x5ac] sm:$0xf0]  ;;  %1703 = vmatpush.bf16.msrb.mxu2 %v3030_v61 }
  0x2b   :  { %v2757_v56 = vld [vmem:[%s5172_s1 + $0x4a0] sm:$0xf]  ;;  %v3726_v58 = vor.u32 %v3191_v53, %v2133_v52  ;;  %v3409_v3 = vld [vmem:[%s5172_s1 + $0x6ac] sm:$0xf0]  ;;  %1717 = vmatpush.bf16.msrb.mxu3 %v3158_v2 }
  0x2c   :  { %v2885_v62 = vld [vmem:[%s5172_s1 + $0x5a0] sm:$0xf]  ;;  %v3441_v5 = vld [vmem:[%s5172_s1 + $0x7ac] sm:$0xf0]  ;;  %v2758_v9 = vor.u32 %v3345_v57, %v2757_v56 }
  0x2d   :  { %v3013_v0 = vld [vmem:[%s5172_s1 + $0x6a0] sm:$0xf]  ;;  %1626 = vmatmul.bf16.vlgmr.msra.gmra.mxu0 %v3726_v58  ;;  %v2886_v12 = vor.u32 %v3377_v63, %v2885_v62  ;;  %v3341_v15 = vld [vmem:[%s5172_s1 + $0x48c] sm:$0xf0] }
  0x2e   :  { %v3141_v4 = vld [vmem:[%s5172_s1 + $0x7a0] sm:$0xf]  ;;  %v3014_v13 = vor.u32 %v3409_v3, %v3013_v0  ;;  %v3373_v19 = vld [vmem:[%s5172_s1 + $0x58c] sm:$0xf0]  ;;  %1676 = vmatpush.bf16.msrb.mxu0 %v2758_v9  ;;  %v3223_v9 = vld [vmem:[%s5172_s1 + $0xe4] sm:$0xf] }
  0x2f   :  { %v2741_v14 = vld [vmem:[%s5172_s1 + $0x480] sm:$0xf]  ;;  %v3142_v18 = vor.u32 %v3441_v5, %v3141_v4  ;;  %v3405_v21 = vld [vmem:[%s5172_s1 + $0x68c] sm:$0xf0]  ;;  %1690 = vmatpush.bf16.msrb.mxu1 %v2886_v12  ;;  %v2279_v12 = vld [vmem:[%s5172_s1 + $0xf0] sm:$0xf0] }
  0x30   :  { %v2869_v16 = vld [vmem:[%s5172_s1 + $0x580] sm:$0xf]  ;;  %v3437_v23 = vld [vmem:[%s5172_s1 + $0x78c] sm:$0xf0]  ;;  %v2742_v24 = vor.u32 %v3341_v15, %v2741_v14  ;;  %1704 = vmatpush.bf16.msrb.mxu2 %v3014_v13  ;;  %v3255_v13 = vld [vmem:[%s5172_s1 + $0x1e4] sm:$0xf] }
  0x31   :  { %v2997_v20 = vld [vmem:[%s5172_s1 + $0x680] sm:$0xf]  ;;  %v2870_v25 = vor.u32 %v3373_v19, %v2869_v16  ;;  %v3337_v28 = vld [vmem:[%s5172_s1 + $0x46c] sm:$0xf0]  ;;  %1718 = vmatpush.bf16.msrb.mxu3 %v3142_v18  ;;  %v2407_v14 = vld [vmem:[%s5172_s1 + $0x1f0] sm:$0xf0] }
  0x32   :  { %v3125_v22 = vld [vmem:[%s5172_s1 + $0x780] sm:$0xf]  ;;  %v2998_v26 = vor.u32 %v3405_v21, %v2997_v20  ;;  %v3369_v31 = vld [vmem:[%s5172_s1 + $0x56c] sm:$0xf0]  ;;  %1677 = vmatpush.bf16.msrb.mxu0 %v2742_v24  ;;  %v3287_v15 = vld [vmem:[%s5172_s1 + $0x2e4] sm:$0xf] }
  0x33   :  { %v2725_v27 = vld [vmem:[%s5172_s1 + $0x460] sm:$0xf]  ;;  %v3126_v30 = vor.u32 %v3437_v23, %v3125_v22  ;;  %v3401_v33 = vld [vmem:[%s5172_s1 + $0x66c] sm:$0xf0]  ;;  %1691 = vmatpush.bf16.msrb.mxu1 %v2870_v25  ;;  %v2535_v16 = vld [vmem:[%s5172_s1 + $0x2f0] sm:$0xf0] }
  0x34   :  { %v2853_v29 = vld [vmem:[%s5172_s1 + $0x560] sm:$0xf]  ;;  %v3433_v35 = vld [vmem:[%s5172_s1 + $0x76c] sm:$0xf0]  ;;  %v2726_v36 = vor.u32 %v3337_v28, %v2725_v27  ;;  %1705 = vmatpush.bf16.msrb.mxu2 %v2998_v26  ;;  %v3319_v18 = vld [vmem:[%s5172_s1 + $0x3e4] sm:$0xf] }
  0x35   :  { %v2981_v32 = vld [vmem:[%s5172_s1 + $0x660] sm:$0xf]  ;;  %v2854_v37 = vor.u32 %v3369_v31, %v2853_v29  ;;  %v3333_v40 = vld [vmem:[%s5172_s1 + $0x44c] sm:$0xf0]  ;;  %1719 = vmatpush.bf16.msrb.mxu3 %v3126_v30  ;;  %v2663_v20 = vld [vmem:[%s5172_s1 + $0x3f0] sm:$0xf0]  ;;  %v2282_v29 = vor.u32 %v3223_v9, %v2279_v12 }
  0x36   :  { %v3109_v34 = vld [vmem:[%s5172_s1 + $0x760] sm:$0xf]  ;;  %v2982_v38 = vor.u32 %v3401_v33, %v2981_v32  ;;  %v3365_v43 = vld [vmem:[%s5172_s1 + $0x54c] sm:$0xf0]  ;;  %1678 = vmatpush.bf16.msrb.mxu0 %v2726_v36  ;;  %v2157_v25 = vld [vmem:[%s5173_s0 + $0x18] sm:$0xf]  ;;  %v2410_v33 = vor.u32 %v3255_v13, %v2407_v14 }
  0x37   :  { %v2709_v39 = vld [vmem:[%s5172_s1 + $0x440] sm:$0xf]  ;;  %v3110_v42 = vor.u32 %v3433_v35, %v3109_v34  ;;  %v3397_v45 = vld [vmem:[%s5172_s1 + $0x64c] sm:$0xf0]  ;;  %1692 = vmatpush.bf16.msrb.mxu1 %v2854_v37  ;;  %v3194_v26 = vld [vmem:[%s5173_s0 + $0x34] sm:$0xf0]  ;;  %v2538_v34 = vor.u32 %v3287_v15, %v2535_v16 }
  0x38   :  { %v2837_v41 = vld [vmem:[%s5172_s1 + $0x540] sm:$0xf]  ;;  %v3429_v47 = vld [vmem:[%s5172_s1 + $0x74c] sm:$0xf0]  ;;  %v2710_v48 = vor.u32 %v3333_v40, %v2709_v39  ;;  %1706 = vmatpush.bf16.msrb.mxu2 %v2982_v38  ;;  %v3189_v27 = vld [vmem:[%s5173_s0 + $0x14] sm:$0xf]  ;;  %v2666_v38 = vor.u32 %v3319_v18, %v2663_v20 }
  0x39   :  { %v2965_v44 = vld [vmem:[%s5172_s1 + $0x640] sm:$0xf]  ;;  %v2838_v50 = vor.u32 %v3365_v43, %v2837_v41  ;;  %v3329_v52 = vld [vmem:[%s5172_s1 + $0x42c] sm:$0xf0]  ;;  %1720 = vmatpush.bf16.msrb.mxu3 %v3110_v42  ;;  %v2151_v30 = vld [vmem:[%s5173_s0 + $0x30] sm:$0xf0]  ;;  %v3959_v43 = vor.u32 %v3194_v26, %v2157_v25 }
  0x3a   :  { %v3093_v46 = vld [vmem:[%s5172_s1 + $0x740] sm:$0xf]  ;;  %v2966_v51 = vor.u32 %v3397_v45, %v2965_v44  ;;  %v3361_v54 = vld [vmem:[%s5172_s1 + $0x52c] sm:$0xf0]  ;;  %1679 = vmatpush.bf16.msrb.mxu0 %v2710_v48  ;;  %v3190_v31 = vld [vmem:[%s5173_s0 + $0x1c] sm:$0xf]  ;;  %v3961_v44 = vor.u32 %v3189_v27, %v2151_v30 }
  0x3b   :  { %v2693_v49 = vld [vmem:[%s5172_s1 + $0x420] sm:$0xf]  ;;  %v3094_v55 = vor.u32 %v3429_v47, %v3093_v46  ;;  %v3393_v57 = vld [vmem:[%s5172_s1 + $0x62c] sm:$0xf0]  ;;  %1693 = vmatpush.bf16.msrb.mxu1 %v2838_v50  ;;  %v2159_v32 = vld [vmem:[%s5173_s0 + $0x38] sm:$0xf0] }
  0x3c   :  { %v2821_v53 = vld [vmem:[%s5172_s1 + $0x520] sm:$0xf]  ;;  %v3425_v60 = vld [vmem:[%s5172_s1 + $0x72c] sm:$0xf0]  ;;  %v2694_v63 = vor.u32 %v3329_v52, %v2693_v49  ;;  %1707 = vmatpush.bf16.msrb.mxu2 %v2966_v51  ;;  %v3219_v35 = vld [vmem:[%s5172_s1 + $0xc4] sm:$0xf]  ;;  %v3969_v47 = vor.u32 %v3190_v31, %v2159_v32 }
  0x3d   :  { %v2949_v56 = vld [vmem:[%s5172_s1 + $0x620] sm:$0xf]  ;;  %v3325_v62 = vld [vmem:[%s5172_s1 + $0x40c] sm:$0xf0]  ;;  %v2822_v5 = vor.u32 %v3361_v54, %v2821_v53  ;;  %1721 = vmatpush.bf16.msrb.mxu3 %v3094_v55  ;;  %v2263_v36 = vld [vmem:[%s5172_s1 + $0xd0] sm:$0xf0] }
  0x3e   :  { %v3077_v59 = vld [vmem:[%s5172_s1 + $0x720] sm:$0xf]  ;;  %v3357_v2 = vld [vmem:[%s5172_s1 + $0x50c] sm:$0xf0]  ;;  %v2950_v6 = vor.u32 %v3393_v57, %v2949_v56  ;;  %1680 = vmatpush.bf16.msrb.mxu0 %v2694_v63  ;;  %v3251_v37 = vld [vmem:[%s5172_s1 + $0x1c4] sm:$0xf]  ;;  %v2266_v48 = vor.u32 %v3219_v35, %v2263_v36 }
  0x3f   :  { %v2677_v61 = vld [vmem:[%s5172_s1 + $0x400] sm:$0xf]  ;;  %v3389_v4 = vld [vmem:[%s5172_s1 + $0x60c] sm:$0xf0]  ;;  %v3078_v11 = vor.u32 %v3425_v60, %v3077_v59  ;;  %1694 = vmatpush.bf16.msrb.mxu1 %v2822_v5  ;;  %v2391_v40 = vld [vmem:[%s5172_s1 + $0x1d0] sm:$0xf0] }
  0x40   :  { %v2805_v0 = vld [vmem:[%s5172_s1 + $0x500] sm:$0xf]  ;;  %v3421_v8 = vld [vmem:[%s5172_s1 + $0x70c] sm:$0xf0]  ;;  %v2678_v19 = vor.u32 %v3325_v62, %v2677_v61  ;;  %1708 = vmatpush.bf16.msrb.mxu2 %v2950_v6  ;;  %v3283_v41 = vld [vmem:[%s5172_s1 + $0x2c4] sm:$0xf]  ;;  %v2394_v49 = vor.u32 %v3251_v37, %v2391_v40 }
  0x41   :  { %v2933_v3 = vld [vmem:[%s5172_s1 + $0x600] sm:$0xf]  ;;  %v2149_v21 = vld [vmem:[%s5173_s0 + $0x10] sm:$0xf]  ;;  %v2806_v23 = vor.u32 %v3357_v2, %v2805_v0  ;;  %1722 = vmatpush.bf16.msrb.mxu3 %v3078_v11  ;;  %v2519_v42 = vld [vmem:[%s5172_s1 + $0x2d0] sm:$0xf0] }
  0x42   :  { %v3061_v7 = vld [vmem:[%s5172_s1 + $0x700] sm:$0xf]  ;;  %v3193_v22 = vld [vmem:[%s5173_s0 + $0x2c] sm:$0xf0]  ;;  %v2934_v24 = vor.u32 %v3389_v4, %v2933_v3  ;;  %1681 = vmatpush.bf16.msrb.mxu0 %v2678_v19  ;;  %v3315_v45 = vld [vmem:[%s5172_s1 + $0x3c4] sm:$0xf]  ;;  %v2522_v50 = vor.u32 %v3283_v41, %v2519_v42 }
  0x43   :  { %v3062_v28 = vor.u32 %v3421_v8, %v3061_v7  ;;  %v3948_v39 = vor.u32 %v3193_v22, %v2149_v21  ;;  %1695 = vmatpush.bf16.msrb.mxu1 %v2806_v23  ;;  %v2647_v46 = vld [vmem:[%s5172_s1 + $0x3d0] sm:$0xf0]  ;;  %v3215_v51 = vld [vmem:[%s5172_s1 + $0xa4] sm:$0xf] }
  0x44   :  { %1709 = vmatpush.bf16.msrb.mxu2 %v2934_v24  ;;  %v2247_v52 = vld [vmem:[%s5172_s1 + $0xb0] sm:$0xf0]  ;;  %v3247_v53 = vld [vmem:[%s5172_s1 + $0x1a4] sm:$0xf]  ;;  %v2650_v54 = vor.u32 %v3315_v45, %v2647_v46 }
  0x45   :  { %1723 = vmatpush.bf16.msrb.mxu3 %v3062_v28  ;;  %1682 = vmatmul.bf16.vlgmr.msrb.gmra.mxu0 %v3948_v39  ;;  %v2375_v55 = vld [vmem:[%s5172_s1 + $0x1b0] sm:$0xf0]  ;;  %v3279_v56 = vld [vmem:[%s5172_s1 + $0x2a4] sm:$0xf]  ;;  %v2250_v61 = vor.u32 %v3215_v51, %v2247_v52 }
  0x46   :  { %1730 = vmatpush.bf16.msra.mxu0 %v2282_v29  ;;  %v2503_v57 = vld [vmem:[%s5172_s1 + $0x2b0] sm:$0xf0]  ;;  %1696 = vmatmul.bf16.vlgmr.msrb.gmra.mxu1 %v3961_v44  ;;  %v3311_v59 = vld [vmem:[%s5172_s1 + $0x3a4] sm:$0xf]  ;;  %v2378_v62 = vor.u32 %v3247_v53, %v2375_v55 }
  0x47   :  { %1744 = vmatpush.bf16.msra.mxu1 %v2410_v33  ;;  %1710 = vmatmul.bf16.vlgmr.msrb.gmra.mxu2 %v3959_v43  ;;  %v2631_v60 = vld [vmem:[%s5172_s1 + $0x3b0] sm:$0xf0]  ;;  %v2506_v63 = vor.u32 %v3279_v56, %v2503_v57  ;;  %v3211_v0 = vld [vmem:[%s5172_s1 + $0x84] sm:$0xf] }
  0x48   :  { %1758 = vmatpush.bf16.msra.mxu2 %v2538_v34  ;;  %1724 = vmatmul.bf16.vlgmr.msrb.gmra.mxu3 %v3969_v47  ;;  %v2231_v2 = vld [vmem:[%s5172_s1 + $0x90] sm:$0xf0]  ;;  %v3243_v3 = vld [vmem:[%s5172_s1 + $0x184] sm:$0xf]  ;;  %v2634_v4 = vor.u32 %v3311_v59, %v2631_v60 }
  0x49   :  { %1772 = vmatpush.bf16.msra.mxu3 %v2666_v38  ;;  %v2359_v5 = vld [vmem:[%s5172_s1 + $0x190] sm:$0xf0]  ;;  %v3275_v6 = vld [vmem:[%s5172_s1 + $0x284] sm:$0xf]  ;;  %v2234_v11 = vor.u32 %v3211_v0, %v2231_v2 }
  0x4a   :  { %1731 = vmatpush.bf16.msra.mxu0 %v2266_v48  ;;  %v2487_v7 = vld [vmem:[%s5172_s1 + $0x290] sm:$0xf0]  ;;  %v3307_v8 = vld [vmem:[%s5172_s1 + $0x384] sm:$0xf]  ;;  %v2362_v12 = vor.u32 %v3243_v3, %v2359_v5 }
  0x4b   :  { %1745 = vmatpush.bf16.msra.mxu1 %v2394_v49  ;;  %v2615_v9 = vld [vmem:[%s5172_s1 + $0x390] sm:$0xf0]  ;;  %v2490_v13 = vor.u32 %v3275_v6, %v2487_v7  ;;  %v3207_v14 = vld [vmem:[%s5172_s1 + $0x64] sm:$0xf] }
  0x4c   :  { %1759 = vmatpush.bf16.msra.mxu2 %v2522_v50  ;;  %v2215_v15 = vld [vmem:[%s5172_s1 + $0x70] sm:$0xf0]  ;;  %v3239_v16 = vld [vmem:[%s5172_s1 + $0x164] sm:$0xf]  ;;  %v2618_v18 = vor.u32 %v3307_v8, %v2615_v9 }
  0x4d   :  { %1773 = vmatpush.bf16.msra.mxu3 %v2650_v54  ;;  %v2343_v19 = vld [vmem:[%s5172_s1 + $0x170] sm:$0xf0]  ;;  %v3271_v20 = vld [vmem:[%s5172_s1 + $0x264] sm:$0xf]  ;;  %v2218_v24 = vor.u32 %v3207_v14, %v2215_v15 }
  0x4e   :  { %1732 = vmatpush.bf16.msra.mxu0 %v2250_v61  ;;  %v2471_v21 = vld [vmem:[%s5172_s1 + $0x270] sm:$0xf0]  ;;  %v3303_v22 = vld [vmem:[%s5172_s1 + $0x364] sm:$0xf]  ;;  %v2346_v25 = vor.u32 %v3239_v16, %v2343_v19 }
  0x4f   :  { %1746 = vmatpush.bf16.msra.mxu1 %v2378_v62  ;;  %v2599_v23 = vld [vmem:[%s5172_s1 + $0x370] sm:$0xf0]  ;;  %v2474_v26 = vor.u32 %v3271_v20, %v2471_v21  ;;  %v3203_v27 = vld [vmem:[%s5172_s1 + $0x44] sm:$0xf] }
  0x50   :  { %1760 = vmatpush.bf16.msra.mxu2 %v2506_v63  ;;  %v2199_v28 = vld [vmem:[%s5172_s1 + $0x50] sm:$0xf0]  ;;  %v3235_v29 = vld [vmem:[%s5172_s1 + $0x144] sm:$0xf]  ;;  %v2602_v30 = vor.u32 %v3303_v22, %v2599_v23 }
  0x51   :  { %1774 = vmatpush.bf16.msra.mxu3 %v2634_v4  ;;  %v2327_v31 = vld [vmem:[%s5172_s1 + $0x150] sm:$0xf0]  ;;  %v3267_v32 = vld [vmem:[%s5172_s1 + $0x244] sm:$0xf]  ;;  %v2202_v36 = vor.u32 %v3203_v27, %v2199_v28 }
  0x52   :  { %1733 = vmatpush.bf16.msra.mxu0 %v2234_v11  ;;  %v2455_v33 = vld [vmem:[%s5172_s1 + $0x250] sm:$0xf0]  ;;  %v3299_v34 = vld [vmem:[%s5172_s1 + $0x344] sm:$0xf]  ;;  %v2330_v37 = vor.u32 %v3235_v29, %v2327_v31 }
  0x53   :  { %1747 = vmatpush.bf16.msra.mxu1 %v2362_v12  ;;  %v2583_v35 = vld [vmem:[%s5172_s1 + $0x350] sm:$0xf0]  ;;  %v2458_v38 = vor.u32 %v3267_v32, %v2455_v33  ;;  %v3199_v40 = vld [vmem:[%s5172_s1 + $0x24] sm:$0xf] }
  0x54   :  { %1761 = vmatpush.bf16.msra.mxu2 %v2490_v13  ;;  %v2183_v41 = vld [vmem:[%s5172_s1 + $0x30] sm:$0xf0]  ;;  %v3231_v42 = vld [vmem:[%s5172_s1 + $0x124] sm:$0xf]  ;;  %v2586_v45 = vor.u32 %v3299_v34, %v2583_v35 }
  0x55   :  { %1775 = vmatpush.bf16.msra.mxu3 %v2618_v18  ;;  %v2311_v46 = vld [vmem:[%s5172_s1 + $0x130] sm:$0xf0]  ;;  %v3263_v48 = vld [vmem:[%s5172_s1 + $0x224] sm:$0xf]  ;;  %v2186_v52 = vor.u32 %v3199_v40, %v2183_v41 }
  0x56   :  { %1734 = vmatpush.bf16.msra.mxu0 %v2218_v24  ;;  %v2439_v49 = vld [vmem:[%s5172_s1 + $0x230] sm:$0xf0]  ;;  %v3295_v50 = vld [vmem:[%s5172_s1 + $0x324] sm:$0xf]  ;;  %v2314_v55 = vor.u32 %v3231_v42, %v2311_v46 }
  0x57   :  { %1748 = vmatpush.bf16.msra.mxu1 %v2346_v25  ;;  %v2567_v51 = vld [vmem:[%s5172_s1 + $0x330] sm:$0xf0]  ;;  %v3195_v53 = vld [vmem:[%s5172_s1 + $0x4] sm:$0xf]  ;;  %v2442_v56 = vor.u32 %v3263_v48, %v2439_v49 }
  0x58   :  { %1762 = vmatpush.bf16.msra.mxu2 %v2474_v26  ;;  %v2167_v54 = vld [vmem:[%s5172_s1 + $0x10] sm:$0xf0]  ;;  %v3227_v57 = vld [vmem:[%s5172_s1 + $0x104] sm:$0xf]  ;;  %v2570_v61 = vor.u32 %v3295_v50, %v2567_v51 }
  0x59   :  { %1776 = vmatpush.bf16.msra.mxu3 %v2602_v30  ;;  %v2295_v59 = vld [vmem:[%s5172_s1 + $0x110] sm:$0xf0]  ;;  %v3259_v60 = vld [vmem:[%s5172_s1 + $0x204] sm:$0xf]  ;;  %v2170_v5 = vor.u32 %v3195_v53, %v2167_v54 }
  0x5a   :  { %1735 = vmatpush.bf16.msra.mxu0 %v2202_v36  ;;  %v2423_v62 = vld [vmem:[%s5172_s1 + $0x210] sm:$0xf0]  ;;  %v3291_v63 = vld [vmem:[%s5172_s1 + $0x304] sm:$0xf]  ;;  %v2298_v9 = vor.u32 %v3227_v57, %v2295_v59 }
  0x5b   :  { %1749 = vmatpush.bf16.msra.mxu1 %v2330_v37  ;;  %v2551_v0 = vld [vmem:[%s5172_s1 + $0x310] sm:$0xf0]  ;;  %v3351_v2 = vld [vmem:[%s5172_s1 + $0x4e4] sm:$0xf]  ;;  %v2426_v11 = vor.u32 %v3259_v60, %v2423_v62 }
  0x5c   :  { %1763 = vmatpush.bf16.msra.mxu2 %v2458_v38  ;;  %v2791_v3 = vld [vmem:[%s5172_s1 + $0x4f0] sm:$0xf0]  ;;  %v3383_v4 = vld [vmem:[%s5172_s1 + $0x5e4] sm:$0xf]  ;;  %v2554_v14 = vor.u32 %v3291_v63, %v2551_v0 }
  0x5d   :  { %1777 = vmatpush.bf16.msra.mxu3 %v2586_v45  ;;  %v2919_v6 = vld [vmem:[%s5172_s1 + $0x5f0] sm:$0xf0]  ;;  %v3415_v7 = vld [vmem:[%s5172_s1 + $0x6e4] sm:$0xf]  ;;  %v2794_v15 = vor.u32 %v3351_v2, %v2791_v3 }
  0x5e   :  { %1736 = vmatpush.bf16.msra.mxu0 %v2186_v52  ;;  %v3047_v8 = vld [vmem:[%s5172_s1 + $0x6f0] sm:$0xf0]  ;;  %v3447_v12 = vld [vmem:[%s5172_s1 + $0x7e4] sm:$0xf]  ;;  %v2922_v16 = vor.u32 %v3383_v4, %v2919_v6 }
  0x5f   :  { %1750 = vmatpush.bf16.msra.mxu1 %v2314_v55  ;;  %v3175_v13 = vld [vmem:[%s5172_s1 + $0x7f0] sm:$0xf0]  ;;  %v3050_v18 = vor.u32 %v3415_v7, %v3047_v8  ;;  %v3347_v19 = vld [vmem:[%s5172_s1 + $0x4c4] sm:$0xf] }
  0x60   :  { %1764 = vmatpush.bf16.msra.mxu2 %v2442_v56  ;;  %v2775_v20 = vld [vmem:[%s5172_s1 + $0x4d0] sm:$0xf0]  ;;  %v3379_v21 = vld [vmem:[%s5172_s1 + $0x5c4] sm:$0xf]  ;;  %v3178_v22 = vor.u32 %v3447_v12, %v3175_v13 }
  0x61   :  { %1778 = vmatpush.bf16.msra.mxu3 %v2570_v61  ;;  %v2903_v23 = vld [vmem:[%s5172_s1 + $0x5d0] sm:$0xf0]  ;;  %v3411_v24 = vld [vmem:[%s5172_s1 + $0x6c4] sm:$0xf]  ;;  %v2778_v28 = vor.u32 %v3347_v19, %v2775_v20 }
  0x62   :  { %1737 = vmatpush.bf16.msra.mxu0 %v2170_v5  ;;  %v3031_v25 = vld [vmem:[%s5172_s1 + $0x6d0] sm:$0xf0]  ;;  %v3443_v26 = vld [vmem:[%s5172_s1 + $0x7c4] sm:$0xf]  ;;  %v2906_v29 = vor.u32 %v3379_v21, %v2903_v23 }
  0x63   :  { %1751 = vmatpush.bf16.msra.mxu1 %v2298_v9  ;;  %v3159_v27 = vld [vmem:[%s5172_s1 + $0x7d0] sm:$0xf0]  ;;  %v3034_v30 = vor.u32 %v3411_v24, %v3031_v25  ;;  %v3343_v31 = vld [vmem:[%s5172_s1 + $0x4a4] sm:$0xf] }
  0x64   :  { %1765 = vmatpush.bf16.msra.mxu2 %v2426_v11  ;;  %v2759_v32 = vld [vmem:[%s5172_s1 + $0x4b0] sm:$0xf0]  ;;  %v3375_v33 = vld [vmem:[%s5172_s1 + $0x5a4] sm:$0xf]  ;;  %v3162_v34 = vor.u32 %v3443_v26, %v3159_v27 }
  0x65   :  { %1779 = vmatpush.bf16.msra.mxu3 %v2554_v14  ;;  %v2887_v35 = vld [vmem:[%s5172_s1 + $0x5b0] sm:$0xf0]  ;;  %v3407_v36 = vld [vmem:[%s5172_s1 + $0x6a4] sm:$0xf]  ;;  %1738 = vmatmul.bf16.vlgmr.msra.gmra.mxu0 %v3726_v58  ;;  %v2762_v41 = vor.u32 %v3343_v31, %v2759_v32 }
  0x66   :  { %1786 = vmatpush.bf16.msrb.mxu0 %v2794_v15  ;;  %v3015_v37 = vld [vmem:[%s5172_s1 + $0x6b0] sm:$0xf0]  ;;  %v3439_v38 = vld [vmem:[%s5172_s1 + $0x7a4] sm:$0xf]  ;;  %1752 = vmatmul.bf16.vlgmr.msra.gmra.mxu1 %v3762_v10  ;;  %v2890_v42 = vor.u32 %v3375_v33, %v2887_v35 }
  0x67   :  { %1800 = vmatpush.bf16.msrb.mxu1 %v2922_v16  ;;  %v3143_v40 = vld [vmem:[%s5172_s1 + $0x7b0] sm:$0xf0]  ;;  %1766 = vmatmul.bf16.vlgmr.msra.gmra.mxu2 %v3740_v1  ;;  %v3018_v45 = vor.u32 %v3407_v36, %v3015_v37  ;;  %v3339_v46 = vld [vmem:[%s5172_s1 + $0x484] sm:$0xf] }
  0x68   :  { %1814 = vmatpush.bf16.msrb.mxu2 %v3050_v18  ;;  %1780 = vmatmul.bf16.vlgmr.msra.gmra.mxu3 %v3776_v17  ;;  %v2743_v48 = vld [vmem:[%s5172_s1 + $0x490] sm:$0xf0]  ;;  %v3371_v49 = vld [vmem:[%s5172_s1 + $0x584] sm:$0xf]  ;;  %v3146_v50 = vor.u32 %v3439_v38, %v3143_v40 }
  0x69   :  { %1828 = vmatpush.bf16.msrb.mxu3 %v3178_v22  ;;  %v2871_v51 = vld [vmem:[%s5172_s1 + $0x590] sm:$0xf0]  ;;  %v3403_v52 = vld [vmem:[%s5172_s1 + $0x684] sm:$0xf]  ;;  %v2746_v56 = vor.u32 %v3339_v46, %v2743_v48  ;;  %v2285_v48 = vld [vmem:[%s5172_s1 + $0xe8] sm:$0xf] }
  0x6a   :  { %1787 = vmatpush.bf16.msrb.mxu0 %v2778_v28  ;;  %v2999_v53 = vld [vmem:[%s5172_s1 + $0x690] sm:$0xf0]  ;;  %v3435_v54 = vld [vmem:[%s5172_s1 + $0x784] sm:$0xf]  ;;  %v2874_v57 = vor.u32 %v3371_v49, %v2871_v51  ;;  %v3226_v49 = vld [vmem:[%s5172_s1 + $0xf4] sm:$0xf0] }
  0x6b   :  { %1801 = vmatpush.bf16.msrb.mxu1 %v2906_v29  ;;  %v3127_v55 = vld [vmem:[%s5172_s1 + $0x790] sm:$0xf0]  ;;  %v3002_v59 = vor.u32 %v3403_v52, %v2999_v53  ;;  %v3335_v60 = vld [vmem:[%s5172_s1 + $0x464] sm:$0xf]  ;;  %v3258_v52 = vld [vmem:[%s5172_s1 + $0x1f4] sm:$0xf0] }
  0x6c   :  { %1815 = vmatpush.bf16.msrb.mxu2 %v3034_v30  ;;  %v2727_v61 = vld [vmem:[%s5172_s1 + $0x470] sm:$0xf0]  ;;  %v3367_v62 = vld [vmem:[%s5172_s1 + $0x564] sm:$0xf]  ;;  %v3130_v63 = vor.u32 %v3435_v54, %v3127_v55  ;;  %v2541_v53 = vld [vmem:[%s5172_s1 + $0x2e8] sm:$0xf] }
  0x6d   :  { %1829 = vmatpush.bf16.msrb.mxu3 %v3162_v34  ;;  %v2855_v0 = vld [vmem:[%s5172_s1 + $0x570] sm:$0xf0]  ;;  %v3399_v2 = vld [vmem:[%s5172_s1 + $0x664] sm:$0xf]  ;;  %v2730_v6 = vor.u32 %v3335_v60, %v2727_v61  ;;  %v3290_v54 = vld [vmem:[%s5172_s1 + $0x2f4] sm:$0xf0]  ;;  %v2286_v61 = vor.u32 %v3226_v49, %v2285_v48 }
  0x6e   :  { %1788 = vmatpush.bf16.msrb.mxu0 %v2762_v41  ;;  %v2983_v3 = vld [vmem:[%s5172_s1 + $0x670] sm:$0xf0]  ;;  %v3431_v4 = vld [vmem:[%s5172_s1 + $0x764] sm:$0xf]  ;;  %v2858_v7 = vor.u32 %v3367_v62, %v2855_v0  ;;  %v2269_v0 = vld [vmem:[%s5172_s1 + $0xc8] sm:$0xf] }
  0x6f   :  { %1802 = vmatpush.bf16.msrb.mxu1 %v2890_v42  ;;  %v3111_v5 = vld [vmem:[%s5172_s1 + $0x770] sm:$0xf0]  ;;  %v2986_v8 = vor.u32 %v3399_v2, %v2983_v3  ;;  %v3331_v9 = vld [vmem:[%s5172_s1 + $0x444] sm:$0xf]  ;;  %v3222_v2 = vld [vmem:[%s5172_s1 + $0xd4] sm:$0xf0] }
  0x70   :  { %1816 = vmatpush.bf16.msrb.mxu2 %v3018_v45  ;;  %v2711_v11 = vld [vmem:[%s5172_s1 + $0x450] sm:$0xf0]  ;;  %v3363_v12 = vld [vmem:[%s5172_s1 + $0x544] sm:$0xf]  ;;  %v3114_v13 = vor.u32 %v3431_v4, %v3111_v5  ;;  %v2397_v3 = vld [vmem:[%s5172_s1 + $0x1c8] sm:$0xf] }
  0x71   :  { %1830 = vmatpush.bf16.msrb.mxu3 %v3146_v50  ;;  %v2839_v14 = vld [vmem:[%s5172_s1 + $0x550] sm:$0xf0]  ;;  %v3395_v15 = vld [vmem:[%s5172_s1 + $0x644] sm:$0xf]  ;;  %v2714_v20 = vor.u32 %v3331_v9, %v2711_v11  ;;  %v2413_v50 = vld [vmem:[%s5172_s1 + $0x1e8] sm:$0xf]  ;;  %v2270_v11 = vor.u32 %v3222_v2, %v2269_v0 }
  0x72   :  { %1789 = vmatpush.bf16.msrb.mxu0 %v2746_v56  ;;  %v2967_v16 = vld [vmem:[%s5172_s1 + $0x650] sm:$0xf0]  ;;  %v3427_v18 = vld [vmem:[%s5172_s1 + $0x744] sm:$0xf]  ;;  %v2842_v21 = vor.u32 %v3363_v12, %v2839_v14  ;;  %v2414_v62 = vor.u32 %v3258_v52, %v2413_v50  ;;  %v3254_v5 = vld [vmem:[%s5172_s1 + $0x1d4] sm:$0xf0] }
  0x73   :  { %1803 = vmatpush.bf16.msrb.mxu1 %v2874_v57  ;;  %v3095_v19 = vld [vmem:[%s5172_s1 + $0x750] sm:$0xf0]  ;;  %v2970_v22 = vor.u32 %v3395_v15, %v2967_v16  ;;  %v3327_v23 = vld [vmem:[%s5172_s1 + $0x424] sm:$0xf]  ;;  %v2669_v57 = vld [vmem:[%s5172_s1 + $0x3e8] sm:$0xf]  ;;  %v2398_v12 = vor.u32 %v3254_v5, %v2397_v3 }
  0x74   :  { %1817 = vmatpush.bf16.msrb.mxu2 %v3002_v59  ;;  %v2695_v24 = vld [vmem:[%s5172_s1 + $0x430] sm:$0xf0]  ;;  %v3359_v25 = vld [vmem:[%s5172_s1 + $0x524] sm:$0xf]  ;;  %v3098_v26 = vor.u32 %v3427_v18, %v3095_v19  ;;  %v3322_v59 = vld [vmem:[%s5172_s1 + $0x3f4] sm:$0xf0] }
  0x75   :  { %1831 = vmatpush.bf16.msrb.mxu3 %v3130_v63  ;;  %v2823_v27 = vld [vmem:[%s5172_s1 + $0x530] sm:$0xf0]  ;;  %v3391_v28 = vld [vmem:[%s5172_s1 + $0x624] sm:$0xf]  ;;  %v2698_v32 = vor.u32 %v3327_v23, %v2695_v24  ;;  %v2542_v63 = vor.u32 %v3290_v54, %v2541_v53  ;;  %v2670_v4 = vor.u32 %v3322_v59, %v2669_v57  ;;  %v3318_v9 = vld [vmem:[%s5172_s1 + $0x3d4] sm:$0xf0] }
  0x76   :  { %1790 = vmatpush.bf16.msrb.mxu0 %v2730_v6  ;;  %v2951_v29 = vld [vmem:[%s5172_s1 + $0x630] sm:$0xf0]  ;;  %v3423_v30 = vld [vmem:[%s5172_s1 + $0x724] sm:$0xf]  ;;  %v2826_v35 = vor.u32 %v3359_v25, %v2823_v27  ;;  %v2525_v6 = vld [vmem:[%s5172_s1 + $0x2c8] sm:$0xf] }
  0x77   :  { %1804 = vmatpush.bf16.msrb.mxu1 %v2858_v7  ;;  %v3079_v31 = vld [vmem:[%s5172_s1 + $0x730] sm:$0xf0]  ;;  %v3323_v33 = vld [vmem:[%s5172_s1 + $0x404] sm:$0xf]  ;;  %v2954_v36 = vor.u32 %v3391_v28, %v2951_v29  ;;  %v3286_v7 = vld [vmem:[%s5172_s1 + $0x2d4] sm:$0xf0] }
  0x78   :  { %1818 = vmatpush.bf16.msrb.mxu2 %v2986_v8  ;;  %v2679_v34 = vld [vmem:[%s5172_s1 + $0x410] sm:$0xf0]  ;;  %v3355_v37 = vld [vmem:[%s5172_s1 + $0x504] sm:$0xf]  ;;  %v3082_v41 = vor.u32 %v3423_v30, %v3079_v31  ;;  %v2653_v8 = vld [vmem:[%s5172_s1 + $0x3c8] sm:$0xf] }
  0x79   :  { %1832 = vmatpush.bf16.msrb.mxu3 %v3114_v13  ;;  %v2807_v38 = vld [vmem:[%s5172_s1 + $0x510] sm:$0xf0]  ;;  %v3387_v40 = vld [vmem:[%s5172_s1 + $0x604] sm:$0xf]  ;;  %v2682_v51 = vor.u32 %v3323_v33, %v2679_v34  ;;  %v2526_v13 = vor.u32 %v3286_v7, %v2525_v6  ;;  %v2253_v14 = vld [vmem:[%s5172_s1 + $0xa8] sm:$0xf]  ;;  %v2654_v18 = vor.u32 %v3318_v9, %v2653_v8 }
  0x7a   :  { %1791 = vmatpush.bf16.msrb.mxu0 %v2714_v20  ;;  %v2935_v42 = vld [vmem:[%s5172_s1 + $0x610] sm:$0xf0]  ;;  %v3419_v45 = vld [vmem:[%s5172_s1 + $0x704] sm:$0xf]  ;;  %v2810_v55 = vor.u32 %v3355_v37, %v2807_v38  ;;  %v3218_v15 = vld [vmem:[%s5172_s1 + $0xb4] sm:$0xf0] }
  0x7b   :  { %1805 = vmatpush.bf16.msrb.mxu1 %v2842_v21  ;;  %v3063_v46 = vld [vmem:[%s5172_s1 + $0x710] sm:$0xf0]  ;;  %v2938_v56 = vor.u32 %v3387_v40, %v2935_v42  ;;  %v2381_v16 = vld [vmem:[%s5172_s1 + $0x1a8] sm:$0xf]  ;;  %v3250_v19 = vld [vmem:[%s5172_s1 + $0x1b4] sm:$0xf0]  ;;  %v2254_v24 = vor.u32 %v3218_v15, %v2253_v14 }
  0x7c   :  { %1819 = vmatpush.bf16.msrb.mxu2 %v2970_v22  ;;  %v3066_v60 = vor.u32 %v3419_v45, %v3063_v46  ;;  %v2509_v20 = vld [vmem:[%s5172_s1 + $0x2a8] sm:$0xf]  ;;  %v3282_v21 = vld [vmem:[%s5172_s1 + $0x2b4] sm:$0xf0]  ;;  %v2382_v25 = vor.u32 %v3250_v19, %v2381_v16 }
  0x7d   :  { %1833 = vmatpush.bf16.msrb.mxu3 %v3098_v26  ;;  %v2637_v22 = vld [vmem:[%s5172_s1 + $0x3a8] sm:$0xf]  ;;  %v3314_v23 = vld [vmem:[%s5172_s1 + $0x3b4] sm:$0xf0]  ;;  %v2510_v26 = vor.u32 %v3282_v21, %v2509_v20 }
  0x7e   :  { %1792 = vmatpush.bf16.msrb.mxu0 %v2698_v32  ;;  %v2237_v27 = vld [vmem:[%s5172_s1 + $0x88] sm:$0xf]  ;;  %v3214_v28 = vld [vmem:[%s5172_s1 + $0x94] sm:$0xf0]  ;;  %v2638_v30 = vor.u32 %v3314_v23, %v2637_v22 }
  0x7f   :  { %1806 = vmatpush.bf16.msrb.mxu1 %v2826_v35  ;;  %v2365_v29 = vld [vmem:[%s5172_s1 + $0x188] sm:$0xf]  ;;  %v3246_v31 = vld [vmem:[%s5172_s1 + $0x194] sm:$0xf0] }
  0x80   :  { %1820 = vmatpush.bf16.msrb.mxu2 %v2954_v36  ;;  %v2493_v32 = vld [vmem:[%s5172_s1 + $0x288] sm:$0xf]  ;;  %v3278_v33 = vld [vmem:[%s5172_s1 + $0x294] sm:$0xf0]  ;;  %v2238_v36 = vor.u32 %v3214_v28, %v2237_v27  ;;  %v2366_v37 = vor.u32 %v3246_v31, %v2365_v29 }
  0x81   :  { %1834 = vmatpush.bf16.msrb.mxu3 %v3082_v41  ;;  %v2621_v34 = vld [vmem:[%s5172_s1 + $0x388] sm:$0xf]  ;;  %v3310_v35 = vld [vmem:[%s5172_s1 + $0x394] sm:$0xf0]  ;;  %v2494_v38 = vor.u32 %v3278_v33, %v2493_v32 }
  0x82   :  { %1793 = vmatpush.bf16.msrb.mxu0 %v2682_v51  ;;  %v2221_v40 = vld [vmem:[%s5172_s1 + $0x68] sm:$0xf]  ;;  %v3210_v41 = vld [vmem:[%s5172_s1 + $0x74] sm:$0xf0]  ;;  %v2622_v45 = vor.u32 %v3310_v35, %v2621_v34 }
  0x83   :  { %1807 = vmatpush.bf16.msrb.mxu1 %v2810_v55  ;;  %v2349_v42 = vld [vmem:[%s5172_s1 + $0x168] sm:$0xf]  ;;  %v3242_v46 = vld [vmem:[%s5172_s1 + $0x174] sm:$0xf0]  ;;  %v2222_v52 = vor.u32 %v3210_v41, %v2221_v40 }
  0x84   :  { %1821 = vmatpush.bf16.msrb.mxu2 %v2938_v56  ;;  %v2477_v48 = vld [vmem:[%s5172_s1 + $0x268] sm:$0xf]  ;;  %v3274_v49 = vld [vmem:[%s5172_s1 + $0x274] sm:$0xf0]  ;;  %v2350_v53 = vor.u32 %v3242_v46, %v2349_v42 }
  0x85   :  { %1835 = vmatpush.bf16.msrb.mxu3 %v3066_v60  ;;  %1794 = vmatmul.bf16.vlgmr.msrb.gmra.mxu0 %v3948_v39  ;;  %v2605_v50 = vld [vmem:[%s5172_s1 + $0x368] sm:$0xf]  ;;  %v3306_v51 = vld [vmem:[%s5172_s1 + $0x374] sm:$0xf0]  ;;  %v2478_v54 = vor.u32 %v3274_v49, %v2477_v48 }
  0x86   :  { %1842 = vmatpush.bf16.msra.mxu0 %v2286_v61  ;;  %1808 = vmatmul.bf16.vlgmr.msrb.gmra.mxu1 %v3961_v44  ;;  %v2205_v55 = vld [vmem:[%s5172_s1 + $0x48] sm:$0xf]  ;;  %v3206_v56 = vld [vmem:[%s5172_s1 + $0x54] sm:$0xf0]  ;;  %v2606_v59 = vor.u32 %v3306_v51, %v2605_v50 }
  0x87   :  { %1856 = vmatpush.bf16.msra.mxu1 %v2414_v62  ;;  %1822 = vmatmul.bf16.vlgmr.msrb.gmra.mxu2 %v3959_v43  ;;  %v2333_v57 = vld [vmem:[%s5172_s1 + $0x148] sm:$0xf]  ;;  %v3238_v60 = vld [vmem:[%s5172_s1 + $0x154] sm:$0xf0]  ;;  %v2206_v2 = vor.u32 %v3206_v56, %v2205_v55 }
  0x88   :  { %1870 = vmatpush.bf16.msra.mxu2 %v2542_v63  ;;  %1836 = vmatmul.bf16.vlgmr.msrb.gmra.mxu3 %v3969_v47  ;;  %v2461_v61 = vld [vmem:[%s5172_s1 + $0x248] sm:$0xf]  ;;  %v3270_v62 = vld [vmem:[%s5172_s1 + $0x254] sm:$0xf0]  ;;  %v2334_v3 = vor.u32 %v3238_v60, %v2333_v57 }
  0x89   :  { %1884 = vmatpush.bf16.msra.mxu3 %v2670_v4  ;;  %v2589_v63 = vld [vmem:[%s5172_s1 + $0x348] sm:$0xf]  ;;  %v3302_v0 = vld [vmem:[%s5172_s1 + $0x354] sm:$0xf0]  ;;  %v2462_v4 = vor.u32 %v3270_v62, %v2461_v61 }
  0x8a   :  { %1843 = vmatpush.bf16.msra.mxu0 %v2270_v11  ;;  %v2189_v5 = vld [vmem:[%s5172_s1 + $0x28] sm:$0xf]  ;;  %v3202_v6 = vld [vmem:[%s5172_s1 + $0x34] sm:$0xf0]  ;;  %v2590_v8 = vor.u32 %v3302_v0, %v2589_v63 }
  0x8b   :  { %1857 = vmatpush.bf16.msra.mxu1 %v2398_v12  ;;  %v2317_v7 = vld [vmem:[%s5172_s1 + $0x128] sm:$0xf]  ;;  %v3234_v9 = vld [vmem:[%s5172_s1 + $0x134] sm:$0xf0]  ;;  %v2190_v15 = vor.u32 %v3202_v6, %v2189_v5 }
  0x8c   :  { %1871 = vmatpush.bf16.msra.mxu2 %v2526_v13  ;;  %v2445_v11 = vld [vmem:[%s5172_s1 + $0x228] sm:$0xf]  ;;  %v3266_v12 = vld [vmem:[%s5172_s1 + $0x234] sm:$0xf0]  ;;  %v2318_v19 = vor.u32 %v3234_v9, %v2317_v7 }
  0x8d   :  { %1885 = vmatpush.bf16.msra.mxu3 %v2654_v18  ;;  %v2573_v13 = vld [vmem:[%s5172_s1 + $0x328] sm:$0xf]  ;;  %v3298_v14 = vld [vmem:[%s5172_s1 + $0x334] sm:$0xf0]  ;;  %v2446_v20 = vor.u32 %v3266_v12, %v2445_v11 }
  0x8e   :  { %1844 = vmatpush.bf16.msra.mxu0 %v2254_v24  ;;  %v2173_v16 = vld [vmem:[%s5172_s1 + $0x8] sm:$0xf]  ;;  %v3198_v18 = vld [vmem:[%s5172_s1 + $0x14] sm:$0xf0]  ;;  %v2574_v24 = vor.u32 %v3298_v14, %v2573_v13 }
  0x8f   :  { %1858 = vmatpush.bf16.msra.mxu1 %v2382_v25  ;;  %v2301_v21 = vld [vmem:[%s5172_s1 + $0x108] sm:$0xf]  ;;  %v3230_v22 = vld [vmem:[%s5172_s1 + $0x114] sm:$0xf0]  ;;  %v2174_v31 = vor.u32 %v3198_v18, %v2173_v16 }
  0x90   :  { %1872 = vmatpush.bf16.msra.mxu2 %v2510_v26  ;;  %v2429_v23 = vld [vmem:[%s5172_s1 + $0x208] sm:$0xf]  ;;  %v3262_v25 = vld [vmem:[%s5172_s1 + $0x214] sm:$0xf0]  ;;  %v2302_v35 = vor.u32 %v3230_v22, %v2301_v21 }
  0x91   :  { %1886 = vmatpush.bf16.msra.mxu3 %v2638_v30  ;;  %v2557_v26 = vld [vmem:[%s5172_s1 + $0x308] sm:$0xf]  ;;  %v3294_v27 = vld [vmem:[%s5172_s1 + $0x314] sm:$0xf0] }
  0x92   :  { %1845 = vmatpush.bf16.msra.mxu0 %v2238_v36  ;;  %v2797_v28 = vld [vmem:[%s5172_s1 + $0x4e8] sm:$0xf]  ;;  %v3354_v29 = vld [vmem:[%s5172_s1 + $0x4f4] sm:$0xf0]  ;;  %v2430_v36 = vor.u32 %v3262_v25, %v2429_v23  ;;  %v2558_v40 = vor.u32 %v3294_v27, %v2557_v26 }
  0x93   :  { %1859 = vmatpush.bf16.msra.mxu1 %v2366_v37  ;;  %v2925_v30 = vld [vmem:[%s5172_s1 + $0x5e8] sm:$0xf]  ;;  %v3386_v32 = vld [vmem:[%s5172_s1 + $0x5f4] sm:$0xf0]  ;;  %v2798_v41 = vor.u32 %v3354_v29, %v2797_v28 }
  0x94   :  { %1873 = vmatpush.bf16.msra.mxu2 %v2494_v38  ;;  %v3053_v33 = vld [vmem:[%s5172_s1 + $0x6e8] sm:$0xf]  ;;  %v3418_v34 = vld [vmem:[%s5172_s1 + $0x6f4] sm:$0xf0]  ;;  %v2926_v42 = vor.u32 %v3386_v32, %v2925_v30 }
  0x95   :  { %1887 = vmatpush.bf16.msra.mxu3 %v2622_v45  ;;  %v3181_v37 = vld [vmem:[%s5172_s1 + $0x7e8] sm:$0xf]  ;;  %v3450_v38 = vld [vmem:[%s5172_s1 + $0x7f4] sm:$0xf0]  ;;  %v3054_v45 = vor.u32 %v3418_v34, %v3053_v33 }
  0x96   :  { %1846 = vmatpush.bf16.msra.mxu0 %v2222_v52  ;;  %v2781_v46 = vld [vmem:[%s5172_s1 + $0x4c8] sm:$0xf]  ;;  %v3350_v48 = vld [vmem:[%s5172_s1 + $0x4d4] sm:$0xf0]  ;;  %v3182_v50 = vor.u32 %v3450_v38, %v3181_v37 }
  0x97   :  { %1860 = vmatpush.bf16.msra.mxu1 %v2350_v53  ;;  %v2909_v49 = vld [vmem:[%s5172_s1 + $0x5c8] sm:$0xf]  ;;  %v3382_v51 = vld [vmem:[%s5172_s1 + $0x5d4] sm:$0xf0]  ;;  %v2782_v56 = vor.u32 %v3350_v48, %v2781_v46 }
  0x98   :  { %1874 = vmatpush.bf16.msra.mxu2 %v2478_v54  ;;  %v3037_v52 = vld [vmem:[%s5172_s1 + $0x6c8] sm:$0xf]  ;;  %v3414_v53 = vld [vmem:[%s5172_s1 + $0x6d4] sm:$0xf0]  ;;  %v2910_v57 = vor.u32 %v3382_v51, %v2909_v49 }
  0x99   :  { %1888 = vmatpush.bf16.msra.mxu3 %v2606_v59  ;;  %v3165_v54 = vld [vmem:[%s5172_s1 + $0x7c8] sm:$0xf]  ;;  %v3446_v55 = vld [vmem:[%s5172_s1 + $0x7d4] sm:$0xf0]  ;;  %v3038_v59 = vor.u32 %v3414_v53, %v3037_v52 }
  0x9a   :  { %1847 = vmatpush.bf16.msra.mxu0 %v2206_v2  ;;  %v2765_v60 = vld [vmem:[%s5172_s1 + $0x4a8] sm:$0xf]  ;;  %v3346_v61 = vld [vmem:[%s5172_s1 + $0x4b4] sm:$0xf0]  ;;  %v3166_v63 = vor.u32 %v3446_v55, %v3165_v54 }
  0x9b   :  { %1861 = vmatpush.bf16.msra.mxu1 %v2334_v3  ;;  %v2893_v62 = vld [vmem:[%s5172_s1 + $0x5a8] sm:$0xf]  ;;  %v3378_v0 = vld [vmem:[%s5172_s1 + $0x5b4] sm:$0xf0]  ;;  %v2766_v6 = vor.u32 %v3346_v61, %v2765_v60 }
  0x9c   :  { %1875 = vmatpush.bf16.msra.mxu2 %v2462_v4  ;;  %v3021_v2 = vld [vmem:[%s5172_s1 + $0x6a8] sm:$0xf]  ;;  %v3410_v3 = vld [vmem:[%s5172_s1 + $0x6b4] sm:$0xf0]  ;;  %v2894_v7 = vor.u32 %v3378_v0, %v2893_v62 }
  0x9d   :  { %1889 = vmatpush.bf16.msra.mxu3 %v2590_v8  ;;  %v3149_v4 = vld [vmem:[%s5172_s1 + $0x7a8] sm:$0xf]  ;;  %v3442_v5 = vld [vmem:[%s5172_s1 + $0x7b4] sm:$0xf0]  ;;  %v3022_v8 = vor.u32 %v3410_v3, %v3021_v2 }
  0x9e   :  { %1848 = vmatpush.bf16.msra.mxu0 %v2190_v15  ;;  %v2749_v9 = vld [vmem:[%s5172_s1 + $0x488] sm:$0xf]  ;;  %v3342_v11 = vld [vmem:[%s5172_s1 + $0x494] sm:$0xf0]  ;;  %v3150_v13 = vor.u32 %v3442_v5, %v3149_v4 }
  0x9f   :  { %1862 = vmatpush.bf16.msra.mxu1 %v2318_v19  ;;  %v2877_v12 = vld [vmem:[%s5172_s1 + $0x588] sm:$0xf]  ;;  %v3374_v14 = vld [vmem:[%s5172_s1 + $0x594] sm:$0xf0] }
  0xa0   :  { %1876 = vmatpush.bf16.msra.mxu2 %v2446_v20  ;;  %v3005_v15 = vld [vmem:[%s5172_s1 + $0x688] sm:$0xf]  ;;  %v3406_v16 = vld [vmem:[%s5172_s1 + $0x694] sm:$0xf0]  ;;  %v2750_v20 = vor.u32 %v3342_v11, %v2749_v9  ;;  %v2878_v21 = vor.u32 %v3374_v14, %v2877_v12  ;;  %v3224_v11 = vld [vmem:[%s5172_s1 + $0xec] sm:$0xf] }
  0xa1   :  { %1890 = vmatpush.bf16.msra.mxu3 %v2574_v24  ;;  %v3133_v18 = vld [vmem:[%s5172_s1 + $0x788] sm:$0xf]  ;;  %v3438_v19 = vld [vmem:[%s5172_s1 + $0x794] sm:$0xf0]  ;;  %v3006_v22 = vor.u32 %v3406_v16, %v3005_v15  ;;  %v2287_v12 = vld [vmem:[%s5172_s1 + $0xf8] sm:$0xf0] }
  0xa2   :  { %1849 = vmatpush.bf16.msra.mxu0 %v2174_v31  ;;  %v2733_v23 = vld [vmem:[%s5172_s1 + $0x468] sm:$0xf]  ;;  %v3338_v24 = vld [vmem:[%s5172_s1 + $0x474] sm:$0xf0]  ;;  %v3134_v26 = vor.u32 %v3438_v19, %v3133_v18  ;;  %v2415_v15 = vld [vmem:[%s5172_s1 + $0x1f8] sm:$0xf0] }
  0xa3   :  { %1863 = vmatpush.bf16.msra.mxu1 %v2302_v35  ;;  %v2861_v25 = vld [vmem:[%s5172_s1 + $0x568] sm:$0xf]  ;;  %v3370_v27 = vld [vmem:[%s5172_s1 + $0x574] sm:$0xf0]  ;;  %v2734_v32 = vor.u32 %v3338_v24, %v2733_v23  ;;  %v3288_v16 = vld [vmem:[%s5172_s1 + $0x2ec] sm:$0xf]  ;;  %v2290_v24 = vor.u32 %v3224_v11, %v2287_v12 }
  0xa4   :  { %1877 = vmatpush.bf16.msra.mxu2 %v2430_v36  ;;  %v2989_v28 = vld [vmem:[%s5172_s1 + $0x668] sm:$0xf]  ;;  %v3402_v29 = vld [vmem:[%s5172_s1 + $0x674] sm:$0xf0]  ;;  %v2862_v33 = vor.u32 %v3370_v27, %v2861_v25  ;;  %v2543_v18 = vld [vmem:[%s5172_s1 + $0x2f8] sm:$0xf0] }
  0xa5   :  { %1891 = vmatpush.bf16.msra.mxu3 %v2558_v40  ;;  %1850 = vmatmul.bf16.vlgmr.msra.gmra.mxu0 %v3726_v58  ;;  %v3117_v30 = vld [vmem:[%s5172_s1 + $0x768] sm:$0xf]  ;;  %v3434_v31 = vld [vmem:[%s5172_s1 + $0x774] sm:$0xf0]  ;;  %v2990_v34 = vor.u32 %v3402_v29, %v2989_v28  ;;  %v3220_v27 = vld [vmem:[%s5172_s1 + $0xcc] sm:$0xf] }
  0xa6   :  { %1898 = vmatpush.bf16.msrb.mxu0 %v2798_v41  ;;  %1864 = vmatmul.bf16.vlgmr.msra.gmra.mxu1 %v3762_v10  ;;  %v2717_v35 = vld [vmem:[%s5172_s1 + $0x448] sm:$0xf]  ;;  %v3334_v36 = vld [vmem:[%s5172_s1 + $0x454] sm:$0xf0]  ;;  %v3118_v38 = vor.u32 %v3434_v31, %v3117_v30  ;;  %v2271_v28 = vld [vmem:[%s5172_s1 + $0xd8] sm:$0xf0] }
  0xa7   :  { %1912 = vmatpush.bf16.msrb.mxu1 %v2926_v42  ;;  %1878 = vmatmul.bf16.vlgmr.msra.gmra.mxu2 %v3740_v1  ;;  %v2845_v37 = vld [vmem:[%s5172_s1 + $0x548] sm:$0xf]  ;;  %v3366_v40 = vld [vmem:[%s5172_s1 + $0x554] sm:$0xf0]  ;;  %v2718_v48 = vor.u32 %v3334_v36, %v2717_v35  ;;  %v3252_v29 = vld [vmem:[%s5172_s1 + $0x1cc] sm:$0xf]  ;;  %v2274_v36 = vor.u32 %v3220_v27, %v2271_v28 }
  0xa8   :  { %1926 = vmatpush.bf16.msrb.mxu2 %v3054_v45  ;;  %1892 = vmatmul.bf16.vlgmr.msra.gmra.mxu3 %v3776_v17  ;;  %v2973_v41 = vld [vmem:[%s5172_s1 + $0x648] sm:$0xf]  ;;  %v3398_v42 = vld [vmem:[%s5172_s1 + $0x654] sm:$0xf0]  ;;  %v2846_v49 = vor.u32 %v3366_v40, %v2845_v37  ;;  %v2399_v31 = vld [vmem:[%s5172_s1 + $0x1d8] sm:$0xf0] }
  0xa9   :  { %1940 = vmatpush.bf16.msrb.mxu3 %v3182_v50  ;;  %v3101_v45 = vld [vmem:[%s5172_s1 + $0x748] sm:$0xf]  ;;  %v3430_v46 = vld [vmem:[%s5172_s1 + $0x754] sm:$0xf0]  ;;  %v2974_v50 = vor.u32 %v3398_v42, %v2973_v41  ;;  %v2655_v35 = vld [vmem:[%s5172_s1 + $0x3d8] sm:$0xf0]  ;;  %v2402_v37 = vor.u32 %v3252_v29, %v2399_v31 }
  0xaa   :  { %1899 = vmatpush.bf16.msrb.mxu0 %v2782_v56  ;;  %v2701_v51 = vld [vmem:[%s5172_s1 + $0x428] sm:$0xf]  ;;  %v3330_v52 = vld [vmem:[%s5172_s1 + $0x434] sm:$0xf0]  ;;  %v3102_v54 = vor.u32 %v3430_v46, %v3101_v45  ;;  %v3216_v40 = vld [vmem:[%s5172_s1 + $0xac] sm:$0xf] }
  0xab   :  { %1913 = vmatpush.bf16.msrb.mxu1 %v2910_v57  ;;  %v2829_v53 = vld [vmem:[%s5172_s1 + $0x528] sm:$0xf]  ;;  %v3362_v55 = vld [vmem:[%s5172_s1 + $0x534] sm:$0xf0]  ;;  %v2702_v61 = vor.u32 %v3330_v52, %v2701_v51  ;;  %v2255_v41 = vld [vmem:[%s5172_s1 + $0xb8] sm:$0xf0] }
  0xac   :  { %1927 = vmatpush.bf16.msrb.mxu2 %v3038_v59  ;;  %v2957_v56 = vld [vmem:[%s5172_s1 + $0x628] sm:$0xf]  ;;  %v3394_v57 = vld [vmem:[%s5172_s1 + $0x634] sm:$0xf0]  ;;  %v2830_v0 = vor.u32 %v3362_v55, %v2829_v53  ;;  %v3248_v42 = vld [vmem:[%s5172_s1 + $0x1ac] sm:$0xf]  ;;  %v2258_v52 = vor.u32 %v3216_v40, %v2255_v41 }
  0xad   :  { %1941 = vmatpush.bf16.msrb.mxu3 %v3166_v63  ;;  %v3085_v59 = vld [vmem:[%s5172_s1 + $0x728] sm:$0xf]  ;;  %v3426_v60 = vld [vmem:[%s5172_s1 + $0x734] sm:$0xf0]  ;;  %v2958_v2 = vor.u32 %v3394_v57, %v2957_v56  ;;  %v2383_v46 = vld [vmem:[%s5172_s1 + $0x1b8] sm:$0xf0] }
  0xae   :  { %1900 = vmatpush.bf16.msrb.mxu0 %v2766_v6  ;;  %v2685_v62 = vld [vmem:[%s5172_s1 + $0x408] sm:$0xf]  ;;  %v3326_v63 = vld [vmem:[%s5172_s1 + $0x414] sm:$0xf0]  ;;  %v3086_v6 = vor.u32 %v3426_v60, %v3085_v59  ;;  %v2639_v51 = vld [vmem:[%s5172_s1 + $0x3b8] sm:$0xf0]  ;;  %v2386_v53 = vor.u32 %v3248_v42, %v2383_v46 }
  0xaf   :  { %1914 = vmatpush.bf16.msrb.mxu1 %v2894_v7  ;;  %v2813_v3 = vld [vmem:[%s5172_s1 + $0x508] sm:$0xf]  ;;  %v3358_v4 = vld [vmem:[%s5172_s1 + $0x514] sm:$0xf0]  ;;  %v2686_v14 = vor.u32 %v3326_v63, %v2685_v62  ;;  %v3212_v55 = vld [vmem:[%s5172_s1 + $0x8c] sm:$0xf] }
  0xb0   :  { %1928 = vmatpush.bf16.msrb.mxu2 %v3022_v8  ;;  %v2941_v5 = vld [vmem:[%s5172_s1 + $0x608] sm:$0xf]  ;;  %v3390_v7 = vld [vmem:[%s5172_s1 + $0x614] sm:$0xf0]  ;;  %v2814_v19 = vor.u32 %v3358_v4, %v2813_v3  ;;  %v2239_v56 = vld [vmem:[%s5172_s1 + $0x98] sm:$0xf0]  ;;  %v4807_v3 = vpop.f32.mrf.mxu0 }
  0xb1   :  { %1942 = vmatpush.bf16.msrb.mxu3 %v3150_v13  ;;  %v3069_v8 = vld [vmem:[%s5172_s1 + $0x708] sm:$0xf]  ;;  %v3422_v9 = vld [vmem:[%s5172_s1 + $0x714] sm:$0xf0]  ;;  %v3256_v13 = vld [vmem:[%s5172_s1 + $0x1ec] sm:$0xf] }
  0xb2   :  { %1901 = vmatpush.bf16.msrb.mxu0 %v2750_v20  ;;  %v2942_v20 = vor.u32 %v3390_v7, %v2941_v5  ;;  %v3070_v23 = vor.u32 %v3422_v9, %v3069_v8  ;;  %v2418_v25 = vor.u32 %v3256_v13, %v2415_v15  ;;  %v3244_v57 = vld [vmem:[%s5172_s1 + $0x18c] sm:$0xf]  ;;  %v2367_v60 = vld [vmem:[%s5172_s1 + $0x198] sm:$0xf0]  ;;  %v4818_v9 = vpop.f32.mrf.mxu1 }
  0xb3   :  { %1915 = vmatpush.bf16.msrb.mxu1 %v2878_v21  ;;  %v3320_v21 = vld [vmem:[%s5172_s1 + $0x3ec] sm:$0xf]  ;;  %v2495_v62 = vld [vmem:[%s5172_s1 + $0x298] sm:$0xf0]  ;;  %v2370_v4 = vor.u32 %v3244_v57, %v2367_v60 }
  0xb4   :  { %1929 = vmatpush.bf16.msrb.mxu2 %v3006_v22  ;;  %v2671_v22 = vld [vmem:[%s5172_s1 + $0x3f8] sm:$0xf0]  ;;  %v3308_v63 = vld [vmem:[%s5172_s1 + $0x38c] sm:$0xf] }
  0xb5   :  { %1943 = vmatpush.bf16.msrb.mxu3 %v3134_v26  ;;  %v2546_v26 = vor.u32 %v3288_v16, %v2543_v18  ;;  %v2674_v30 = vor.u32 %v3320_v21, %v2671_v22  ;;  %v2223_v7 = vld [vmem:[%s5172_s1 + $0x78] sm:$0xf0]  ;;  %v3240_v8 = vld [vmem:[%s5172_s1 + $0x16c] sm:$0xf] }
  0xb6   :  { %1902 = vmatpush.bf16.msrb.mxu0 %v2734_v32  ;;  %v3284_v32 = vld [vmem:[%s5172_s1 + $0x2cc] sm:$0xf]  ;;  %v2351_v12 = vld [vmem:[%s5172_s1 + $0x178] sm:$0xf0] }
  0xb7   :  { %1916 = vmatpush.bf16.msrb.mxu1 %v2862_v33  ;;  %v2527_v33 = vld [vmem:[%s5172_s1 + $0x2d8] sm:$0xf0]  ;;  %v3272_v13 = vld [vmem:[%s5172_s1 + $0x26c] sm:$0xf] }
  0xb8   :  { %1930 = vmatpush.bf16.msrb.mxu2 %v2990_v34  ;;  %v3316_v34 = vld [vmem:[%s5172_s1 + $0x3cc] sm:$0xf]  ;;  %v2607_v16 = vld [vmem:[%s5172_s1 + $0x378] sm:$0xf0] }
  0xb9   :  { %1944 = vmatpush.bf16.msrb.mxu3 %v3118_v38  ;;  %v2530_v38 = vor.u32 %v3284_v32, %v2527_v33  ;;  %v2658_v45 = vor.u32 %v3316_v34, %v2655_v35  ;;  %v3304_v15 = vld [vmem:[%s5172_s1 + $0x36c] sm:$0xf]  ;;  %v2207_v22 = vld [vmem:[%s5172_s1 + $0x58] sm:$0xf0]  ;;  %v4861_v32 = vpop.f32.mrf.mxu3 }
  0xba   :  { %1903 = vmatpush.bf16.msrb.mxu0 %v2718_v48  ;;  %v3280_v48 = vld [vmem:[%s5172_s1 + $0x2ac] sm:$0xf]  ;;  %v2463_v27 = vld [vmem:[%s5172_s1 + $0x258] sm:$0xf0] }
  0xbb   :  { %1917 = vmatpush.bf16.msrb.mxu1 %v2846_v49  ;;  %v2511_v49 = vld [vmem:[%s5172_s1 + $0x2b8] sm:$0xf0]  ;;  %v3204_v21 = vld [vmem:[%s5172_s1 + $0x4c] sm:$0xf] }
  0xbc   :  { %1931 = vmatpush.bf16.msrb.mxu2 %v2974_v50  ;;  %v3312_v50 = vld [vmem:[%s5172_s1 + $0x3ac] sm:$0xf]  ;;  %v2591_v29 = vld [vmem:[%s5172_s1 + $0x358] sm:$0xf0]  ;;  %v2210_v31 = vor.u32 %v3204_v21, %v2207_v22 }
  0xbd   :  { %1945 = vmatpush.bf16.msrb.mxu3 %v3102_v54  ;;  %v2514_v54 = vor.u32 %v3280_v48, %v2511_v49  ;;  %v2642_v59 = vor.u32 %v3312_v50, %v2639_v51  ;;  %v3300_v28 = vld [vmem:[%s5172_s1 + $0x34c] sm:$0xf]  ;;  %v2319_v40 = vld [vmem:[%s5172_s1 + $0x138] sm:$0xf0]  ;;  %v4889_v49 = vpop.f32.mrf.mxu1 }
  0xbe   :  { %1904 = vmatpush.bf16.msrb.mxu0 %v2702_v61  ;;  %v3276_v61 = vld [vmem:[%s5172_s1 + $0x28c] sm:$0xf]  ;;  %v2447_v42 = vld [vmem:[%s5172_s1 + $0x238] sm:$0xf0] }
  0xbf   :  { %1918 = vmatpush.bf16.msrb.mxu1 %v2830_v0  ;;  %v2623_v0 = vld [vmem:[%s5172_s1 + $0x398] sm:$0xf0]  ;;  %v2498_v5 = vor.u32 %v3276_v61, %v2495_v62  ;;  %v3200_v35 = vld [vmem:[%s5172_s1 + $0x2c] sm:$0xf] }
  0xc0   :  { %1932 = vmatpush.bf16.msrb.mxu2 %v2958_v2  ;;  %v2242_v2 = vor.u32 %v3212_v55, %v2239_v56  ;;  %v2626_v11 = vor.u32 %v3308_v63, %v2623_v0  ;;  %v3264_v41 = vld [vmem:[%s5172_s1 + $0x22c] sm:$0xf]  ;;  %v2575_v48 = vld [vmem:[%s5172_s1 + $0x338] sm:$0xf0] }
  0xc1   :  { %1946 = vmatpush.bf16.msrb.mxu3 %v3086_v6  ;;  %v3208_v6 = vld [vmem:[%s5172_s1 + $0x6c] sm:$0xf]  ;;  %v2303_v56 = vld [vmem:[%s5172_s1 + $0x118] sm:$0xf0] }
  0xc2   :  { %1905 = vmatpush.bf16.msrb.mxu0 %v2686_v14  ;;  %v2479_v14 = vld [vmem:[%s5172_s1 + $0x278] sm:$0xf0]  ;;  %v2226_v18 = vor.u32 %v3208_v6, %v2223_v7  ;;  %v3296_v46 = vld [vmem:[%s5172_s1 + $0x32c] sm:$0xf] }
  0xc3   :  { %1919 = vmatpush.bf16.msrb.mxu1 %v2814_v19  ;;  %v2354_v19 = vor.u32 %v3240_v8, %v2351_v12  ;;  %v3196_v51 = vld [vmem:[%s5172_s1 + $0xc] sm:$0xf]  ;;  %v2431_v60 = vld [vmem:[%s5172_s1 + $0x218] sm:$0xf0] }
  0xc4   :  { %1933 = vmatpush.bf16.msrb.mxu2 %v2942_v20  ;;  %v2482_v20 = vor.u32 %v3272_v13, %v2479_v14  ;;  %v3228_v55 = vld [vmem:[%s5172_s1 + $0x10c] sm:$0xf]  ;;  %v2559_v62 = vld [vmem:[%s5172_s1 + $0x318] sm:$0xf0] }
  0xc5   :  { %1947 = vmatpush.bf16.msrb.mxu3 %v3070_v23  ;;  %1906 = vmatmul.bf16.vlgmr.msrb.gmra.mxu0 %v3948_v39  ;;  %v3236_v23 = vld [vmem:[%s5172_s1 + $0x14c] sm:$0xf]  ;;  %v2799_v0 = vld [vmem:[%s5172_s1 + $0x4f8] sm:$0xf0]  ;;  %v2306_v8 = vor.u32 %v3228_v55, %v2303_v56 }
  0xc6   :  { %1954 = vmatpush.bf16.msra.mxu0 %v2290_v24  ;;  %1920 = vmatmul.bf16.vlgmr.msrb.gmra.mxu1 %v3961_v44  ;;  %v2610_v24 = vor.u32 %v3304_v15, %v2607_v16  ;;  %v3260_v57 = vld [vmem:[%s5172_s1 + $0x20c] sm:$0xf]  ;;  %v3055_v7 = vld [vmem:[%s5172_s1 + $0x6f8] sm:$0xf0] }
  0xc7   :  { %1968 = vmatpush.bf16.msra.mxu1 %v2418_v25  ;;  %1934 = vmatmul.bf16.vlgmr.msrb.gmra.mxu2 %v3959_v43  ;;  %v2335_v25 = vld [vmem:[%s5172_s1 + $0x158] sm:$0xf0]  ;;  %v3292_v61 = vld [vmem:[%s5172_s1 + $0x30c] sm:$0xf] }
  0xc8   :  { %1982 = vmatpush.bf16.msra.mxu2 %v2546_v26  ;;  %1948 = vmatmul.bf16.vlgmr.msrb.gmra.mxu3 %v3969_v47  ;;  %v3268_v26 = vld [vmem:[%s5172_s1 + $0x24c] sm:$0xf]  ;;  %v2338_v33 = vor.u32 %v3236_v23, %v2335_v25  ;;  %v3183_v13 = vld [vmem:[%s5172_s1 + $0x7f8] sm:$0xf0]  ;;  %v2562_v15 = vor.u32 %v3292_v61, %v2559_v62 }
  0xc9   :  { %1996 = vmatpush.bf16.msra.mxu3 %v2674_v30  ;;  %v4859_v30 = vpop.f32.mrf.mxu2  ;;  %v2466_v34 = vor.u32 %v3268_v26, %v2463_v27  ;;  %v3352_v63 = vld [vmem:[%s5172_s1 + $0x4ec] sm:$0xf]  ;;  %v2783_v22 = vld [vmem:[%s5172_s1 + $0x4d8] sm:$0xf0] }
  0xca   :  { %1955 = vmatpush.bf16.msra.mxu0 %v2274_v36  ;;  %v2191_v36 = vld [vmem:[%s5172_s1 + $0x38] sm:$0xf0]  ;;  %v3416_v6 = vld [vmem:[%s5172_s1 + $0x6ec] sm:$0xf]  ;;  %v2802_v16 = vor.u32 %v3352_v63, %v2799_v0 }
  0xcb   :  { %1969 = vmatpush.bf16.msra.mxu1 %v2402_v37  ;;  %v3232_v37 = vld [vmem:[%s5172_s1 + $0x12c] sm:$0xf]  ;;  %v2194_v50 = vor.u32 %v3200_v35, %v2191_v36  ;;  %v2911_v25 = vld [vmem:[%s5172_s1 + $0x5d8] sm:$0xf0] }
  0xcc   :  { %1983 = vmatpush.bf16.msra.mxu2 %v2530_v38  ;;  %v2594_v38 = vor.u32 %v3300_v28, %v2591_v29  ;;  %v3448_v12 = vld [vmem:[%s5172_s1 + $0x7ec] sm:$0xf]  ;;  %v3039_v27 = vld [vmem:[%s5172_s1 + $0x6d8] sm:$0xf0] }
  0xcd   :  { %1997 = vmatpush.bf16.msra.mxu3 %v2658_v45  ;;  %v4881_v45 = vpop.f32.mrf.mxu0  ;;  %v3348_v21 = vld [vmem:[%s5172_s1 + $0x4cc] sm:$0xf]  ;;  %v2879_v56 = vld [vmem:[%s5172_s1 + $0x598] sm:$0xf0] }
  0xce   :  { %1956 = vmatpush.bf16.msra.mxu0 %v2258_v52  ;;  %v2175_v52 = vld [vmem:[%s5172_s1 + $0x18] sm:$0xf0]  ;;  %v3380_v23 = vld [vmem:[%s5172_s1 + $0x5cc] sm:$0xf] }
  0xcf   :  { %1970 = vmatpush.bf16.msra.mxu1 %v2386_v53  ;;  %v2322_v53 = vor.u32 %v3232_v37, %v2319_v40  ;;  %v3412_v26 = vld [vmem:[%s5172_s1 + $0x6cc] sm:$0xf]  ;;  %v2914_v35 = vor.u32 %v3380_v23, %v2911_v25  ;;  %v3135_v62 = vld [vmem:[%s5172_s1 + $0x798] sm:$0xf0] }
  0xd0   :  { %1984 = vmatpush.bf16.msra.mxu2 %v2514_v54  ;;  %v2450_v54 = vor.u32 %v3264_v41, %v2447_v42  ;;  %v3444_v29 = vld [vmem:[%s5172_s1 + $0x7cc] sm:$0xf]  ;;  %v3042_v36 = vor.u32 %v3412_v26, %v3039_v27  ;;  %v2895_v42 = vld [vmem:[%s5172_s1 + $0x5b8] sm:$0xf0] }
  0xd1   :  { %1998 = vmatpush.bf16.msra.mxu3 %v2642_v59  ;;  %v2578_v59 = vor.u32 %v3296_v46, %v2575_v48  ;;  %v4939_v14 = vpop.f32.mrf.mxu2  ;;  %v3344_v37 = vld [vmem:[%s5172_s1 + $0x4ac] sm:$0xf]  ;;  %v3023_v48 = vld [vmem:[%s5172_s1 + $0x6b8] sm:$0xf0] }
  0xd2   :  { %1957 = vmatpush.bf16.msra.mxu0 %v2242_v2  ;;  %v3384_v2 = vld [vmem:[%s5172_s1 + $0x5ec] sm:$0xf]  ;;  %v2847_v27 = vld [vmem:[%s5172_s1 + $0x558] sm:$0xf0] }
  0xd3   :  { %1971 = vmatpush.bf16.msra.mxu1 %v2370_v4  ;;  %v2178_v4 = vor.u32 %v3196_v51, %v2175_v52  ;;  %v3376_v40 = vld [vmem:[%s5172_s1 + $0x5ac] sm:$0xf] }
  0xd4   :  { %1985 = vmatpush.bf16.msra.mxu2 %v2498_v5  ;;  %v2927_v5 = vld [vmem:[%s5172_s1 + $0x5f8] sm:$0xf0]  ;;  %v3408_v46 = vld [vmem:[%s5172_s1 + $0x6ac] sm:$0xf]  ;;  %v2898_v52 = vor.u32 %v3376_v40, %v2895_v42 }
  0xd5   :  { %1999 = vmatpush.bf16.msra.mxu3 %v2626_v11  ;;  %v2434_v11 = vor.u32 %v3260_v57, %v2431_v60  ;;  %v4961_v28 = vpop.f32.mrf.mxu0  ;;  %v3404_v57 = vld [vmem:[%s5172_s1 + $0x68c] sm:$0xf] }
  0xd6   :  { %1958 = vmatpush.bf16.msra.mxu0 %v2226_v18  ;;  %v4941_v18 = vpop.f32.mrf.mxu3  ;;  %v3436_v61 = vld [vmem:[%s5172_s1 + $0x78c] sm:$0xf] }
  0xd7   :  { %1972 = vmatpush.bf16.msra.mxu1 %v2354_v19  ;;  %v2930_v19 = vor.u32 %v3384_v2, %v2927_v5  ;;  %v3336_v5 = vld [vmem:[%s5172_s1 + $0x46c] sm:$0xf] }
  0xd8   :  { %1986 = vmatpush.bf16.msra.mxu2 %v2482_v20  ;;  %v3058_v20 = vor.u32 %v3416_v6, %v3055_v7  ;;  %v2735_v6 = vld [vmem:[%s5172_s1 + $0x478] sm:$0xf0]  ;;  %v3368_v7 = vld [vmem:[%s5172_s1 + $0x56c] sm:$0xf] }
  0xd9   :  { %2000 = vmatpush.bf16.msra.mxu3 %v2610_v24  ;;  %v3186_v24 = vor.u32 %v3448_v12, %v3183_v13  ;;  %v5008_v55 = vpop.f32.mrf.mxu2  ;;  %v2863_v12 = vld [vmem:[%s5172_s1 + $0x578] sm:$0xf0]  ;;  %v3400_v13 = vld [vmem:[%s5172_s1 + $0x66c] sm:$0xf] }
  0xda   :  { %1959 = vmatpush.bf16.msra.mxu0 %v2210_v31  ;;  %v3167_v31 = vld [vmem:[%s5172_s1 + $0x7d8] sm:$0xf0]  ;;  %v3332_v23 = vld [vmem:[%s5172_s1 + $0x44c] sm:$0xf] }
  0xdb   :  { %1973 = vmatpush.bf16.msra.mxu1 %v2338_v33  ;;  %v4969_v33 = vpop.f32.mrf.mxu1  ;;  %v3170_v41 = vor.u32 %v3444_v29, %v3167_v31  ;;  %v3364_v25 = vld [vmem:[%s5172_s1 + $0x54c] sm:$0xf]  ;;  %v2975_v31 = vld [vmem:[%s5172_s1 + $0x658] sm:$0xf0] }
  0xdc   :  { %1987 = vmatpush.bf16.msra.mxu2 %v2466_v34  ;;  %v2786_v34 = vor.u32 %v3348_v21, %v2783_v22  ;;  %v2866_v21 = vor.u32 %v3368_v7, %v2863_v12  ;;  %v3396_v29 = vld [vmem:[%s5172_s1 + $0x64c] sm:$0xf]  ;;  %v2850_v40 = vor.u32 %v3364_v25, %v2847_v27  ;;  %v3071_v7 = vld [vmem:[%s5172_s1 + $0x718] sm:$0xf0] }
  0xdd   :  { %2001 = vmatpush.bf16.msra.mxu3 %v2594_v38  ;;  %v2767_v38 = vld [vmem:[%s5172_s1 + $0x4b8] sm:$0xf0]  ;;  %v5027_v0 = vpop.f32.mrf.mxu0 }
  0xde   :  { %1960 = vmatpush.bf16.msra.mxu0 %v2194_v50  ;;  %v3440_v50 = vld [vmem:[%s5172_s1 + $0x7ac] sm:$0xf]  ;;  %v2770_v51 = vor.u32 %v3344_v37, %v2767_v38  ;;  %v5019_v60 = vpop.f32.mrf.mxu3 }
  0xdf   :  { %1974 = vmatpush.bf16.msra.mxu1 %v2322_v53  ;;  %v3026_v53 = vor.u32 %v3408_v46, %v3023_v48  ;;  %v3328_v46 = vld [vmem:[%s5172_s1 + $0x42c] sm:$0xf]  ;;  %v2703_v48 = vld [vmem:[%s5172_s1 + $0x438] sm:$0xf0] }
  0xe0   :  { %1988 = vmatpush.bf16.msra.mxu2 %v2450_v54  ;;  %v2751_v54 = vld [vmem:[%s5172_s1 + $0x498] sm:$0xf0] }
  0xe1   :  { %2002 = vmatpush.bf16.msra.mxu3 %v2578_v59  ;;  %v3007_v59 = vld [vmem:[%s5172_s1 + $0x698] sm:$0xf0] }
  0xe2   :  { %1961 = vmatpush.bf16.msra.mxu0 %v2178_v4  ;;  %v3010_v4 = vor.u32 %v3404_v57, %v3007_v59 }
  0xe3   :  { %1975 = vmatpush.bf16.msra.mxu1 %v2306_v8  ;;  %v5038_v8 = vpop.f32.mrf.mxu1 }
  0xe4   :  { %1989 = vmatpush.bf16.msra.mxu2 %v2434_v11  ;;  %v3138_v11 = vor.u32 %v3436_v61, %v3135_v62  ;;  %v3324_v61 = vld [vmem:[%s5172_s1 + $0x40c] sm:$0xf] }
  0xe5   :  { %2003 = vmatpush.bf16.msra.mxu3 %v2562_v15  ;;  %1962 = vmatmul.bf16.vlgmr.msra.gmra.mxu0 %v3726_v58  ;;  %v3372_v58 = vld [vmem:[%s5172_s1 + $0x58c] sm:$0xf]  ;;  %v2991_v15 = vld [vmem:[%s5172_s1 + $0x678] sm:$0xf0]  ;;  %v1739_v42 = vpop.f32.mrf.mxu0 }
  0xe6   :  { %2010 = vmatpush.bf16.msrb.mxu0 %v2802_v16  ;;  %1976 = vmatmul.bf16.vlgmr.msra.gmra.mxu1 %v3762_v10  ;;  %v2882_v2 = vor.u32 %v3372_v58, %v2879_v56  ;;  %v3432_v16 = vld [vmem:[%s5172_s1 + $0x76c] sm:$0xf]  ;;  %v2994_v22 = vor.u32 %v3400_v13, %v2991_v15  ;;  %v5081_v38 = vpop.f32.mrf.mxu3  ;;  %v2706_v56 = vor.u32 %v3328_v46, %v2703_v48 }
  0xe7   :  { %2024 = vmatpush.bf16.msrb.mxu1 %v2930_v19  ;;  %1990 = vmatmul.bf16.vlgmr.msra.gmra.mxu2 %v3740_v1  ;;  %v3151_v1 = vld [vmem:[%s5172_s1 + $0x7b8] sm:$0xf0]  ;;  %v3424_v58 = vld [vmem:[%s5172_s1 + $0x72c] sm:$0xf] }
  0xe8   :  { %2038 = vmatpush.bf16.msrb.mxu2 %v3058_v20  ;;  %2004 = vmatmul.bf16.vlgmr.msra.gmra.mxu3 %v3776_v17  ;;  %v3340_v17 = vld [vmem:[%s5172_s1 + $0x48c] sm:$0xf]  ;;  %v3154_v10 = vor.u32 %v3440_v50, %v3151_v1  ;;  %v3119_v19 = vld [vmem:[%s5172_s1 + $0x778] sm:$0xf0]  ;;  %v2738_v20 = vor.u32 %v3336_v5, %v2735_v6 }
  0xe9   :  { %2052 = vmatpush.bf16.msrb.mxu3 %v3186_v24  ;;  %v2754_v63 = vor.u32 %v3340_v17, %v2751_v54  ;;  %v2719_v24 = vld [vmem:[%s5172_s1 + $0x458] sm:$0xf0]  ;;  %v3122_v26 = vor.u32 %v3432_v16, %v3119_v19  ;;  %v3360_v50 = vld [vmem:[%s5172_s1 + $0x52c] sm:$0xf]  ;;  %v1642_v54 = vadd.f32 %v4818_v9, %v4807_v3 }
  0xea   :  { %2011 = vmatpush.bf16.msrb.mxu0 %v2786_v34  ;;  %v3428_v34 = vld [vmem:[%s5172_s1 + $0x74c] sm:$0xf]  ;;  %v2722_v37 = vor.u32 %v3332_v23, %v2719_v24  ;;  %v2687_v3 = vld [vmem:[%s5172_s1 + $0x418] sm:$0xf0]  ;;  %v1644_v24 = vadd.f32 %v4889_v49, %v4881_v45 }
  0xeb   :  { %2025 = vmatpush.bf16.msrb.mxu1 %v2914_v35  ;;  %v3103_v35 = vld [vmem:[%s5172_s1 + $0x758] sm:$0xf0]  ;;  %v1753_v17 = vpop.f32.mrf.mxu1  ;;  %v3356_v9 = vld [vmem:[%s5172_s1 + $0x50c] sm:$0xf]  ;;  %v1656_v5 = vadd.f32 %v4859_v30, %v1642_v54 }
  0xec   :  { %2039 = vmatpush.bf16.msrb.mxu2 %v3042_v36  ;;  %v5079_v36 = vpop.f32.mrf.mxu2  ;;  %v3106_v1 = vor.u32 %v3428_v34, %v3103_v35  ;;  %v3420_v6 = vld [vmem:[%s5172_s1 + $0x70c] sm:$0xf]  ;;  %v1754_v19 = vadd.f32 %v1753_v17, %v1739_v42  ;;  %v1658_v27 = vadd.f32 %v4939_v14, %v1644_v24 }
  0xed   :  { %2053 = vmatpush.bf16.msrb.mxu3 %v3170_v41  ;;  %v2978_v41 = vor.u32 %v3396_v29, %v2975_v31  ;;  %v1670_v30 = vadd.f32 %v4861_v32, %v1656_v5 }
  0xee   :  { %2012 = vmatpush.bf16.msrb.mxu0 %v2770_v51  ;;  %v2831_v51 = vld [vmem:[%s5172_s1 + $0x538] sm:$0xf0]  ;;  %v1781_v16 = vpop.f32.mrf.mxu3 }
  0xef   :  { %2026 = vmatpush.bf16.msrb.mxu1 %v2898_v52  ;;  %v3392_v52 = vld [vmem:[%s5172_s1 + $0x62c] sm:$0xf]  ;;  %v2834_v57 = vor.u32 %v3360_v50, %v2831_v51  ;;  %v1684_v25 = vadd.f32 %v4961_v28, %v1670_v30  ;;  %v1672_v28 = vadd.f32 %v4941_v18, %v1658_v27 }
  0xf0   :  { %2040 = vmatpush.bf16.msrb.mxu2 %v3026_v53  ;;  %v2959_v53 = vld [vmem:[%s5172_s1 + $0x638] sm:$0xf0] }
  0xf1   :  { %2054 = vmatpush.bf16.msrb.mxu3 %v3154_v10  ;;  %v3087_v10 = vld [vmem:[%s5172_s1 + $0x738] sm:$0xf0]  ;;  %v2962_v59 = vor.u32 %v3392_v52, %v2959_v53  ;;  %v1698_v29 = vadd.f32 %v4969_v33, %v1684_v25 }
  0xf2   :  { %2013 = vmatpush.bf16.msrb.mxu0 %v2754_v63  ;;  %v3090_v62 = vor.u32 %v3424_v58, %v3087_v10  ;;  %v2815_v63 = vld [vmem:[%s5172_s1 + $0x518] sm:$0xf0] }
  0xf3   :  { %2027 = vmatpush.bf16.msrb.mxu1 %v2882_v2  ;;  %v3388_v2 = vld [vmem:[%s5172_s1 + $0x60c] sm:$0xf]  ;;  %v2818_v13 = vor.u32 %v3356_v9, %v2815_v63 }
  0xf4   :  { %2041 = vmatpush.bf16.msrb.mxu2 %v3010_v4  ;;  %v2943_v4 = vld [vmem:[%s5172_s1 + $0x618] sm:$0xf0]  ;;  %v1767_v12 = vpop.f32.mrf.mxu2 }
  0xf5   :  { %2055 = vmatpush.bf16.msrb.mxu3 %v3138_v11  ;;  %v2690_v11 = vor.u32 %v3324_v61, %v2687_v3  ;;  %v2946_v15 = vor.u32 %v3388_v2, %v2943_v4  ;;  %v1768_v23 = vadd.f32 %v1767_v12, %v1754_v19 }
  0xf6   :  { %2014 = vmatpush.bf16.msrb.mxu0 %v2738_v20  ;;  %v3074_v20 = vor.u32 %v3420_v6, %v3071_v7  ;;  %v1783_v31 = vpop.f32.mrf.mxu3 }
  0xf7   :  { %2028 = vmatpush.bf16.msrb.mxu1 %v2866_v21  ;;  %v1741_v21 = vpop.f32.mrf.mxu0  ;;  %v1782_v32 = vadd.f32 %v1781_v16, %v1768_v23 }
  0xf8   :  { %2042 = vmatpush.bf16.msrb.mxu2 %v2994_v22  ;;  %v1755_v22 = vpop.f32.mrf.mxu1 }
  0xf9   :  { %2056 = vmatpush.bf16.msrb.mxu3 %v3122_v26  ;;  %v1756_v34 = vadd.f32 %v1755_v22, %v1741_v21 }
  0xfa   :  { %2015 = vmatpush.bf16.msrb.mxu0 %v2722_v37 }
  0xfb   :  { %2029 = vmatpush.bf16.msrb.mxu1 %v2850_v40 }
  0xfc   :  { %2043 = vmatpush.bf16.msrb.mxu2 %v2978_v41  ;;  %v1769_v26 = vpop.f32.mrf.mxu2 }
  0xfd   :  { %2057 = vmatpush.bf16.msrb.mxu3 %v3106_v1 }
  0xfe   :  { %2016 = vmatpush.bf16.msrb.mxu0 %v2706_v56 }
  0xff   :  { %2030 = vmatpush.bf16.msrb.mxu1 %v2834_v57 }
 0x100   :  { %2044 = vmatpush.bf16.msrb.mxu2 %v2962_v59 }
 0x101   :  { %2058 = vmatpush.bf16.msrb.mxu3 %v3090_v62 }
 0x102   :  { %2017 = vmatpush.bf16.msrb.mxu0 %v2690_v11  ;;  %v1795_v35 = vpop.f32.mrf.mxu0 }
 0x103   :  { %2031 = vmatpush.bf16.msrb.mxu1 %v2818_v13  ;;  %v1796_v45 = vadd.f32 %v1795_v35, %v1782_v32  ;;  %v1809_v49 = vpop.f32.mrf.mxu1 }
 0x104   :  { %2045 = vmatpush.bf16.msrb.mxu2 %v2946_v15 }
 0x105   :  { %2059 = vmatpush.bf16.msrb.mxu3 %v3074_v20  ;;  %2018 = vmatmul.bf16.vlgmr.msrb.gmra.mxu0 %v3948_v39  ;;  %v1712_v39 = vadd.f32 %v5008_v55, %v1698_v29  ;;  %v1810_v14 = vadd.f32 %v1809_v49, %v1796_v45 }
 0x106   :  { %2032 = vmatmul.bf16.vlgmr.msrb.gmra.mxu1 %v3961_v44  ;;  %v1686_v44 = vadd.f32 %v5027_v0, %v1672_v28 }
 0x107   :  { %2046 = vmatmul.bf16.vlgmr.msrb.gmra.mxu2 %v3959_v43  ;;  %v5149_v43 = vld [vmem:[%s5174_s2] sm:$0xf]  ;;  %v1726_v33 = vadd.f32 %v5019_v60, %v1712_v39 }
 0x108   :  { %2060 = vmatmul.bf16.vlgmr.msrb.gmra.mxu3 %v3969_v47  ;;  %v1770_v47 = vadd.f32 %v1769_v26, %v1756_v34  ;;  %v2095_v37 = vperm.slane %v5149_v43, 0  ;;  %v1700_v41 = vadd.f32 %v5038_v8, %v1686_v44  ;;  %v2096_v48 = vperm.slane %v5149_v43, 1 }
 0x10a   :  { %v1823_v40 = vpop.f32.mrf.mxu2  ;;  %v1784_v42 = vadd.f32 %v1783_v31, %v1770_v47  ;;  %v1797_v46 = vpop.f32.mrf.mxu0  ;;  %v2103_v50 = vadd.f32 %v2095_v37, %v1726_v33  ;;  %v1714_v1 = vadd.f32 %v5079_v36, %v1700_v41 }
 0x10b   :  { %v1824_v18 = vadd.f32 %v1823_v40, %v1810_v14  ;;  %v1837_v55 = vpop.f32.mrf.mxu3  ;;  %v1811_v52 = vpop.f32.mrf.mxu1 }
 0x10c   :  { %v1798_v51 = vadd.f32 %v1797_v46, %v1784_v42  ;;  %v2111_v17 = vmax.f32 %v2103_v50, 0.0  ;;  %v1728_v60 = vadd.f32 %v5081_v38, %v1714_v1  ;;  %v2097_v50 = vperm.slane %v5149_v43, 2 }
 0x10d   :  { %v1838_v0 = vadd.f32 %v1837_v55, %v1824_v18 }
 0x10e   :  { %v1812_v58 = vadd.f32 %v1811_v52, %v1798_v51  ;;  %v2107_v59 = vadd.f32 %v2095_v37, %v1728_v60  ;;  %v2098_v60 = vperm.slane %v5149_v43, 3 }
 0x10f   :  { %v2104_v53 = vadd.f32 %v2096_v48, %v1838_v0 }
 0x110   :  { %v2115_v3 = vmax.f32 %v2107_v59, 0.0 }
 0x111   :  { %v2112_v54 = vmax.f32 %v2104_v53, 0.0 }
 0x112   :  { %v1825_v10 = vpop.f32.mrf.mxu2 }
 0x113   :  { %v2119_v8 = vpack.c.bf16 %v2112_v54, %v2111_v17  ;;  %v1826_v56 = vadd.f32 %v1825_v10, %v1812_v58  ;;  %v1839_v57 = vpop.f32.mrf.mxu3 }
 0x115   :  { %2123 = vst [vmem:[%s5175_s3] sm:$0xff] %v2119_v8  ;;  %v1840_v61 = vadd.f32 %v1839_v57, %v1826_v56 }
 0x117   :  { %v2108_v36 = vadd.f32 %v2096_v48, %v1840_v61 }
 0x119   :  { %v2116_v9 = vmax.f32 %v2108_v36, 0.0 }
 0x11b   :  { %v2121_v62 = vpack.c.bf16 %v2116_v9, %v2115_v3 }
 0x11d   :  { %2125 = vst [vmem:[%s5175_s3 + $0x10] sm:$0xff] %v2121_v62 }
 0x122   :  { %v1851_v38 = vpop.f32.mrf.mxu0 }
 0x123   :  { %v1865_v63 = vpop.f32.mrf.mxu1 }
 0x124   :  { %v1866_v21 = vadd.f32 %v1865_v63, %v1851_v38 }
 0x12a   :  { %v1879_v2 = vpop.f32.mrf.mxu2  ;;  %v1853_v5 = vpop.f32.mrf.mxu0 }
 0x12b   :  { %v1893_v4 = vpop.f32.mrf.mxu3  ;;  %v1867_v6 = vpop.f32.mrf.mxu1  ;;  %v1880_v25 = vadd.f32 %v1879_v2, %v1866_v21 }
 0x12c   :  { %v1868_v34 = vadd.f32 %v1867_v6, %v1853_v5 }
 0x12d   :  { %v1894_v26 = vadd.f32 %v1893_v4, %v1880_v25 }
 0x132   :  { %v1881_v7 = vpop.f32.mrf.mxu2 }
 0x133   :  { %v1895_v11 = vpop.f32.mrf.mxu3  ;;  %v1882_v28 = vadd.f32 %v1881_v7, %v1868_v34 }
 0x135   :  { %v1896_v40 = vadd.f32 %v1895_v11, %v1882_v28 }
 0x142   :  { %v1907_v12 = vpop.f32.mrf.mxu0 }
 0x143   :  { %v1921_v13 = vpop.f32.mrf.mxu1  ;;  %v1908_v35 = vadd.f32 %v1907_v12, %v1894_v26 }
 0x145   :  { %v1922_v39 = vadd.f32 %v1921_v13, %v1908_v35 }
 0x14a   :  { %v1935_v15 = vpop.f32.mrf.mxu2  ;;  %v1909_v19 = vpop.f32.mrf.mxu0 }
 0x14b   :  { %v1949_v16 = vpop.f32.mrf.mxu3  ;;  %v1923_v20 = vpop.f32.mrf.mxu1  ;;  %v1936_v41 = vadd.f32 %v1935_v15, %v1922_v39  ;;  %v1910_v46 = vadd.f32 %v1909_v19, %v1896_v40 }
 0x14d   :  { %v1950_v48 = vadd.f32 %v1949_v16, %v1936_v41  ;;  %v1924_v0 = vadd.f32 %v1923_v20, %v1910_v46 }
 0x14f   :  { %v2105_v58 = vadd.f32 %v2097_v50, %v1950_v48 }
 0x151   :  { %v2113_v61 = vmax.f32 %v2105_v58, 0.0 }
 0x152   :  { %v1937_v30 = vpop.f32.mrf.mxu2 }
 0x153   :  { %v1951_v22 = vpop.f32.mrf.mxu3  ;;  %v1938_v10 = vadd.f32 %v1937_v30, %v1924_v0 }
 0x155   :  { %v1952_v36 = vadd.f32 %v1951_v22, %v1938_v10 }
 0x157   :  { %v2109_v4 = vadd.f32 %v2097_v50, %v1952_v36 }
 0x159   :  { %v2117_v6 = vmax.f32 %v2109_v4, 0.0 }
 0x162   :  { %v1963_v23 = vpop.f32.mrf.mxu0 }
 0x163   :  { %v1977_v24 = vpop.f32.mrf.mxu1 }
 0x164   :  { %v1978_v29 = vadd.f32 %v1977_v24, %v1963_v23 }
 0x16a   :  { %v1991_v32 = vpop.f32.mrf.mxu2  ;;  %v1965_v31 = vpop.f32.mrf.mxu0 }
 0x16b   :  { %v2005_v27 = vpop.f32.mrf.mxu3  ;;  %v1979_v45 = vpop.f32.mrf.mxu1  ;;  %v1992_v49 = vadd.f32 %v1991_v32, %v1978_v29 }
 0x16c   :  { %v1980_v14 = vadd.f32 %v1979_v45, %v1965_v31 }
 0x16d   :  { %v2006_v47 = vadd.f32 %v2005_v27, %v1992_v49 }
 0x172   :  { %v1993_v44 = vpop.f32.mrf.mxu2 }
 0x173   :  { %v2007_v33 = vpop.f32.mrf.mxu3  ;;  %v1994_v55 = vadd.f32 %v1993_v44, %v1980_v14 }
 0x175   :  { %v2008_v52 = vadd.f32 %v2007_v33, %v1994_v55 }
 0x182   :  { %v2019_v37 = vpop.f32.mrf.mxu0 }
 0x183   :  { %v2020_v42 = vadd.f32 %v2019_v37, %v2006_v47  ;;  %v2033_v18 = vpop.f32.mrf.mxu1 }
 0x185   :  { %v2034_v1 = vadd.f32 %v2033_v18, %v2020_v42 }
 0x18a   :  { %v2047_v51 = vpop.f32.mrf.mxu2  ;;  %v2021_v54 = vpop.f32.mrf.mxu0 }
 0x18b   :  { %v2048_v53 = vadd.f32 %v2047_v51, %v2034_v1  ;;  %v2061_v17 = vpop.f32.mrf.mxu3  ;;  %v2022_v56 = vadd.f32 %v2021_v54, %v2008_v52  ;;  %v2035_v59 = vpop.f32.mrf.mxu1 }
 0x18d   :  { %v2062_v8 = vadd.f32 %v2061_v17, %v2048_v53  ;;  %v2036_v9 = vadd.f32 %v2035_v59, %v2022_v56 }
 0x18f   :  { %v2106_v57 = vadd.f32 %v2098_v60, %v2062_v8 }
 0x191   :  { %v2114_v3 = vmax.f32 %v2106_v57, 0.0 }
 0x192   :  { %v2049_v62 = vpop.f32.mrf.mxu2 }
 0x193   :  { %v2120_v38 = vpack.c.bf16 %v2114_v3, %v2113_v61  ;;  %v2050_v63 = vadd.f32 %v2049_v62, %v2036_v9  ;;  %v2063_v2 = vpop.f32.mrf.mxu3 }
 0x195   :  { %2124 = vst [vmem:[%s5175_s3 + $0x8] sm:$0xff] %v2120_v38  ;;  %v2064_v43 = vadd.f32 %v2063_v2, %v2050_v63 }
 0x197   :  { %v2110_v5 = vadd.f32 %v2098_v60, %v2064_v43 }
 0x199   :  { %v2118_v7 = vmax.f32 %v2110_v5, 0.0 }
 0x19b   :  { %v2122_v11 = vpack.c.bf16 %v2118_v7, %v2117_v6 }
 0x19d   :  { %2126 = vst [vmem:[%s5175_s3 + $0x18] sm:$0xff] %v2122_v11 }

// kernel: vae_forward.18
= control target key start
LH: loop header
LB: loop body
LE: loop exit
PB: predicated region body
PF: predicated region fallthrough
CT: control target
= control target key end

     0   :  { %s928_s1 = inlined_call_operand.vmem [shape: bf16[256,128], index: 1, kind: input, shape index: {}]   ;;  %s929_s0 = inlined_call_operand.vmem [shape: bf16[128,256], index: 0, kind: input, shape index: {}]   ;;  %s930_s2 = inlined_call_operand.vmem [shape: f32[1,128], index: 2, kind: input, shape index: {}]   ;;  %s931_s3 = inlined_call_operand.vmem [shape: bf16[128,128], index: 3, kind: output, shape index: {}]  }
   0x1   :  { %v646_v0 = vld [vmem:[%s928_s1 + $0x38] sm:$0xff]  ;;  %v645_v2 = vld [vmem:[%s928_s1 + $0x30] sm:$0xff]  ;;  %v644_v4 = vld [vmem:[%s928_s1 + $0x28] sm:$0xff] }
   0x2   :  { %v654_v1 = vld [vmem:[%s928_s1 + $0x78] sm:$0xff]  ;;  %274 = vmatpush.bf16.msra.mxu0 %v646_v0  ;;  %702 = vmatpush.bf16.msra.mxu2 %v646_v0  ;;  %v653_v3 = vld [vmem:[%s928_s1 + $0x70] sm:$0xff]  ;;  %v652_v5 = vld [vmem:[%s928_s1 + $0x68] sm:$0xff] }
   0x3   :  { %323 = vmatpush.bf16.msra.mxu1 %v654_v1  ;;  %710 = vmatpush.bf16.msra.mxu3 %v654_v1  ;;  %v643_v6 = vld [vmem:[%s928_s1 + $0x20] sm:$0xff]  ;;  %v642_v8 = vld [vmem:[%s928_s1 + $0x18] sm:$0xff]  ;;  %v641_v10 = vld [vmem:[%s928_s1 + $0x10] sm:$0xff] }
   0x4   :  { %v651_v7 = vld [vmem:[%s928_s1 + $0x60] sm:$0xff]  ;;  %v650_v9 = vld [vmem:[%s928_s1 + $0x58] sm:$0xff]  ;;  %v649_v11 = vld [vmem:[%s928_s1 + $0x50] sm:$0xff] }
   0x5   :  { %v640_v12 = vld [vmem:[%s928_s1 + $0x8] sm:$0xff]  ;;  %v639_v14 = vld [vmem:[%s928_s1] sm:$0xff]  ;;  %v505_v28 = vld [vmem:[%s929_s0 + $0x10] sm:$0xf] }
   0x6   :  { %275 = vmatpush.bf16.msra.mxu0 %v645_v2  ;;  %703 = vmatpush.bf16.msra.mxu2 %v645_v2  ;;  %v648_v13 = vld [vmem:[%s928_s1 + $0x48] sm:$0xff]  ;;  %v647_v15 = vld [vmem:[%s928_s1 + $0x40] sm:$0xff]  ;;  %v626_v29 = vld [vmem:[%s929_s0 + $0x14] sm:$0xf0] }
   0x7   :  { %324 = vmatpush.bf16.msra.mxu1 %v653_v3  ;;  %711 = vmatpush.bf16.msra.mxu3 %v653_v3  ;;  %v497_v16 = vld [vmem:[%s929_s0] sm:$0xf]  ;;  %v624_v17 = vld [vmem:[%s929_s0 + $0x4] sm:$0xf0]  ;;  %v623_v20 = vld [vmem:[%s929_s0 + $0x4] sm:$0xf]  ;;  %v506_v36 = vor.u32 %v626_v29, %v505_v28 }
   0x8   :  { %v529_v18 = vld [vmem:[%s929_s0 + $0x40] sm:$0xf]  ;;  %v632_v19 = vld [vmem:[%s929_s0 + $0x44] sm:$0xf0]  ;;  %v499_v21 = vld [vmem:[%s929_s0 + $0x8] sm:$0xf0]  ;;  %v498_v24 = vor.u32 %v624_v17, %v497_v16 }
   0x9   :  { %v631_v22 = vld [vmem:[%s929_s0 + $0x44] sm:$0xf]  ;;  %v531_v23 = vld [vmem:[%s929_s0 + $0x48] sm:$0xf0]  ;;  %v530_v25 = vor.u32 %v632_v19, %v529_v18  ;;  %v502_v26 = vor.u32 %v623_v20, %v499_v21  ;;  %v537_v30 = vld [vmem:[%s929_s0 + $0x50] sm:$0xf] }
   0xa   :  { %276 = vmatpush.bf16.msra.mxu0 %v644_v4  ;;  %704 = vmatpush.bf16.msra.mxu2 %v644_v4  ;;  %v534_v27 = vor.u32 %v631_v22, %v531_v23  ;;  %v634_v31 = vld [vmem:[%s929_s0 + $0x54] sm:$0xf0]  ;;  %v625_v32 = vld [vmem:[%s929_s0 + $0x14] sm:$0xf]  ;;  %v507_v33 = vld [vmem:[%s929_s0 + $0x18] sm:$0xf0] }
   0xb   :  { %325 = vmatpush.bf16.msra.mxu1 %v652_v5  ;;  %712 = vmatpush.bf16.msra.mxu3 %v652_v5  ;;  %v633_v34 = vld [vmem:[%s929_s0 + $0x54] sm:$0xf]  ;;  %v539_v35 = vld [vmem:[%s929_s0 + $0x58] sm:$0xf0]  ;;  %v538_v37 = vor.u32 %v634_v31, %v537_v30  ;;  %v510_v38 = vor.u32 %v625_v32, %v507_v33  ;;  %v513_v40 = vld [vmem:[%s929_s0 + $0x20] sm:$0xf] }
   0xc   :  { %v542_v39 = vor.u32 %v633_v34, %v539_v35  ;;  %v628_v41 = vld [vmem:[%s929_s0 + $0x24] sm:$0xf0]  ;;  %v545_v42 = vld [vmem:[%s929_s0 + $0x60] sm:$0xf]  ;;  %v627_v44 = vld [vmem:[%s929_s0 + $0x24] sm:$0xf] }
   0xd   :  { %v636_v43 = vld [vmem:[%s929_s0 + $0x64] sm:$0xf0]  ;;  %v515_v45 = vld [vmem:[%s929_s0 + $0x28] sm:$0xf0]  ;;  %v635_v46 = vld [vmem:[%s929_s0 + $0x64] sm:$0xf]  ;;  %v514_v48 = vor.u32 %v628_v41, %v513_v40 }
   0xe   :  { %277 = vmatpush.bf16.msra.mxu0 %v643_v6  ;;  %705 = vmatpush.bf16.msra.mxu2 %v643_v6  ;;  %v547_v47 = vld [vmem:[%s929_s0 + $0x68] sm:$0xf0]  ;;  %v546_v49 = vor.u32 %v636_v43, %v545_v42  ;;  %v518_v50 = vor.u32 %v627_v44, %v515_v45  ;;  %v521_v52 = vld [vmem:[%s929_s0 + $0x30] sm:$0xf]  ;;  %v630_v53 = vld [vmem:[%s929_s0 + $0x34] sm:$0xf0] }
   0xf   :  { %326 = vmatpush.bf16.msra.mxu1 %v651_v7  ;;  %713 = vmatpush.bf16.msra.mxu3 %v651_v7  ;;  %v550_v51 = vor.u32 %v635_v46, %v547_v47  ;;  %v553_v54 = vld [vmem:[%s929_s0 + $0x70] sm:$0xf]  ;;  %v638_v55 = vld [vmem:[%s929_s0 + $0x74] sm:$0xf0]  ;;  %v629_v56 = vld [vmem:[%s929_s0 + $0x34] sm:$0xf]  ;;  %v522_v60 = vor.u32 %v630_v53, %v521_v52 }
  0x10   :  { %v523_v57 = vld [vmem:[%s929_s0 + $0x38] sm:$0xf0]  ;;  %v637_v58 = vld [vmem:[%s929_s0 + $0x74] sm:$0xf]  ;;  %v554_v61 = vor.u32 %v638_v55, %v553_v54  ;;  %v886_v3 = vld [vmem:[%s930_s2] ss:$0 sm:$0xff] }
  0x11   :  { %v555_v59 = vld [vmem:[%s929_s0 + $0x78] sm:$0xf0]  ;;  %v526_v62 = vor.u32 %v629_v56, %v523_v57 }
  0x12   :  { %278 = vmatpush.bf16.msra.mxu0 %v642_v8  ;;  %706 = vmatpush.bf16.msra.mxu2 %v642_v8  ;;  %v558_v63 = vor.u32 %v637_v58, %v555_v59 }
  0x13   :  { %327 = vmatpush.bf16.msra.mxu1 %v650_v9  ;;  %714 = vmatpush.bf16.msra.mxu3 %v650_v9 }
  0x16   :  { %279 = vmatpush.bf16.msra.mxu0 %v641_v10  ;;  %707 = vmatpush.bf16.msra.mxu2 %v641_v10 }
  0x17   :  { %328 = vmatpush.bf16.msra.mxu1 %v649_v11  ;;  %715 = vmatpush.bf16.msra.mxu3 %v649_v11 }
  0x1a   :  { %280 = vmatpush.bf16.msra.mxu0 %v640_v12  ;;  %708 = vmatpush.bf16.msra.mxu2 %v640_v12 }
  0x1b   :  { %329 = vmatpush.bf16.msra.mxu1 %v648_v13  ;;  %716 = vmatpush.bf16.msra.mxu3 %v648_v13 }
  0x1e   :  { %281 = vmatpush.bf16.msra.mxu0 %v639_v14  ;;  %709 = vmatpush.bf16.msra.mxu2 %v639_v14 }
  0x1f   :  { %330 = vmatpush.bf16.msra.mxu1 %v647_v15  ;;  %717 = vmatpush.bf16.msra.mxu3 %v647_v15 }
  0x21   :  { %282 = vmatmul.bf16.vlgmr.msra.gmra.mxu0 %v498_v24  ;;  %302 = vmatmul.bf16.vlgmr.msra.gmra.mxu2 %v530_v25 }
  0x22   :  { %331 = vmatmul.bf16.vlgmr.msra.gmra.mxu1 %v502_v26  ;;  %351 = vmatmul.bf16.vlgmr.msra.gmra.mxu3 %v534_v27 }
  0x31   :  { %287 = vmatmul.bf16.gmra.mxu0 %v506_v36  ;;  %307 = vmatmul.bf16.gmra.mxu2 %v538_v37 }
  0x32   :  { %336 = vmatmul.bf16.gmra.mxu1 %v510_v38  ;;  %356 = vmatmul.bf16.gmra.mxu3 %v542_v39 }
  0x41   :  { %292 = vmatmul.bf16.gmra.mxu0 %v514_v48  ;;  %312 = vmatmul.bf16.gmra.mxu2 %v546_v49 }
  0x42   :  { %341 = vmatmul.bf16.gmra.mxu1 %v518_v50  ;;  %361 = vmatmul.bf16.gmra.mxu3 %v550_v51 }
  0x51   :  { %297 = vmatmul.bf16.gmra.mxu0 %v522_v60  ;;  %317 = vmatmul.bf16.gmra.mxu2 %v554_v61 }
  0x52   :  { %346 = vmatmul.bf16.gmra.mxu1 %v526_v62  ;;  %366 = vmatmul.bf16.gmra.mxu3 %v558_v63 }
  0x9e   :  { %v283_v0 = vpop.f32.mrf.mxu0 }
  0x9f   :  { %v332_v1 = vpop.f32.mrf.mxu1 }
  0xa0   :  { %v333_v2 = vadd.f32 %v332_v1, %v283_v0 }
  0xa2   :  { %v427_v8 = vadd.f32 %v886_v3, %v333_v2 }
  0xa4   :  { %v303_v4 = vpop.f32.mrf.mxu2  ;;  %v443_v12 = vmax.f32 %v427_v8, 0.0 }
  0xa5   :  { %v352_v5 = vpop.f32.mrf.mxu3 }
  0xa6   :  { %v285_v6 = vpop.f32.mrf.mxu0  ;;  %v353_v10 = vadd.f32 %v352_v5, %v303_v4 }
  0xa7   :  { %v334_v7 = vpop.f32.mrf.mxu1 }
  0xa8   :  { %v335_v9 = vadd.f32 %v334_v7, %v285_v6  ;;  %v435_v16 = vadd.f32 %v886_v3, %v353_v10 }
  0xaa   :  { %v428_v11 = vadd.f32 %v886_v3, %v335_v9  ;;  %v451_v22 = vmax.f32 %v435_v16, 0.0 }
  0xac   :  { %v444_v13 = vmax.f32 %v428_v11, 0.0  ;;  %v305_v14 = vpop.f32.mrf.mxu2 }
  0xad   :  { %v354_v15 = vpop.f32.mrf.mxu3 }
  0xae   :  { %v658_v17 = vpack.c.bf16 %v444_v13, %v443_v12  ;;  %v355_v18 = vadd.f32 %v354_v15, %v305_v14  ;;  %v288_v19 = vpop.f32.mrf.mxu0 }
  0xaf   :  { %v337_v20 = vpop.f32.mrf.mxu1 }
  0xb0   :  { %659 = vst [vmem:[%s931_s3] sm:$0xff] %v658_v17   ;;  %v436_v21 = vadd.f32 %v886_v3, %v355_v18  ;;  %v338_v25 = vadd.f32 %v337_v20, %v288_v19 }
  0xb2   :  { %v452_v23 = vmax.f32 %v436_v21, 0.0  ;;  %v429_v30 = vadd.f32 %v886_v3, %v338_v25 }
  0xb4   :  { %v678_v24 = vpack.c.bf16 %v452_v23, %v451_v22  ;;  %v308_v26 = vpop.f32.mrf.mxu2  ;;  %v445_v34 = vmax.f32 %v429_v30, 0.0 }
  0xb5   :  { %v357_v27 = vpop.f32.mrf.mxu3 }
  0xb6   :  { %698 = vst [vmem:[%s931_s3 + $0x20] sm:$0xff] %v678_v24   ;;  %v290_v28 = vpop.f32.mrf.mxu0  ;;  %v358_v32 = vadd.f32 %v357_v27, %v308_v26 }
  0xb7   :  { %v339_v29 = vpop.f32.mrf.mxu1 }
  0xb8   :  { %v340_v31 = vadd.f32 %v339_v29, %v290_v28  ;;  %v437_v38 = vadd.f32 %v886_v3, %v358_v32 }
  0xba   :  { %v430_v33 = vadd.f32 %v886_v3, %v340_v31  ;;  %v453_v44 = vmax.f32 %v437_v38, 0.0 }
  0xbc   :  { %v446_v35 = vmax.f32 %v430_v33, 0.0  ;;  %v310_v36 = vpop.f32.mrf.mxu2 }
  0xbd   :  { %v359_v37 = vpop.f32.mrf.mxu3 }
  0xbe   :  { %v663_v39 = vpack.c.bf16 %v446_v35, %v445_v34  ;;  %v360_v40 = vadd.f32 %v359_v37, %v310_v36  ;;  %v293_v41 = vpop.f32.mrf.mxu0 }
  0xbf   :  { %v342_v42 = vpop.f32.mrf.mxu1 }
  0xc0   :  { %695 = vst [vmem:[%s931_s3 + $0x8] sm:$0xff] %v663_v39   ;;  %v438_v43 = vadd.f32 %v886_v3, %v360_v40  ;;  %v343_v47 = vadd.f32 %v342_v42, %v293_v41 }
  0xc2   :  { %v454_v45 = vmax.f32 %v438_v43, 0.0  ;;  %v431_v52 = vadd.f32 %v886_v3, %v343_v47 }
  0xc4   :  { %v683_v46 = vpack.c.bf16 %v454_v45, %v453_v44  ;;  %v313_v48 = vpop.f32.mrf.mxu2  ;;  %v447_v56 = vmax.f32 %v431_v52, 0.0 }
  0xc5   :  { %v362_v49 = vpop.f32.mrf.mxu3 }
  0xc6   :  { %699 = vst [vmem:[%s931_s3 + $0x28] sm:$0xff] %v683_v46   ;;  %v295_v50 = vpop.f32.mrf.mxu0  ;;  %v363_v54 = vadd.f32 %v362_v49, %v313_v48 }
  0xc7   :  { %v344_v51 = vpop.f32.mrf.mxu1 }
  0xc8   :  { %v345_v53 = vadd.f32 %v344_v51, %v295_v50  ;;  %v439_v60 = vadd.f32 %v886_v3, %v363_v54 }
  0xca   :  { %v432_v55 = vadd.f32 %v886_v3, %v345_v53  ;;  %v455_v2 = vmax.f32 %v439_v60, 0.0 }
  0xcc   :  { %v448_v57 = vmax.f32 %v432_v55, 0.0  ;;  %v315_v58 = vpop.f32.mrf.mxu2 }
  0xcd   :  { %v364_v59 = vpop.f32.mrf.mxu3 }
  0xce   :  { %v668_v61 = vpack.c.bf16 %v448_v57, %v447_v56  ;;  %v365_v62 = vadd.f32 %v364_v59, %v315_v58  ;;  %v298_v63 = vpop.f32.mrf.mxu0 }
  0xcf   :  { %v347_v0 = vpop.f32.mrf.mxu1 }
  0xd0   :  { %696 = vst [vmem:[%s931_s3 + $0x10] sm:$0xff] %v668_v61   ;;  %v440_v1 = vadd.f32 %v886_v3, %v365_v62  ;;  %v348_v6 = vadd.f32 %v347_v0, %v298_v63 }
  0xd2   :  { %v456_v4 = vmax.f32 %v440_v1, 0.0  ;;  %v433_v11 = vadd.f32 %v886_v3, %v348_v6 }
  0xd4   :  { %v688_v5 = vpack.c.bf16 %v456_v4, %v455_v2  ;;  %v318_v7 = vpop.f32.mrf.mxu2  ;;  %v449_v15 = vmax.f32 %v433_v11, 0.0 }
  0xd5   :  { %v367_v8 = vpop.f32.mrf.mxu3 }
  0xd6   :  { %700 = vst [vmem:[%s931_s3 + $0x30] sm:$0xff] %v688_v5   ;;  %v300_v9 = vpop.f32.mrf.mxu0  ;;  %v368_v13 = vadd.f32 %v367_v8, %v318_v7 }
  0xd7   :  { %v349_v10 = vpop.f32.mrf.mxu1 }
  0xd8   :  { %v350_v12 = vadd.f32 %v349_v10, %v300_v9  ;;  %v441_v19 = vadd.f32 %v886_v3, %v368_v13 }
  0xda   :  { %v434_v14 = vadd.f32 %v886_v3, %v350_v12  ;;  %v457_v23 = vmax.f32 %v441_v19, 0.0 }
  0xdc   :  { %v450_v16 = vmax.f32 %v434_v14, 0.0  ;;  %v320_v17 = vpop.f32.mrf.mxu2 }
  0xdd   :  { %v369_v18 = vpop.f32.mrf.mxu3 }
  0xde   :  { %v673_v20 = vpack.c.bf16 %v450_v16, %v449_v15  ;;  %v370_v21 = vadd.f32 %v369_v18, %v320_v17 }
  0xe0   :  { %697 = vst [vmem:[%s931_s3 + $0x18] sm:$0xff] %v673_v20   ;;  %v442_v22 = vadd.f32 %v886_v3, %v370_v21 }
  0xe2   :  { %v458_v24 = vmax.f32 %v442_v22, 0.0 }
  0xe4   :  { %v693_v25 = vpack.c.bf16 %v458_v24, %v457_v23 }
  0xe6   :  { %701 = vst [vmem:[%s931_s3 + $0x38] sm:$0xff] %v693_v25  }

// kernel: vae_forward.19
= control target key start
LH: loop header
LB: loop body
LE: loop exit
PB: predicated region body
PF: predicated region fallthrough
CT: control target
= control target key end

     0   :  { %s1976_s1 = inlined_call_operand.vmem [shape: bf16[128,128], index: 1, kind: input, shape index: {}]   ;;  %s1977_s2 = inlined_call_operand.vmem [shape: f32[1,128], index: 2, kind: input, shape index: {}]   ;;  %s1978_s0 = inlined_call_operand.vmem [shape: bf16[512,128], index: 0, kind: input, shape index: {}]   ;;  %s1979_s3 = inlined_call_operand.vmem [shape: f32[512,128], index: 3, kind: output, shape index: {}]  }
   0x1   :  { %v1421_v0 = vld [vmem:[%s1976_s1 + $0x38] sm:$0xff]  ;;  %v1420_v1 = vld [vmem:[%s1976_s1 + $0x30] sm:$0xff]  ;;  %v1419_v2 = vld [vmem:[%s1976_s1 + $0x28] sm:$0xff] }
   0x2   :  { %466 = vmatpush.bf16.msra.mxu0 %v1421_v0  ;;  %1422 = vmatpush.bf16.msra.mxu1 %v1421_v0  ;;  %v1418_v3 = vld [vmem:[%s1976_s1 + $0x20] sm:$0xff]  ;;  %v1417_v4 = vld [vmem:[%s1976_s1 + $0x18] sm:$0xff]  ;;  %v1416_v5 = vld [vmem:[%s1976_s1 + $0x10] sm:$0xff] }
   0x3   :  { %1423 = vmatpush.bf16.msra.mxu2 %v1421_v0  ;;  %1424 = vmatpush.bf16.msra.mxu3 %v1421_v0  ;;  %v1415_v6 = vld [vmem:[%s1976_s1 + $0x8] sm:$0xff]  ;;  %v1414_v7 = vld [vmem:[%s1976_s1] sm:$0xff]  ;;  %v1384_v16 = vld [vmem:[%s1978_s0 + $0x10] sm:$0xff] }
   0x4   :  { %v1382_v8 = vld [vmem:[%s1978_s0] sm:$0xff]  ;;  %v1383_v12 = vld [vmem:[%s1978_s0 + $0x8] sm:$0xff]  ;;  %v1392_v17 = vld [vmem:[%s1978_s0 + $0x50] sm:$0xff] }
   0x5   :  { %v1390_v9 = vld [vmem:[%s1978_s0 + $0x40] sm:$0xff]  ;;  %v1391_v13 = vld [vmem:[%s1978_s0 + $0x48] sm:$0xff]  ;;  %v1400_v18 = vld [vmem:[%s1978_s0 + $0x90] sm:$0xff] }
   0x6   :  { %467 = vmatpush.bf16.msra.mxu0 %v1420_v1  ;;  %1425 = vmatpush.bf16.msra.mxu1 %v1420_v1  ;;  %v1398_v10 = vld [vmem:[%s1978_s0 + $0x80] sm:$0xff]  ;;  %v1399_v14 = vld [vmem:[%s1978_s0 + $0x88] sm:$0xff]  ;;  %v1408_v19 = vld [vmem:[%s1978_s0 + $0xd0] sm:$0xff] }
   0x7   :  { %1426 = vmatpush.bf16.msra.mxu2 %v1420_v1  ;;  %1427 = vmatpush.bf16.msra.mxu3 %v1420_v1  ;;  %v1406_v11 = vld [vmem:[%s1978_s0 + $0xc0] sm:$0xff]  ;;  %v1407_v15 = vld [vmem:[%s1978_s0 + $0xc8] sm:$0xff]  ;;  %v1385_v20 = vld [vmem:[%s1978_s0 + $0x18] sm:$0xff] }
   0x8   :  { %v1393_v21 = vld [vmem:[%s1978_s0 + $0x58] sm:$0xff]  ;;  %v1386_v24 = vld [vmem:[%s1978_s0 + $0x20] sm:$0xff]  ;;  %v1387_v28 = vld [vmem:[%s1978_s0 + $0x28] sm:$0xff] }
   0x9   :  { %v1401_v22 = vld [vmem:[%s1978_s0 + $0x98] sm:$0xff]  ;;  %v1394_v25 = vld [vmem:[%s1978_s0 + $0x60] sm:$0xff]  ;;  %v1395_v29 = vld [vmem:[%s1978_s0 + $0x68] sm:$0xff] }
   0xa   :  { %468 = vmatpush.bf16.msra.mxu0 %v1419_v2  ;;  %1428 = vmatpush.bf16.msra.mxu1 %v1419_v2  ;;  %v1409_v23 = vld [vmem:[%s1978_s0 + $0xd8] sm:$0xff]  ;;  %v1402_v26 = vld [vmem:[%s1978_s0 + $0xa0] sm:$0xff]  ;;  %v1403_v30 = vld [vmem:[%s1978_s0 + $0xa8] sm:$0xff] }
   0xb   :  { %1429 = vmatpush.bf16.msra.mxu2 %v1419_v2  ;;  %1430 = vmatpush.bf16.msra.mxu3 %v1419_v2  ;;  %v1410_v27 = vld [vmem:[%s1978_s0 + $0xe0] sm:$0xff]  ;;  %v1411_v31 = vld [vmem:[%s1978_s0 + $0xe8] sm:$0xff]  ;;  %v1388_v32 = vld [vmem:[%s1978_s0 + $0x30] sm:$0xff] }
   0xc   :  { %v1396_v33 = vld [vmem:[%s1978_s0 + $0x70] sm:$0xff]  ;;  %v1389_v36 = vld [vmem:[%s1978_s0 + $0x38] sm:$0xff]  ;;  %v1718_v40 = vld [vmem:[%s1977_s2] ss:$0 sm:$0xff] }
   0xd   :  { %v1404_v34 = vld [vmem:[%s1978_s0 + $0xb0] sm:$0xff]  ;;  %v1397_v37 = vld [vmem:[%s1978_s0 + $0x78] sm:$0xff] }
   0xe   :  { %469 = vmatpush.bf16.msra.mxu0 %v1418_v3  ;;  %1431 = vmatpush.bf16.msra.mxu1 %v1418_v3  ;;  %v1412_v35 = vld [vmem:[%s1978_s0 + $0xf0] sm:$0xff]  ;;  %v1405_v38 = vld [vmem:[%s1978_s0 + $0xb8] sm:$0xff] }
   0xf   :  { %1432 = vmatpush.bf16.msra.mxu2 %v1418_v3  ;;  %1433 = vmatpush.bf16.msra.mxu3 %v1418_v3  ;;  %v1413_v39 = vld [vmem:[%s1978_s0 + $0xf8] sm:$0xff] }
  0x12   :  { %470 = vmatpush.bf16.msra.mxu0 %v1417_v4  ;;  %1434 = vmatpush.bf16.msra.mxu1 %v1417_v4 }
  0x13   :  { %1435 = vmatpush.bf16.msra.mxu2 %v1417_v4  ;;  %1436 = vmatpush.bf16.msra.mxu3 %v1417_v4 }
  0x16   :  { %471 = vmatpush.bf16.msra.mxu0 %v1416_v5  ;;  %1437 = vmatpush.bf16.msra.mxu1 %v1416_v5 }
  0x17   :  { %1438 = vmatpush.bf16.msra.mxu2 %v1416_v5  ;;  %1439 = vmatpush.bf16.msra.mxu3 %v1416_v5 }
  0x1a   :  { %472 = vmatpush.bf16.msra.mxu0 %v1415_v6  ;;  %1440 = vmatpush.bf16.msra.mxu1 %v1415_v6 }
  0x1b   :  { %1441 = vmatpush.bf16.msra.mxu2 %v1415_v6  ;;  %1442 = vmatpush.bf16.msra.mxu3 %v1415_v6 }
  0x1e   :  { %473 = vmatpush.bf16.msra.mxu0 %v1414_v7  ;;  %1443 = vmatpush.bf16.msra.mxu1 %v1414_v7 }
  0x1f   :  { %1444 = vmatpush.bf16.msra.mxu2 %v1414_v7  ;;  %1445 = vmatpush.bf16.msra.mxu3 %v1414_v7 }
  0x21   :  { %474 = vmatmul.bf16.vlgmr.msra.gmra.mxu0 %v1382_v8  ;;  %514 = vmatmul.bf16.vlgmr.msra.gmra.mxu1 %v1390_v9 }
  0x22   :  { %554 = vmatmul.bf16.vlgmr.msra.gmra.mxu2 %v1398_v10  ;;  %594 = vmatmul.bf16.vlgmr.msra.gmra.mxu3 %v1406_v11 }
  0x31   :  { %479 = vmatmul.bf16.gmra.mxu0 %v1383_v12  ;;  %519 = vmatmul.bf16.gmra.mxu1 %v1391_v13 }
  0x32   :  { %559 = vmatmul.bf16.gmra.mxu2 %v1399_v14  ;;  %599 = vmatmul.bf16.gmra.mxu3 %v1407_v15 }
  0x41   :  { %484 = vmatmul.bf16.gmra.mxu0 %v1384_v16  ;;  %524 = vmatmul.bf16.gmra.mxu1 %v1392_v17 }
  0x42   :  { %564 = vmatmul.bf16.gmra.mxu2 %v1400_v18  ;;  %604 = vmatmul.bf16.gmra.mxu3 %v1408_v19 }
  0x51   :  { %489 = vmatmul.bf16.gmra.mxu0 %v1385_v20  ;;  %529 = vmatmul.bf16.gmra.mxu1 %v1393_v21 }
  0x52   :  { %569 = vmatmul.bf16.gmra.mxu2 %v1401_v22  ;;  %609 = vmatmul.bf16.gmra.mxu3 %v1409_v23 }
  0x61   :  { %494 = vmatmul.bf16.gmra.mxu0 %v1386_v24  ;;  %534 = vmatmul.bf16.gmra.mxu1 %v1394_v25 }
  0x62   :  { %574 = vmatmul.bf16.gmra.mxu2 %v1402_v26  ;;  %614 = vmatmul.bf16.gmra.mxu3 %v1410_v27 }
  0x71   :  { %499 = vmatmul.bf16.gmra.mxu0 %v1387_v28  ;;  %539 = vmatmul.bf16.gmra.mxu1 %v1395_v29 }
  0x72   :  { %579 = vmatmul.bf16.gmra.mxu2 %v1403_v30  ;;  %619 = vmatmul.bf16.gmra.mxu3 %v1411_v31 }
  0x81   :  { %504 = vmatmul.bf16.gmra.mxu0 %v1388_v32  ;;  %544 = vmatmul.bf16.gmra.mxu1 %v1396_v33 }
  0x82   :  { %584 = vmatmul.bf16.gmra.mxu2 %v1404_v34  ;;  %624 = vmatmul.bf16.gmra.mxu3 %v1412_v35 }
  0x91   :  { %509 = vmatmul.bf16.gmra.mxu0 %v1389_v36  ;;  %549 = vmatmul.bf16.gmra.mxu1 %v1397_v37 }
  0x92   :  { %589 = vmatmul.bf16.gmra.mxu2 %v1405_v38  ;;  %629 = vmatmul.bf16.gmra.mxu3 %v1413_v39 }
  0x9e   :  { %v475_v41 = vpop.f32.mrf.mxu0  ;;  %v515_v42 = vpop.f32.mrf.mxu1 }
  0x9f   :  { %v834_v43 = vadd.f32 %v1718_v40, %v475_v41  ;;  %v850_v44 = vadd.f32 %v1718_v40, %v515_v42 }
  0xa1   :  { %v898_v45 = vmul.f32 0.5, %v834_v43  ;;  %v914_v46 = vmul.f32 0.5, %v850_v44 }
  0xa3   :  { %1447 = vtanh.f32 %v898_v45 }
  0xa4   :  { %1449 = vtanh.f32 %v914_v46 }
  0xa5   :  { %v555_v47 = vpop.f32.mrf.mxu2  ;;  %v595_v48 = vpop.f32.mrf.mxu3 }
  0xa6   :  { %v866_v49 = vadd.f32 %v1718_v40, %v555_v47  ;;  %v882_v50 = vadd.f32 %v1718_v40, %v595_v48  ;;  %v477_v51 = vpop.f32.mrf.mxu0  ;;  %v517_v52 = vpop.f32.mrf.mxu1 }
  0xa7   :  { %v835_v53 = vadd.f32 %v1718_v40, %v477_v51  ;;  %v851_v54 = vadd.f32 %v1718_v40, %v517_v52 }
  0xa8   :  { %v930_v55 = vmul.f32 0.5, %v866_v49  ;;  %v946_v56 = vmul.f32 0.5, %v882_v50 }
  0xa9   :  { %v1448_v57 = vpop.eup %1447  ;;  %v899_v58 = vmul.f32 0.5, %v835_v53  ;;  %v915_v59 = vmul.f32 0.5, %v851_v54 }
  0xaa   :  { %v1450_v60 = vpop.eup %1449  ;;  %v1026_v61 = vadd.f32 1.0, %v1448_v57  ;;  %1451 = vtanh.f32 %v930_v55 }
  0xab   :  { %v1042_v62 = vadd.f32 1.0, %v1450_v60  ;;  %1453 = vtanh.f32 %v946_v56 }
  0xac   :  { %v1090_v63 = vmul.f32 0.5, %v1026_v61  ;;  %1455 = vtanh.f32 %v899_v58 }
  0xad   :  { %v1106_v0 = vmul.f32 0.5, %v1042_v62  ;;  %1457 = vtanh.f32 %v915_v59  ;;  %v557_v1 = vpop.f32.mrf.mxu2  ;;  %v597_v2 = vpop.f32.mrf.mxu3 }
  0xae   :  { %1154 = vst [vmem:[%s1979_s3] sm:$0xff] %v1090_v63  ;;  %v867_v3 = vadd.f32 %v1718_v40, %v557_v1  ;;  %v883_v4 = vadd.f32 %v1718_v40, %v597_v2  ;;  %v480_v5 = vpop.f32.mrf.mxu0  ;;  %v520_v6 = vpop.f32.mrf.mxu1 }
  0xaf   :  { %1170 = vst [vmem:[%s1979_s3 + $0x80] sm:$0xff] %v1106_v0  ;;  %v836_v7 = vadd.f32 %v1718_v40, %v480_v5  ;;  %v852_v8 = vadd.f32 %v1718_v40, %v520_v6 }
  0xb0   :  { %v1452_v9 = vpop.eup %1451  ;;  %v931_v10 = vmul.f32 0.5, %v867_v3  ;;  %v947_v11 = vmul.f32 0.5, %v883_v4 }
  0xb1   :  { %v1454_v12 = vpop.eup %1453  ;;  %v1058_v13 = vadd.f32 1.0, %v1452_v9  ;;  %v900_v14 = vmul.f32 0.5, %v836_v7  ;;  %v916_v15 = vmul.f32 0.5, %v852_v8 }
  0xb2   :  { %v1456_v16 = vpop.eup %1455  ;;  %v1074_v17 = vadd.f32 1.0, %v1454_v12  ;;  %1459 = vtanh.f32 %v931_v10 }
  0xb3   :  { %v1458_v18 = vpop.eup %1457  ;;  %v1122_v19 = vmul.f32 0.5, %v1058_v13  ;;  %v1027_v20 = vadd.f32 1.0, %v1456_v16  ;;  %1461 = vtanh.f32 %v947_v11 }
  0xb4   :  { %v1138_v21 = vmul.f32 0.5, %v1074_v17  ;;  %v1043_v22 = vadd.f32 1.0, %v1458_v18  ;;  %1463 = vtanh.f32 %v900_v14 }
  0xb5   :  { %1186 = vst [vmem:[%s1979_s3 + $0x100] sm:$0xff] %v1122_v19  ;;  %v1091_v23 = vmul.f32 0.5, %v1027_v20  ;;  %1465 = vtanh.f32 %v916_v15  ;;  %v560_v24 = vpop.f32.mrf.mxu2  ;;  %v600_v25 = vpop.f32.mrf.mxu3 }
  0xb6   :  { %1202 = vst [vmem:[%s1979_s3 + $0x180] sm:$0xff] %v1138_v21  ;;  %v1107_v26 = vmul.f32 0.5, %v1043_v22  ;;  %v868_v27 = vadd.f32 %v1718_v40, %v560_v24  ;;  %v884_v28 = vadd.f32 %v1718_v40, %v600_v25  ;;  %v482_v29 = vpop.f32.mrf.mxu0  ;;  %v522_v30 = vpop.f32.mrf.mxu1 }
  0xb7   :  { %1155 = vst [vmem:[%s1979_s3 + $0x8] sm:$0xff] %v1091_v23  ;;  %v837_v31 = vadd.f32 %v1718_v40, %v482_v29  ;;  %v853_v32 = vadd.f32 %v1718_v40, %v522_v30 }
  0xb8   :  { %v1460_v33 = vpop.eup %1459  ;;  %1171 = vst [vmem:[%s1979_s3 + $0x88] sm:$0xff] %v1107_v26  ;;  %v932_v34 = vmul.f32 0.5, %v868_v27  ;;  %v948_v35 = vmul.f32 0.5, %v884_v28 }
  0xb9   :  { %v1462_v36 = vpop.eup %1461  ;;  %v1059_v37 = vadd.f32 1.0, %v1460_v33  ;;  %v901_v38 = vmul.f32 0.5, %v837_v31  ;;  %v917_v39 = vmul.f32 0.5, %v853_v32 }
  0xba   :  { %v1464_v41 = vpop.eup %1463  ;;  %v1075_v42 = vadd.f32 1.0, %v1462_v36  ;;  %1467 = vtanh.f32 %v932_v34 }
  0xbb   :  { %v1466_v43 = vpop.eup %1465  ;;  %v1123_v44 = vmul.f32 0.5, %v1059_v37  ;;  %v1028_v45 = vadd.f32 1.0, %v1464_v41  ;;  %1469 = vtanh.f32 %v948_v35 }
  0xbc   :  { %v1139_v46 = vmul.f32 0.5, %v1075_v42  ;;  %v1044_v47 = vadd.f32 1.0, %v1466_v43  ;;  %1471 = vtanh.f32 %v901_v38 }
  0xbd   :  { %1187 = vst [vmem:[%s1979_s3 + $0x108] sm:$0xff] %v1123_v44  ;;  %v1092_v48 = vmul.f32 0.5, %v1028_v45  ;;  %1473 = vtanh.f32 %v917_v39  ;;  %v562_v49 = vpop.f32.mrf.mxu2  ;;  %v602_v50 = vpop.f32.mrf.mxu3 }
  0xbe   :  { %1203 = vst [vmem:[%s1979_s3 + $0x188] sm:$0xff] %v1139_v46  ;;  %v1108_v51 = vmul.f32 0.5, %v1044_v47  ;;  %v869_v52 = vadd.f32 %v1718_v40, %v562_v49  ;;  %v885_v53 = vadd.f32 %v1718_v40, %v602_v50  ;;  %v485_v54 = vpop.f32.mrf.mxu0  ;;  %v525_v55 = vpop.f32.mrf.mxu1 }
  0xbf   :  { %1156 = vst [vmem:[%s1979_s3 + $0x10] sm:$0xff] %v1092_v48  ;;  %v838_v56 = vadd.f32 %v1718_v40, %v485_v54  ;;  %v854_v57 = vadd.f32 %v1718_v40, %v525_v55 }
  0xc0   :  { %v1468_v58 = vpop.eup %1467  ;;  %1172 = vst [vmem:[%s1979_s3 + $0x90] sm:$0xff] %v1108_v51  ;;  %v933_v59 = vmul.f32 0.5, %v869_v52  ;;  %v949_v60 = vmul.f32 0.5, %v885_v53 }
  0xc1   :  { %v1470_v61 = vpop.eup %1469  ;;  %v1060_v62 = vadd.f32 1.0, %v1468_v58  ;;  %v902_v63 = vmul.f32 0.5, %v838_v56  ;;  %v918_v0 = vmul.f32 0.5, %v854_v57 }
  0xc2   :  { %v1472_v1 = vpop.eup %1471  ;;  %v1076_v2 = vadd.f32 1.0, %v1470_v61  ;;  %1475 = vtanh.f32 %v933_v59 }
  0xc3   :  { %v1474_v3 = vpop.eup %1473  ;;  %v1124_v4 = vmul.f32 0.5, %v1060_v62  ;;  %v1029_v5 = vadd.f32 1.0, %v1472_v1  ;;  %1477 = vtanh.f32 %v949_v60 }
  0xc4   :  { %v1140_v6 = vmul.f32 0.5, %v1076_v2  ;;  %v1045_v7 = vadd.f32 1.0, %v1474_v3  ;;  %1479 = vtanh.f32 %v902_v63 }
  0xc5   :  { %1188 = vst [vmem:[%s1979_s3 + $0x110] sm:$0xff] %v1124_v4  ;;  %v1093_v8 = vmul.f32 0.5, %v1029_v5  ;;  %1481 = vtanh.f32 %v918_v0  ;;  %v565_v9 = vpop.f32.mrf.mxu2  ;;  %v605_v10 = vpop.f32.mrf.mxu3 }
  0xc6   :  { %1204 = vst [vmem:[%s1979_s3 + $0x190] sm:$0xff] %v1140_v6  ;;  %v1109_v11 = vmul.f32 0.5, %v1045_v7  ;;  %v870_v12 = vadd.f32 %v1718_v40, %v565_v9  ;;  %v886_v13 = vadd.f32 %v1718_v40, %v605_v10  ;;  %v487_v14 = vpop.f32.mrf.mxu0  ;;  %v527_v15 = vpop.f32.mrf.mxu1 }
  0xc7   :  { %1157 = vst [vmem:[%s1979_s3 + $0x18] sm:$0xff] %v1093_v8  ;;  %v839_v16 = vadd.f32 %v1718_v40, %v487_v14  ;;  %v855_v17 = vadd.f32 %v1718_v40, %v527_v15 }
  0xc8   :  { %v1476_v18 = vpop.eup %1475  ;;  %1173 = vst [vmem:[%s1979_s3 + $0x98] sm:$0xff] %v1109_v11  ;;  %v934_v19 = vmul.f32 0.5, %v870_v12  ;;  %v950_v20 = vmul.f32 0.5, %v886_v13 }
  0xc9   :  { %v1478_v21 = vpop.eup %1477  ;;  %v1061_v22 = vadd.f32 1.0, %v1476_v18  ;;  %v903_v23 = vmul.f32 0.5, %v839_v16  ;;  %v919_v24 = vmul.f32 0.5, %v855_v17 }
  0xca   :  { %v1480_v25 = vpop.eup %1479  ;;  %v1077_v26 = vadd.f32 1.0, %v1478_v21  ;;  %1483 = vtanh.f32 %v934_v19 }
  0xcb   :  { %v1482_v27 = vpop.eup %1481  ;;  %v1125_v28 = vmul.f32 0.5, %v1061_v22  ;;  %v1030_v29 = vadd.f32 1.0, %v1480_v25  ;;  %1485 = vtanh.f32 %v950_v20 }
  0xcc   :  { %v1141_v30 = vmul.f32 0.5, %v1077_v26  ;;  %v1046_v31 = vadd.f32 1.0, %v1482_v27  ;;  %1487 = vtanh.f32 %v903_v23 }
  0xcd   :  { %1189 = vst [vmem:[%s1979_s3 + $0x118] sm:$0xff] %v1125_v28  ;;  %v1094_v32 = vmul.f32 0.5, %v1030_v29  ;;  %1489 = vtanh.f32 %v919_v24  ;;  %v567_v33 = vpop.f32.mrf.mxu2  ;;  %v607_v34 = vpop.f32.mrf.mxu3 }
  0xce   :  { %1205 = vst [vmem:[%s1979_s3 + $0x198] sm:$0xff] %v1141_v30  ;;  %v1110_v35 = vmul.f32 0.5, %v1046_v31  ;;  %v871_v36 = vadd.f32 %v1718_v40, %v567_v33  ;;  %v887_v37 = vadd.f32 %v1718_v40, %v607_v34  ;;  %v490_v38 = vpop.f32.mrf.mxu0  ;;  %v530_v39 = vpop.f32.mrf.mxu1 }
  0xcf   :  { %1158 = vst [vmem:[%s1979_s3 + $0x20] sm:$0xff] %v1094_v32  ;;  %v840_v41 = vadd.f32 %v1718_v40, %v490_v38  ;;  %v856_v42 = vadd.f32 %v1718_v40, %v530_v39 }
  0xd0   :  { %v1484_v43 = vpop.eup %1483  ;;  %1174 = vst [vmem:[%s1979_s3 + $0xa0] sm:$0xff] %v1110_v35  ;;  %v935_v44 = vmul.f32 0.5, %v871_v36  ;;  %v951_v45 = vmul.f32 0.5, %v887_v37 }
  0xd1   :  { %v1486_v46 = vpop.eup %1485  ;;  %v1062_v47 = vadd.f32 1.0, %v1484_v43  ;;  %v904_v48 = vmul.f32 0.5, %v840_v41  ;;  %v920_v49 = vmul.f32 0.5, %v856_v42 }
  0xd2   :  { %v1488_v50 = vpop.eup %1487  ;;  %v1078_v51 = vadd.f32 1.0, %v1486_v46  ;;  %1491 = vtanh.f32 %v935_v44 }
  0xd3   :  { %v1490_v52 = vpop.eup %1489  ;;  %v1126_v53 = vmul.f32 0.5, %v1062_v47  ;;  %v1031_v54 = vadd.f32 1.0, %v1488_v50  ;;  %1493 = vtanh.f32 %v951_v45 }
  0xd4   :  { %v1142_v55 = vmul.f32 0.5, %v1078_v51  ;;  %v1047_v56 = vadd.f32 1.0, %v1490_v52  ;;  %1495 = vtanh.f32 %v904_v48 }
  0xd5   :  { %1190 = vst [vmem:[%s1979_s3 + $0x120] sm:$0xff] %v1126_v53  ;;  %v1095_v57 = vmul.f32 0.5, %v1031_v54  ;;  %1497 = vtanh.f32 %v920_v49  ;;  %v570_v58 = vpop.f32.mrf.mxu2  ;;  %v610_v59 = vpop.f32.mrf.mxu3 }
  0xd6   :  { %1206 = vst [vmem:[%s1979_s3 + $0x1a0] sm:$0xff] %v1142_v55  ;;  %v1111_v60 = vmul.f32 0.5, %v1047_v56  ;;  %v872_v61 = vadd.f32 %v1718_v40, %v570_v58  ;;  %v888_v62 = vadd.f32 %v1718_v40, %v610_v59  ;;  %v492_v63 = vpop.f32.mrf.mxu0  ;;  %v532_v0 = vpop.f32.mrf.mxu1 }
  0xd7   :  { %1159 = vst [vmem:[%s1979_s3 + $0x28] sm:$0xff] %v1095_v57  ;;  %v841_v1 = vadd.f32 %v1718_v40, %v492_v63  ;;  %v857_v2 = vadd.f32 %v1718_v40, %v532_v0 }
  0xd8   :  { %v1492_v3 = vpop.eup %1491  ;;  %1175 = vst [vmem:[%s1979_s3 + $0xa8] sm:$0xff] %v1111_v60  ;;  %v936_v4 = vmul.f32 0.5, %v872_v61  ;;  %v952_v5 = vmul.f32 0.5, %v888_v62 }
  0xd9   :  { %v1494_v6 = vpop.eup %1493  ;;  %v1063_v7 = vadd.f32 1.0, %v1492_v3  ;;  %v905_v8 = vmul.f32 0.5, %v841_v1  ;;  %v921_v9 = vmul.f32 0.5, %v857_v2 }
  0xda   :  { %v1496_v10 = vpop.eup %1495  ;;  %v1079_v11 = vadd.f32 1.0, %v1494_v6  ;;  %1499 = vtanh.f32 %v936_v4 }
  0xdb   :  { %v1498_v12 = vpop.eup %1497  ;;  %v1127_v13 = vmul.f32 0.5, %v1063_v7  ;;  %v1032_v14 = vadd.f32 1.0, %v1496_v10  ;;  %1501 = vtanh.f32 %v952_v5 }
  0xdc   :  { %v1143_v15 = vmul.f32 0.5, %v1079_v11  ;;  %v1048_v16 = vadd.f32 1.0, %v1498_v12  ;;  %1503 = vtanh.f32 %v905_v8 }
  0xdd   :  { %1191 = vst [vmem:[%s1979_s3 + $0x128] sm:$0xff] %v1127_v13  ;;  %v1096_v17 = vmul.f32 0.5, %v1032_v14  ;;  %1505 = vtanh.f32 %v921_v9  ;;  %v572_v18 = vpop.f32.mrf.mxu2  ;;  %v612_v19 = vpop.f32.mrf.mxu3 }
  0xde   :  { %1207 = vst [vmem:[%s1979_s3 + $0x1a8] sm:$0xff] %v1143_v15  ;;  %v1112_v20 = vmul.f32 0.5, %v1048_v16  ;;  %v873_v21 = vadd.f32 %v1718_v40, %v572_v18  ;;  %v889_v22 = vadd.f32 %v1718_v40, %v612_v19  ;;  %v495_v23 = vpop.f32.mrf.mxu0  ;;  %v535_v24 = vpop.f32.mrf.mxu1 }
  0xdf   :  { %1160 = vst [vmem:[%s1979_s3 + $0x30] sm:$0xff] %v1096_v17  ;;  %v842_v25 = vadd.f32 %v1718_v40, %v495_v23  ;;  %v858_v26 = vadd.f32 %v1718_v40, %v535_v24 }
  0xe0   :  { %v1500_v27 = vpop.eup %1499  ;;  %1176 = vst [vmem:[%s1979_s3 + $0xb0] sm:$0xff] %v1112_v20  ;;  %v937_v28 = vmul.f32 0.5, %v873_v21  ;;  %v953_v29 = vmul.f32 0.5, %v889_v22 }
  0xe1   :  { %v1502_v30 = vpop.eup %1501  ;;  %v1064_v31 = vadd.f32 1.0, %v1500_v27  ;;  %v906_v32 = vmul.f32 0.5, %v842_v25  ;;  %v922_v33 = vmul.f32 0.5, %v858_v26 }
  0xe2   :  { %v1504_v34 = vpop.eup %1503  ;;  %v1080_v35 = vadd.f32 1.0, %v1502_v30  ;;  %1507 = vtanh.f32 %v937_v28 }
  0xe3   :  { %v1506_v36 = vpop.eup %1505  ;;  %v1128_v37 = vmul.f32 0.5, %v1064_v31  ;;  %v1033_v38 = vadd.f32 1.0, %v1504_v34  ;;  %1509 = vtanh.f32 %v953_v29 }
  0xe4   :  { %v1144_v39 = vmul.f32 0.5, %v1080_v35  ;;  %v1049_v41 = vadd.f32 1.0, %v1506_v36  ;;  %1511 = vtanh.f32 %v906_v32 }
  0xe5   :  { %1192 = vst [vmem:[%s1979_s3 + $0x130] sm:$0xff] %v1128_v37  ;;  %v1097_v42 = vmul.f32 0.5, %v1033_v38  ;;  %1513 = vtanh.f32 %v922_v33  ;;  %v575_v43 = vpop.f32.mrf.mxu2  ;;  %v615_v44 = vpop.f32.mrf.mxu3 }
  0xe6   :  { %1208 = vst [vmem:[%s1979_s3 + $0x1b0] sm:$0xff] %v1144_v39  ;;  %v1113_v45 = vmul.f32 0.5, %v1049_v41  ;;  %v874_v46 = vadd.f32 %v1718_v40, %v575_v43  ;;  %v890_v47 = vadd.f32 %v1718_v40, %v615_v44  ;;  %v497_v48 = vpop.f32.mrf.mxu0  ;;  %v537_v49 = vpop.f32.mrf.mxu1 }
  0xe7   :  { %1161 = vst [vmem:[%s1979_s3 + $0x38] sm:$0xff] %v1097_v42  ;;  %v843_v50 = vadd.f32 %v1718_v40, %v497_v48  ;;  %v859_v51 = vadd.f32 %v1718_v40, %v537_v49 }
  0xe8   :  { %v1508_v52 = vpop.eup %1507  ;;  %1177 = vst [vmem:[%s1979_s3 + $0xb8] sm:$0xff] %v1113_v45  ;;  %v938_v53 = vmul.f32 0.5, %v874_v46  ;;  %v954_v54 = vmul.f32 0.5, %v890_v47 }
  0xe9   :  { %v1510_v55 = vpop.eup %1509  ;;  %v1065_v56 = vadd.f32 1.0, %v1508_v52  ;;  %v907_v57 = vmul.f32 0.5, %v843_v50  ;;  %v923_v58 = vmul.f32 0.5, %v859_v51 }
  0xea   :  { %v1512_v59 = vpop.eup %1511  ;;  %v1081_v60 = vadd.f32 1.0, %v1510_v55  ;;  %1515 = vtanh.f32 %v938_v53 }
  0xeb   :  { %v1514_v61 = vpop.eup %1513  ;;  %v1129_v62 = vmul.f32 0.5, %v1065_v56  ;;  %v1034_v63 = vadd.f32 1.0, %v1512_v59  ;;  %1517 = vtanh.f32 %v954_v54 }
  0xec   :  { %v1145_v0 = vmul.f32 0.5, %v1081_v60  ;;  %v1050_v1 = vadd.f32 1.0, %v1514_v61  ;;  %1519 = vtanh.f32 %v907_v57 }
  0xed   :  { %1193 = vst [vmem:[%s1979_s3 + $0x138] sm:$0xff] %v1129_v62  ;;  %v1098_v2 = vmul.f32 0.5, %v1034_v63  ;;  %1521 = vtanh.f32 %v923_v58  ;;  %v577_v3 = vpop.f32.mrf.mxu2  ;;  %v617_v4 = vpop.f32.mrf.mxu3 }
  0xee   :  { %1209 = vst [vmem:[%s1979_s3 + $0x1b8] sm:$0xff] %v1145_v0  ;;  %v1114_v5 = vmul.f32 0.5, %v1050_v1  ;;  %v875_v6 = vadd.f32 %v1718_v40, %v577_v3  ;;  %v891_v7 = vadd.f32 %v1718_v40, %v617_v4  ;;  %v500_v8 = vpop.f32.mrf.mxu0  ;;  %v540_v9 = vpop.f32.mrf.mxu1 }
  0xef   :  { %1162 = vst [vmem:[%s1979_s3 + $0x40] sm:$0xff] %v1098_v2  ;;  %v844_v10 = vadd.f32 %v1718_v40, %v500_v8  ;;  %v860_v11 = vadd.f32 %v1718_v40, %v540_v9 }
  0xf0   :  { %v1516_v12 = vpop.eup %1515  ;;  %1178 = vst [vmem:[%s1979_s3 + $0xc0] sm:$0xff] %v1114_v5  ;;  %v939_v13 = vmul.f32 0.5, %v875_v6  ;;  %v955_v14 = vmul.f32 0.5, %v891_v7 }
  0xf1   :  { %v1518_v15 = vpop.eup %1517  ;;  %v1066_v16 = vadd.f32 1.0, %v1516_v12  ;;  %v908_v17 = vmul.f32 0.5, %v844_v10  ;;  %v924_v18 = vmul.f32 0.5, %v860_v11 }
  0xf2   :  { %v1520_v19 = vpop.eup %1519  ;;  %v1082_v20 = vadd.f32 1.0, %v1518_v15  ;;  %1523 = vtanh.f32 %v939_v13 }
  0xf3   :  { %v1522_v21 = vpop.eup %1521  ;;  %v1130_v22 = vmul.f32 0.5, %v1066_v16  ;;  %v1035_v23 = vadd.f32 1.0, %v1520_v19  ;;  %1525 = vtanh.f32 %v955_v14 }
  0xf4   :  { %v1146_v24 = vmul.f32 0.5, %v1082_v20  ;;  %v1051_v25 = vadd.f32 1.0, %v1522_v21  ;;  %1527 = vtanh.f32 %v908_v17 }
  0xf5   :  { %1194 = vst [vmem:[%s1979_s3 + $0x140] sm:$0xff] %v1130_v22  ;;  %v1099_v26 = vmul.f32 0.5, %v1035_v23  ;;  %1529 = vtanh.f32 %v924_v18  ;;  %v580_v27 = vpop.f32.mrf.mxu2  ;;  %v620_v28 = vpop.f32.mrf.mxu3 }
  0xf6   :  { %1210 = vst [vmem:[%s1979_s3 + $0x1c0] sm:$0xff] %v1146_v24  ;;  %v1115_v29 = vmul.f32 0.5, %v1051_v25  ;;  %v876_v30 = vadd.f32 %v1718_v40, %v580_v27  ;;  %v892_v31 = vadd.f32 %v1718_v40, %v620_v28  ;;  %v502_v32 = vpop.f32.mrf.mxu0  ;;  %v542_v33 = vpop.f32.mrf.mxu1 }
  0xf7   :  { %1163 = vst [vmem:[%s1979_s3 + $0x48] sm:$0xff] %v1099_v26  ;;  %v845_v34 = vadd.f32 %v1718_v40, %v502_v32  ;;  %v861_v35 = vadd.f32 %v1718_v40, %v542_v33 }
  0xf8   :  { %v1524_v36 = vpop.eup %1523  ;;  %1179 = vst [vmem:[%s1979_s3 + $0xc8] sm:$0xff] %v1115_v29  ;;  %v940_v37 = vmul.f32 0.5, %v876_v30  ;;  %v956_v38 = vmul.f32 0.5, %v892_v31 }
  0xf9   :  { %v1526_v39 = vpop.eup %1525  ;;  %v1067_v41 = vadd.f32 1.0, %v1524_v36  ;;  %v909_v42 = vmul.f32 0.5, %v845_v34  ;;  %v925_v43 = vmul.f32 0.5, %v861_v35 }
  0xfa   :  { %v1528_v44 = vpop.eup %1527  ;;  %v1083_v45 = vadd.f32 1.0, %v1526_v39  ;;  %1531 = vtanh.f32 %v940_v37 }
  0xfb   :  { %v1530_v46 = vpop.eup %1529  ;;  %v1131_v47 = vmul.f32 0.5, %v1067_v41  ;;  %v1036_v48 = vadd.f32 1.0, %v1528_v44  ;;  %1533 = vtanh.f32 %v956_v38 }
  0xfc   :  { %v1147_v49 = vmul.f32 0.5, %v1083_v45  ;;  %v1052_v50 = vadd.f32 1.0, %v1530_v46  ;;  %1535 = vtanh.f32 %v909_v42 }
  0xfd   :  { %1195 = vst [vmem:[%s1979_s3 + $0x148] sm:$0xff] %v1131_v47  ;;  %v1100_v51 = vmul.f32 0.5, %v1036_v48  ;;  %1537 = vtanh.f32 %v925_v43  ;;  %v582_v52 = vpop.f32.mrf.mxu2  ;;  %v622_v53 = vpop.f32.mrf.mxu3 }
  0xfe   :  { %1211 = vst [vmem:[%s1979_s3 + $0x1c8] sm:$0xff] %v1147_v49  ;;  %v1116_v54 = vmul.f32 0.5, %v1052_v50  ;;  %v877_v55 = vadd.f32 %v1718_v40, %v582_v52  ;;  %v893_v56 = vadd.f32 %v1718_v40, %v622_v53  ;;  %v505_v57 = vpop.f32.mrf.mxu0  ;;  %v545_v58 = vpop.f32.mrf.mxu1 }
  0xff   :  { %1164 = vst [vmem:[%s1979_s3 + $0x50] sm:$0xff] %v1100_v51  ;;  %v846_v59 = vadd.f32 %v1718_v40, %v505_v57  ;;  %v862_v60 = vadd.f32 %v1718_v40, %v545_v58 }
 0x100   :  { %v1532_v61 = vpop.eup %1531  ;;  %1180 = vst [vmem:[%s1979_s3 + $0xd0] sm:$0xff] %v1116_v54  ;;  %v941_v62 = vmul.f32 0.5, %v877_v55  ;;  %v957_v63 = vmul.f32 0.5, %v893_v56 }
 0x101   :  { %v1534_v0 = vpop.eup %1533  ;;  %v1068_v1 = vadd.f32 1.0, %v1532_v61  ;;  %v910_v2 = vmul.f32 0.5, %v846_v59  ;;  %v926_v3 = vmul.f32 0.5, %v862_v60 }
 0x102   :  { %v1536_v4 = vpop.eup %1535  ;;  %v1084_v5 = vadd.f32 1.0, %v1534_v0  ;;  %1539 = vtanh.f32 %v941_v62 }
 0x103   :  { %v1538_v6 = vpop.eup %1537  ;;  %v1132_v7 = vmul.f32 0.5, %v1068_v1  ;;  %v1037_v8 = vadd.f32 1.0, %v1536_v4  ;;  %1541 = vtanh.f32 %v957_v63 }
 0x104   :  { %v1148_v9 = vmul.f32 0.5, %v1084_v5  ;;  %v1053_v10 = vadd.f32 1.0, %v1538_v6  ;;  %1543 = vtanh.f32 %v910_v2 }
 0x105   :  { %1196 = vst [vmem:[%s1979_s3 + $0x150] sm:$0xff] %v1132_v7  ;;  %v1101_v11 = vmul.f32 0.5, %v1037_v8  ;;  %1545 = vtanh.f32 %v926_v3  ;;  %v585_v12 = vpop.f32.mrf.mxu2  ;;  %v625_v13 = vpop.f32.mrf.mxu3 }
 0x106   :  { %1212 = vst [vmem:[%s1979_s3 + $0x1d0] sm:$0xff] %v1148_v9  ;;  %v1117_v14 = vmul.f32 0.5, %v1053_v10  ;;  %v878_v15 = vadd.f32 %v1718_v40, %v585_v12  ;;  %v894_v16 = vadd.f32 %v1718_v40, %v625_v13  ;;  %v507_v17 = vpop.f32.mrf.mxu0  ;;  %v547_v18 = vpop.f32.mrf.mxu1 }
 0x107   :  { %1165 = vst [vmem:[%s1979_s3 + $0x58] sm:$0xff] %v1101_v11  ;;  %v847_v19 = vadd.f32 %v1718_v40, %v507_v17  ;;  %v863_v20 = vadd.f32 %v1718_v40, %v547_v18 }
 0x108   :  { %v1540_v21 = vpop.eup %1539  ;;  %1181 = vst [vmem:[%s1979_s3 + $0xd8] sm:$0xff] %v1117_v14  ;;  %v942_v22 = vmul.f32 0.5, %v878_v15  ;;  %v958_v23 = vmul.f32 0.5, %v894_v16 }
 0x109   :  { %v1542_v24 = vpop.eup %1541  ;;  %v1069_v25 = vadd.f32 1.0, %v1540_v21  ;;  %v911_v26 = vmul.f32 0.5, %v847_v19  ;;  %v927_v27 = vmul.f32 0.5, %v863_v20 }
 0x10a   :  { %v1544_v28 = vpop.eup %1543  ;;  %v1085_v29 = vadd.f32 1.0, %v1542_v24  ;;  %1547 = vtanh.f32 %v942_v22 }
 0x10b   :  { %v1546_v30 = vpop.eup %1545  ;;  %v1133_v31 = vmul.f32 0.5, %v1069_v25  ;;  %v1038_v32 = vadd.f32 1.0, %v1544_v28  ;;  %1549 = vtanh.f32 %v958_v23 }
 0x10c   :  { %v1149_v33 = vmul.f32 0.5, %v1085_v29  ;;  %v1054_v34 = vadd.f32 1.0, %v1546_v30  ;;  %1551 = vtanh.f32 %v911_v26 }
 0x10d   :  { %1197 = vst [vmem:[%s1979_s3 + $0x158] sm:$0xff] %v1133_v31  ;;  %v1102_v35 = vmul.f32 0.5, %v1038_v32  ;;  %1553 = vtanh.f32 %v927_v27  ;;  %v587_v36 = vpop.f32.mrf.mxu2  ;;  %v627_v37 = vpop.f32.mrf.mxu3 }
 0x10e   :  { %1213 = vst [vmem:[%s1979_s3 + $0x1d8] sm:$0xff] %v1149_v33  ;;  %v1118_v38 = vmul.f32 0.5, %v1054_v34  ;;  %v879_v39 = vadd.f32 %v1718_v40, %v587_v36  ;;  %v895_v41 = vadd.f32 %v1718_v40, %v627_v37  ;;  %v510_v42 = vpop.f32.mrf.mxu0  ;;  %v550_v43 = vpop.f32.mrf.mxu1 }
 0x10f   :  { %1166 = vst [vmem:[%s1979_s3 + $0x60] sm:$0xff] %v1102_v35  ;;  %v848_v44 = vadd.f32 %v1718_v40, %v510_v42  ;;  %v864_v45 = vadd.f32 %v1718_v40, %v550_v43 }
 0x110   :  { %v1548_v46 = vpop.eup %1547  ;;  %1182 = vst [vmem:[%s1979_s3 + $0xe0] sm:$0xff] %v1118_v38  ;;  %v943_v47 = vmul.f32 0.5, %v879_v39  ;;  %v959_v48 = vmul.f32 0.5, %v895_v41 }
 0x111   :  { %v1550_v49 = vpop.eup %1549  ;;  %v1070_v50 = vadd.f32 1.0, %v1548_v46  ;;  %v912_v51 = vmul.f32 0.5, %v848_v44  ;;  %v928_v52 = vmul.f32 0.5, %v864_v45 }
 0x112   :  { %v1552_v53 = vpop.eup %1551  ;;  %v1086_v54 = vadd.f32 1.0, %v1550_v49  ;;  %1555 = vtanh.f32 %v943_v47 }
 0x113   :  { %v1554_v55 = vpop.eup %1553  ;;  %v1134_v56 = vmul.f32 0.5, %v1070_v50  ;;  %v1039_v57 = vadd.f32 1.0, %v1552_v53  ;;  %1557 = vtanh.f32 %v959_v48 }
 0x114   :  { %v1150_v58 = vmul.f32 0.5, %v1086_v54  ;;  %v1055_v59 = vadd.f32 1.0, %v1554_v55  ;;  %1559 = vtanh.f32 %v912_v51 }
 0x115   :  { %1198 = vst [vmem:[%s1979_s3 + $0x160] sm:$0xff] %v1134_v56  ;;  %v1103_v60 = vmul.f32 0.5, %v1039_v57  ;;  %1561 = vtanh.f32 %v928_v52  ;;  %v590_v61 = vpop.f32.mrf.mxu2  ;;  %v630_v62 = vpop.f32.mrf.mxu3 }
 0x116   :  { %1214 = vst [vmem:[%s1979_s3 + $0x1e0] sm:$0xff] %v1150_v58  ;;  %v1119_v63 = vmul.f32 0.5, %v1055_v59  ;;  %v880_v0 = vadd.f32 %v1718_v40, %v590_v61  ;;  %v896_v1 = vadd.f32 %v1718_v40, %v630_v62  ;;  %v512_v2 = vpop.f32.mrf.mxu0  ;;  %v552_v3 = vpop.f32.mrf.mxu1 }
 0x117   :  { %1167 = vst [vmem:[%s1979_s3 + $0x68] sm:$0xff] %v1103_v60  ;;  %v849_v4 = vadd.f32 %v1718_v40, %v512_v2  ;;  %v865_v5 = vadd.f32 %v1718_v40, %v552_v3 }
 0x118   :  { %v1556_v6 = vpop.eup %1555  ;;  %1183 = vst [vmem:[%s1979_s3 + $0xe8] sm:$0xff] %v1119_v63  ;;  %v944_v7 = vmul.f32 0.5, %v880_v0  ;;  %v960_v8 = vmul.f32 0.5, %v896_v1 }
 0x119   :  { %v1558_v9 = vpop.eup %1557  ;;  %v1071_v10 = vadd.f32 1.0, %v1556_v6  ;;  %v913_v11 = vmul.f32 0.5, %v849_v4  ;;  %v929_v12 = vmul.f32 0.5, %v865_v5 }
 0x11a   :  { %v1560_v13 = vpop.eup %1559  ;;  %v1087_v14 = vadd.f32 1.0, %v1558_v9  ;;  %1563 = vtanh.f32 %v944_v7 }
 0x11b   :  { %v1562_v15 = vpop.eup %1561  ;;  %v1135_v16 = vmul.f32 0.5, %v1071_v10  ;;  %v1040_v17 = vadd.f32 1.0, %v1560_v13  ;;  %1565 = vtanh.f32 %v960_v8 }
 0x11c   :  { %v1151_v18 = vmul.f32 0.5, %v1087_v14  ;;  %v1056_v19 = vadd.f32 1.0, %v1562_v15  ;;  %1567 = vtanh.f32 %v913_v11 }
 0x11d   :  { %1199 = vst [vmem:[%s1979_s3 + $0x168] sm:$0xff] %v1135_v16  ;;  %v1104_v20 = vmul.f32 0.5, %v1040_v17  ;;  %1569 = vtanh.f32 %v929_v12  ;;  %v592_v21 = vpop.f32.mrf.mxu2  ;;  %v632_v22 = vpop.f32.mrf.mxu3 }
 0x11e   :  { %1215 = vst [vmem:[%s1979_s3 + $0x1e8] sm:$0xff] %v1151_v18  ;;  %v1120_v23 = vmul.f32 0.5, %v1056_v19  ;;  %v881_v24 = vadd.f32 %v1718_v40, %v592_v21  ;;  %v897_v25 = vadd.f32 %v1718_v40, %v632_v22 }
 0x11f   :  { %1168 = vst [vmem:[%s1979_s3 + $0x70] sm:$0xff] %v1104_v20 }
 0x120   :  { %v1564_v26 = vpop.eup %1563  ;;  %1184 = vst [vmem:[%s1979_s3 + $0xf0] sm:$0xff] %v1120_v23  ;;  %v945_v27 = vmul.f32 0.5, %v881_v24  ;;  %v961_v28 = vmul.f32 0.5, %v897_v25 }
 0x121   :  { %v1566_v29 = vpop.eup %1565  ;;  %v1072_v30 = vadd.f32 1.0, %v1564_v26 }
 0x122   :  { %v1568_v31 = vpop.eup %1567  ;;  %v1088_v32 = vadd.f32 1.0, %v1566_v29  ;;  %1571 = vtanh.f32 %v945_v27 }
 0x123   :  { %v1570_v33 = vpop.eup %1569  ;;  %v1136_v34 = vmul.f32 0.5, %v1072_v30  ;;  %v1041_v35 = vadd.f32 1.0, %v1568_v31  ;;  %1573 = vtanh.f32 %v961_v28 }
 0x124   :  { %v1152_v40 = vmul.f32 0.5, %v1088_v32  ;;  %v1057_v36 = vadd.f32 1.0, %v1570_v33 }
 0x125   :  { %1200 = vst [vmem:[%s1979_s3 + $0x170] sm:$0xff] %v1136_v34  ;;  %v1105_v37 = vmul.f32 0.5, %v1041_v35 }
 0x126   :  { %1216 = vst [vmem:[%s1979_s3 + $0x1f0] sm:$0xff] %v1152_v40  ;;  %v1121_v38 = vmul.f32 0.5, %v1057_v36 }
 0x127   :  { %1169 = vst [vmem:[%s1979_s3 + $0x78] sm:$0xff] %v1105_v37 }
 0x128   :  { %v1572_v39 = vpop.eup %1571  ;;  %1185 = vst [vmem:[%s1979_s3 + $0xf8] sm:$0xff] %v1121_v38 }
 0x129   :  { %v1574_v41 = vpop.eup %1573  ;;  %v1073_v42 = vadd.f32 1.0, %v1572_v39 }
 0x12a   :  { %v1089_v43 = vadd.f32 1.0, %v1574_v41 }
 0x12b   :  { %v1137_v44 = vmul.f32 0.5, %v1073_v42 }
 0x12c   :  { %v1153_v45 = vmul.f32 0.5, %v1089_v43 }
 0x12d   :  { %1201 = vst [vmem:[%s1979_s3 + $0x178] sm:$0xff] %v1137_v44 }
 0x12e   :  { %1217 = vst [vmem:[%s1979_s3 + $0x1f8] sm:$0xff] %v1153_v45 }

</bundles_post_ra>
